<compile_context>
chip_gen: v7x
topology: tpu7x:2x2x1
jax: 0.10.0
libtpu: 0.0.40
codegen_flags: <defaults>
</compile_context>

<pallas_src>
import functools

import jax
import jax.numpy as jnp
from jax.experimental import pallas as pl
from jax.experimental.pallas import tpu as pltpu


def _round_up(x, m):
    return (x + m - 1) // m * m


# ----------------------------------------------------------------------------
# Pallas kernels
# ----------------------------------------------------------------------------
def _mm_kernel(a_ref, b_ref, bias_ref, o_ref, acc_ref, *, act_in, act_out):
    """Fused  act_out(act_in(A) @ B + bias)  tiled matmul (bf16 MXU, f32 acc)."""
    k = pl.program_id(2)

    @pl.when(k == 0)
    def _():
        acc_ref[...] = jnp.zeros_like(acc_ref)

    a = a_ref[...].astype(jnp.float32)          # act math in f32 (v5e-safe)
    if act_in == "lrelu":                       # LeakyReLU(0.2)
        a = jnp.where(a >= 0, a, 0.2 * a)
    elif act_in == "relu":
        a = jnp.maximum(a, 0.0)
    a = a.astype(jnp.bfloat16)                  # bf16 operands -> native MXU

    acc_ref[...] += jnp.dot(a, b_ref[...], preferred_element_type=jnp.float32)

    @pl.when(k == pl.num_programs(2) - 1)
    def _():
        out = acc_ref[...] + bias_ref[...]
        if act_out == "tanh":
            out = jnp.tanh(out)
        o_ref[...] = out.astype(o_ref.dtype)


def _bn_stats_kernel(x_ref, sum_ref, ssq_ref):
    """Accumulate per-channel sum and sum-of-squares over M tiles."""
    @pl.when(pl.program_id(0) == 0)
    def _():
        sum_ref[...] = jnp.zeros_like(sum_ref)
        ssq_ref[...] = jnp.zeros_like(ssq_ref)

    x = x_ref[...]
    sum_ref[...] += jnp.sum(x, axis=0, keepdims=True)
    ssq_ref[...] += jnp.sum(x * x, axis=0, keepdims=True)


def _bn_apply_kernel(x_ref, scale_ref, shift_ref, o_ref):
    o_ref[...] = x_ref[...] * scale_ref[...] + shift_ref[...]


# ----------------------------------------------------------------------------
# Pallas wrappers
# ----------------------------------------------------------------------------
_K_CAP = 2048  # max K block (bf16): keeps double-buffered working set << 64 MiB


def _pick_tk(K):
    if K <= _K_CAP:
        return K, K                       # single full-K block, no padding
    Kp = _round_up(K, 128)
    for t in (2048, 1024, 512, 256, 128):
        if Kp % t == 0:
            return t, Kp
    return 128, Kp                        # unreachable (128 always divides Kp)


def matmul_pallas(a, b, bias=None, act_in="none", act_out="none"):
    """act_out(act_in(a) @ b + bias); a:(M,K), b:(K,N) cast to bf16, f32 out."""
    M, K = a.shape
    K2, N = b.shape
    assert K == K2

    tm = min(256, _round_up(M, 8))
    Mp = _round_up(M, tm)
    tk, Kp = _pick_tk(K)
    Np = _round_up(N, 128)
    if Np <= 512:
        tn = Np                           # full-N block (A read exactly once)
    else:
        tn = 512 if Np % 512 == 0 else (256 if Np % 256 == 0 else 128)

    a = a.astype(jnp.bfloat16)
    b = b.astype(jnp.bfloat16)
    if (Mp, Kp) != (M, K):
        a = jnp.pad(a, ((0, Mp - M), (0, Kp - K)))
    if (Kp, Np) != (K, N):
        b = jnp.pad(b, ((0, Kp - K), (0, Np - N)))
    if bias is None:
        bias_p = jnp.zeros((1, Np), jnp.float32)
    else:
        bias_p = jnp.pad(bias.astype(jnp.float32), (0, Np - N)).reshape(1, Np)

    kernel = functools.partial(_mm_kernel, act_in=act_in, act_out=act_out)
    out = pl.pallas_call(
        kernel,
        out_shape=jax.ShapeDtypeStruct((Mp, Np), jnp.float32),
        grid_spec=pltpu.PrefetchScalarGridSpec(
            num_scalar_prefetch=0,
            grid=(Mp // tm, Np // tn, Kp // tk),
            in_specs=[
                pl.BlockSpec((tm, tk), lambda i, j, k: (i, k)),
                pl.BlockSpec((tk, tn), lambda i, j, k: (k, j)),
                pl.BlockSpec((1, tn), lambda i, j, k: (0, j)),
            ],
            out_specs=pl.BlockSpec((tm, tn), lambda i, j, k: (i, j)),
            scratch_shapes=[pltpu.VMEM((tm, tn), jnp.float32)],
        ),
        compiler_params=pltpu.CompilerParams(
            dimension_semantics=("parallel", "parallel", "arbitrary"),
            vmem_limit_bytes=48 * 1024 * 1024),
    )(a, b, bias_p)
    if (Mp, Np) != (M, N):
        out = out[:M, :N]
    return out


def batchnorm_nhwc_pallas(x, gamma, beta, eps=1e-5):
    """BatchNorm2d with batch statistics (torch train-mode default).  x: NHWC."""
    N, H, W, C = x.shape
    M = N * H * W
    x2 = x.reshape(M, C).astype(jnp.float32)
    tm = min(512, _round_up(M, 8))
    Mp = _round_up(M, tm)
    if Mp != M:
        x2 = jnp.pad(x2, ((0, Mp - M), (0, 0)))   # zero rows: add 0 to sums

    s, ss = pl.pallas_call(
        _bn_stats_kernel,
        out_shape=(jax.ShapeDtypeStruct((1, C), jnp.float32),
                   jax.ShapeDtypeStruct((1, C), jnp.float32)),
        grid_spec=pltpu.PrefetchScalarGridSpec(
            num_scalar_prefetch=0,
            grid=(Mp // tm,),
            in_specs=[pl.BlockSpec((tm, C), lambda i: (i, 0))],
            out_specs=(pl.BlockSpec((1, C), lambda i: (0, 0)),
                       pl.BlockSpec((1, C), lambda i: (0, 0))),
        ),
        compiler_params=pltpu.CompilerParams(
            dimension_semantics=("arbitrary",)),
    )(x2)

    mean = s / M
    var = jnp.maximum(ss / M - mean * mean, 0.0)        # biased variance
    scale = gamma.reshape(1, C).astype(jnp.float32) * jax.lax.rsqrt(var + eps)
    shift = beta.reshape(1, C).astype(jnp.float32) - mean * scale

    y = pl.pallas_call(
        _bn_apply_kernel,
        out_shape=jax.ShapeDtypeStruct((Mp, C), jnp.float32),
        grid_spec=pltpu.PrefetchScalarGridSpec(
            num_scalar_prefetch=0,
            grid=(Mp // tm,),
            in_specs=[pl.BlockSpec((tm, C), lambda i: (i, 0)),
                      pl.BlockSpec((1, C), lambda i: (0, 0)),
                      pl.BlockSpec((1, C), lambda i: (0, 0))],
            out_specs=pl.BlockSpec((tm, C), lambda i: (i, 0)),
        ),
        compiler_params=pltpu.CompilerParams(
            dimension_semantics=("parallel",)),
    )(x2, scale, shift)
    return y[:M].reshape(N, H, W, C)


# ----------------------------------------------------------------------------
# NHWC im2col based conv / conv-transpose (k=4, s=2, p=1 as in UnetGenerator)
# ----------------------------------------------------------------------------
def _im2col_nhwc(x, k, s, pad):
    """x: NHWC -> (N*Ho*Wo, k*k*C); patch K-index ordering = (kh, kw, c)."""
    N, H, W, C = x.shape
    if pad:
        x = jnp.pad(x, ((0, 0), (pad, pad), (pad, pad), (0, 0)))
    Hp, Wp = H + 2 * pad, W + 2 * pad
    Ho = (Hp - k) // s + 1
    Wo = (Wp - k) // s + 1
    cols = []
    for kh in range(k):
        for kw in range(k):
            cols.append(x[:, kh:kh + s * (Ho - 1) + 1:s,
                             kw:kw + s * (Wo - 1) + 1:s, :])   # (N,Ho,Wo,C)
    patches = jnp.concatenate(cols, axis=-1)                   # (N,Ho,Wo,k*k*C)
    return patches.reshape(N * Ho * Wo, k * k * C), Ho, Wo


def conv2d_pallas(x, w, act_in="none"):
    """Conv2d(k=4, s=2, p=1, bias=False).  x: NHWC, w: (Cout, Cin, 4, 4)."""
    N, H, W, C = x.shape
    Cout = w.shape[0]
    patches, Ho, Wo = _im2col_nhwc(x.astype(jnp.bfloat16), k=4, s=2, pad=1)
    B = w.transpose(2, 3, 1, 0).reshape(16 * C, Cout)          # (kh,kw,ci) order
    out = matmul_pallas(patches, B, bias=None, act_in=act_in)  # (M, Cout)
    return out.reshape(N, Ho, Wo, Cout)


def _convt_combined_weight(w):
    """Torch ConvTranspose2d weight (Cin, Cout, 4, 4) -> (9*Cin, 4*Cout).

    Builds the sparsified weight of the fused 4-phase sub-pixel decomposition:
    out[2i+ph, 2j+pw] = sum_{a,b} xpad1[i+a, j+b] @ Wc[a, b, :, ph, pw, :]."""
    Cin, Cout = w.shape[0], w.shape[1]
    wc = jnp.zeros((3, 3, Cin, 2, 2, Cout), w.dtype)
    for a in range(3):
        for b in range(3):
            for ph in range(2):
                for pw in range(2):
                    if (ph <= a <= ph + 1) and (pw <= b <= pw + 1):
                        kh = 3 + ph - 2 * a
                        kw = 3 + pw - 2 * b
                        wc = wc.at[a, b, :, ph, pw, :].set(w[:, :, kh, kw])
    return wc.reshape(9 * Cin, 4 * Cout)


def conv_transpose2d_pallas(x, w, bias=None, act_in="none", act_out="none"):
    """ConvTranspose2d(k=4, s=2, p=1).  x: NHWC, w: (Cin, Cout, 4, 4).

    Sub-pixel decomposition: one 3x3 stride-1 conv over the 1-padded input
    (no zero-dilated input), producing all four output parities at once, then a
    depth-to-space interleave.  Fused ReLU input activation is exact (0 -> 0)."""
    N, H, W, Cin = x.shape
    Cout = w.shape[1]
    xp = jnp.pad(x.astype(jnp.bfloat16), ((0, 0), (1, 1), (1, 1), (0, 0)))
    patches, _, _ = _im2col_nhwc(xp, k=3, s=1, pad=0)          # (N*H*W, 9*Cin)
    wc = _convt_combined_weight(w)                             # (9*Cin, 4*Cout)
    b4 = None if bias is None else jnp.tile(bias, 4)           # (ph,pw,co) order
    y = matmul_pallas(patches, wc, bias=b4, act_in=act_in, act_out=act_out)
    y = y.reshape(N, H, W, 2, 2, Cout)
    y = y.transpose(0, 1, 3, 2, 4, 5).reshape(N, 2 * H, 2 * W, Cout)
    return y


# ----------------------------------------------------------------------------
# UnetGenerator: parameter init + forward (mirrors the torch constructor)
# ----------------------------------------------------------------------------
def _make_block(key, outer_nc, inner_nc, input_nc=None, submodule=None,
                outermost=False, innermost=False):
    if input_nc is None:
        input_nc = outer_nc
    ks = jax.random.split(key, 8)
    p = {"outermost": outermost, "innermost": innermost, "sub": submodule}
    # BatchNorm norm_layer => use_bias = False for down/intermediate up convs.
    p["down_w"] = 0.05 * jax.random.normal(ks[0], (inner_nc, input_nc, 4, 4), jnp.float32)
    up_in = inner_nc if innermost else inner_nc * 2
    p["up_w"] = 0.05 * jax.random.normal(ks[1], (up_in, outer_nc, 4, 4), jnp.float32)
    if outermost:
        p["up_b"] = 0.05 * jax.random.normal(ks[2], (outer_nc,), jnp.float32)
    else:
        p["up_gamma"] = 1.0 + 0.1 * jax.random.normal(ks[3], (outer_nc,), jnp.float32)
        p["up_beta"] = 0.1 * jax.random.normal(ks[4], (outer_nc,), jnp.float32)
        if not innermost:
            p["down_gamma"] = 1.0 + 0.1 * jax.random.normal(ks[5], (inner_nc,), jnp.float32)
            p["down_beta"] = 0.1 * jax.random.normal(ks[6], (inner_nc,), jnp.float32)
    return p


def init_unet_generator(key, input_nc, output_nc, num_downs, ngf=64):
    keys = jax.random.split(key, num_downs)
    blk = _make_block(keys[0], ngf * 8, ngf * 8, innermost=True)
    for i in range(num_downs - 5):
        blk = _make_block(keys[1 + i], ngf * 8, ngf * 8, submodule=blk)
    blk = _make_block(keys[num_downs - 4], ngf * 4, ngf * 8, submodule=blk)
    blk = _make_block(keys[num_downs - 3], ngf * 2, ngf * 4, submodule=blk)
    blk = _make_block(keys[num_downs - 2], ngf, ngf * 2, submodule=blk)
    blk = _make_block(keys[num_downs - 1], output_nc, ngf, input_nc=input_nc,
                      submodule=blk, outermost=True)
    return blk


def apply_block(p, x):
    """x: NHWC.  Skip concats happen on the (cheap) last channel axis."""
    if p["outermost"]:
        # down = [downconv]; up = [ReLU, upconv(+bias), Tanh]; no skip concat.
        d = conv2d_pallas(x, p["down_w"], act_in="none")
        s = apply_block(p["sub"], d)
        return conv_transpose2d_pallas(s, p["up_w"], bias=p["up_b"],
                                       act_in="relu", act_out="tanh")
    elif p["innermost"]:
        # down = [LeakyReLU, downconv]; up = [ReLU, upconv, BN]; concat skip.
        d = conv2d_pallas(x, p["down_w"], act_in="lrelu")
        u = conv_transpose2d_pallas(d, p["up_w"], act_in="relu")
        u = batchnorm_nhwc_pallas(u, p["up_gamma"], p["up_beta"])
        return jnp.concatenate([x, u], axis=-1)
    else:
        # down = [LeakyReLU, downconv, BN]; up = [ReLU, upconv, BN]; concat skip.
        d = conv2d_pallas(x, p["down_w"], act_in="lrelu")
        d = batchnorm_nhwc_pallas(d, p["down_gamma"], p["down_beta"])
        s = apply_block(p["sub"], d)
        u = conv_transpose2d_pallas(s, p["up_w"], act_in="relu")
        u = batchnorm_nhwc_pallas(u, p["up_gamma"], p["up_beta"])
        return jnp.concatenate([x, u], axis=-1)


def unet_generator_forward(params, x_nchw):
    x = x_nchw.transpose(0, 2, 3, 1)          # NCHW -> NHWC once at entry
    y = apply_block(params, x)
    return y.transpose(0, 3, 1, 2)            # NHWC -> NCHW once at exit


# ----------------------------------------------------------------------------
if __name__ == "__main__":
    # Small, structurally-complete config: num_downs=5 (inner + 3 mid + outer).
    INPUT_NC, OUTPUT_NC, NUM_DOWNS, NGF = 3, 2, 5, 8
    N, H, W = 2, 32, 32      # spatial must be >= 2**num_downs

    key = jax.random.PRNGKey(0)
    k_param, k_x = jax.random.split(key)
    params = init_unet_generator(k_param, INPUT_NC, OUTPUT_NC, NUM_DOWNS, NGF)
    x = jax.random.normal(k_x, (N, INPUT_NC, H, W), jnp.float32)

    fwd = jax.jit(lambda inp: unet_generator_forward(params, inp))
    out = jax.block_until_ready(fwd(x))

    assert out.shape == (N, OUTPUT_NC, H, W), out.shape
    assert bool(jnp.all(jnp.isfinite(out)))
    assert bool(jnp.all(jnp.abs(out) <= 1.0 + 1e-6))   # tanh output range
    print("KERNEL_OK")
</pallas_src>

<mosaic_0001>
module attributes {stable_mosaic.version = 11 : i64} {
  func.func @_mm_kernel(%arg0: i32, %arg1: i32, %arg2: i32, %arg3: memref<256x48xbf16, #tpu.memory_space<vmem>>, %arg4: memref<48x128xbf16, #tpu.memory_space<vmem>>, %arg5: memref<1x128xf32, #tpu.memory_space<vmem>>, %arg6: memref<256x128xf32, #tpu.memory_space<vmem>>, %arg7: memref<256x128xf32, #tpu.memory_space<vmem>>) attributes {dimension_semantics = [#tpu.dimension_semantics<parallel>, #tpu.dimension_semantics<parallel>, #tpu.dimension_semantics<arbitrary>], iteration_bounds = array<i64: 2, 1, 1>, scalar_prefetch = 0 : i64, scratch_operands = 1 : i64, tpu.core_type = #tpu.core_type<tc>, window_params = [{transform_indices = @transform_0, window_bounds = array<i64: 256, 48>}, {transform_indices = @transform_1, window_bounds = array<i64: 48, 128>}, {transform_indices = @transform_2, window_bounds = array<i64: 1, 128>}, {transform_indices = @transform_3, window_bounds = array<i64: 256, 128>}]} {
    %c0_i32 = arith.constant 0 : i32
    %0 = arith.cmpi eq, %arg2, %c0_i32 : i32
    %1 = arith.extui %0 : i1 to i32
    %c0_i32_0 = arith.constant 0 : i32
    %2 = arith.cmpi ne, %1, %c0_i32_0 : i32
    scf.if %2 {
      %cst_10 = arith.constant 0.000000e+00 : f32
      %14 = vector.broadcast %cst_10 : f32 to vector<256x128xf32>
      %c0_11 = arith.constant 0 : index
      %c0_12 = arith.constant 0 : index
      %15 = vector.load %arg7[%c0_11, %c0_12] : memref<256x128xf32, #tpu.memory_space<vmem>>, vector<256x128xf32>
      tpu.vector_store %arg7[%c0_11, %c0_12], %14 {strides = array<i32>} : memref<256x128xf32, #tpu.memory_space<vmem>>, vector<256x128xf32>,
    } else {
    }
    %c0 = arith.constant 0 : index
    %c0_1 = arith.constant 0 : index
    %3 = vector.load %arg3[%c0, %c0_1] : memref<256x48xbf16, #tpu.memory_space<vmem>>, vector<256x48xbf16>
    %4 = arith.extf %3 : vector<256x48xbf16> to vector<256x48xf32>
    %5 = arith.truncf %4 : vector<256x48xf32> to vector<256x48xbf16>
    %c0_2 = arith.constant 0 : index
    %c0_3 = arith.constant 0 : index
    %6 = vector.load %arg7[%c0_2, %c0_3] : memref<256x128xf32, #tpu.memory_space<vmem>>, vector<256x128xf32>
    %c0_4 = arith.constant 0 : index
    %c0_5 = arith.constant 0 : index
    %7 = vector.load %arg4[%c0_4, %c0_5] : memref<48x128xbf16, #tpu.memory_space<vmem>>, vector<48x128xbf16>
    %cst = arith.constant dense<0.000000e+00> : vector<256x128xf32>
    %8 = tpu.matmul %5, %7, %cst {dimension_numbers = #tpu.dot_dimension_numbers<[1], [0], [0], [1], [0, 0, 1, 1], [], []>} : vector<256x48xbf16>, vector<48x128xbf16>, vector<256x128xf32> -> vector<256x128xf32>
    %9 = arith.addf %6, %8 : vector<256x128xf32>
    %c0_6 = arith.constant 0 : index
    %c0_7 = arith.constant 0 : index
    %10 = vector.load %arg7[%c0_6, %c0_7] : memref<256x128xf32, #tpu.memory_space<vmem>>, vector<256x128xf32>
    tpu.vector_store %arg7[%c0_6, %c0_7], %9 {strides = array<i32>} : memref<256x128xf32, #tpu.memory_space<vmem>>, vector<256x128xf32>,
    %c0_i32_8 = arith.constant 0 : i32
    %11 = arith.cmpi eq, %arg2, %c0_i32_8 : i32
    %12 = arith.extui %11 : i1 to i32
    %c0_i32_9 = arith.constant 0 : i32
    %13 = arith.cmpi ne, %12, %c0_i32_9 : i32
    scf.if %13 {
      %c0_10 = arith.constant 0 : index
      %c0_11 = arith.constant 0 : index
      %14 = vector.load %arg7[%c0_10, %c0_11] : memref<256x128xf32, #tpu.memory_space<vmem>>, vector<256x128xf32>
      %c0_12 = arith.constant 0 : index
      %c0_13 = arith.constant 0 : index
      %15 = vector.load %arg5[%c0_12, %c0_13] : memref<1x128xf32, #tpu.memory_space<vmem>>, vector<1x128xf32>
      %16 = vector.broadcast %15 : vector<1x128xf32> to vector<256x128xf32>
      %17 = arith.addf %14, %16 : vector<256x128xf32>
      %c0_14 = arith.constant 0 : index
      %c0_15 = arith.constant 0 : index
      %18 = vector.load %arg6[%c0_14, %c0_15] : memref<256x128xf32, #tpu.memory_space<vmem>>, vector<256x128xf32>
      tpu.vector_store %arg6[%c0_14, %c0_15], %17 {strides = array<i32>} : memref<256x128xf32, #tpu.memory_space<vmem>>, vector<256x128xf32>,
    } else {
    }
    return
  }
  func.func @transform_0(%arg0: i32, %arg1: i32, %arg2: i32) -> (i32, i32) {
    %c0_i32 = arith.constant 0 : i32
    return %arg0, %arg2 : i32, i32
  }
  func.func @transform_1(%arg0: i32, %arg1: i32, %arg2: i32) -> (i32, i32) {
    %c0_i32 = arith.constant 0 : i32
    return %arg2, %arg1 : i32, i32
  }
  func.func @transform_2(%arg0: i32, %arg1: i32, %arg2: i32) -> (i32, i32) {
    %c0_i32 = arith.constant 0 : i32
    %c0_i32_0 = arith.constant 0 : i32
    return %c0_i32, %arg1 : i32, i32
  }
  func.func @transform_3(%arg0: i32, %arg1: i32, %arg2: i32) -> (i32, i32) {
    %c0_i32 = arith.constant 0 : i32
    return %arg0, %arg1 : i32, i32
  }
}

module attributes {stable_mosaic.version = 11 : i64} {
  func.func @_mm_kernel(%arg0: i32, %arg1: i32, %arg2: i32, %arg3: memref<128x128xbf16, #tpu.memory_space<vmem>>, %arg4: memref<128x128xbf16, #tpu.memory_space<vmem>>, %arg5: memref<1x128xf32, #tpu.memory_space<vmem>>, %arg6: memref<128x128xf32, #tpu.memory_space<vmem>>, %arg7: memref<128x128xf32, #tpu.memory_space<vmem>>) attributes {dimension_semantics = [#tpu.dimension_semantics<parallel>, #tpu.dimension_semantics<parallel>, #tpu.dimension_semantics<arbitrary>], iteration_bounds = array<i64: 1, 1, 1>, scalar_prefetch = 0 : i64, scratch_operands = 1 : i64, tpu.core_type = #tpu.core_type<tc>, window_params = [{transform_indices = @transform_0, window_bounds = array<i64: 128, 128>}, {transform_indices = @transform_1, window_bounds = array<i64: 128, 128>}, {transform_indices = @transform_2, window_bounds = array<i64: 1, 128>}, {transform_indices = @transform_3, window_bounds = array<i64: 128, 128>}]} {
    %c0_i32 = arith.constant 0 : i32
    %0 = arith.cmpi eq, %arg2, %c0_i32 : i32
    %1 = arith.extui %0 : i1 to i32
    %c0_i32_0 = arith.constant 0 : i32
    %2 = arith.cmpi ne, %1, %c0_i32_0 : i32
    scf.if %2 {
      %cst_12 = arith.constant 0.000000e+00 : f32
      %19 = vector.broadcast %cst_12 : f32 to vector<128x128xf32>
      %c0_13 = arith.constant 0 : index
      %c0_14 = arith.constant 0 : index
      %20 = vector.load %arg7[%c0_13, %c0_14] : memref<128x128xf32, #tpu.memory_space<vmem>>, vector<128x128xf32>
      tpu.vector_store %arg7[%c0_13, %c0_14], %19 {strides = array<i32>} : memref<128x128xf32, #tpu.memory_space<vmem>>, vector<128x128xf32>,
    } else {
    }
    %c0 = arith.constant 0 : index
    %c0_1 = arith.constant 0 : index
    %3 = vector.load %arg3[%c0, %c0_1] : memref<128x128xbf16, #tpu.memory_space<vmem>>, vector<128x128xbf16>
    %4 = arith.extf %3 : vector<128x128xbf16> to vector<128x128xf32>
    %cst = arith.constant 0.000000e+00 : f32
    %5 = vector.broadcast %cst : f32 to vector<128x128xf32>
    %6 = arith.cmpf oge, %4, %5 : vector<128x128xf32>
    %cst_2 = arith.constant 2.000000e-01 : f32
    %7 = vector.broadcast %cst_2 : f32 to vector<128x128xf32>
    %8 = arith.mulf %7, %4 : vector<128x128xf32>
    %9 = arith.select %6, %4, %8 : vector<128x128xi1>, vector<128x128xf32>
    %10 = arith.truncf %9 : vector<128x128xf32> to vector<128x128xbf16>
    %c0_3 = arith.constant 0 : index
    %c0_4 = arith.constant 0 : index
    %11 = vector.load %arg7[%c0_3, %c0_4] : memref<128x128xf32, #tpu.memory_space<vmem>>, vector<128x128xf32>
    %c0_5 = arith.constant 0 : index
    %c0_6 = arith.constant 0 : index
    %12 = vector.load %arg4[%c0_5, %c0_6] : memref<128x128xbf16, #tpu.memory_space<vmem>>, vector<128x128xbf16>
    %cst_7 = arith.constant dense<0.000000e+00> : vector<128x128xf32>
    %13 = tpu.matmul %10, %12, %cst_7 {dimension_numbers = #tpu.dot_dimension_numbers<[1], [0], [0], [1], [0, 0, 1, 1], [], []>} : vector<128x128xbf16>, vector<128x128xbf16>, vector<128x128xf32> -> vector<128x128xf32>
    %14 = arith.addf %11, %13 : vector<128x128xf32>
    %c0_8 = arith.constant 0 : index
    %c0_9 = arith.constant 0 : index
    %15 = vector.load %arg7[%c0_8, %c0_9] : memref<128x128xf32, #tpu.memory_space<vmem>>, vector<128x128xf32>
    tpu.vector_store %arg7[%c0_8, %c0_9], %14 {strides = array<i32>} : memref<128x128xf32, #tpu.memory_space<vmem>>, vector<128x128xf32>,
    %c0_i32_10 = arith.constant 0 : i32
    %16 = arith.cmpi eq, %arg2, %c0_i32_10 : i32
    %17 = arith.extui %16 : i1 to i32
    %c0_i32_11 = arith.constant 0 : i32
    %18 = arith.cmpi ne, %17, %c0_i32_11 : i32
    scf.if %18 {
      %c0_12 = arith.constant 0 : index
      %c0_13 = arith.constant 0 : index
      %19 = vector.load %arg7[%c0_12, %c0_13] : memref<128x128xf32, #tpu.memory_space<vmem>>, vector<128x128xf32>
      %c0_14 = arith.constant 0 : index
      %c0_15 = arith.constant 0 : index
      %20 = vector.load %arg5[%c0_14, %c0_15] : memref<1x128xf32, #tpu.memory_space<vmem>>, vector<1x128xf32>
      %21 = vector.broadcast %20 : vector<1x128xf32> to vector<128x128xf32>
      %22 = arith.addf %19, %21 : vector<128x128xf32>
      %c0_16 = arith.constant 0 : index
      %c0_17 = arith.constant 0 : index
      %23 = vector.load %arg6[%c0_16, %c0_17] : memref<128x128xf32, #tpu.memory_space<vmem>>, vector<128x128xf32>
      tpu.vector_store %arg6[%c0_16, %c0_17], %22 {strides = array<i32>} : memref<128x128xf32, #tpu.memory_space<vmem>>, vector<128x128xf32>,
    } else {
    }
    return
  }
  func.func @transform_0(%arg0: i32, %arg1: i32, %arg2: i32) -> (i32, i32) {
    %c0_i32 = arith.constant 0 : i32
    return %arg0, %arg2 : i32, i32
  }
  func.func @transform_1(%arg0: i32, %arg1: i32, %arg2: i32) -> (i32, i32) {
    %c0_i32 = arith.constant 0 : i32
    return %arg2, %arg1 : i32, i32
  }
  func.func @transform_2(%arg0: i32, %arg1: i32, %arg2: i32) -> (i32, i32) {
    %c0_i32 = arith.constant 0 : i32
    %c0_i32_0 = arith.constant 0 : i32
    return %c0_i32, %arg1 : i32, i32
  }
  func.func @transform_3(%arg0: i32, %arg1: i32, %arg2: i32) -> (i32, i32) {
    %c0_i32 = arith.constant 0 : i32
    return %arg0, %arg1 : i32, i32
  }
}

module attributes {stable_mosaic.version = 11 : i64} {
  func.func @_bn_stats_kernel(%arg0: i32, %arg1: memref<128x16xf32, #tpu.memory_space<vmem>>, %arg2: memref<1x16xf32, #tpu.memory_space<vmem>>, %arg3: memref<1x16xf32, #tpu.memory_space<vmem>>) attributes {dimension_semantics = [#tpu.dimension_semantics<arbitrary>], iteration_bounds = array<i64: 1>, scalar_prefetch = 0 : i64, scratch_operands = 0 : i64, tpu.core_type = #tpu.core_type<tc>, window_params = [{transform_indices = @transform_0, window_bounds = array<i64: 128, 16>}, {pipeline_mode = #tpu.pipeline_mode<synchronous>, transform_indices = @transform_1, window_bounds = array<i64: 1, 16>}, {pipeline_mode = #tpu.pipeline_mode<synchronous>, transform_indices = @transform_2, window_bounds = array<i64: 1, 16>}]} {
    %c0_i32 = arith.constant 0 : i32
    %0 = arith.cmpi eq, %arg0, %c0_i32 : i32
    %1 = arith.extui %0 : i1 to i32
    %c0_i32_0 = arith.constant 0 : i32
    %2 = arith.cmpi ne, %1, %c0_i32_0 : i32
    scf.if %2 {
      %cst_11 = arith.constant 0.000000e+00 : f32
      %15 = vector.broadcast %cst_11 : f32 to vector<1x16xf32>
      %c0_12 = arith.constant 0 : index
      %c0_13 = arith.constant 0 : index
      %16 = vector.load %arg2[%c0_12, %c0_13] : memref<1x16xf32, #tpu.memory_space<vmem>>, vector<1x16xf32>
      tpu.vector_store %arg2[%c0_12, %c0_13], %15 {strides = array<i32>} : memref<1x16xf32, #tpu.memory_space<vmem>>, vector<1x16xf32>,
      %cst_14 = arith.constant 0.000000e+00 : f32
      %17 = vector.broadcast %cst_14 : f32 to vector<1x16xf32>
      %c0_15 = arith.constant 0 : index
      %c0_16 = arith.constant 0 : index
      %18 = vector.load %arg3[%c0_15, %c0_16] : memref<1x16xf32, #tpu.memory_space<vmem>>, vector<1x16xf32>
      tpu.vector_store %arg3[%c0_15, %c0_16], %17 {strides = array<i32>} : memref<1x16xf32, #tpu.memory_space<vmem>>, vector<1x16xf32>,
    } else {
    }
    %c0 = arith.constant 0 : index
    %c0_1 = arith.constant 0 : index
    %3 = vector.load %arg1[%c0, %c0_1] : memref<128x16xf32, #tpu.memory_space<vmem>>, vector<128x16xf32>
    %c0_2 = arith.constant 0 : index
    %c0_3 = arith.constant 0 : index
    %4 = vector.load %arg2[%c0_2, %c0_3] : memref<1x16xf32, #tpu.memory_space<vmem>>, vector<1x16xf32>
    %cst = arith.constant dense<0.000000e+00> : vector<16xf32>
    %5 = vector.multi_reduction <add>, %3, %cst [0] : vector<128x16xf32> to vector<16xf32>
    %6 = vector.shape_cast %5 : vector<16xf32> to vector<1x16xf32>
    %7 = arith.addf %4, %6 : vector<1x16xf32>
    %c0_4 = arith.constant 0 : index
    %c0_5 = arith.constant 0 : index
    %8 = vector.load %arg2[%c0_4, %c0_5] : memref<1x16xf32, #tpu.memory_space<vmem>>, vector<1x16xf32>
    tpu.vector_store %arg2[%c0_4, %c0_5], %7 {strides = array<i32>} : memref<1x16xf32, #tpu.memory_space<vmem>>, vector<1x16xf32>,
    %c0_6 = arith.constant 0 : index
    %c0_7 = arith.constant 0 : index
    %9 = vector.load %arg3[%c0_6, %c0_7] : memref<1x16xf32, #tpu.memory_space<vmem>>, vector<1x16xf32>
    %10 = arith.mulf %3, %3 : vector<128x16xf32>
    %cst_8 = arith.constant dense<0.000000e+00> : vector<16xf32>
    %11 = vector.multi_reduction <add>, %10, %cst_8 [0] : vector<128x16xf32> to vector<16xf32>
    %12 = vector.shape_cast %11 : vector<16xf32> to vector<1x16xf32>
    %13 = arith.addf %9, %12 : vector<1x16xf32>
    %c0_9 = arith.constant 0 : index
    %c0_10 = arith.constant 0 : index
    %14 = vector.load %arg3[%c0_9, %c0_10] : memref<1x16xf32, #tpu.memory_space<vmem>>, vector<1x16xf32>
    tpu.vector_store %arg3[%c0_9, %c0_10], %13 {strides = array<i32>} : memref<1x16xf32, #tpu.memory_space<vmem>>, vector<1x16xf32>,
    return
  }
  func.func @transform_0(%arg0: i32) -> (i32, i32) {
    %c0_i32 = arith.constant 0 : i32
    %c0_i32_0 = arith.constant 0 : i32
    return %arg0, %c0_i32 : i32, i32
  }
  func.func @transform_1(%arg0: i32) -> (i32, i32) {
    %c0_i32 = arith.constant 0 : i32
    %c0_i32_0 = arith.constant 0 : i32
    %c0_i32_1 = arith.constant 0 : i32
    return %c0_i32, %c0_i32_0 : i32, i32
  }
  func.func @transform_2(%arg0: i32) -> (i32, i32) {
    %c0_i32 = arith.constant 0 : i32
    %c0_i32_0 = arith.constant 0 : i32
    %c0_i32_1 = arith.constant 0 : i32
    return %c0_i32, %c0_i32_0 : i32, i32
  }
}

module attributes {stable_mosaic.version = 11 : i64} {
  func.func @_bn_apply_kernel(%arg0: i32, %arg1: memref<128x16xf32, #tpu.memory_space<vmem>>, %arg2: memref<1x16xf32, #tpu.memory_space<vmem>>, %arg3: memref<1x16xf32, #tpu.memory_space<vmem>>, %arg4: memref<128x16xf32, #tpu.memory_space<vmem>>) attributes {dimension_semantics = [#tpu.dimension_semantics<parallel>], iteration_bounds = array<i64: 1>, scalar_prefetch = 0 : i64, scratch_operands = 0 : i64, tpu.core_type = #tpu.core_type<tc>, window_params = [{transform_indices = @transform_0, window_bounds = array<i64: 128, 16>}, {pipeline_mode = #tpu.pipeline_mode<synchronous>, transform_indices = @transform_1, window_bounds = array<i64: 1, 16>}, {pipeline_mode = #tpu.pipeline_mode<synchronous>, transform_indices = @transform_2, window_bounds = array<i64: 1, 16>}, {transform_indices = @transform_3, window_bounds = array<i64: 128, 16>}]} {
    %c0 = arith.constant 0 : index
    %c0_0 = arith.constant 0 : index
    %0 = vector.load %arg1[%c0, %c0_0] : memref<128x16xf32, #tpu.memory_space<vmem>>, vector<128x16xf32>
    %c0_1 = arith.constant 0 : index
    %c0_2 = arith.constant 0 : index
    %1 = vector.load %arg2[%c0_1, %c0_2] : memref<1x16xf32, #tpu.memory_space<vmem>>, vector<1x16xf32>
    %2 = vector.broadcast %1 : vector<1x16xf32> to vector<128x16xf32>
    %3 = arith.mulf %0, %2 : vector<128x16xf32>
    %c0_3 = arith.constant 0 : index
    %c0_4 = arith.constant 0 : index
    %4 = vector.load %arg3[%c0_3, %c0_4] : memref<1x16xf32, #tpu.memory_space<vmem>>, vector<1x16xf32>
    %5 = vector.broadcast %4 : vector<1x16xf32> to vector<128x16xf32>
    %6 = arith.addf %3, %5 : vector<128x16xf32>
    %c0_5 = arith.constant 0 : index
    %c0_6 = arith.constant 0 : index
    %7 = vector.load %arg4[%c0_5, %c0_6] : memref<128x16xf32, #tpu.memory_space<vmem>>, vector<128x16xf32>
    tpu.vector_store %arg4[%c0_5, %c0_6], %6 {strides = array<i32>} : memref<128x16xf32, #tpu.memory_space<vmem>>, vector<128x16xf32>,
    return
  }
  func.func @transform_0(%arg0: i32) -> (i32, i32) {
    %c0_i32 = arith.constant 0 : i32
    %c0_i32_0 = arith.constant 0 : i32
    return %arg0, %c0_i32 : i32, i32
  }
  func.func @transform_1(%arg0: i32) -> (i32, i32) {
    %c0_i32 = arith.constant 0 : i32
    %c0_i32_0 = arith.constant 0 : i32
    %c0_i32_1 = arith.constant 0 : i32
    return %c0_i32, %c0_i32_0 : i32, i32
  }
  func.func @transform_2(%arg0: i32) -> (i32, i32) {
    %c0_i32 = arith.constant 0 : i32
    %c0_i32_0 = arith.constant 0 : i32
    %c0_i32_1 = arith.constant 0 : i32
    return %c0_i32, %c0_i32_0 : i32, i32
  }
  func.func @transform_3(%arg0: i32) -> (i32, i32) {
    %c0_i32 = arith.constant 0 : i32
    %c0_i32_0 = arith.constant 0 : i32
    return %arg0, %c0_i32 : i32, i32
  }
}

module attributes {stable_mosaic.version = 11 : i64} {
  func.func @_mm_kernel(%arg0: i32, %arg1: i32, %arg2: i32, %arg3: memref<32x256xbf16, #tpu.memory_space<vmem>>, %arg4: memref<256x128xbf16, #tpu.memory_space<vmem>>, %arg5: memref<1x128xf32, #tpu.memory_space<vmem>>, %arg6: memref<32x128xf32, #tpu.memory_space<vmem>>, %arg7: memref<32x128xf32, #tpu.memory_space<vmem>>) attributes {dimension_semantics = [#tpu.dimension_semantics<parallel>, #tpu.dimension_semantics<parallel>, #tpu.dimension_semantics<arbitrary>], iteration_bounds = array<i64: 1, 1, 1>, scalar_prefetch = 0 : i64, scratch_operands = 1 : i64, tpu.core_type = #tpu.core_type<tc>, window_params = [{transform_indices = @transform_0, window_bounds = array<i64: 32, 256>}, {transform_indices = @transform_1, window_bounds = array<i64: 256, 128>}, {transform_indices = @transform_2, window_bounds = array<i64: 1, 128>}, {transform_indices = @transform_3, window_bounds = array<i64: 32, 128>}]} {
    %c0_i32 = arith.constant 0 : i32
    %0 = arith.cmpi eq, %arg2, %c0_i32 : i32
    %1 = arith.extui %0 : i1 to i32
    %c0_i32_0 = arith.constant 0 : i32
    %2 = arith.cmpi ne, %1, %c0_i32_0 : i32
    scf.if %2 {
      %cst_12 = arith.constant 0.000000e+00 : f32
      %19 = vector.broadcast %cst_12 : f32 to vector<32x128xf32>
      %c0_13 = arith.constant 0 : index
      %c0_14 = arith.constant 0 : index
      %20 = vector.load %arg7[%c0_13, %c0_14] : memref<32x128xf32, #tpu.memory_space<vmem>>, vector<32x128xf32>
      tpu.vector_store %arg7[%c0_13, %c0_14], %19 {strides = array<i32>} : memref<32x128xf32, #tpu.memory_space<vmem>>, vector<32x128xf32>,
    } else {
    }
    %c0 = arith.constant 0 : index
    %c0_1 = arith.constant 0 : index
    %3 = vector.load %arg3[%c0, %c0_1] : memref<32x256xbf16, #tpu.memory_space<vmem>>, vector<32x256xbf16>
    %4 = arith.extf %3 : vector<32x256xbf16> to vector<32x256xf32>
    %cst = arith.constant 0.000000e+00 : f32
    %5 = vector.broadcast %cst : f32 to vector<32x256xf32>
    %6 = arith.cmpf oge, %4, %5 : vector<32x256xf32>
    %cst_2 = arith.constant 2.000000e-01 : f32
    %7 = vector.broadcast %cst_2 : f32 to vector<32x256xf32>
    %8 = arith.mulf %7, %4 : vector<32x256xf32>
    %9 = arith.select %6, %4, %8 : vector<32x256xi1>, vector<32x256xf32>
    %10 = arith.truncf %9 : vector<32x256xf32> to vector<32x256xbf16>
    %c0_3 = arith.constant 0 : index
    %c0_4 = arith.constant 0 : index
    %11 = vector.load %arg7[%c0_3, %c0_4] : memref<32x128xf32, #tpu.memory_space<vmem>>, vector<32x128xf32>
    %c0_5 = arith.constant 0 : index
    %c0_6 = arith.constant 0 : index
    %12 = vector.load %arg4[%c0_5, %c0_6] : memref<256x128xbf16, #tpu.memory_space<vmem>>, vector<256x128xbf16>
    %cst_7 = arith.constant dense<0.000000e+00> : vector<32x128xf32>
    %13 = tpu.matmul %10, %12, %cst_7 {dimension_numbers = #tpu.dot_dimension_numbers<[1], [0], [0], [1], [0, 0, 1, 1], [], []>} : vector<32x256xbf16>, vector<256x128xbf16>, vector<32x128xf32> -> vector<32x128xf32>
    %14 = arith.addf %11, %13 : vector<32x128xf32>
    %c0_8 = arith.constant 0 : index
    %c0_9 = arith.constant 0 : index
    %15 = vector.load %arg7[%c0_8, %c0_9] : memref<32x128xf32, #tpu.memory_space<vmem>>, vector<32x128xf32>
    tpu.vector_store %arg7[%c0_8, %c0_9], %14 {strides = array<i32>} : memref<32x128xf32, #tpu.memory_space<vmem>>, vector<32x128xf32>,
    %c0_i32_10 = arith.constant 0 : i32
    %16 = arith.cmpi eq, %arg2, %c0_i32_10 : i32
    %17 = arith.extui %16 : i1 to i32
    %c0_i32_11 = arith.constant 0 : i32
    %18 = arith.cmpi ne, %17, %c0_i32_11 : i32
    scf.if %18 {
      %c0_12 = arith.constant 0 : index
      %c0_13 = arith.constant 0 : index
      %19 = vector.load %arg7[%c0_12, %c0_13] : memref<32x128xf32, #tpu.memory_space<vmem>>, vector<32x128xf32>
      %c0_14 = arith.constant 0 : index
      %c0_15 = arith.constant 0 : index
      %20 = vector.load %arg5[%c0_14, %c0_15] : memref<1x128xf32, #tpu.memory_space<vmem>>, vector<1x128xf32>
      %21 = vector.broadcast %20 : vector<1x128xf32> to vector<32x128xf32>
      %22 = arith.addf %19, %21 : vector<32x128xf32>
      %c0_16 = arith.constant 0 : index
      %c0_17 = arith.constant 0 : index
      %23 = vector.load %arg6[%c0_16, %c0_17] : memref<32x128xf32, #tpu.memory_space<vmem>>, vector<32x128xf32>
      tpu.vector_store %arg6[%c0_16, %c0_17], %22 {strides = array<i32>} : memref<32x128xf32, #tpu.memory_space<vmem>>, vector<32x128xf32>,
    } else {
    }
    return
  }
  func.func @transform_0(%arg0: i32, %arg1: i32, %arg2: i32) -> (i32, i32) {
    %c0_i32 = arith.constant 0 : i32
    return %arg0, %arg2 : i32, i32
  }
  func.func @transform_1(%arg0: i32, %arg1: i32, %arg2: i32) -> (i32, i32) {
    %c0_i32 = arith.constant 0 : i32
    return %arg2, %arg1 : i32, i32
  }
  func.func @transform_2(%arg0: i32, %arg1: i32, %arg2: i32) -> (i32, i32) {
    %c0_i32 = arith.constant 0 : i32
    %c0_i32_0 = arith.constant 0 : i32
    return %c0_i32, %arg1 : i32, i32
  }
  func.func @transform_3(%arg0: i32, %arg1: i32, %arg2: i32) -> (i32, i32) {
    %c0_i32 = arith.constant 0 : i32
    return %arg0, %arg1 : i32, i32
  }
}

module attributes {stable_mosaic.version = 11 : i64} {
  func.func @_bn_apply_kernel(%arg0: i32, %arg1: memref<32x32xf32, #tpu.memory_space<vmem>>, %arg2: memref<1x32xf32, #tpu.memory_space<vmem>>, %arg3: memref<1x32xf32, #tpu.memory_space<vmem>>, %arg4: memref<32x32xf32, #tpu.memory_space<vmem>>) attributes {dimension_semantics = [#tpu.dimension_semantics<parallel>], iteration_bounds = array<i64: 1>, scalar_prefetch = 0 : i64, scratch_operands = 0 : i64, tpu.core_type = #tpu.core_type<tc>, window_params = [{transform_indices = @transform_0, window_bounds = array<i64: 32, 32>}, {pipeline_mode = #tpu.pipeline_mode<synchronous>, transform_indices = @transform_1, window_bounds = array<i64: 1, 32>}, {pipeline_mode = #tpu.pipeline_mode<synchronous>, transform_indices = @transform_2, window_bounds = array<i64: 1, 32>}, {transform_indices = @transform_3, window_bounds = array<i64: 32, 32>}]} {
    %c0 = arith.constant 0 : index
    %c0_0 = arith.constant 0 : index
    %0 = vector.load %arg1[%c0, %c0_0] : memref<32x32xf32, #tpu.memory_space<vmem>>, vector<32x32xf32>
    %c0_1 = arith.constant 0 : index
    %c0_2 = arith.constant 0 : index
    %1 = vector.load %arg2[%c0_1, %c0_2] : memref<1x32xf32, #tpu.memory_space<vmem>>, vector<1x32xf32>
    %2 = vector.broadcast %1 : vector<1x32xf32> to vector<32x32xf32>
    %3 = arith.mulf %0, %2 : vector<32x32xf32>
    %c0_3 = arith.constant 0 : index
    %c0_4 = arith.constant 0 : index
    %4 = vector.load %arg3[%c0_3, %c0_4] : memref<1x32xf32, #tpu.memory_space<vmem>>, vector<1x32xf32>
    %5 = vector.broadcast %4 : vector<1x32xf32> to vector<32x32xf32>
    %6 = arith.addf %3, %5 : vector<32x32xf32>
    %c0_5 = arith.constant 0 : index
    %c0_6 = arith.constant 0 : index
    %7 = vector.load %arg4[%c0_5, %c0_6] : memref<32x32xf32, #tpu.memory_space<vmem>>, vector<32x32xf32>
    tpu.vector_store %arg4[%c0_5, %c0_6], %6 {strides = array<i32>} : memref<32x32xf32, #tpu.memory_space<vmem>>, vector<32x32xf32>,
    return
  }
  func.func @transform_0(%arg0: i32) -> (i32, i32) {
    %c0_i32 = arith.constant 0 : i32
    %c0_i32_0 = arith.constant 0 : i32
    return %arg0, %c0_i32 : i32, i32
  }
  func.func @transform_1(%arg0: i32) -> (i32, i32) {
    %c0_i32 = arith.constant 0 : i32
    %c0_i32_0 = arith.constant 0 : i32
    %c0_i32_1 = arith.constant 0 : i32
    return %c0_i32, %c0_i32_0 : i32, i32
  }
  func.func @transform_2(%arg0: i32) -> (i32, i32) {
    %c0_i32 = arith.constant 0 : i32
    %c0_i32_0 = arith.constant 0 : i32
    %c0_i32_1 = arith.constant 0 : i32
    return %c0_i32, %c0_i32_0 : i32, i32
  }
  func.func @transform_3(%arg0: i32) -> (i32, i32) {
    %c0_i32 = arith.constant 0 : i32
    %c0_i32_0 = arith.constant 0 : i32
    return %arg0, %c0_i32 : i32, i32
  }
}

module attributes {stable_mosaic.version = 11 : i64} {
  func.func @_bn_stats_kernel(%arg0: i32, %arg1: memref<32x32xf32, #tpu.memory_space<vmem>>, %arg2: memref<1x32xf32, #tpu.memory_space<vmem>>, %arg3: memref<1x32xf32, #tpu.memory_space<vmem>>) attributes {dimension_semantics = [#tpu.dimension_semantics<arbitrary>], iteration_bounds = array<i64: 1>, scalar_prefetch = 0 : i64, scratch_operands = 0 : i64, tpu.core_type = #tpu.core_type<tc>, window_params = [{transform_indices = @transform_0, window_bounds = array<i64: 32, 32>}, {pipeline_mode = #tpu.pipeline_mode<synchronous>, transform_indices = @transform_1, window_bounds = array<i64: 1, 32>}, {pipeline_mode = #tpu.pipeline_mode<synchronous>, transform_indices = @transform_2, window_bounds = array<i64: 1, 32>}]} {
    %c0_i32 = arith.constant 0 : i32
    %0 = arith.cmpi eq, %arg0, %c0_i32 : i32
    %1 = arith.extui %0 : i1 to i32
    %c0_i32_0 = arith.constant 0 : i32
    %2 = arith.cmpi ne, %1, %c0_i32_0 : i32
    scf.if %2 {
      %cst_11 = arith.constant 0.000000e+00 : f32
      %15 = vector.broadcast %cst_11 : f32 to vector<1x32xf32>
      %c0_12 = arith.constant 0 : index
      %c0_13 = arith.constant 0 : index
      %16 = vector.load %arg2[%c0_12, %c0_13] : memref<1x32xf32, #tpu.memory_space<vmem>>, vector<1x32xf32>
      tpu.vector_store %arg2[%c0_12, %c0_13], %15 {strides = array<i32>} : memref<1x32xf32, #tpu.memory_space<vmem>>, vector<1x32xf32>,
      %cst_14 = arith.constant 0.000000e+00 : f32
      %17 = vector.broadcast %cst_14 : f32 to vector<1x32xf32>
      %c0_15 = arith.constant 0 : index
      %c0_16 = arith.constant 0 : index
      %18 = vector.load %arg3[%c0_15, %c0_16] : memref<1x32xf32, #tpu.memory_space<vmem>>, vector<1x32xf32>
      tpu.vector_store %arg3[%c0_15, %c0_16], %17 {strides = array<i32>} : memref<1x32xf32, #tpu.memory_space<vmem>>, vector<1x32xf32>,
    } else {
    }
    %c0 = arith.constant 0 : index
    %c0_1 = arith.constant 0 : index
    %3 = vector.load %arg1[%c0, %c0_1] : memref<32x32xf32, #tpu.memory_space<vmem>>, vector<32x32xf32>
    %c0_2 = arith.constant 0 : index
    %c0_3 = arith.constant 0 : index
    %4 = vector.load %arg2[%c0_2, %c0_3] : memref<1x32xf32, #tpu.memory_space<vmem>>, vector<1x32xf32>
    %cst = arith.constant dense<0.000000e+00> : vector<32xf32>
    %5 = vector.multi_reduction <add>, %3, %cst [0] : vector<32x32xf32> to vector<32xf32>
    %6 = vector.shape_cast %5 : vector<32xf32> to vector<1x32xf32>
    %7 = arith.addf %4, %6 : vector<1x32xf32>
    %c0_4 = arith.constant 0 : index
    %c0_5 = arith.constant 0 : index
    %8 = vector.load %arg2[%c0_4, %c0_5] : memref<1x32xf32, #tpu.memory_space<vmem>>, vector<1x32xf32>
    tpu.vector_store %arg2[%c0_4, %c0_5], %7 {strides = array<i32>} : memref<1x32xf32, #tpu.memory_space<vmem>>, vector<1x32xf32>,
    %c0_6 = arith.constant 0 : index
    %c0_7 = arith.constant 0 : index
    %9 = vector.load %arg3[%c0_6, %c0_7] : memref<1x32xf32, #tpu.memory_space<vmem>>, vector<1x32xf32>
    %10 = arith.mulf %3, %3 : vector<32x32xf32>
    %cst_8 = arith.constant dense<0.000000e+00> : vector<32xf32>
    %11 = vector.multi_reduction <add>, %10, %cst_8 [0] : vector<32x32xf32> to vector<32xf32>
    %12 = vector.shape_cast %11 : vector<32xf32> to vector<1x32xf32>
    %13 = arith.addf %9, %12 : vector<1x32xf32>
    %c0_9 = arith.constant 0 : index
    %c0_10 = arith.constant 0 : index
    %14 = vector.load %arg3[%c0_9, %c0_10] : memref<1x32xf32, #tpu.memory_space<vmem>>, vector<1x32xf32>
    tpu.vector_store %arg3[%c0_9, %c0_10], %13 {strides = array<i32>} : memref<1x32xf32, #tpu.memory_space<vmem>>, vector<1x32xf32>,
    return
  }
  func.func @transform_0(%arg0: i32) -> (i32, i32) {
    %c0_i32 = arith.constant 0 : i32
    %c0_i32_0 = arith.constant 0 : i32
    return %arg0, %c0_i32 : i32, i32
  }
  func.func @transform_1(%arg0: i32) -> (i32, i32) {
    %c0_i32 = arith.constant 0 : i32
    %c0_i32_0 = arith.constant 0 : i32
    %c0_i32_1 = arith.constant 0 : i32
    return %c0_i32, %c0_i32_0 : i32, i32
  }
  func.func @transform_2(%arg0: i32) -> (i32, i32) {
    %c0_i32 = arith.constant 0 : i32
    %c0_i32_0 = arith.constant 0 : i32
    %c0_i32_1 = arith.constant 0 : i32
    return %c0_i32, %c0_i32_0 : i32, i32
  }
}

module attributes {stable_mosaic.version = 11 : i64} {
  func.func @_bn_apply_kernel(%arg0: i32, %arg1: memref<8x64xf32, #tpu.memory_space<vmem>>, %arg2: memref<1x64xf32, #tpu.memory_space<vmem>>, %arg3: memref<1x64xf32, #tpu.memory_space<vmem>>, %arg4: memref<8x64xf32, #tpu.memory_space<vmem>>) attributes {dimension_semantics = [#tpu.dimension_semantics<parallel>], iteration_bounds = array<i64: 1>, scalar_prefetch = 0 : i64, scratch_operands = 0 : i64, tpu.core_type = #tpu.core_type<tc>, window_params = [{transform_indices = @transform_0, window_bounds = array<i64: 8, 64>}, {pipeline_mode = #tpu.pipeline_mode<synchronous>, transform_indices = @transform_1, window_bounds = array<i64: 1, 64>}, {pipeline_mode = #tpu.pipeline_mode<synchronous>, transform_indices = @transform_2, window_bounds = array<i64: 1, 64>}, {transform_indices = @transform_3, window_bounds = array<i64: 8, 64>}]} {
    %c0 = arith.constant 0 : index
    %c0_0 = arith.constant 0 : index
    %0 = vector.load %arg1[%c0, %c0_0] : memref<8x64xf32, #tpu.memory_space<vmem>>, vector<8x64xf32>
    %c0_1 = arith.constant 0 : index
    %c0_2 = arith.constant 0 : index
    %1 = vector.load %arg2[%c0_1, %c0_2] : memref<1x64xf32, #tpu.memory_space<vmem>>, vector<1x64xf32>
    %2 = vector.broadcast %1 : vector<1x64xf32> to vector<8x64xf32>
    %3 = arith.mulf %0, %2 : vector<8x64xf32>
    %c0_3 = arith.constant 0 : index
    %c0_4 = arith.constant 0 : index
    %4 = vector.load %arg3[%c0_3, %c0_4] : memref<1x64xf32, #tpu.memory_space<vmem>>, vector<1x64xf32>
    %5 = vector.broadcast %4 : vector<1x64xf32> to vector<8x64xf32>
    %6 = arith.addf %3, %5 : vector<8x64xf32>
    %c0_5 = arith.constant 0 : index
    %c0_6 = arith.constant 0 : index
    %7 = vector.load %arg4[%c0_5, %c0_6] : memref<8x64xf32, #tpu.memory_space<vmem>>, vector<8x64xf32>
    tpu.vector_store %arg4[%c0_5, %c0_6], %6 {strides = array<i32>} : memref<8x64xf32, #tpu.memory_space<vmem>>, vector<8x64xf32>,
    return
  }
  func.func @transform_0(%arg0: i32) -> (i32, i32) {
    %c0_i32 = arith.constant 0 : i32
    %c0_i32_0 = arith.constant 0 : i32
    return %arg0, %c0_i32 : i32, i32
  }
  func.func @transform_1(%arg0: i32) -> (i32, i32) {
    %c0_i32 = arith.constant 0 : i32
    %c0_i32_0 = arith.constant 0 : i32
    %c0_i32_1 = arith.constant 0 : i32
    return %c0_i32, %c0_i32_0 : i32, i32
  }
  func.func @transform_2(%arg0: i32) -> (i32, i32) {
    %c0_i32 = arith.constant 0 : i32
    %c0_i32_0 = arith.constant 0 : i32
    %c0_i32_1 = arith.constant 0 : i32
    return %c0_i32, %c0_i32_0 : i32, i32
  }
  func.func @transform_3(%arg0: i32) -> (i32, i32) {
    %c0_i32 = arith.constant 0 : i32
    %c0_i32_0 = arith.constant 0 : i32
    return %arg0, %c0_i32 : i32, i32
  }
}

module attributes {stable_mosaic.version = 11 : i64} {
  func.func @_mm_kernel(%arg0: i32, %arg1: i32, %arg2: i32, %arg3: memref<8x512xbf16, #tpu.memory_space<vmem>>, %arg4: memref<512x128xbf16, #tpu.memory_space<vmem>>, %arg5: memref<1x128xf32, #tpu.memory_space<vmem>>, %arg6: memref<8x128xf32, #tpu.memory_space<vmem>>, %arg7: memref<8x128xf32, #tpu.memory_space<vmem>>) attributes {dimension_semantics = [#tpu.dimension_semantics<parallel>, #tpu.dimension_semantics<parallel>, #tpu.dimension_semantics<arbitrary>], iteration_bounds = array<i64: 1, 1, 1>, scalar_prefetch = 0 : i64, scratch_operands = 1 : i64, tpu.core_type = #tpu.core_type<tc>, window_params = [{transform_indices = @transform_0, window_bounds = array<i64: 8, 512>}, {transform_indices = @transform_1, window_bounds = array<i64: 512, 128>}, {transform_indices = @transform_2, window_bounds = array<i64: 1, 128>}, {transform_indices = @transform_3, window_bounds = array<i64: 8, 128>}]} {
    %c0_i32 = arith.constant 0 : i32
    %0 = arith.cmpi eq, %arg2, %c0_i32 : i32
    %1 = arith.extui %0 : i1 to i32
    %c0_i32_0 = arith.constant 0 : i32
    %2 = arith.cmpi ne, %1, %c0_i32_0 : i32
    scf.if %2 {
      %cst_12 = arith.constant 0.000000e+00 : f32
      %19 = vector.broadcast %cst_12 : f32 to vector<8x128xf32>
      %c0_13 = arith.constant 0 : index
      %c0_14 = arith.constant 0 : index
      %20 = vector.load %arg7[%c0_13, %c0_14] : memref<8x128xf32, #tpu.memory_space<vmem>>, vector<8x128xf32>
      tpu.vector_store %arg7[%c0_13, %c0_14], %19 {strides = array<i32>} : memref<8x128xf32, #tpu.memory_space<vmem>>, vector<8x128xf32>,
    } else {
    }
    %c0 = arith.constant 0 : index
    %c0_1 = arith.constant 0 : index
    %3 = vector.load %arg3[%c0, %c0_1] : memref<8x512xbf16, #tpu.memory_space<vmem>>, vector<8x512xbf16>
    %4 = arith.extf %3 : vector<8x512xbf16> to vector<8x512xf32>
    %cst = arith.constant 0.000000e+00 : f32
    %5 = vector.broadcast %cst : f32 to vector<8x512xf32>
    %6 = arith.cmpf oge, %4, %5 : vector<8x512xf32>
    %cst_2 = arith.constant 2.000000e-01 : f32
    %7 = vector.broadcast %cst_2 : f32 to vector<8x512xf32>
    %8 = arith.mulf %7, %4 : vector<8x512xf32>
    %9 = arith.select %6, %4, %8 : vector<8x512xi1>, vector<8x512xf32>
    %10 = arith.truncf %9 : vector<8x512xf32> to vector<8x512xbf16>
    %c0_3 = arith.constant 0 : index
    %c0_4 = arith.constant 0 : index
    %11 = vector.load %arg7[%c0_3, %c0_4] : memref<8x128xf32, #tpu.memory_space<vmem>>, vector<8x128xf32>
    %c0_5 = arith.constant 0 : index
    %c0_6 = arith.constant 0 : index
    %12 = vector.load %arg4[%c0_5, %c0_6] : memref<512x128xbf16, #tpu.memory_space<vmem>>, vector<512x128xbf16>
    %cst_7 = arith.constant dense<0.000000e+00> : vector<8x128xf32>
    %13 = tpu.matmul %10, %12, %cst_7 {dimension_numbers = #tpu.dot_dimension_numbers<[1], [0], [0], [1], [0, 0, 1, 1], [], []>} : vector<8x512xbf16>, vector<512x128xbf16>, vector<8x128xf32> -> vector<8x128xf32>
    %14 = arith.addf %11, %13 : vector<8x128xf32>
    %c0_8 = arith.constant 0 : index
    %c0_9 = arith.constant 0 : index
    %15 = vector.load %arg7[%c0_8, %c0_9] : memref<8x128xf32, #tpu.memory_space<vmem>>, vector<8x128xf32>
    tpu.vector_store %arg7[%c0_8, %c0_9], %14 {strides = array<i32>} : memref<8x128xf32, #tpu.memory_space<vmem>>, vector<8x128xf32>,
    %c0_i32_10 = arith.constant 0 : i32
    %16 = arith.cmpi eq, %arg2, %c0_i32_10 : i32
    %17 = arith.extui %16 : i1 to i32
    %c0_i32_11 = arith.constant 0 : i32
    %18 = arith.cmpi ne, %17, %c0_i32_11 : i32
    scf.if %18 {
      %c0_12 = arith.constant 0 : index
      %c0_13 = arith.constant 0 : index
      %19 = vector.load %arg7[%c0_12, %c0_13] : memref<8x128xf32, #tpu.memory_space<vmem>>, vector<8x128xf32>
      %c0_14 = arith.constant 0 : index
      %c0_15 = arith.constant 0 : index
      %20 = vector.load %arg5[%c0_14, %c0_15] : memref<1x128xf32, #tpu.memory_space<vmem>>, vector<1x128xf32>
      %21 = vector.broadcast %20 : vector<1x128xf32> to vector<8x128xf32>
      %22 = arith.addf %19, %21 : vector<8x128xf32>
      %c0_16 = arith.constant 0 : index
      %c0_17 = arith.constant 0 : index
      %23 = vector.load %arg6[%c0_16, %c0_17] : memref<8x128xf32, #tpu.memory_space<vmem>>, vector<8x128xf32>
      tpu.vector_store %arg6[%c0_16, %c0_17], %22 {strides = array<i32>} : memref<8x128xf32, #tpu.memory_space<vmem>>, vector<8x128xf32>,
    } else {
    }
    return
  }
  func.func @transform_0(%arg0: i32, %arg1: i32, %arg2: i32) -> (i32, i32) {
    %c0_i32 = arith.constant 0 : i32
    return %arg0, %arg2 : i32, i32
  }
  func.func @transform_1(%arg0: i32, %arg1: i32, %arg2: i32) -> (i32, i32) {
    %c0_i32 = arith.constant 0 : i32
    return %arg2, %arg1 : i32, i32
  }
  func.func @transform_2(%arg0: i32, %arg1: i32, %arg2: i32) -> (i32, i32) {
    %c0_i32 = arith.constant 0 : i32
    %c0_i32_0 = arith.constant 0 : i32
    return %c0_i32, %arg1 : i32, i32
  }
  func.func @transform_3(%arg0: i32, %arg1: i32, %arg2: i32) -> (i32, i32) {
    %c0_i32 = arith.constant 0 : i32
    return %arg0, %arg1 : i32, i32
  }
}

module attributes {stable_mosaic.version = 11 : i64} {
  func.func @_bn_stats_kernel(%arg0: i32, %arg1: memref<8x64xf32, #tpu.memory_space<vmem>>, %arg2: memref<1x64xf32, #tpu.memory_space<vmem>>, %arg3: memref<1x64xf32, #tpu.memory_space<vmem>>) attributes {dimension_semantics = [#tpu.dimension_semantics<arbitrary>], iteration_bounds = array<i64: 1>, scalar_prefetch = 0 : i64, scratch_operands = 0 : i64, tpu.core_type = #tpu.core_type<tc>, window_params = [{transform_indices = @transform_0, window_bounds = array<i64: 8, 64>}, {pipeline_mode = #tpu.pipeline_mode<synchronous>, transform_indices = @transform_1, window_bounds = array<i64: 1, 64>}, {pipeline_mode = #tpu.pipeline_mode<synchronous>, transform_indices = @transform_2, window_bounds = array<i64: 1, 64>}]} {
    %c0_i32 = arith.constant 0 : i32
    %0 = arith.cmpi eq, %arg0, %c0_i32 : i32
    %1 = arith.extui %0 : i1 to i32
    %c0_i32_0 = arith.constant 0 : i32
    %2 = arith.cmpi ne, %1, %c0_i32_0 : i32
    scf.if %2 {
      %cst_11 = arith.constant 0.000000e+00 : f32
      %15 = vector.broadcast %cst_11 : f32 to vector<1x64xf32>
      %c0_12 = arith.constant 0 : index
      %c0_13 = arith.constant 0 : index
      %16 = vector.load %arg2[%c0_12, %c0_13] : memref<1x64xf32, #tpu.memory_space<vmem>>, vector<1x64xf32>
      tpu.vector_store %arg2[%c0_12, %c0_13], %15 {strides = array<i32>} : memref<1x64xf32, #tpu.memory_space<vmem>>, vector<1x64xf32>,
      %cst_14 = arith.constant 0.000000e+00 : f32
      %17 = vector.broadcast %cst_14 : f32 to vector<1x64xf32>
      %c0_15 = arith.constant 0 : index
      %c0_16 = arith.constant 0 : index
      %18 = vector.load %arg3[%c0_15, %c0_16] : memref<1x64xf32, #tpu.memory_space<vmem>>, vector<1x64xf32>
      tpu.vector_store %arg3[%c0_15, %c0_16], %17 {strides = array<i32>} : memref<1x64xf32, #tpu.memory_space<vmem>>, vector<1x64xf32>,
    } else {
    }
    %c0 = arith.constant 0 : index
    %c0_1 = arith.constant 0 : index
    %3 = vector.load %arg1[%c0, %c0_1] : memref<8x64xf32, #tpu.memory_space<vmem>>, vector<8x64xf32>
    %c0_2 = arith.constant 0 : index
    %c0_3 = arith.constant 0 : index
    %4 = vector.load %arg2[%c0_2, %c0_3] : memref<1x64xf32, #tpu.memory_space<vmem>>, vector<1x64xf32>
    %cst = arith.constant dense<0.000000e+00> : vector<64xf32>
    %5 = vector.multi_reduction <add>, %3, %cst [0] : vector<8x64xf32> to vector<64xf32>
    %6 = vector.shape_cast %5 : vector<64xf32> to vector<1x64xf32>
    %7 = arith.addf %4, %6 : vector<1x64xf32>
    %c0_4 = arith.constant 0 : index
    %c0_5 = arith.constant 0 : index
    %8 = vector.load %arg2[%c0_4, %c0_5] : memref<1x64xf32, #tpu.memory_space<vmem>>, vector<1x64xf32>
    tpu.vector_store %arg2[%c0_4, %c0_5], %7 {strides = array<i32>} : memref<1x64xf32, #tpu.memory_space<vmem>>, vector<1x64xf32>,
    %c0_6 = arith.constant 0 : index
    %c0_7 = arith.constant 0 : index
    %9 = vector.load %arg3[%c0_6, %c0_7] : memref<1x64xf32, #tpu.memory_space<vmem>>, vector<1x64xf32>
    %10 = arith.mulf %3, %3 : vector<8x64xf32>
    %cst_8 = arith.constant dense<0.000000e+00> : vector<64xf32>
    %11 = vector.multi_reduction <add>, %10, %cst_8 [0] : vector<8x64xf32> to vector<64xf32>
    %12 = vector.shape_cast %11 : vector<64xf32> to vector<1x64xf32>
    %13 = arith.addf %9, %12 : vector<1x64xf32>
    %c0_9 = arith.constant 0 : index
    %c0_10 = arith.constant 0 : index
    %14 = vector.load %arg3[%c0_9, %c0_10] : memref<1x64xf32, #tpu.memory_space<vmem>>, vector<1x64xf32>
    tpu.vector_store %arg3[%c0_9, %c0_10], %13 {strides = array<i32>} : memref<1x64xf32, #tpu.memory_space<vmem>>, vector<1x64xf32>,
    return
  }
  func.func @transform_0(%arg0: i32) -> (i32, i32) {
    %c0_i32 = arith.constant 0 : i32
    %c0_i32_0 = arith.constant 0 : i32
    return %arg0, %c0_i32 : i32, i32
  }
  func.func @transform_1(%arg0: i32) -> (i32, i32) {
    %c0_i32 = arith.constant 0 : i32
    %c0_i32_0 = arith.constant 0 : i32
    %c0_i32_1 = arith.constant 0 : i32
    return %c0_i32, %c0_i32_0 : i32, i32
  }
  func.func @transform_2(%arg0: i32) -> (i32, i32) {
    %c0_i32 = arith.constant 0 : i32
    %c0_i32_0 = arith.constant 0 : i32
    %c0_i32_1 = arith.constant 0 : i32
    return %c0_i32, %c0_i32_0 : i32, i32
  }
}

module attributes {stable_mosaic.version = 11 : i64} {
  func.func @_mm_kernel(%arg0: i32, %arg1: i32, %arg2: i32, %arg3: memref<8x1024xbf16, #tpu.memory_space<vmem>>, %arg4: memref<1024x128xbf16, #tpu.memory_space<vmem>>, %arg5: memref<1x128xf32, #tpu.memory_space<vmem>>, %arg6: memref<8x128xf32, #tpu.memory_space<vmem>>, %arg7: memref<8x128xf32, #tpu.memory_space<vmem>>) attributes {dimension_semantics = [#tpu.dimension_semantics<parallel>, #tpu.dimension_semantics<parallel>, #tpu.dimension_semantics<arbitrary>], iteration_bounds = array<i64: 1, 1, 1>, scalar_prefetch = 0 : i64, scratch_operands = 1 : i64, tpu.core_type = #tpu.core_type<tc>, window_params = [{transform_indices = @transform_0, window_bounds = array<i64: 8, 1024>}, {transform_indices = @transform_1, window_bounds = array<i64: 1024, 128>}, {transform_indices = @transform_2, window_bounds = array<i64: 1, 128>}, {transform_indices = @transform_3, window_bounds = array<i64: 8, 128>}]} {
    %c0_i32 = arith.constant 0 : i32
    %0 = arith.cmpi eq, %arg2, %c0_i32 : i32
    %1 = arith.extui %0 : i1 to i32
    %c0_i32_0 = arith.constant 0 : i32
    %2 = arith.cmpi ne, %1, %c0_i32_0 : i32
    scf.if %2 {
      %cst_12 = arith.constant 0.000000e+00 : f32
      %19 = vector.broadcast %cst_12 : f32 to vector<8x128xf32>
      %c0_13 = arith.constant 0 : index
      %c0_14 = arith.constant 0 : index
      %20 = vector.load %arg7[%c0_13, %c0_14] : memref<8x128xf32, #tpu.memory_space<vmem>>, vector<8x128xf32>
      tpu.vector_store %arg7[%c0_13, %c0_14], %19 {strides = array<i32>} : memref<8x128xf32, #tpu.memory_space<vmem>>, vector<8x128xf32>,
    } else {
    }
    %c0 = arith.constant 0 : index
    %c0_1 = arith.constant 0 : index
    %3 = vector.load %arg3[%c0, %c0_1] : memref<8x1024xbf16, #tpu.memory_space<vmem>>, vector<8x1024xbf16>
    %4 = arith.extf %3 : vector<8x1024xbf16> to vector<8x1024xf32>
    %cst = arith.constant 0.000000e+00 : f32
    %5 = vector.broadcast %cst : f32 to vector<8x1024xf32>
    %6 = arith.cmpf oge, %4, %5 : vector<8x1024xf32>
    %cst_2 = arith.constant 2.000000e-01 : f32
    %7 = vector.broadcast %cst_2 : f32 to vector<8x1024xf32>
    %8 = arith.mulf %7, %4 : vector<8x1024xf32>
    %9 = arith.select %6, %4, %8 : vector<8x1024xi1>, vector<8x1024xf32>
    %10 = arith.truncf %9 : vector<8x1024xf32> to vector<8x1024xbf16>
    %c0_3 = arith.constant 0 : index
    %c0_4 = arith.constant 0 : index
    %11 = vector.load %arg7[%c0_3, %c0_4] : memref<8x128xf32, #tpu.memory_space<vmem>>, vector<8x128xf32>
    %c0_5 = arith.constant 0 : index
    %c0_6 = arith.constant 0 : index
    %12 = vector.load %arg4[%c0_5, %c0_6] : memref<1024x128xbf16, #tpu.memory_space<vmem>>, vector<1024x128xbf16>
    %cst_7 = arith.constant dense<0.000000e+00> : vector<8x128xf32>
    %13 = tpu.matmul %10, %12, %cst_7 {dimension_numbers = #tpu.dot_dimension_numbers<[1], [0], [0], [1], [0, 0, 1, 1], [], []>} : vector<8x1024xbf16>, vector<1024x128xbf16>, vector<8x128xf32> -> vector<8x128xf32>
    %14 = arith.addf %11, %13 : vector<8x128xf32>
    %c0_8 = arith.constant 0 : index
    %c0_9 = arith.constant 0 : index
    %15 = vector.load %arg7[%c0_8, %c0_9] : memref<8x128xf32, #tpu.memory_space<vmem>>, vector<8x128xf32>
    tpu.vector_store %arg7[%c0_8, %c0_9], %14 {strides = array<i32>} : memref<8x128xf32, #tpu.memory_space<vmem>>, vector<8x128xf32>,
    %c0_i32_10 = arith.constant 0 : i32
    %16 = arith.cmpi eq, %arg2, %c0_i32_10 : i32
    %17 = arith.extui %16 : i1 to i32
    %c0_i32_11 = arith.constant 0 : i32
    %18 = arith.cmpi ne, %17, %c0_i32_11 : i32
    scf.if %18 {
      %c0_12 = arith.constant 0 : index
      %c0_13 = arith.constant 0 : index
      %19 = vector.load %arg7[%c0_12, %c0_13] : memref<8x128xf32, #tpu.memory_space<vmem>>, vector<8x128xf32>
      %c0_14 = arith.constant 0 : index
      %c0_15 = arith.constant 0 : index
      %20 = vector.load %arg5[%c0_14, %c0_15] : memref<1x128xf32, #tpu.memory_space<vmem>>, vector<1x128xf32>
      %21 = vector.broadcast %20 : vector<1x128xf32> to vector<8x128xf32>
      %22 = arith.addf %19, %21 : vector<8x128xf32>
      %c0_16 = arith.constant 0 : index
      %c0_17 = arith.constant 0 : index
      %23 = vector.load %arg6[%c0_16, %c0_17] : memref<8x128xf32, #tpu.memory_space<vmem>>, vector<8x128xf32>
      tpu.vector_store %arg6[%c0_16, %c0_17], %22 {strides = array<i32>} : memref<8x128xf32, #tpu.memory_space<vmem>>, vector<8x128xf32>,
    } else {
    }
    return
  }
  func.func @transform_0(%arg0: i32, %arg1: i32, %arg2: i32) -> (i32, i32) {
    %c0_i32 = arith.constant 0 : i32
    return %arg0, %arg2 : i32, i32
  }
  func.func @transform_1(%arg0: i32, %arg1: i32, %arg2: i32) -> (i32, i32) {
    %c0_i32 = arith.constant 0 : i32
    return %arg2, %arg1 : i32, i32
  }
  func.func @transform_2(%arg0: i32, %arg1: i32, %arg2: i32) -> (i32, i32) {
    %c0_i32 = arith.constant 0 : i32
    %c0_i32_0 = arith.constant 0 : i32
    return %c0_i32, %arg1 : i32, i32
  }
  func.func @transform_3(%arg0: i32, %arg1: i32, %arg2: i32) -> (i32, i32) {
    %c0_i32 = arith.constant 0 : i32
    return %arg0, %arg1 : i32, i32
  }
}

module attributes {stable_mosaic.version = 11 : i64} {
  func.func @_mm_kernel(%arg0: i32, %arg1: i32, %arg2: i32, %arg3: memref<8x576xbf16, #tpu.memory_space<vmem>>, %arg4: memref<576x256xbf16, #tpu.memory_space<vmem>>, %arg5: memref<1x256xf32, #tpu.memory_space<vmem>>, %arg6: memref<8x256xf32, #tpu.memory_space<vmem>>, %arg7: memref<8x256xf32, #tpu.memory_space<vmem>>) attributes {dimension_semantics = [#tpu.dimension_semantics<parallel>, #tpu.dimension_semantics<parallel>, #tpu.dimension_semantics<arbitrary>], iteration_bounds = array<i64: 1, 1, 1>, scalar_prefetch = 0 : i64, scratch_operands = 1 : i64, tpu.core_type = #tpu.core_type<tc>, window_params = [{transform_indices = @transform_0, window_bounds = array<i64: 8, 576>}, {transform_indices = @transform_1, window_bounds = array<i64: 576, 256>}, {transform_indices = @transform_2, window_bounds = array<i64: 1, 256>}, {transform_indices = @transform_3, window_bounds = array<i64: 8, 256>}]} {
    %c0_i32 = arith.constant 0 : i32
    %0 = arith.cmpi eq, %arg2, %c0_i32 : i32
    %1 = arith.extui %0 : i1 to i32
    %c0_i32_0 = arith.constant 0 : i32
    %2 = arith.cmpi ne, %1, %c0_i32_0 : i32
    scf.if %2 {
      %cst_11 = arith.constant 0.000000e+00 : f32
      %16 = vector.broadcast %cst_11 : f32 to vector<8x256xf32>
      %c0_12 = arith.constant 0 : index
      %c0_13 = arith.constant 0 : index
      %17 = vector.load %arg7[%c0_12, %c0_13] : memref<8x256xf32, #tpu.memory_space<vmem>>, vector<8x256xf32>
      tpu.vector_store %arg7[%c0_12, %c0_13], %16 {strides = array<i32>} : memref<8x256xf32, #tpu.memory_space<vmem>>, vector<8x256xf32>,
    } else {
    }
    %c0 = arith.constant 0 : index
    %c0_1 = arith.constant 0 : index
    %3 = vector.load %arg3[%c0, %c0_1] : memref<8x576xbf16, #tpu.memory_space<vmem>>, vector<8x576xbf16>
    %4 = arith.extf %3 : vector<8x576xbf16> to vector<8x576xf32>
    %cst = arith.constant 0.000000e+00 : f32
    %5 = vector.broadcast %cst : f32 to vector<8x576xf32>
    %6 = arith.maximumf %4, %5 : vector<8x576xf32>
    %7 = arith.truncf %6 : vector<8x576xf32> to vector<8x576xbf16>
    %c0_2 = arith.constant 0 : index
    %c0_3 = arith.constant 0 : index
    %8 = vector.load %arg7[%c0_2, %c0_3] : memref<8x256xf32, #tpu.memory_space<vmem>>, vector<8x256xf32>
    %c0_4 = arith.constant 0 : index
    %c0_5 = arith.constant 0 : index
    %9 = vector.load %arg4[%c0_4, %c0_5] : memref<576x256xbf16, #tpu.memory_space<vmem>>, vector<576x256xbf16>
    %cst_6 = arith.constant dense<0.000000e+00> : vector<8x256xf32>
    %10 = tpu.matmul %7, %9, %cst_6 {dimension_numbers = #tpu.dot_dimension_numbers<[1], [0], [0], [1], [0, 0, 1, 1], [], []>} : vector<8x576xbf16>, vector<576x256xbf16>, vector<8x256xf32> -> vector<8x256xf32>
    %11 = arith.addf %8, %10 : vector<8x256xf32>
    %c0_7 = arith.constant 0 : index
    %c0_8 = arith.constant 0 : index
    %12 = vector.load %arg7[%c0_7, %c0_8] : memref<8x256xf32, #tpu.memory_space<vmem>>, vector<8x256xf32>
    tpu.vector_store %arg7[%c0_7, %c0_8], %11 {strides = array<i32>} : memref<8x256xf32, #tpu.memory_space<vmem>>, vector<8x256xf32>,
    %c0_i32_9 = arith.constant 0 : i32
    %13 = arith.cmpi eq, %arg2, %c0_i32_9 : i32
    %14 = arith.extui %13 : i1 to i32
    %c0_i32_10 = arith.constant 0 : i32
    %15 = arith.cmpi ne, %14, %c0_i32_10 : i32
    scf.if %15 {
      %c0_11 = arith.constant 0 : index
      %c0_12 = arith.constant 0 : index
      %16 = vector.load %arg7[%c0_11, %c0_12] : memref<8x256xf32, #tpu.memory_space<vmem>>, vector<8x256xf32>
      %c0_13 = arith.constant 0 : index
      %c0_14 = arith.constant 0 : index
      %17 = vector.load %arg5[%c0_13, %c0_14] : memref<1x256xf32, #tpu.memory_space<vmem>>, vector<1x256xf32>
      %18 = vector.broadcast %17 : vector<1x256xf32> to vector<8x256xf32>
      %19 = arith.addf %16, %18 : vector<8x256xf32>
      %c0_15 = arith.constant 0 : index
      %c0_16 = arith.constant 0 : index
      %20 = vector.load %arg6[%c0_15, %c0_16] : memref<8x256xf32, #tpu.memory_space<vmem>>, vector<8x256xf32>
      tpu.vector_store %arg6[%c0_15, %c0_16], %19 {strides = array<i32>} : memref<8x256xf32, #tpu.memory_space<vmem>>, vector<8x256xf32>,
    } else {
    }
    return
  }
  func.func @transform_0(%arg0: i32, %arg1: i32, %arg2: i32) -> (i32, i32) {
    %c0_i32 = arith.constant 0 : i32
    return %arg0, %arg2 : i32, i32
  }
  func.func @transform_1(%arg0: i32, %arg1: i32, %arg2: i32) -> (i32, i32) {
    %c0_i32 = arith.constant 0 : i32
    return %arg2, %arg1 : i32, i32
  }
  func.func @transform_2(%arg0: i32, %arg1: i32, %arg2: i32) -> (i32, i32) {
    %c0_i32 = arith.constant 0 : i32
    %c0_i32_0 = arith.constant 0 : i32
    return %c0_i32, %arg1 : i32, i32
  }
  func.func @transform_3(%arg0: i32, %arg1: i32, %arg2: i32) -> (i32, i32) {
    %c0_i32 = arith.constant 0 : i32
    return %arg0, %arg1 : i32, i32
  }
}

module attributes {stable_mosaic.version = 11 : i64} {
  func.func @_mm_kernel(%arg0: i32, %arg1: i32, %arg2: i32, %arg3: memref<8x1152xbf16, #tpu.memory_space<vmem>>, %arg4: memref<1152x128xbf16, #tpu.memory_space<vmem>>, %arg5: memref<1x128xf32, #tpu.memory_space<vmem>>, %arg6: memref<8x128xf32, #tpu.memory_space<vmem>>, %arg7: memref<8x128xf32, #tpu.memory_space<vmem>>) attributes {dimension_semantics = [#tpu.dimension_semantics<parallel>, #tpu.dimension_semantics<parallel>, #tpu.dimension_semantics<arbitrary>], iteration_bounds = array<i64: 1, 1, 1>, scalar_prefetch = 0 : i64, scratch_operands = 1 : i64, tpu.core_type = #tpu.core_type<tc>, window_params = [{transform_indices = @transform_0, window_bounds = array<i64: 8, 1152>}, {transform_indices = @transform_1, window_bounds = array<i64: 1152, 128>}, {transform_indices = @transform_2, window_bounds = array<i64: 1, 128>}, {transform_indices = @transform_3, window_bounds = array<i64: 8, 128>}]} {
    %c0_i32 = arith.constant 0 : i32
    %0 = arith.cmpi eq, %arg2, %c0_i32 : i32
    %1 = arith.extui %0 : i1 to i32
    %c0_i32_0 = arith.constant 0 : i32
    %2 = arith.cmpi ne, %1, %c0_i32_0 : i32
    scf.if %2 {
      %cst_11 = arith.constant 0.000000e+00 : f32
      %16 = vector.broadcast %cst_11 : f32 to vector<8x128xf32>
      %c0_12 = arith.constant 0 : index
      %c0_13 = arith.constant 0 : index
      %17 = vector.load %arg7[%c0_12, %c0_13] : memref<8x128xf32, #tpu.memory_space<vmem>>, vector<8x128xf32>
      tpu.vector_store %arg7[%c0_12, %c0_13], %16 {strides = array<i32>} : memref<8x128xf32, #tpu.memory_space<vmem>>, vector<8x128xf32>,
    } else {
    }
    %c0 = arith.constant 0 : index
    %c0_1 = arith.constant 0 : index
    %3 = vector.load %arg3[%c0, %c0_1] : memref<8x1152xbf16, #tpu.memory_space<vmem>>, vector<8x1152xbf16>
    %4 = arith.extf %3 : vector<8x1152xbf16> to vector<8x1152xf32>
    %cst = arith.constant 0.000000e+00 : f32
    %5 = vector.broadcast %cst : f32 to vector<8x1152xf32>
    %6 = arith.maximumf %4, %5 : vector<8x1152xf32>
    %7 = arith.truncf %6 : vector<8x1152xf32> to vector<8x1152xbf16>
    %c0_2 = arith.constant 0 : index
    %c0_3 = arith.constant 0 : index
    %8 = vector.load %arg7[%c0_2, %c0_3] : memref<8x128xf32, #tpu.memory_space<vmem>>, vector<8x128xf32>
    %c0_4 = arith.constant 0 : index
    %c0_5 = arith.constant 0 : index
    %9 = vector.load %arg4[%c0_4, %c0_5] : memref<1152x128xbf16, #tpu.memory_space<vmem>>, vector<1152x128xbf16>
    %cst_6 = arith.constant dense<0.000000e+00> : vector<8x128xf32>
    %10 = tpu.matmul %7, %9, %cst_6 {dimension_numbers = #tpu.dot_dimension_numbers<[1], [0], [0], [1], [0, 0, 1, 1], [], []>} : vector<8x1152xbf16>, vector<1152x128xbf16>, vector<8x128xf32> -> vector<8x128xf32>
    %11 = arith.addf %8, %10 : vector<8x128xf32>
    %c0_7 = arith.constant 0 : index
    %c0_8 = arith.constant 0 : index
    %12 = vector.load %arg7[%c0_7, %c0_8] : memref<8x128xf32, #tpu.memory_space<vmem>>, vector<8x128xf32>
    tpu.vector_store %arg7[%c0_7, %c0_8], %11 {strides = array<i32>} : memref<8x128xf32, #tpu.memory_space<vmem>>, vector<8x128xf32>,
    %c0_i32_9 = arith.constant 0 : i32
    %13 = arith.cmpi eq, %arg2, %c0_i32_9 : i32
    %14 = arith.extui %13 : i1 to i32
    %c0_i32_10 = arith.constant 0 : i32
    %15 = arith.cmpi ne, %14, %c0_i32_10 : i32
    scf.if %15 {
      %c0_11 = arith.constant 0 : index
      %c0_12 = arith.constant 0 : index
      %16 = vector.load %arg7[%c0_11, %c0_12] : memref<8x128xf32, #tpu.memory_space<vmem>>, vector<8x128xf32>
      %c0_13 = arith.constant 0 : index
      %c0_14 = arith.constant 0 : index
      %17 = vector.load %arg5[%c0_13, %c0_14] : memref<1x128xf32, #tpu.memory_space<vmem>>, vector<1x128xf32>
      %18 = vector.broadcast %17 : vector<1x128xf32> to vector<8x128xf32>
      %19 = arith.addf %16, %18 : vector<8x128xf32>
      %c0_15 = arith.constant 0 : index
      %c0_16 = arith.constant 0 : index
      %20 = vector.load %arg6[%c0_15, %c0_16] : memref<8x128xf32, #tpu.memory_space<vmem>>, vector<8x128xf32>
      tpu.vector_store %arg6[%c0_15, %c0_16], %19 {strides = array<i32>} : memref<8x128xf32, #tpu.memory_space<vmem>>, vector<8x128xf32>,
    } else {
    }
    return
  }
  func.func @transform_0(%arg0: i32, %arg1: i32, %arg2: i32) -> (i32, i32) {
    %c0_i32 = arith.constant 0 : i32
    return %arg0, %arg2 : i32, i32
  }
  func.func @transform_1(%arg0: i32, %arg1: i32, %arg2: i32) -> (i32, i32) {
    %c0_i32 = arith.constant 0 : i32
    return %arg2, %arg1 : i32, i32
  }
  func.func @transform_2(%arg0: i32, %arg1: i32, %arg2: i32) -> (i32, i32) {
    %c0_i32 = arith.constant 0 : i32
    %c0_i32_0 = arith.constant 0 : i32
    return %c0_i32, %arg1 : i32, i32
  }
  func.func @transform_3(%arg0: i32, %arg1: i32, %arg2: i32) -> (i32, i32) {
    %c0_i32 = arith.constant 0 : i32
    return %arg0, %arg1 : i32, i32
  }
}

module attributes {stable_mosaic.version = 11 : i64} {
  func.func @_mm_kernel(%arg0: i32, %arg1: i32, %arg2: i32, %arg3: memref<32x576xbf16, #tpu.memory_space<vmem>>, %arg4: memref<576x128xbf16, #tpu.memory_space<vmem>>, %arg5: memref<1x128xf32, #tpu.memory_space<vmem>>, %arg6: memref<32x128xf32, #tpu.memory_space<vmem>>, %arg7: memref<32x128xf32, #tpu.memory_space<vmem>>) attributes {dimension_semantics = [#tpu.dimension_semantics<parallel>, #tpu.dimension_semantics<parallel>, #tpu.dimension_semantics<arbitrary>], iteration_bounds = array<i64: 1, 1, 1>, scalar_prefetch = 0 : i64, scratch_operands = 1 : i64, tpu.core_type = #tpu.core_type<tc>, window_params = [{transform_indices = @transform_0, window_bounds = array<i64: 32, 576>}, {transform_indices = @transform_1, window_bounds = array<i64: 576, 128>}, {transform_indices = @transform_2, window_bounds = array<i64: 1, 128>}, {transform_indices = @transform_3, window_bounds = array<i64: 32, 128>}]} {
    %c0_i32 = arith.constant 0 : i32
    %0 = arith.cmpi eq, %arg2, %c0_i32 : i32
    %1 = arith.extui %0 : i1 to i32
    %c0_i32_0 = arith.constant 0 : i32
    %2 = arith.cmpi ne, %1, %c0_i32_0 : i32
    scf.if %2 {
      %cst_11 = arith.constant 0.000000e+00 : f32
      %16 = vector.broadcast %cst_11 : f32 to vector<32x128xf32>
      %c0_12 = arith.constant 0 : index
      %c0_13 = arith.constant 0 : index
      %17 = vector.load %arg7[%c0_12, %c0_13] : memref<32x128xf32, #tpu.memory_space<vmem>>, vector<32x128xf32>
      tpu.vector_store %arg7[%c0_12, %c0_13], %16 {strides = array<i32>} : memref<32x128xf32, #tpu.memory_space<vmem>>, vector<32x128xf32>,
    } else {
    }
    %c0 = arith.constant 0 : index
    %c0_1 = arith.constant 0 : index
    %3 = vector.load %arg3[%c0, %c0_1] : memref<32x576xbf16, #tpu.memory_space<vmem>>, vector<32x576xbf16>
    %4 = arith.extf %3 : vector<32x576xbf16> to vector<32x576xf32>
    %cst = arith.constant 0.000000e+00 : f32
    %5 = vector.broadcast %cst : f32 to vector<32x576xf32>
    %6 = arith.maximumf %4, %5 : vector<32x576xf32>
    %7 = arith.truncf %6 : vector<32x576xf32> to vector<32x576xbf16>
    %c0_2 = arith.constant 0 : index
    %c0_3 = arith.constant 0 : index
    %8 = vector.load %arg7[%c0_2, %c0_3] : memref<32x128xf32, #tpu.memory_space<vmem>>, vector<32x128xf32>
    %c0_4 = arith.constant 0 : index
    %c0_5 = arith.constant 0 : index
    %9 = vector.load %arg4[%c0_4, %c0_5] : memref<576x128xbf16, #tpu.memory_space<vmem>>, vector<576x128xbf16>
    %cst_6 = arith.constant dense<0.000000e+00> : vector<32x128xf32>
    %10 = tpu.matmul %7, %9, %cst_6 {dimension_numbers = #tpu.dot_dimension_numbers<[1], [0], [0], [1], [0, 0, 1, 1], [], []>} : vector<32x576xbf16>, vector<576x128xbf16>, vector<32x128xf32> -> vector<32x128xf32>
    %11 = arith.addf %8, %10 : vector<32x128xf32>
    %c0_7 = arith.constant 0 : index
    %c0_8 = arith.constant 0 : index
    %12 = vector.load %arg7[%c0_7, %c0_8] : memref<32x128xf32, #tpu.memory_space<vmem>>, vector<32x128xf32>
    tpu.vector_store %arg7[%c0_7, %c0_8], %11 {strides = array<i32>} : memref<32x128xf32, #tpu.memory_space<vmem>>, vector<32x128xf32>,
    %c0_i32_9 = arith.constant 0 : i32
    %13 = arith.cmpi eq, %arg2, %c0_i32_9 : i32
    %14 = arith.extui %13 : i1 to i32
    %c0_i32_10 = arith.constant 0 : i32
    %15 = arith.cmpi ne, %14, %c0_i32_10 : i32
    scf.if %15 {
      %c0_11 = arith.constant 0 : index
      %c0_12 = arith.constant 0 : index
      %16 = vector.load %arg7[%c0_11, %c0_12] : memref<32x128xf32, #tpu.memory_space<vmem>>, vector<32x128xf32>
      %c0_13 = arith.constant 0 : index
      %c0_14 = arith.constant 0 : index
      %17 = vector.load %arg5[%c0_13, %c0_14] : memref<1x128xf32, #tpu.memory_space<vmem>>, vector<1x128xf32>
      %18 = vector.broadcast %17 : vector<1x128xf32> to vector<32x128xf32>
      %19 = arith.addf %16, %18 : vector<32x128xf32>
      %c0_15 = arith.constant 0 : index
      %c0_16 = arith.constant 0 : index
      %20 = vector.load %arg6[%c0_15, %c0_16] : memref<32x128xf32, #tpu.memory_space<vmem>>, vector<32x128xf32>
      tpu.vector_store %arg6[%c0_15, %c0_16], %19 {strides = array<i32>} : memref<32x128xf32, #tpu.memory_space<vmem>>, vector<32x128xf32>,
    } else {
    }
    return
  }
  func.func @transform_0(%arg0: i32, %arg1: i32, %arg2: i32) -> (i32, i32) {
    %c0_i32 = arith.constant 0 : i32
    return %arg0, %arg2 : i32, i32
  }
  func.func @transform_1(%arg0: i32, %arg1: i32, %arg2: i32) -> (i32, i32) {
    %c0_i32 = arith.constant 0 : i32
    return %arg2, %arg1 : i32, i32
  }
  func.func @transform_2(%arg0: i32, %arg1: i32, %arg2: i32) -> (i32, i32) {
    %c0_i32 = arith.constant 0 : i32
    %c0_i32_0 = arith.constant 0 : i32
    return %c0_i32, %arg1 : i32, i32
  }
  func.func @transform_3(%arg0: i32, %arg1: i32, %arg2: i32) -> (i32, i32) {
    %c0_i32 = arith.constant 0 : i32
    return %arg0, %arg1 : i32, i32
  }
}

module attributes {stable_mosaic.version = 11 : i64} {
  func.func @_mm_kernel(%arg0: i32, %arg1: i32, %arg2: i32, %arg3: memref<128x288xbf16, #tpu.memory_space<vmem>>, %arg4: memref<288x128xbf16, #tpu.memory_space<vmem>>, %arg5: memref<1x128xf32, #tpu.memory_space<vmem>>, %arg6: memref<128x128xf32, #tpu.memory_space<vmem>>, %arg7: memref<128x128xf32, #tpu.memory_space<vmem>>) attributes {dimension_semantics = [#tpu.dimension_semantics<parallel>, #tpu.dimension_semantics<parallel>, #tpu.dimension_semantics<arbitrary>], iteration_bounds = array<i64: 1, 1, 1>, scalar_prefetch = 0 : i64, scratch_operands = 1 : i64, tpu.core_type = #tpu.core_type<tc>, window_params = [{transform_indices = @transform_0, window_bounds = array<i64: 128, 288>}, {transform_indices = @transform_1, window_bounds = array<i64: 288, 128>}, {transform_indices = @transform_2, window_bounds = array<i64: 1, 128>}, {transform_indices = @transform_3, window_bounds = array<i64: 128, 128>}]} {
    %c0_i32 = arith.constant 0 : i32
    %0 = arith.cmpi eq, %arg2, %c0_i32 : i32
    %1 = arith.extui %0 : i1 to i32
    %c0_i32_0 = arith.constant 0 : i32
    %2 = arith.cmpi ne, %1, %c0_i32_0 : i32
    scf.if %2 {
      %cst_11 = arith.constant 0.000000e+00 : f32
      %16 = vector.broadcast %cst_11 : f32 to vector<128x128xf32>
      %c0_12 = arith.constant 0 : index
      %c0_13 = arith.constant 0 : index
      %17 = vector.load %arg7[%c0_12, %c0_13] : memref<128x128xf32, #tpu.memory_space<vmem>>, vector<128x128xf32>
      tpu.vector_store %arg7[%c0_12, %c0_13], %16 {strides = array<i32>} : memref<128x128xf32, #tpu.memory_space<vmem>>, vector<128x128xf32>,
    } else {
    }
    %c0 = arith.constant 0 : index
    %c0_1 = arith.constant 0 : index
    %3 = vector.load %arg3[%c0, %c0_1] : memref<128x288xbf16, #tpu.memory_space<vmem>>, vector<128x288xbf16>
    %4 = arith.extf %3 : vector<128x288xbf16> to vector<128x288xf32>
    %cst = arith.constant 0.000000e+00 : f32
    %5 = vector.broadcast %cst : f32 to vector<128x288xf32>
    %6 = arith.maximumf %4, %5 : vector<128x288xf32>
    %7 = arith.truncf %6 : vector<128x288xf32> to vector<128x288xbf16>
    %c0_2 = arith.constant 0 : index
    %c0_3 = arith.constant 0 : index
    %8 = vector.load %arg7[%c0_2, %c0_3] : memref<128x128xf32, #tpu.memory_space<vmem>>, vector<128x128xf32>
    %c0_4 = arith.constant 0 : index
    %c0_5 = arith.constant 0 : index
    %9 = vector.load %arg4[%c0_4, %c0_5] : memref<288x128xbf16, #tpu.memory_space<vmem>>, vector<288x128xbf16>
    %cst_6 = arith.constant dense<0.000000e+00> : vector<128x128xf32>
    %10 = tpu.matmul %7, %9, %cst_6 {dimension_numbers = #tpu.dot_dimension_numbers<[1], [0], [0], [1], [0, 0, 1, 1], [], []>} : vector<128x288xbf16>, vector<288x128xbf16>, vector<128x128xf32> -> vector<128x128xf32>
    %11 = arith.addf %8, %10 : vector<128x128xf32>
    %c0_7 = arith.constant 0 : index
    %c0_8 = arith.constant 0 : index
    %12 = vector.load %arg7[%c0_7, %c0_8] : memref<128x128xf32, #tpu.memory_space<vmem>>, vector<128x128xf32>
    tpu.vector_store %arg7[%c0_7, %c0_8], %11 {strides = array<i32>} : memref<128x128xf32, #tpu.memory_space<vmem>>, vector<128x128xf32>,
    %c0_i32_9 = arith.constant 0 : i32
    %13 = arith.cmpi eq, %arg2, %c0_i32_9 : i32
    %14 = arith.extui %13 : i1 to i32
    %c0_i32_10 = arith.constant 0 : i32
    %15 = arith.cmpi ne, %14, %c0_i32_10 : i32
    scf.if %15 {
      %c0_11 = arith.constant 0 : index
      %c0_12 = arith.constant 0 : index
      %16 = vector.load %arg7[%c0_11, %c0_12] : memref<128x128xf32, #tpu.memory_space<vmem>>, vector<128x128xf32>
      %c0_13 = arith.constant 0 : index
      %c0_14 = arith.constant 0 : index
      %17 = vector.load %arg5[%c0_13, %c0_14] : memref<1x128xf32, #tpu.memory_space<vmem>>, vector<1x128xf32>
      %18 = vector.broadcast %17 : vector<1x128xf32> to vector<128x128xf32>
      %19 = arith.addf %16, %18 : vector<128x128xf32>
      %c0_15 = arith.constant 0 : index
      %c0_16 = arith.constant 0 : index
      %20 = vector.load %arg6[%c0_15, %c0_16] : memref<128x128xf32, #tpu.memory_space<vmem>>, vector<128x128xf32>
      tpu.vector_store %arg6[%c0_15, %c0_16], %19 {strides = array<i32>} : memref<128x128xf32, #tpu.memory_space<vmem>>, vector<128x128xf32>,
    } else {
    }
    return
  }
  func.func @transform_0(%arg0: i32, %arg1: i32, %arg2: i32) -> (i32, i32) {
    %c0_i32 = arith.constant 0 : i32
    return %arg0, %arg2 : i32, i32
  }
  func.func @transform_1(%arg0: i32, %arg1: i32, %arg2: i32) -> (i32, i32) {
    %c0_i32 = arith.constant 0 : i32
    return %arg2, %arg1 : i32, i32
  }
  func.func @transform_2(%arg0: i32, %arg1: i32, %arg2: i32) -> (i32, i32) {
    %c0_i32 = arith.constant 0 : i32
    %c0_i32_0 = arith.constant 0 : i32
    return %c0_i32, %arg1 : i32, i32
  }
  func.func @transform_3(%arg0: i32, %arg1: i32, %arg2: i32) -> (i32, i32) {
    %c0_i32 = arith.constant 0 : i32
    return %arg0, %arg1 : i32, i32
  }
}

module attributes {stable_mosaic.version = 11 : i64} {
  func.func @_bn_stats_kernel(%arg0: i32, %arg1: memref<512x8xf32, #tpu.memory_space<vmem>>, %arg2: memref<1x8xf32, #tpu.memory_space<vmem>>, %arg3: memref<1x8xf32, #tpu.memory_space<vmem>>) attributes {dimension_semantics = [#tpu.dimension_semantics<arbitrary>], iteration_bounds = array<i64: 1>, scalar_prefetch = 0 : i64, scratch_operands = 0 : i64, tpu.core_type = #tpu.core_type<tc>, window_params = [{transform_indices = @transform_0, window_bounds = array<i64: 512, 8>}, {pipeline_mode = #tpu.pipeline_mode<synchronous>, transform_indices = @transform_1, window_bounds = array<i64: 1, 8>}, {pipeline_mode = #tpu.pipeline_mode<synchronous>, transform_indices = @transform_2, window_bounds = array<i64: 1, 8>}]} {
    %c0_i32 = arith.constant 0 : i32
    %0 = arith.cmpi eq, %arg0, %c0_i32 : i32
    %1 = arith.extui %0 : i1 to i32
    %c0_i32_0 = arith.constant 0 : i32
    %2 = arith.cmpi ne, %1, %c0_i32_0 : i32
    scf.if %2 {
      %cst_11 = arith.constant 0.000000e+00 : f32
      %15 = vector.broadcast %cst_11 : f32 to vector<1x8xf32>
      %c0_12 = arith.constant 0 : index
      %c0_13 = arith.constant 0 : index
      %16 = vector.load %arg2[%c0_12, %c0_13] : memref<1x8xf32, #tpu.memory_space<vmem>>, vector<1x8xf32>
      tpu.vector_store %arg2[%c0_12, %c0_13], %15 {strides = array<i32>} : memref<1x8xf32, #tpu.memory_space<vmem>>, vector<1x8xf32>,
      %cst_14 = arith.constant 0.000000e+00 : f32
      %17 = vector.broadcast %cst_14 : f32 to vector<1x8xf32>
      %c0_15 = arith.constant 0 : index
      %c0_16 = arith.constant 0 : index
      %18 = vector.load %arg3[%c0_15, %c0_16] : memref<1x8xf32, #tpu.memory_space<vmem>>, vector<1x8xf32>
      tpu.vector_store %arg3[%c0_15, %c0_16], %17 {strides = array<i32>} : memref<1x8xf32, #tpu.memory_space<vmem>>, vector<1x8xf32>,
    } else {
    }
    %c0 = arith.constant 0 : index
    %c0_1 = arith.constant 0 : index
    %3 = vector.load %arg1[%c0, %c0_1] : memref<512x8xf32, #tpu.memory_space<vmem>>, vector<512x8xf32>
    %c0_2 = arith.constant 0 : index
    %c0_3 = arith.constant 0 : index
    %4 = vector.load %arg2[%c0_2, %c0_3] : memref<1x8xf32, #tpu.memory_space<vmem>>, vector<1x8xf32>
    %cst = arith.constant dense<0.000000e+00> : vector<8xf32>
    %5 = vector.multi_reduction <add>, %3, %cst [0] : vector<512x8xf32> to vector<8xf32>
    %6 = vector.shape_cast %5 : vector<8xf32> to vector<1x8xf32>
    %7 = arith.addf %4, %6 : vector<1x8xf32>
    %c0_4 = arith.constant 0 : index
    %c0_5 = arith.constant 0 : index
    %8 = vector.load %arg2[%c0_4, %c0_5] : memref<1x8xf32, #tpu.memory_space<vmem>>, vector<1x8xf32>
    tpu.vector_store %arg2[%c0_4, %c0_5], %7 {strides = array<i32>} : memref<1x8xf32, #tpu.memory_space<vmem>>, vector<1x8xf32>,
    %c0_6 = arith.constant 0 : index
    %c0_7 = arith.constant 0 : index
    %9 = vector.load %arg3[%c0_6, %c0_7] : memref<1x8xf32, #tpu.memory_space<vmem>>, vector<1x8xf32>
    %10 = arith.mulf %3, %3 : vector<512x8xf32>
    %cst_8 = arith.constant dense<0.000000e+00> : vector<8xf32>
    %11 = vector.multi_reduction <add>, %10, %cst_8 [0] : vector<512x8xf32> to vector<8xf32>
    %12 = vector.shape_cast %11 : vector<8xf32> to vector<1x8xf32>
    %13 = arith.addf %9, %12 : vector<1x8xf32>
    %c0_9 = arith.constant 0 : index
    %c0_10 = arith.constant 0 : index
    %14 = vector.load %arg3[%c0_9, %c0_10] : memref<1x8xf32, #tpu.memory_space<vmem>>, vector<1x8xf32>
    tpu.vector_store %arg3[%c0_9, %c0_10], %13 {strides = array<i32>} : memref<1x8xf32, #tpu.memory_space<vmem>>, vector<1x8xf32>,
    return
  }
  func.func @transform_0(%arg0: i32) -> (i32, i32) {
    %c0_i32 = arith.constant 0 : i32
    %c0_i32_0 = arith.constant 0 : i32
    return %arg0, %c0_i32 : i32, i32
  }
  func.func @transform_1(%arg0: i32) -> (i32, i32) {
    %c0_i32 = arith.constant 0 : i32
    %c0_i32_0 = arith.constant 0 : i32
    %c0_i32_1 = arith.constant 0 : i32
    return %c0_i32, %c0_i32_0 : i32, i32
  }
  func.func @transform_2(%arg0: i32) -> (i32, i32) {
    %c0_i32 = arith.constant 0 : i32
    %c0_i32_0 = arith.constant 0 : i32
    %c0_i32_1 = arith.constant 0 : i32
    return %c0_i32, %c0_i32_0 : i32, i32
  }
}

module attributes {stable_mosaic.version = 11 : i64} {
  func.func @_bn_apply_kernel(%arg0: i32, %arg1: memref<512x8xf32, #tpu.memory_space<vmem>>, %arg2: memref<1x8xf32, #tpu.memory_space<vmem>>, %arg3: memref<1x8xf32, #tpu.memory_space<vmem>>, %arg4: memref<512x8xf32, #tpu.memory_space<vmem>>) attributes {dimension_semantics = [#tpu.dimension_semantics<parallel>], iteration_bounds = array<i64: 1>, scalar_prefetch = 0 : i64, scratch_operands = 0 : i64, tpu.core_type = #tpu.core_type<tc>, window_params = [{transform_indices = @transform_0, window_bounds = array<i64: 512, 8>}, {pipeline_mode = #tpu.pipeline_mode<synchronous>, transform_indices = @transform_1, window_bounds = array<i64: 1, 8>}, {pipeline_mode = #tpu.pipeline_mode<synchronous>, transform_indices = @transform_2, window_bounds = array<i64: 1, 8>}, {transform_indices = @transform_3, window_bounds = array<i64: 512, 8>}]} {
    %c0 = arith.constant 0 : index
    %c0_0 = arith.constant 0 : index
    %0 = vector.load %arg1[%c0, %c0_0] : memref<512x8xf32, #tpu.memory_space<vmem>>, vector<512x8xf32>
    %c0_1 = arith.constant 0 : index
    %c0_2 = arith.constant 0 : index
    %1 = vector.load %arg2[%c0_1, %c0_2] : memref<1x8xf32, #tpu.memory_space<vmem>>, vector<1x8xf32>
    %2 = vector.broadcast %1 : vector<1x8xf32> to vector<512x8xf32>
    %3 = arith.mulf %0, %2 : vector<512x8xf32>
    %c0_3 = arith.constant 0 : index
    %c0_4 = arith.constant 0 : index
    %4 = vector.load %arg3[%c0_3, %c0_4] : memref<1x8xf32, #tpu.memory_space<vmem>>, vector<1x8xf32>
    %5 = vector.broadcast %4 : vector<1x8xf32> to vector<512x8xf32>
    %6 = arith.addf %3, %5 : vector<512x8xf32>
    %c0_5 = arith.constant 0 : index
    %c0_6 = arith.constant 0 : index
    %7 = vector.load %arg4[%c0_5, %c0_6] : memref<512x8xf32, #tpu.memory_space<vmem>>, vector<512x8xf32>
    tpu.vector_store %arg4[%c0_5, %c0_6], %6 {strides = array<i32>} : memref<512x8xf32, #tpu.memory_space<vmem>>, vector<512x8xf32>,
    return
  }
  func.func @transform_0(%arg0: i32) -> (i32, i32) {
    %c0_i32 = arith.constant 0 : i32
    %c0_i32_0 = arith.constant 0 : i32
    return %arg0, %c0_i32 : i32, i32
  }
  func.func @transform_1(%arg0: i32) -> (i32, i32) {
    %c0_i32 = arith.constant 0 : i32
    %c0_i32_0 = arith.constant 0 : i32
    %c0_i32_1 = arith.constant 0 : i32
    return %c0_i32, %c0_i32_0 : i32, i32
  }
  func.func @transform_2(%arg0: i32) -> (i32, i32) {
    %c0_i32 = arith.constant 0 : i32
    %c0_i32_0 = arith.constant 0 : i32
    %c0_i32_1 = arith.constant 0 : i32
    return %c0_i32, %c0_i32_0 : i32, i32
  }
  func.func @transform_3(%arg0: i32) -> (i32, i32) {
    %c0_i32 = arith.constant 0 : i32
    %c0_i32_0 = arith.constant 0 : i32
    return %arg0, %c0_i32 : i32, i32
  }
}

module attributes {stable_mosaic.version = 11 : i64} {
  func.func @_mm_kernel(%arg0: i32, %arg1: i32, %arg2: i32, %arg3: memref<256x144xbf16, #tpu.memory_space<vmem>>, %arg4: memref<144x128xbf16, #tpu.memory_space<vmem>>, %arg5: memref<1x128xf32, #tpu.memory_space<vmem>>, %arg6: memref<256x128xf32, #tpu.memory_space<vmem>>, %arg7: memref<256x128xf32, #tpu.memory_space<vmem>>) attributes {dimension_semantics = [#tpu.dimension_semantics<parallel>, #tpu.dimension_semantics<parallel>, #tpu.dimension_semantics<arbitrary>], iteration_bounds = array<i64: 2, 1, 1>, scalar_prefetch = 0 : i64, scratch_operands = 1 : i64, tpu.core_type = #tpu.core_type<tc>, window_params = [{transform_indices = @transform_0, window_bounds = array<i64: 256, 144>}, {transform_indices = @transform_1, window_bounds = array<i64: 144, 128>}, {transform_indices = @transform_2, window_bounds = array<i64: 1, 128>}, {transform_indices = @transform_3, window_bounds = array<i64: 256, 128>}]} {
    %c0_i32 = arith.constant 0 : i32
    %0 = arith.cmpi eq, %arg2, %c0_i32 : i32
    %1 = arith.extui %0 : i1 to i32
    %c0_i32_0 = arith.constant 0 : i32
    %2 = arith.cmpi ne, %1, %c0_i32_0 : i32
    scf.if %2 {
      %cst_11 = arith.constant 0.000000e+00 : f32
      %16 = vector.broadcast %cst_11 : f32 to vector<256x128xf32>
      %c0_12 = arith.constant 0 : index
      %c0_13 = arith.constant 0 : index
      %17 = vector.load %arg7[%c0_12, %c0_13] : memref<256x128xf32, #tpu.memory_space<vmem>>, vector<256x128xf32>
      tpu.vector_store %arg7[%c0_12, %c0_13], %16 {strides = array<i32>} : memref<256x128xf32, #tpu.memory_space<vmem>>, vector<256x128xf32>,
    } else {
    }
    %c0 = arith.constant 0 : index
    %c0_1 = arith.constant 0 : index
    %3 = vector.load %arg3[%c0, %c0_1] : memref<256x144xbf16, #tpu.memory_space<vmem>>, vector<256x144xbf16>
    %4 = arith.extf %3 : vector<256x144xbf16> to vector<256x144xf32>
    %cst = arith.constant 0.000000e+00 : f32
    %5 = vector.broadcast %cst : f32 to vector<256x144xf32>
    %6 = arith.maximumf %4, %5 : vector<256x144xf32>
    %7 = arith.truncf %6 : vector<256x144xf32> to vector<256x144xbf16>
    %c0_2 = arith.constant 0 : index
    %c0_3 = arith.constant 0 : index
    %8 = vector.load %arg7[%c0_2, %c0_3] : memref<256x128xf32, #tpu.memory_space<vmem>>, vector<256x128xf32>
    %c0_4 = arith.constant 0 : index
    %c0_5 = arith.constant 0 : index
    %9 = vector.load %arg4[%c0_4, %c0_5] : memref<144x128xbf16, #tpu.memory_space<vmem>>, vector<144x128xbf16>
    %cst_6 = arith.constant dense<0.000000e+00> : vector<256x128xf32>
    %10 = tpu.matmul %7, %9, %cst_6 {dimension_numbers = #tpu.dot_dimension_numbers<[1], [0], [0], [1], [0, 0, 1, 1], [], []>} : vector<256x144xbf16>, vector<144x128xbf16>, vector<256x128xf32> -> vector<256x128xf32>
    %11 = arith.addf %8, %10 : vector<256x128xf32>
    %c0_7 = arith.constant 0 : index
    %c0_8 = arith.constant 0 : index
    %12 = vector.load %arg7[%c0_7, %c0_8] : memref<256x128xf32, #tpu.memory_space<vmem>>, vector<256x128xf32>
    tpu.vector_store %arg7[%c0_7, %c0_8], %11 {strides = array<i32>} : memref<256x128xf32, #tpu.memory_space<vmem>>, vector<256x128xf32>,
    %c0_i32_9 = arith.constant 0 : i32
    %13 = arith.cmpi eq, %arg2, %c0_i32_9 : i32
    %14 = arith.extui %13 : i1 to i32
    %c0_i32_10 = arith.constant 0 : i32
    %15 = arith.cmpi ne, %14, %c0_i32_10 : i32
    scf.if %15 {
      %c0_11 = arith.constant 0 : index
      %c0_12 = arith.constant 0 : index
      %16 = vector.load %arg7[%c0_11, %c0_12] : memref<256x128xf32, #tpu.memory_space<vmem>>, vector<256x128xf32>
      %c0_13 = arith.constant 0 : index
      %c0_14 = arith.constant 0 : index
      %17 = vector.load %arg5[%c0_13, %c0_14] : memref<1x128xf32, #tpu.memory_space<vmem>>, vector<1x128xf32>
      %18 = vector.broadcast %17 : vector<1x128xf32> to vector<256x128xf32>
      %19 = arith.addf %16, %18 : vector<256x128xf32>
      %20 = math.tanh %19 : vector<256x128xf32>
      %c0_15 = arith.constant 0 : index
      %c0_16 = arith.constant 0 : index
      %21 = vector.load %arg6[%c0_15, %c0_16] : memref<256x128xf32, #tpu.memory_space<vmem>>, vector<256x128xf32>
      tpu.vector_store %arg6[%c0_15, %c0_16], %20 {strides = array<i32>} : memref<256x128xf32, #tpu.memory_space<vmem>>, vector<256x128xf32>,
    } else {
    }
    return
  }
  func.func @transform_0(%arg0: i32, %arg1: i32, %arg2: i32) -> (i32, i32) {
    %c0_i32 = arith.constant 0 : i32
    return %arg0, %arg2 : i32, i32
  }
  func.func @transform_1(%arg0: i32, %arg1: i32, %arg2: i32) -> (i32, i32) {
    %c0_i32 = arith.constant 0 : i32
    return %arg2, %arg1 : i32, i32
  }
  func.func @transform_2(%arg0: i32, %arg1: i32, %arg2: i32) -> (i32, i32) {
    %c0_i32 = arith.constant 0 : i32
    %c0_i32_0 = arith.constant 0 : i32
    return %c0_i32, %arg1 : i32, i32
  }
  func.func @transform_3(%arg0: i32, %arg1: i32, %arg2: i32) -> (i32, i32) {
    %c0_i32 = arith.constant 0 : i32
    return %arg0, %arg1 : i32, i32
  }
}

</mosaic_0001>

<bundles_post_ra>
// kernel: _lambda_.24
= control target key start
LH: loop header
LB: loop body
LE: loop exit
PB: predicated region body
PF: predicated region fallthrough
CT: control target
= control target key end

     0   :  { %s1154_s12 = smov 0   ;;  %s1156_s13 = smov 0   ;;  %s1305_s0 = inlined_call_operand.vmem [shape: bf16[512,48], index: 0, kind: input, shape index: {}]   ;;  %s1306_s1 = inlined_call_operand.vmem [shape: bf16[48,128], index: 1, kind: input, shape index: {}]   ;;  %s1307_s2 = inlined_call_operand.vmem [shape: f32[1,128], index: 2, kind: input, shape index: {}]   ;;  %s1308_s3 = inlined_call_operand.vmem [shape: f32[512,128], index: 3, kind: output, shape index: {}]  }
   0x1   :  { %s1158_s14 = smov 0  }
   0x2 LB: > { %s32_s15 = sadd.s32 1, %s1128_s13  ;;  %p961_p0 = scmp.ge.s32.totalorder %s1132_s14, 1  ;;  %s1132_s14 = sphi %s1158_s14, %s13_s14   ;;  %s1128_s13 = sphi %s1156_s13, %s1310_s13   ;;  %s1124_s12 = sphi %s1154_s12, %s1309_s12  }
   0x3   : > { %p34_p1 = scmp.ge.s32.totalorder %s32_s15, 2  ;;  %p188_p2 = scmp.lt.s32.totalorder %s1132_s14, 3 }
   0x5   : > { %s1312_s15 = smov (%p34_p1, %s32_s15), 0  ;;  %p189_p3 = pnand %p961_p0, %p188_p2 }
   0x6   : > { %v1091_v0 = vld [vmem:[%s1306_s1] sm:$0xff] (!%p189_p3)   ;;  %s962_s18 = sshll.u32 (!%p189_p3), %s1124_s12, 5  ;;  %v1092_v1 = vld [vmem:[%s1306_s1 + $0x8] sm:$0xff] (!%p189_p3)   ;;  %v1093_v2 = vld [vmem:[%s1306_s1 + $0x10] sm:$0xff] (!%p189_p3)   ;;  %vm464_vm0 = vcmask (!%p189_p3), 392192  }
   0x7   : > { %192 = sbr.rel (%p189_p3) target bundleno = 262 (0x106), region = 32  ;;  %p230_p4 = scmp.lt.s32.totalorder (!%p189_p3), %s962_s18, 63  ;;  %1023 = vmatprep.subr.bf16.mxu0 (!%p189_p3), %v1091_v0  ;;  %1061 = vmatprep.subr.bf16.mxu1 (!%p189_p3), %v1091_v0  ;;  %v1225_v19 = vld [vmem:[%s1307_s2] ss:$0 sm:$0xff] (!%p189_p3) }
   0x8   : > { %1024 = vmatpush3.bf16.msra.mxu0 (!%p189_p3), %v1091_v0  ;;  %1064 = vmatpush3.bf16.msra.mxu1 (!%p189_p3), %v1091_v0 }
   0x9   : > { %1025 = vmatprep.subr.bf16.mxu0 (!%p189_p3), %v1092_v1  ;;  %1062 = vmatprep.subr.bf16.mxu1 (!%p189_p3), %v1092_v1 }
   0xc   : > { %1026 = vmatpush3.bf16.msra.mxu0 (!%p189_p3), %v1092_v1  ;;  %1065 = vmatpush3.bf16.msra.mxu1 (!%p189_p3), %v1092_v1 }
   0xd   : > { %1027 = vmatprep.subr.bf16.mxu0 (!%p189_p3), %v1093_v2  ;;  %1063 = vmatprep.subr.bf16.mxu1 (!%p189_p3), %v1093_v2 }
   0xe   : > { %s1314_s18 = smov (!%p230_p4, %s962_s18), 63 }
   0xf   : > { %s963_s23 = sshll.u32 %s1314_s18, 2  ;;  %s965_s27 = sshll.u32 %s1314_s18, 3 }
  0x10   : > { %s1187_s26 = scalar_lea.vmem %s1305_s0, %s963_s23  ;;  %1028 = vmatpush3.bf16.msra.mxu0 %v1093_v2  ;;  %1066 = vmatpush3.bf16.msra.mxu1 %v1093_v2  ;;  %s1230_s5 = scalar_lea.vmem %s1308_s3, %s965_s27 }
  0x11   : > { %v1094_v3 = vld [vmem:[%s1187_s26] sm:$0xff]   ;;  %v1096_v5 = vld [vmem:[%s1187_s26 + $0x8] sm:$0xff]   ;;  %v1098_v7 = vld [vmem:[%s1187_s26 + $0x10] sm:$0xff]  }
  0x12   : > { %v1095_v4 = vld [vmem:[%s1187_s26 + $0x40] sm:$0xff]   ;;  %1029 = vmatprep.mubr.msk.bf16.mxu0 %vm464_vm0, %v1094_v3  ;;  %v1097_v6 = vld [vmem:[%s1187_s26 + $0x48] sm:$0xff]   ;;  %v1099_v8 = vld [vmem:[%s1187_s26 + $0x50] sm:$0xff]  }
  0x13   : > { %1045 = vmatprep.mubr.msk.bf16.mxu1 %vm464_vm0, %v1095_v4  ;;  %1030 = vmatmul.mubr.msk.bf16.vlgmr.msra.gmra.mrb[0].mxu0 %vm464_vm0, %v1096_v5  ;;  %v1100_v9 = vld [vmem:[%s1187_s26 + $0x18] sm:$0xff]   ;;  %v1102_v11 = vld [vmem:[%s1187_s26 + $0x20] sm:$0xff]   ;;  %v1104_v13 = vld [vmem:[%s1187_s26 + $0x28] sm:$0xff]  }
  0x14   : > { %1046 = vmatmul.mubr.msk.bf16.vlgmr.msra.gmra.mrb[0].mxu1 %vm464_vm0, %v1097_v6  ;;  %1033 = vmatprep.mubr.msk.bf16.mxu0 %vm464_vm0, %v1098_v7  ;;  %v1101_v10 = vld [vmem:[%s1187_s26 + $0x58] sm:$0xff]   ;;  %v1103_v12 = vld [vmem:[%s1187_s26 + $0x60] sm:$0xff]   ;;  %v1105_v14 = vld [vmem:[%s1187_s26 + $0x68] sm:$0xff]  }
  0x15   : > { %1049 = vmatprep.mubr.msk.bf16.mxu1 %vm464_vm0, %v1099_v8  ;;  %v1106_v15 = vld [vmem:[%s1187_s26 + $0x30] sm:$0xff]   ;;  %v1108_v17 = vld [vmem:[%s1187_s26 + $0x38] sm:$0xff]  }
  0x16   : > { %v1107_v16 = vld [vmem:[%s1187_s26 + $0x70] sm:$0xff]   ;;  %v1109_v18 = vld [vmem:[%s1187_s26 + $0x78] sm:$0xff]  }
  0x1b   : > { %1034 = vmatmul.mubr.msk.bf16.gmra.mrb[4].mxu0 %vm464_vm0, %v1100_v9 }
  0x1c   : > { %1050 = vmatmul.mubr.msk.bf16.gmra.mrb[4].mxu1 %vm464_vm0, %v1101_v10  ;;  %1037 = vmatprep.mubr.msk.bf16.mxu0 %vm464_vm0, %v1102_v11 }
  0x1d   : > { %1053 = vmatprep.mubr.msk.bf16.mxu1 %vm464_vm0, %v1103_v12 }
  0x23   : > { %1038 = vmatmul.mubr.msk.bf16.gmra.mrb[8].mxu0 %vm464_vm0, %v1104_v13 }
  0x24   : > { %1054 = vmatmul.mubr.msk.bf16.gmra.mrb[8].mxu1 %vm464_vm0, %v1105_v14  ;;  %1041 = vmatprep.mubr.msk.bf16.mxu0 %vm464_vm0, %v1106_v15 }
  0x25   : > { %1057 = vmatprep.mubr.msk.bf16.mxu1 %vm464_vm0, %v1107_v16 }
  0x2b   : > { %1042 = vmatmul.mubr.msk.bf16.gmra.mrb[12].mxu0 %vm464_vm0, %v1108_v17 }
  0x2c   : > { %1058 = vmatmul.mubr.msk.bf16.gmra.mrb[12].mxu1 %vm464_vm0, %v1109_v18 }
  0xe6   : > { %v1031_v20 = vpop.f32.mrb[0].mxu0 }
  0xe7   : > { %v1047_v21 = vpop.f32.mrb[0].mxu1  ;;  %v782_v22 = vadd.f32 %v1031_v20, %v1225_v19  ;;  %v547_v24 = vpop.f32.mrb[1].mxu0 }
  0xe8   : > { %v798_v23 = vadd.f32 %v1047_v21, %v1225_v19  ;;  %v611_v25 = vpop.f32.mrb[1].mxu1  ;;  %v780_v26 = vadd.f32 %v1225_v19, %v547_v24  ;;  %v1032_v28 = vpop.f32.mrb[2].mxu0 }
  0xe9   : > { %v796_v27 = vadd.f32 %v1225_v19, %v611_v25  ;;  %v1048_v29 = vpop.f32.mrb[2].mxu1  ;;  %814 = vst [vmem:[%s1230_s5 + $0x10] sm:$0xff] %v782_v22  ;;  %v783_v30 = vadd.f32 %v1032_v28, %v1225_v19  ;;  %v550_v32 = vpop.f32.mrb[3].mxu0 }
  0xea   : > { %830 = vst [vmem:[%s1230_s5 + $0x90] sm:$0xff] %v798_v23  ;;  %v799_v31 = vadd.f32 %v1048_v29, %v1225_v19  ;;  %v614_v33 = vpop.f32.mrb[3].mxu1  ;;  %812 = vst [vmem:[%s1230_s5] sm:$0xff] %v780_v26  ;;  %v781_v34 = vadd.f32 %v1225_v19, %v550_v32 }
  0xeb   : > { %828 = vst [vmem:[%s1230_s5 + $0x80] sm:$0xff] %v796_v27  ;;  %v797_v35 = vadd.f32 %v1225_v19, %v614_v33  ;;  %815 = vst [vmem:[%s1230_s5 + $0x18] sm:$0xff] %v783_v30 }
  0xec   : > { %831 = vst [vmem:[%s1230_s5 + $0x98] sm:$0xff] %v799_v31  ;;  %813 = vst [vmem:[%s1230_s5 + $0x8] sm:$0xff] %v781_v34 }
  0xed   : > { %829 = vst [vmem:[%s1230_s5 + $0x88] sm:$0xff] %v797_v35 }
  0xee   : > { %v1035_v36 = vpop.f32.mrb[4].mxu0 }
  0xef   : > { %v1051_v37 = vpop.f32.mrb[4].mxu1  ;;  %v786_v38 = vadd.f32 %v1035_v36, %v1225_v19  ;;  %v563_v40 = vpop.f32.mrb[5].mxu0 }
  0xf0   : > { %v802_v39 = vadd.f32 %v1051_v37, %v1225_v19  ;;  %v627_v41 = vpop.f32.mrb[5].mxu1  ;;  %v784_v42 = vadd.f32 %v1225_v19, %v563_v40  ;;  %v1036_v44 = vpop.f32.mrb[6].mxu0 }
  0xf1   : > { %v800_v43 = vadd.f32 %v1225_v19, %v627_v41  ;;  %v1052_v45 = vpop.f32.mrb[6].mxu1  ;;  %818 = vst [vmem:[%s1230_s5 + $0x30] sm:$0xff] %v786_v38  ;;  %v787_v46 = vadd.f32 %v1036_v44, %v1225_v19  ;;  %v566_v48 = vpop.f32.mrb[7].mxu0 }
  0xf2   : > { %834 = vst [vmem:[%s1230_s5 + $0xb0] sm:$0xff] %v802_v39  ;;  %v803_v47 = vadd.f32 %v1052_v45, %v1225_v19  ;;  %v630_v49 = vpop.f32.mrb[7].mxu1  ;;  %816 = vst [vmem:[%s1230_s5 + $0x20] sm:$0xff] %v784_v42  ;;  %v785_v50 = vadd.f32 %v1225_v19, %v566_v48 }
  0xf3   : > { %832 = vst [vmem:[%s1230_s5 + $0xa0] sm:$0xff] %v800_v43  ;;  %v801_v51 = vadd.f32 %v1225_v19, %v630_v49  ;;  %819 = vst [vmem:[%s1230_s5 + $0x38] sm:$0xff] %v787_v46 }
  0xf4   : > { %835 = vst [vmem:[%s1230_s5 + $0xb8] sm:$0xff] %v803_v47  ;;  %817 = vst [vmem:[%s1230_s5 + $0x28] sm:$0xff] %v785_v50 }
  0xf5   : > { %833 = vst [vmem:[%s1230_s5 + $0xa8] sm:$0xff] %v801_v51 }
  0xf6   : > { %v1039_v52 = vpop.f32.mrb[8].mxu0 }
  0xf7   : > { %v1055_v53 = vpop.f32.mrb[8].mxu1  ;;  %v790_v54 = vadd.f32 %v1039_v52, %v1225_v19  ;;  %v579_v56 = vpop.f32.mrb[9].mxu0 }
  0xf8   : > { %v806_v55 = vadd.f32 %v1055_v53, %v1225_v19  ;;  %v643_v57 = vpop.f32.mrb[9].mxu1  ;;  %v788_v58 = vadd.f32 %v1225_v19, %v579_v56  ;;  %v1040_v60 = vpop.f32.mrb[10].mxu0 }
  0xf9   : > { %v804_v59 = vadd.f32 %v1225_v19, %v643_v57  ;;  %v1056_v61 = vpop.f32.mrb[10].mxu1  ;;  %822 = vst [vmem:[%s1230_s5 + $0x50] sm:$0xff] %v790_v54  ;;  %v791_v62 = vadd.f32 %v1040_v60, %v1225_v19  ;;  %v582_v0 = vpop.f32.mrb[11].mxu0 }
  0xfa   : > { %838 = vst [vmem:[%s1230_s5 + $0xd0] sm:$0xff] %v806_v55  ;;  %v807_v63 = vadd.f32 %v1056_v61, %v1225_v19  ;;  %v646_v1 = vpop.f32.mrb[11].mxu1  ;;  %820 = vst [vmem:[%s1230_s5 + $0x40] sm:$0xff] %v788_v58  ;;  %v789_v2 = vadd.f32 %v1225_v19, %v582_v0 }
  0xfb   : > { %836 = vst [vmem:[%s1230_s5 + $0xc0] sm:$0xff] %v804_v59  ;;  %v805_v3 = vadd.f32 %v1225_v19, %v646_v1  ;;  %823 = vst [vmem:[%s1230_s5 + $0x58] sm:$0xff] %v791_v62 }
  0xfc   : > { %839 = vst [vmem:[%s1230_s5 + $0xd8] sm:$0xff] %v807_v63  ;;  %821 = vst [vmem:[%s1230_s5 + $0x48] sm:$0xff] %v789_v2 }
  0xfd   : > { %837 = vst [vmem:[%s1230_s5 + $0xc8] sm:$0xff] %v805_v3 }
  0xfe   : > { %v1043_v4 = vpop.f32.mrb[12].mxu0 }
  0xff   : > { %v1059_v5 = vpop.f32.mrb[12].mxu1  ;;  %v794_v6 = vadd.f32 %v1043_v4, %v1225_v19  ;;  %v595_v8 = vpop.f32.mrb[13].mxu0 }
 0x100   : > { %v810_v7 = vadd.f32 %v1059_v5, %v1225_v19  ;;  %v659_v9 = vpop.f32.mrb[13].mxu1  ;;  %v792_v10 = vadd.f32 %v1225_v19, %v595_v8  ;;  %v1044_v12 = vpop.f32.mrb[14].mxu0 }
 0x101   : > { %v808_v11 = vadd.f32 %v1225_v19, %v659_v9  ;;  %v1060_v13 = vpop.f32.mrb[14].mxu1  ;;  %826 = vst [vmem:[%s1230_s5 + $0x70] sm:$0xff] %v794_v6  ;;  %v795_v14 = vadd.f32 %v1044_v12, %v1225_v19  ;;  %v598_v16 = vpop.f32.mrb[15].mxu0 }
 0x102   : > { %842 = vst [vmem:[%s1230_s5 + $0xf0] sm:$0xff] %v810_v7  ;;  %v811_v15 = vadd.f32 %v1060_v13, %v1225_v19  ;;  %v662_v17 = vpop.f32.mrb[15].mxu1  ;;  %824 = vst [vmem:[%s1230_s5 + $0x60] sm:$0xff] %v792_v10  ;;  %v793_v18 = vadd.f32 %v1225_v19, %v598_v16 }
 0x103   : > { %840 = vst [vmem:[%s1230_s5 + $0xe0] sm:$0xff] %v808_v11  ;;  %v809_v20 = vadd.f32 %v1225_v19, %v662_v17  ;;  %827 = vst [vmem:[%s1230_s5 + $0x78] sm:$0xff] %v795_v14 }
 0x104   : > { %843 = vst [vmem:[%s1230_s5 + $0xf8] sm:$0xff] %v811_v15  ;;  %825 = vst [vmem:[%s1230_s5 + $0x68] sm:$0xff] %v793_v18 }
 0x105   : > { %841 = vst [vmem:[%s1230_s5 + $0xe8] sm:$0xff] %v809_v20 }
 0x106 PF: > { %s13_s14 = sadd.s32 1, %s1132_s14   ;;  %s1309_s12 = smov %s1128_s13 }
 0x107   : > { %p10_p5 = scmp.ge.s32.totalorder %s13_s14, 4   ;;  %s1310_s13 = smov %s1312_s15 }
 0x109   :  { %12 = sbr.rel (!%p10_p5) target bundleno = 2 (0x2), region = 76 }

// kernel: _lambda_.26
= control target key start
LH: loop header
LB: loop body
LE: loop exit
PB: predicated region body
PF: predicated region fallthrough
CT: control target
= control target key end

     0   :  { %vm14_vm0 = vcmask 122880   ;;  %vm34_vm1 = vcmask 130048   ;;  %v140_v0 = vmov 0.0   ;;  %s258_s0 = inlined_call_operand.vmem [shape: f32[128,16], index: 0, kind: input, shape index: {}]   ;;  %s259_s1 = inlined_call_operand.vmem [shape: f32[1,16], index: 1, kind: output, shape index: {0}]   ;;  %s260_s2 = inlined_call_operand.vmem [shape: f32[1,16], index: 2, kind: output, shape index: {1}]  }
   0x1   :  { %15 = vst.msk [vmem:[%s259_s1] sm:$0x1] %vm14_vm0, %v140_v0  ;;  %v17_v1 = vld [vmem:[%s258_s0] sm:$0xff]  ;;  %v18_v2 = vld [vmem:[%s258_s0 + $0x8] sm:$0xff]  ;;  %v19_v3 = vld [vmem:[%s258_s0 + $0x10] sm:$0xff] }
   0x2   :  { %16 = vst.msk [vmem:[%s260_s2] sm:$0x1] %vm14_vm0, %v140_v0  ;;  %v35_v4 = vsel %vm34_vm1, %v17_v1, 0.0  ;;  %v36_v5 = vsel %vm34_vm1, %v18_v2, 0.0  ;;  %v38_v6 = vsel %vm34_vm1, %v19_v3, 0.0  ;;  %v20_v7 = vld [vmem:[%s258_s0 + $0x18] sm:$0xff]  ;;  %v76_v15 = vmul.f32 %v17_v1, %v17_v1 }
   0x3   :  { %v37_v8 = vadd.f32 %v36_v5, %v35_v4  ;;  %v40_v9 = vsel %vm34_vm1, %v20_v7, 0.0  ;;  %v21_v10 = vld [vmem:[%s258_s0 + $0x20] sm:$0xff]  ;;  %v22_v13 = vld [vmem:[%s258_s0 + $0x28] sm:$0xff]  ;;  %v77_v16 = vmul.f32 %v18_v2, %v18_v2  ;;  %v78_v17 = vmul.f32 %v19_v3, %v19_v3  ;;  %v23_v19 = vld [vmem:[%s258_s0 + $0x30] sm:$0xff] }
   0x4   :  { %v42_v12 = vsel %vm34_vm1, %v21_v10, 0.0  ;;  %v44_v18 = vsel %vm34_vm1, %v22_v13, 0.0  ;;  %v79_v21 = vmul.f32 %v20_v7, %v20_v7  ;;  %v46_v22 = vsel %vm34_vm1, %v23_v19, 0.0  ;;  %v24_v24 = vld [vmem:[%s258_s0 + $0x38] sm:$0xff]  ;;  %v25_v31 = vld [vmem:[%s258_s0 + $0x40] sm:$0xff]  ;;  %v26_v37 = vld [vmem:[%s258_s0 + $0x48] sm:$0xff] }
   0x5   :  { %v39_v11 = vadd.f32 %v38_v6, %v37_v8  ;;  %v80_v23 = vmul.f32 %v21_v10, %v21_v10  ;;  %v92_v26 = vsel %vm34_vm1, %v76_v15, 0.0  ;;  %v93_v27 = vsel %vm34_vm1, %v77_v16, 0.0  ;;  %v27_v43 = vld [vmem:[%s258_s0 + $0x50] sm:$0xff]  ;;  %v28_v49 = vld [vmem:[%s258_s0 + $0x58] sm:$0xff]  ;;  %v29_v55 = vld [vmem:[%s258_s0 + $0x60] sm:$0xff] }
   0x6   :  { %v95_v28 = vsel %vm34_vm1, %v78_v17, 0.0  ;;  %v48_v29 = vsel %vm34_vm1, %v24_v24, 0.0  ;;  %v94_v30 = vadd.f32 %v93_v27, %v92_v26  ;;  %v81_v33 = vmul.f32 %v22_v13, %v22_v13  ;;  %v30_v61 = vld [vmem:[%s258_s0 + $0x68] sm:$0xff]  ;;  %v31_v3 = vld [vmem:[%s258_s0 + $0x70] sm:$0xff] }
   0x7   :  { %v41_v14 = vadd.f32 %v40_v9, %v39_v11  ;;  %v97_v34 = vsel %vm34_vm1, %v79_v21, 0.0  ;;  %v50_v35 = vsel %vm34_vm1, %v25_v31, 0.0  ;;  %v82_v39 = vmul.f32 %v23_v19, %v23_v19  ;;  %v32_v9 = vld [vmem:[%s258_s0 + $0x78] sm:$0xff] }
   0x8   :  { %v96_v36 = vadd.f32 %v95_v28, %v94_v30  ;;  %v99_v40 = vsel %vm34_vm1, %v80_v23, 0.0  ;;  %v52_v41 = vsel %vm34_vm1, %v26_v37, 0.0  ;;  %v83_v45 = vmul.f32 %v24_v24, %v24_v24 }
   0x9   :  { %v43_v20 = vadd.f32 %v42_v12, %v41_v14  ;;  %v101_v46 = vsel %vm34_vm1, %v81_v33, 0.0  ;;  %v54_v47 = vsel %vm34_vm1, %v27_v43, 0.0  ;;  %v84_v51 = vmul.f32 %v25_v31, %v25_v31 }
   0xa   :  { %v98_v42 = vadd.f32 %v97_v34, %v96_v36  ;;  %v103_v52 = vsel %vm34_vm1, %v82_v39, 0.0  ;;  %v56_v53 = vsel %vm34_vm1, %v28_v49, 0.0  ;;  %v85_v57 = vmul.f32 %v26_v37, %v26_v37  ;;  %v33_v36 = vld [vmem:[%s259_s1] sm:$0x1] }
   0xb   :  { %v45_v25 = vadd.f32 %v44_v18, %v43_v20  ;;  %v105_v58 = vsel %vm34_vm1, %v83_v45, 0.0  ;;  %v58_v59 = vsel %vm34_vm1, %v29_v55, 0.0  ;;  %v86_v63 = vmul.f32 %v27_v43, %v27_v43 }
   0xc   :  { %v100_v48 = vadd.f32 %v99_v40, %v98_v42  ;;  %v107_v0 = vsel %vm34_vm1, %v84_v51, 0.0  ;;  %v60_v1 = vsel %vm34_vm1, %v30_v61, 0.0  ;;  %v87_v5 = vmul.f32 %v28_v49, %v28_v49 }
   0xd   :  { %v47_v32 = vadd.f32 %v46_v22, %v45_v25  ;;  %v109_v6 = vsel %vm34_vm1, %v85_v57, 0.0  ;;  %v62_v7 = vsel %vm34_vm1, %v31_v3, 0.0  ;;  %v88_v11 = vmul.f32 %v29_v55, %v29_v55 }
   0xe   :  { %v102_v54 = vadd.f32 %v101_v46, %v100_v48  ;;  %v111_v12 = vsel %vm34_vm1, %v86_v63, 0.0  ;;  %v64_v13 = vsel %vm34_vm1, %v32_v9, 0.0  ;;  %v89_v16 = vmul.f32 %v30_v61, %v30_v61 }
   0xf   :  { %v49_v38 = vadd.f32 %v48_v29, %v47_v32  ;;  %v113_v17 = vsel %vm34_vm1, %v87_v5, 0.0  ;;  %v90_v20 = vmul.f32 %v31_v3, %v31_v3  ;;  %v115_v21 = vsel %vm34_vm1, %v88_v11, 0.0 }
  0x10   :  { %v104_v60 = vadd.f32 %v103_v52, %v102_v54  ;;  %v91_v24 = vmul.f32 %v32_v9, %v32_v9  ;;  %v117_v25 = vsel %vm34_vm1, %v89_v16, 0.0 }
  0x11   :  { %v51_v44 = vadd.f32 %v50_v35, %v49_v38  ;;  %v119_v28 = vsel %vm34_vm1, %v90_v20, 0.0 }
  0x12   :  { %v106_v2 = vadd.f32 %v105_v58, %v104_v60  ;;  %v121_v31 = vsel %vm34_vm1, %v91_v24, 0.0 }
  0x13   :  { %v53_v50 = vadd.f32 %v52_v41, %v51_v44  ;;  %v75_v44 = vld [vmem:[%s260_s2] sm:$0x1] }
  0x14   :  { %v108_v8 = vadd.f32 %v107_v0, %v106_v2 }
  0x15   :  { %v55_v56 = vadd.f32 %v54_v47, %v53_v50 }
  0x16   :  { %v110_v14 = vadd.f32 %v109_v6, %v108_v8 }
  0x17   :  { %v57_v62 = vadd.f32 %v56_v53, %v55_v56 }
  0x18   :  { %v112_v18 = vadd.f32 %v111_v12, %v110_v14 }
  0x19   :  { %v59_v4 = vadd.f32 %v58_v59, %v57_v62 }
  0x1a   :  { %v114_v22 = vadd.f32 %v113_v17, %v112_v18 }
  0x1b   :  { %v61_v10 = vadd.f32 %v60_v1, %v59_v4 }
  0x1c   :  { %v116_v26 = vadd.f32 %v115_v21, %v114_v22 }
  0x1d   :  { %v63_v15 = vadd.f32 %v62_v7, %v61_v10 }
  0x1e   :  { %v118_v29 = vadd.f32 %v117_v25, %v116_v26 }
  0x1f   :  { %v65_v19 = vadd.f32 %v64_v13, %v63_v15 }
  0x20   :  { %v120_v32 = vadd.f32 %v119_v28, %v118_v29 }
  0x21   :  { %v66_v23 = vrot.slane %v65_v19, 4 }
  0x22   :  { %v122_v34 = vadd.f32 %v121_v31, %v120_v32 }
  0x23   :  { %v67_v27 = vadd.f32 %v66_v23, %v65_v19 }
  0x24   :  { %v123_v37 = vrot.slane %v122_v34, 4 }
  0x25   :  { %v68_v30 = vrot.slane %v67_v27, 2 }
  0x26   :  { %v124_v39 = vadd.f32 %v123_v37, %v122_v34 }
  0x27   :  { %v69_v33 = vadd.f32 %v68_v30, %v67_v27 }
  0x28   :  { %v125_v41 = vrot.slane %v124_v39, 2 }
  0x29   :  { %v70_v35 = vrot.slane %v69_v33, 1 }
  0x2a   :  { %v126_v42 = vadd.f32 %v125_v41, %v124_v39 }
  0x2b   :  { %v71_v38 = vadd.f32 %v70_v35, %v69_v33 }
  0x2c   :  { %v127_v43 = vrot.slane %v126_v42, 1 }
  0x2d   :  { %v72_v40 = vadd.f32 %v71_v38, %v33_v36 }
  0x2e   :  { %v128_v45 = vadd.f32 %v127_v43, %v126_v42 }
  0x2f   :  { %74 = vst.msk [vmem:[%s259_s1] sm:$0x1] %vm14_vm0, %v72_v40 }
  0x30   :  { %v129_v46 = vadd.f32 %v128_v45, %v75_v44 }
  0x32   :  { %130 = vst.msk [vmem:[%s260_s2] sm:$0x1] %vm14_vm0, %v129_v46 }

// kernel: _lambda_.25
= control target key start
LH: loop header
LB: loop body
LE: loop exit
PB: predicated region body
PF: predicated region fallthrough
CT: control target
= control target key end

     0   :  { %s635_s1 = inlined_call_operand.vmem [shape: bf16[128,128], index: 1, kind: input, shape index: {}]   ;;  %s636_s0 = inlined_call_operand.vmem [shape: bf16[128,128], index: 0, kind: input, shape index: {}]   ;;  %s637_s2 = inlined_call_operand.vmem [shape: f32[1,128], index: 2, kind: input, shape index: {}]   ;;  %s638_s3 = inlined_call_operand.vmem [shape: f32[128,128], index: 3, kind: output, shape index: {}]  }
   0x1   :  { %v506_v0 = vld [vmem:[%s635_s1] sm:$0xff]   ;;  %v507_v1 = vld [vmem:[%s635_s1 + $0x8] sm:$0xff]   ;;  %v508_v2 = vld [vmem:[%s635_s1 + $0x10] sm:$0xff]  }
   0x2   :  { %458 = vmatprep.subr.bf16.mxu0 %v506_v0  ;;  %490 = vmatprep.subr.bf16.mxu1 %v506_v0  ;;  %v509_v3 = vld [vmem:[%s635_s1 + $0x18] sm:$0xff]   ;;  %v404_v4 = vld [vmem:[%s636_s0] sm:$0xff]   ;;  %v435_v20 = vld [vmem:[%s636_s0 + $0x8] sm:$0xff]  }
   0x3   :  { %459 = vmatpush3.bf16.msra.mxu0 %v506_v0  ;;  %498 = vmatpush3.bf16.msra.mxu1 %v506_v0  ;;  %v438_v5 = vld [vmem:[%s636_s0 + $0x20] sm:$0xff]   ;;  %v405_v6 = vunpack.c.l.bf16 %v404_v4  ;;  %v406_v7 = vunpack.c.h.bf16 %v404_v4  ;;  %v439_v22 = vld [vmem:[%s636_s0 + $0x28] sm:$0xff]   ;;  %v436_v23 = vld [vmem:[%s636_s0 + $0x10] sm:$0xff]   ;;  %v409_v25 = vunpack.c.l.bf16 %v435_v20  ;;  %v410_v26 = vunpack.c.h.bf16 %v435_v20 }
   0x4   :  { %460 = vmatprep.subr.bf16.mxu0 %v507_v1  ;;  %491 = vmatprep.subr.bf16.mxu1 %v507_v1  ;;  %v421_v8 = vunpack.c.l.bf16 %v438_v5  ;;  %v422_v9 = vunpack.c.h.bf16 %v438_v5  ;;  %v510_v10 = vld [vmem:[%s635_s1 + $0x20] sm:$0xff]   ;;  %v511_v24 = vld [vmem:[%s635_s1 + $0x28] sm:$0xff]   ;;  %v440_v27 = vld [vmem:[%s636_s0 + $0x30] sm:$0xff]   ;;  %v425_v28 = vunpack.c.l.bf16 %v439_v22  ;;  %v426_v29 = vunpack.c.h.bf16 %v439_v22 }
   0x5   :  { %vm67_vm0 = vcmp.ge.f32.partialorder %v405_v6, 0.0  ;;  %vm68_vm1 = vcmp.ge.f32.partialorder %v406_v7, 0.0  ;;  %v83_v11 = vmul.f32 0.2, %v405_v6  ;;  %v84_v12 = vmul.f32 0.2, %v406_v7 }
   0x6   :  { %vm75_vm2 = vcmp.ge.f32.partialorder %v421_v8, 0.0  ;;  %vm76_vm3 = vcmp.ge.f32.partialorder %v422_v9, 0.0  ;;  %v91_v13 = vmul.f32 0.2, %v421_v8  ;;  %v92_v14 = vmul.f32 0.2, %v422_v9 }
   0x7   :  { %461 = vmatpush3.bf16.msra.mxu0 %v507_v1  ;;  %499 = vmatpush3.bf16.msra.mxu1 %v507_v1  ;;  %v99_v15 = vsel %vm67_vm0, %v405_v6, %v83_v11  ;;  %v100_v16 = vsel %vm68_vm1, %v406_v7, %v84_v12  ;;  %v413_v30 = vunpack.c.l.bf16 %v436_v23  ;;  %v414_v31 = vunpack.c.h.bf16 %v436_v23  ;;  %v512_v32 = vld [vmem:[%s635_s1 + $0x30] sm:$0xff]   ;;  %v513_v37 = vld [vmem:[%s635_s1 + $0x38] sm:$0xff]  }
   0x8   :  { %462 = vmatprep.subr.bf16.mxu0 %v508_v2  ;;  %492 = vmatprep.subr.bf16.mxu1 %v508_v2  ;;  %v115_v17 = vpack.c.bf16 %v100_v16, %v99_v15  ;;  %v107_v18 = vsel %vm75_vm2, %v421_v8, %v91_v13  ;;  %v108_v19 = vsel %vm76_vm3, %v422_v9, %v92_v14  ;;  %v429_v33 = vunpack.c.l.bf16 %v440_v27  ;;  %v437_v42 = vld [vmem:[%s636_s0 + $0x18] sm:$0xff]   ;;  %v402_v8 = vld [vmem:[%s637_s2] ss:$0 sm:$0xff] }
   0x9   :  { %v119_v21 = vpack.c.bf16 %v108_v19, %v107_v18  ;;  %v430_v34 = vunpack.c.h.bf16 %v440_v27  ;;  %vm69_vm4 = vcmp.ge.f32.partialorder %v409_v25, 0.0  ;;  %vm70_vm5 = vcmp.ge.f32.partialorder %v410_v26, 0.0  ;;  %v441_v45 = vld [vmem:[%s636_s0 + $0x38] sm:$0xff]  }
   0xa   :  { %474 = vmatprep.mubr.bf16.mxu0 %v115_v17  ;;  %v85_v35 = vmul.f32 0.2, %v409_v25  ;;  %v86_v36 = vmul.f32 0.2, %v410_v26  ;;  %v93_v38 = vmul.f32 0.2, %v425_v28  ;;  %v417_v51 = vunpack.c.l.bf16 %v437_v42 }
   0xb   :  { %463 = vmatpush3.bf16.msra.mxu0 %v508_v2  ;;  %500 = vmatpush3.bf16.msra.mxu1 %v508_v2  ;;  %v94_v39 = vmul.f32 0.2, %v426_v29  ;;  %v87_v40 = vmul.f32 0.2, %v413_v30  ;;  %vm77_vm6 = vcmp.ge.f32.partialorder %v425_v28, 0.0  ;;  %vm78_vm7 = vcmp.ge.f32.partialorder %v426_v29, 0.0 }
   0xc   :  { %464 = vmatprep.subr.bf16.mxu0 %v509_v3  ;;  %493 = vmatprep.subr.bf16.mxu1 %v509_v3  ;;  %vm71_vm8 = vcmp.ge.f32.partialorder %v413_v30, 0.0  ;;  %v88_v41 = vmul.f32 0.2, %v414_v31  ;;  %vm72_vm9 = vcmp.ge.f32.partialorder %v414_v31, 0.0  ;;  %v95_v43 = vmul.f32 0.2, %v429_v33 }
   0xd   :  { %482 = vmatprep.mubr.bf16.mxu1 %v119_v21  ;;  %v96_v44 = vmul.f32 0.2, %v430_v34  ;;  %v101_v46 = vsel %vm69_vm4, %v409_v25, %v85_v35  ;;  %v102_v47 = vsel %vm70_vm5, %v410_v26, %v86_v36  ;;  %vm79_vm10 = vcmp.ge.f32.partialorder %v429_v33, 0.0 }
   0xe   :  { %vm80_vm11 = vcmp.ge.f32.partialorder %v430_v34, 0.0  ;;  %v109_v48 = vsel %vm77_vm6, %v425_v28, %v93_v38  ;;  %v110_v49 = vsel %vm78_vm7, %v426_v29, %v94_v39  ;;  %v103_v50 = vsel %vm71_vm8, %v413_v30, %v87_v40 }
   0xf   :  { %465 = vmatpush3.bf16.msra.mxu0 %v509_v3  ;;  %501 = vmatpush3.bf16.msra.mxu1 %v509_v3  ;;  %v104_v52 = vsel %vm72_vm9, %v414_v31, %v88_v41  ;;  %v418_v53 = vunpack.c.h.bf16 %v437_v42  ;;  %v433_v54 = vunpack.c.l.bf16 %v441_v45  ;;  %v434_v55 = vunpack.c.h.bf16 %v441_v45 }
  0x10   :  { %466 = vmatprep.subr.bf16.mxu0 %v510_v10  ;;  %494 = vmatprep.subr.bf16.mxu1 %v510_v10  ;;  %v111_v56 = vsel %vm79_vm10, %v429_v33, %v95_v43  ;;  %v112_v57 = vsel %vm80_vm11, %v430_v34, %v96_v44  ;;  %v116_v58 = vpack.c.bf16 %v102_v47, %v101_v46  ;;  %vm73_vm12 = vcmp.ge.f32.partialorder %v417_v51, 0.0 }
  0x11   :  { %v120_v59 = vpack.c.bf16 %v110_v49, %v109_v48  ;;  %v117_v60 = vpack.c.bf16 %v104_v52, %v103_v50  ;;  %v89_v61 = vmul.f32 0.2, %v417_v51  ;;  %v121_v62 = vpack.c.bf16 %v112_v57, %v111_v56 }
  0x12   :  { %v90_v63 = vmul.f32 0.2, %v418_v53  ;;  %v97_v0 = vmul.f32 0.2, %v433_v54  ;;  %v98_v1 = vmul.f32 0.2, %v434_v55 }
  0x13   :  { %467 = vmatpush3.bf16.msra.mxu0 %v510_v10  ;;  %502 = vmatpush3.bf16.msra.mxu1 %v510_v10  ;;  %vm74_vm13 = vcmp.ge.f32.partialorder %v418_v53, 0.0  ;;  %vm81_vm14 = vcmp.ge.f32.partialorder %v433_v54, 0.0  ;;  %vm82_vm15 = vcmp.ge.f32.partialorder %v434_v55, 0.0  ;;  %v105_v2 = vsel %vm73_vm12, %v417_v51, %v89_v61 }
  0x14   :  { %468 = vmatprep.subr.bf16.mxu0 %v511_v24  ;;  %495 = vmatprep.subr.bf16.mxu1 %v511_v24  ;;  %v106_v3 = vsel %vm74_vm13, %v418_v53, %v90_v63  ;;  %v113_v4 = vsel %vm81_vm14, %v433_v54, %v97_v0  ;;  %v114_v5 = vsel %vm82_vm15, %v434_v55, %v98_v1 }
  0x15   :  { %v118_v6 = vpack.c.bf16 %v106_v3, %v105_v2  ;;  %v122_v7 = vpack.c.bf16 %v114_v5, %v113_v4 }
  0x17   :  { %469 = vmatpush3.bf16.msra.mxu0 %v511_v24  ;;  %503 = vmatpush3.bf16.msra.mxu1 %v511_v24 }
  0x18   :  { %470 = vmatprep.subr.bf16.mxu0 %v512_v32  ;;  %496 = vmatprep.subr.bf16.mxu1 %v512_v32 }
  0x1b   :  { %471 = vmatpush3.bf16.msra.mxu0 %v512_v32  ;;  %504 = vmatpush3.bf16.msra.mxu1 %v512_v32 }
  0x1c   :  { %472 = vmatprep.subr.bf16.mxu0 %v513_v37  ;;  %497 = vmatprep.subr.bf16.mxu1 %v513_v37 }
  0x1f   :  { %473 = vmatpush3.bf16.msra.mxu0 %v513_v37  ;;  %505 = vmatpush3.bf16.msra.mxu1 %v513_v37 }
  0x22   :  { %475 = vmatmul.mubr.bf16.vlgmr.msra.gmra.mrb[0].mxu0 %v116_v58  ;;  %483 = vmatmul.mubr.bf16.vlgmr.msra.gmra.mrb[0].mxu1 %v120_v59 }
  0x23   :  { %478 = vmatprep.mubr.bf16.mxu0 %v117_v60  ;;  %486 = vmatprep.mubr.bf16.mxu1 %v121_v62 }
  0x2a   :  { %479 = vmatmul.mubr.bf16.gmra.mrb[4].mxu0 %v118_v6  ;;  %487 = vmatmul.mubr.bf16.gmra.mrb[4].mxu1 %v122_v7 }
  0xf5   :  { %v476_v9 = vpop.f32.mrb[0].mxu0  ;;  %v484_v10 = vpop.f32.mrb[0].mxu1 }
  0xf6   :  { %v360_v11 = vadd.f32 %v476_v9, %v402_v8  ;;  %v368_v12 = vadd.f32 %v484_v10, %v402_v8  ;;  %v237_v13 = vpop.f32.mrb[1].mxu0  ;;  %v269_v14 = vpop.f32.mrb[1].mxu1 }
  0xf7   :  { %v358_v15 = vadd.f32 %v402_v8, %v237_v13  ;;  %v366_v16 = vadd.f32 %v402_v8, %v269_v14  ;;  %v477_v17 = vpop.f32.mrb[2].mxu0  ;;  %v485_v18 = vpop.f32.mrb[2].mxu1 }
  0xf8   :  { %376 = vst [vmem:[%s638_s3 + $0x10] sm:$0xff] %v360_v11  ;;  %384 = vst [vmem:[%s638_s3 + $0x50] sm:$0xff] %v368_v12  ;;  %v361_v19 = vadd.f32 %v477_v17, %v402_v8  ;;  %v369_v20 = vadd.f32 %v485_v18, %v402_v8  ;;  %v240_v21 = vpop.f32.mrb[3].mxu0  ;;  %v272_v22 = vpop.f32.mrb[3].mxu1 }
  0xf9   :  { %374 = vst [vmem:[%s638_s3] sm:$0xff] %v358_v15  ;;  %382 = vst [vmem:[%s638_s3 + $0x40] sm:$0xff] %v366_v16  ;;  %v359_v23 = vadd.f32 %v402_v8, %v240_v21  ;;  %v367_v24 = vadd.f32 %v402_v8, %v272_v22 }
  0xfa   :  { %377 = vst [vmem:[%s638_s3 + $0x18] sm:$0xff] %v361_v19  ;;  %385 = vst [vmem:[%s638_s3 + $0x58] sm:$0xff] %v369_v20 }
  0xfb   :  { %375 = vst [vmem:[%s638_s3 + $0x8] sm:$0xff] %v359_v23  ;;  %383 = vst [vmem:[%s638_s3 + $0x48] sm:$0xff] %v367_v24 }
  0xfd   :  { %v480_v25 = vpop.f32.mrb[4].mxu0  ;;  %v488_v26 = vpop.f32.mrb[4].mxu1 }
  0xfe   :  { %v364_v27 = vadd.f32 %v480_v25, %v402_v8  ;;  %v372_v28 = vadd.f32 %v488_v26, %v402_v8  ;;  %v253_v29 = vpop.f32.mrb[5].mxu0  ;;  %v285_v30 = vpop.f32.mrb[5].mxu1 }
  0xff   :  { %v362_v31 = vadd.f32 %v402_v8, %v253_v29  ;;  %v370_v32 = vadd.f32 %v402_v8, %v285_v30  ;;  %v481_v33 = vpop.f32.mrb[6].mxu0  ;;  %v489_v34 = vpop.f32.mrb[6].mxu1 }
 0x100   :  { %380 = vst [vmem:[%s638_s3 + $0x30] sm:$0xff] %v364_v27  ;;  %388 = vst [vmem:[%s638_s3 + $0x70] sm:$0xff] %v372_v28  ;;  %v365_v35 = vadd.f32 %v481_v33, %v402_v8  ;;  %v373_v36 = vadd.f32 %v489_v34, %v402_v8  ;;  %v256_v37 = vpop.f32.mrb[7].mxu0  ;;  %v288_v38 = vpop.f32.mrb[7].mxu1 }
 0x101   :  { %378 = vst [vmem:[%s638_s3 + $0x20] sm:$0xff] %v362_v31  ;;  %386 = vst [vmem:[%s638_s3 + $0x60] sm:$0xff] %v370_v32  ;;  %v363_v39 = vadd.f32 %v402_v8, %v256_v37  ;;  %v371_v40 = vadd.f32 %v402_v8, %v288_v38 }
 0x102   :  { %381 = vst [vmem:[%s638_s3 + $0x38] sm:$0xff] %v365_v35  ;;  %389 = vst [vmem:[%s638_s3 + $0x78] sm:$0xff] %v373_v36 }
 0x103   :  { %379 = vst [vmem:[%s638_s3 + $0x28] sm:$0xff] %v363_v39  ;;  %387 = vst [vmem:[%s638_s3 + $0x68] sm:$0xff] %v371_v40 }

// kernel: _lambda_.27
= control target key start
LH: loop header
LB: loop body
LE: loop exit
PB: predicated region body
PF: predicated region fallthrough
CT: control target
= control target key end

     0   :  { %vm76_vm0 = vcmask 130048   ;;  %s237_s0 = inlined_call_operand.vmem [shape: f32[128,16], index: 0, kind: input, shape index: {}]   ;;  %s238_s1 = inlined_call_operand.vmem [shape: f32[1,16], index: 1, kind: input, shape index: {}]   ;;  %s239_s2 = inlined_call_operand.vmem [shape: f32[1,16], index: 2, kind: input, shape index: {}]   ;;  %s240_s3 = inlined_call_operand.vmem [shape: f32[128,16], index: 3, kind: output, shape index: {}]  }
   0x1   :  { %v14_v0 = vld [vmem:[%s237_s0] sm:$0xff]  ;;  %v15_v4 = vld [vmem:[%s237_s0 + $0x8] sm:$0xff]  ;;  %v16_v5 = vld [vmem:[%s237_s0 + $0x10] sm:$0xff] }
   0x2   :  { %v97_v1 = vld [vmem:[%s238_s1] ss:$0 sm:$0xff]  ;;  %v17_v6 = vld [vmem:[%s237_s0 + $0x18] sm:$0xff]  ;;  %v19_v11 = vld [vmem:[%s237_s0 + $0x28] sm:$0xff] }
   0x3   :  { %v98_v2 = vld [vmem:[%s239_s2] ss:$0 sm:$0xff]  ;;  %v37_v3 = vmul.f32 %v97_v1, %v14_v0  ;;  %v38_v7 = vmul.f32 %v97_v1, %v15_v4  ;;  %v39_v8 = vmul.f32 %v97_v1, %v16_v5  ;;  %v40_v9 = vmul.f32 %v97_v1, %v17_v6  ;;  %v20_v12 = vld [vmem:[%s237_s0 + $0x30] sm:$0xff]  ;;  %v21_v17 = vld [vmem:[%s237_s0 + $0x38] sm:$0xff] }
   0x4   :  { %v18_v10 = vld [vmem:[%s237_s0 + $0x20] sm:$0xff]  ;;  %v42_v15 = vmul.f32 %v97_v1, %v19_v11  ;;  %v43_v16 = vmul.f32 %v97_v1, %v20_v12  ;;  %v23_v19 = vld [vmem:[%s237_s0 + $0x48] sm:$0xff]  ;;  %v44_v23 = vmul.f32 %v97_v1, %v21_v17  ;;  %v24_v24 = vld [vmem:[%s237_s0 + $0x50] sm:$0xff] }
   0x5   :  { %v60_v13 = vadd.f32 %v98_v2, %v37_v3  ;;  %v41_v14 = vmul.f32 %v97_v1, %v18_v10  ;;  %v22_v18 = vld [vmem:[%s237_s0 + $0x40] sm:$0xff]  ;;  %v61_v20 = vadd.f32 %v98_v2, %v38_v7  ;;  %v62_v21 = vadd.f32 %v98_v2, %v39_v8  ;;  %v25_v25 = vld [vmem:[%s237_s0 + $0x58] sm:$0xff]  ;;  %v27_v31 = vld [vmem:[%s237_s0 + $0x68] sm:$0xff] }
   0x6   :  { %v63_v22 = vadd.f32 %v98_v2, %v40_v9  ;;  %v26_v26 = vld [vmem:[%s237_s0 + $0x60] sm:$0xff]  ;;  %v65_v28 = vadd.f32 %v98_v2, %v42_v15  ;;  %v66_v29 = vadd.f32 %v98_v2, %v43_v16  ;;  %v45_v30 = vmul.f32 %v97_v1, %v22_v18  ;;  %v28_v32 = vld [vmem:[%s237_s0 + $0x70] sm:$0xff]  ;;  %v29_v33 = vld [vmem:[%s237_s0 + $0x78] sm:$0xff] }
   0x7   :  { %77 = vst.msk [vmem:[%s240_s3] sm:$0xff] %vm76_vm0, %v60_v13  ;;  %v64_v27 = vadd.f32 %v98_v2, %v41_v14  ;;  %78 = vst.msk [vmem:[%s240_s3 + $0x8] sm:$0xff] %vm76_vm0, %v61_v20  ;;  %v67_v34 = vadd.f32 %v98_v2, %v44_v23  ;;  %v46_v35 = vmul.f32 %v97_v1, %v23_v19 }
   0x8   :  { %79 = vst.msk [vmem:[%s240_s3 + $0x10] sm:$0xff] %vm76_vm0, %v62_v21  ;;  %80 = vst.msk [vmem:[%s240_s3 + $0x18] sm:$0xff] %vm76_vm0, %v63_v22  ;;  %v47_v36 = vmul.f32 %v97_v1, %v24_v24  ;;  %v48_v37 = vmul.f32 %v97_v1, %v25_v25  ;;  %v68_v38 = vadd.f32 %v98_v2, %v45_v30 }
   0x9   :  { %81 = vst.msk [vmem:[%s240_s3 + $0x20] sm:$0xff] %vm76_vm0, %v64_v27  ;;  %82 = vst.msk [vmem:[%s240_s3 + $0x28] sm:$0xff] %vm76_vm0, %v65_v28  ;;  %v49_v39 = vmul.f32 %v97_v1, %v26_v26  ;;  %v50_v40 = vmul.f32 %v97_v1, %v27_v31  ;;  %v51_v41 = vmul.f32 %v97_v1, %v28_v32 }
   0xa   :  { %83 = vst.msk [vmem:[%s240_s3 + $0x30] sm:$0xff] %vm76_vm0, %v66_v29  ;;  %84 = vst.msk [vmem:[%s240_s3 + $0x38] sm:$0xff] %vm76_vm0, %v67_v34  ;;  %v69_v42 = vadd.f32 %v98_v2, %v46_v35  ;;  %v70_v43 = vadd.f32 %v98_v2, %v47_v36  ;;  %v71_v44 = vadd.f32 %v98_v2, %v48_v37 }
   0xb   :  { %v52_v45 = vmul.f32 %v97_v1, %v29_v33  ;;  %85 = vst.msk [vmem:[%s240_s3 + $0x40] sm:$0xff] %vm76_vm0, %v68_v38  ;;  %v72_v46 = vadd.f32 %v98_v2, %v49_v39  ;;  %v73_v47 = vadd.f32 %v98_v2, %v50_v40  ;;  %v74_v48 = vadd.f32 %v98_v2, %v51_v41 }
   0xc   :  { %86 = vst.msk [vmem:[%s240_s3 + $0x48] sm:$0xff] %vm76_vm0, %v69_v42  ;;  %87 = vst.msk [vmem:[%s240_s3 + $0x50] sm:$0xff] %vm76_vm0, %v70_v43 }
   0xd   :  { %88 = vst.msk [vmem:[%s240_s3 + $0x58] sm:$0xff] %vm76_vm0, %v71_v44  ;;  %v75_v49 = vadd.f32 %v98_v2, %v52_v45  ;;  %89 = vst.msk [vmem:[%s240_s3 + $0x60] sm:$0xff] %vm76_vm0, %v72_v46 }
   0xe   :  { %90 = vst.msk [vmem:[%s240_s3 + $0x68] sm:$0xff] %vm76_vm0, %v73_v47  ;;  %91 = vst.msk [vmem:[%s240_s3 + $0x70] sm:$0xff] %vm76_vm0, %v74_v48 }
   0xf   :  { %92 = vst.msk [vmem:[%s240_s3 + $0x78] sm:$0xff] %vm76_vm0, %v75_v49 }

// kernel: _lambda_.28
= control target key start
LH: loop header
LB: loop body
LE: loop exit
PB: predicated region body
PF: predicated region fallthrough
CT: control target
= control target key end

     0   :  { %s450_s1 = inlined_call_operand.vmem [shape: bf16[256,128], index: 1, kind: input, shape index: {}]   ;;  %s451_s0 = inlined_call_operand.vmem [shape: bf16[32,256], index: 0, kind: input, shape index: {}]   ;;  %s452_s2 = inlined_call_operand.vmem [shape: f32[1,128], index: 2, kind: input, shape index: {}]   ;;  %s453_s3 = inlined_call_operand.vmem [shape: f32[32,128], index: 3, kind: output, shape index: {}]  }
   0x1   :  { %v339_v0 = vld [vmem:[%s450_s1 + $0x40] sm:$0xff]   ;;  %v341_v2 = vld [vmem:[%s450_s1 + $0x48] sm:$0xff]   ;;  %v343_v4 = vld [vmem:[%s450_s1 + $0x50] sm:$0xff]  }
   0x2   :  { %v340_v1 = vld [vmem:[%s450_s1] sm:$0xff]   ;;  %295 = vmatprep.subr.bf16.mxu0 %v339_v0  ;;  %323 = vmatprep.subr.bf16.mxu1 %v339_v0  ;;  %v342_v3 = vld [vmem:[%s450_s1 + $0x8] sm:$0xff]   ;;  %v344_v5 = vld [vmem:[%s450_s1 + $0x10] sm:$0xff]  }
   0x3   :  { %296 = vmatpush3.bf16.msra.mxu0 %v340_v1  ;;  %331 = vmatpush3.bf16.msra.mxu1 %v340_v1  ;;  %v345_v6 = vld [vmem:[%s450_s1 + $0x58] sm:$0xff]   ;;  %v347_v8 = vld [vmem:[%s450_s1 + $0x60] sm:$0xff]   ;;  %v349_v10 = vld [vmem:[%s450_s1 + $0x68] sm:$0xff]  }
   0x4   :  { %297 = vmatprep.subr.bf16.mxu0 %v341_v2  ;;  %324 = vmatprep.subr.bf16.mxu1 %v341_v2  ;;  %v346_v7 = vld [vmem:[%s450_s1 + $0x18] sm:$0xff]   ;;  %v348_v9 = vld [vmem:[%s450_s1 + $0x20] sm:$0xff]   ;;  %v24_v12 = vld [vmem:[%s451_s0 + $0x8] sm:$0xff] }
   0x5   :  { %v23_v11 = vld [vmem:[%s451_s0] sm:$0xff]  ;;  %v25_v13 = vld [vmem:[%s451_s0 + $0x10] sm:$0xff]  ;;  %v29_v16 = vunpack.c.l.bf16 %v24_v12  ;;  %v30_v17 = vunpack.c.h.bf16 %v24_v12  ;;  %v26_v18 = vld [vmem:[%s451_s0 + $0x18] sm:$0xff] }
   0x6   :  { %v27_v14 = vunpack.c.l.bf16 %v23_v11  ;;  %v28_v15 = vunpack.c.h.bf16 %v23_v11  ;;  %v350_v19 = vld [vmem:[%s450_s1 + $0x28] sm:$0xff]   ;;  %v351_v20 = vld [vmem:[%s450_s1 + $0x70] sm:$0xff]   ;;  %v31_v21 = vunpack.c.l.bf16 %v25_v13  ;;  %v32_v22 = vunpack.c.h.bf16 %v25_v13  ;;  %v353_v36 = vld [vmem:[%s450_s1 + $0x78] sm:$0xff]  }
   0x7   :  { %298 = vmatpush3.bf16.msra.mxu0 %v342_v3  ;;  %332 = vmatpush3.bf16.msra.mxu1 %v342_v3  ;;  %v33_v23 = vunpack.c.l.bf16 %v26_v18  ;;  %v34_v24 = vunpack.c.h.bf16 %v26_v18  ;;  %vm38_vm1 = vcmp.ge.f32.partialorder %v30_v17, 0.0  ;;  %v46_v26 = vmul.f32 0.2, %v30_v17  ;;  %v352_v35 = vld [vmem:[%s450_s1 + $0x30] sm:$0xff]   ;;  %v354_v42 = vld [vmem:[%s450_s1 + $0x38] sm:$0xff]  }
   0x8   :  { %299 = vmatprep.subr.bf16.mxu0 %v343_v4  ;;  %325 = vmatprep.subr.bf16.mxu1 %v343_v4  ;;  %vm36_vm0 = vcmp.ge.f32.partialorder %v28_v15, 0.0  ;;  %v44_v25 = vmul.f32 0.2, %v28_v15  ;;  %vm40_vm2 = vcmp.ge.f32.partialorder %v32_v22, 0.0  ;;  %v48_v27 = vmul.f32 0.2, %v32_v22 }
   0x9   :  { %vm42_vm3 = vcmp.ge.f32.partialorder %v34_v24, 0.0  ;;  %v50_v28 = vmul.f32 0.2, %v34_v24  ;;  %v54_v30 = vsel %vm38_vm1, %v30_v17, %v46_v26  ;;  %v43_v34 = vmul.f32 0.2, %v27_v14 }
   0xa   :  { %v52_v29 = vsel %vm36_vm0, %v28_v15, %v44_v25  ;;  %v56_v32 = vsel %vm40_vm2, %v32_v22, %v48_v27  ;;  %vm35_vm4 = vcmp.ge.f32.partialorder %v27_v14, 0.0  ;;  %vm37_vm5 = vcmp.ge.f32.partialorder %v29_v16, 0.0  ;;  %v294_v51 = vld [vmem:[%s452_s2] ss:$0 sm:$0xff] }
   0xb   :  { %300 = vmatpush3.bf16.msra.mxu0 %v344_v5  ;;  %333 = vmatpush3.bf16.msra.mxu1 %v344_v5  ;;  %v60_v31 = vpack.c.bf16 %v54_v30, %v52_v29  ;;  %v58_v33 = vsel %vm42_vm3, %v34_v24, %v50_v28  ;;  %v45_v38 = vmul.f32 0.2, %v29_v16  ;;  %vm39_vm6 = vcmp.ge.f32.partialorder %v31_v21, 0.0 }
   0xc   :  { %301 = vmatprep.subr.bf16.mxu0 %v345_v6  ;;  %326 = vmatprep.subr.bf16.mxu1 %v345_v6  ;;  %v62_v37 = vpack.c.bf16 %v58_v33, %v56_v32  ;;  %vm41_vm7 = vcmp.ge.f32.partialorder %v33_v23, 0.0  ;;  %v47_v39 = vmul.f32 0.2, %v31_v21  ;;  %v49_v40 = vmul.f32 0.2, %v33_v23 }
   0xd   :  { %227 = vmatprep.mubr.bf16.mxu0 %v60_v31  ;;  %v51_v41 = vsel %vm35_vm4, %v27_v14, %v43_v34  ;;  %v53_v43 = vsel %vm37_vm5, %v29_v16, %v45_v38 }
   0xe   :  { %235 = vmatprep.mubr.bf16.mxu1 %v62_v37  ;;  %v55_v44 = vsel %vm39_vm6, %v31_v21, %v47_v39  ;;  %v57_v45 = vsel %vm41_vm7, %v33_v23, %v49_v40  ;;  %v59_v46 = vpack.c.bf16 %v53_v43, %v51_v41 }
   0xf   :  { %302 = vmatpush3.bf16.msra.mxu0 %v346_v7  ;;  %334 = vmatpush3.bf16.msra.mxu1 %v346_v7  ;;  %v61_v47 = vpack.c.bf16 %v57_v45, %v55_v44 }
  0x10   :  { %303 = vmatprep.subr.bf16.mxu0 %v347_v8  ;;  %327 = vmatprep.subr.bf16.mxu1 %v347_v8 }
  0x13   :  { %304 = vmatpush3.bf16.msra.mxu0 %v348_v9  ;;  %335 = vmatpush3.bf16.msra.mxu1 %v348_v9 }
  0x14   :  { %305 = vmatprep.subr.bf16.mxu0 %v349_v10  ;;  %328 = vmatprep.subr.bf16.mxu1 %v349_v10 }
  0x17   :  { %306 = vmatpush3.bf16.msra.mxu0 %v350_v19  ;;  %336 = vmatpush3.bf16.msra.mxu1 %v350_v19 }
  0x18   :  { %307 = vmatprep.subr.bf16.mxu0 %v351_v20  ;;  %329 = vmatprep.subr.bf16.mxu1 %v351_v20 }
  0x1b   :  { %308 = vmatpush3.bf16.msra.mxu0 %v352_v35  ;;  %337 = vmatpush3.bf16.msra.mxu1 %v352_v35 }
  0x1c   :  { %309 = vmatprep.subr.bf16.mxu0 %v353_v36  ;;  %330 = vmatprep.subr.bf16.mxu1 %v353_v36 }
  0x1f   :  { %310 = vmatpush3.bf16.msra.mxu0 %v354_v42  ;;  %338 = vmatpush3.bf16.msra.mxu1 %v354_v42 }
  0x22   :  { %228 = vmatmul.mubr.bf16.vlgmr.msra.gmra.mrb[0].mxu0 %v59_v46  ;;  %236 = vmatmul.mubr.bf16.vlgmr.msra.gmra.mrb[0].mxu1 %v61_v47 }
  0xf5   :  { %v311_v48 = vpop.f32.mrb[0].mxu0  ;;  %v317_v49 = vpop.f32.mrb[0].mxu1 }
  0xf6   :  { %v312_v50 = vpop.f32.mrb[1].mxu0  ;;  %v318_v52 = vpop.f32.mrb[1].mxu1 }
  0xf7   :  { %v313_v53 = vadd.f32 %v312_v50, %v311_v48  ;;  %v319_v54 = vadd.f32 %v318_v52, %v317_v49  ;;  %v314_v55 = vpop.f32.mrb[2].mxu0  ;;  %v320_v56 = vpop.f32.mrb[2].mxu1 }
  0xf8   :  { %v315_v57 = vpop.f32.mrb[3].mxu0  ;;  %v321_v58 = vpop.f32.mrb[3].mxu1 }
  0xf9   :  { %v266_v59 = vadd.f32 %v313_v53, %v294_v51  ;;  %v268_v60 = vadd.f32 %v319_v54, %v294_v51  ;;  %v316_v61 = vadd.f32 %v315_v57, %v314_v55  ;;  %v322_v62 = vadd.f32 %v321_v58, %v320_v56 }
  0xfb   :  { %270 = vst [vmem:[%s453_s3] sm:$0xff] %v266_v59  ;;  %272 = vst [vmem:[%s453_s3 + $0x10] sm:$0xff] %v268_v60  ;;  %v267_v63 = vadd.f32 %v316_v61, %v294_v51  ;;  %v269_v0 = vadd.f32 %v322_v62, %v294_v51 }
  0xfd   :  { %271 = vst [vmem:[%s453_s3 + $0x8] sm:$0xff] %v267_v63  ;;  %273 = vst [vmem:[%s453_s3 + $0x18] sm:$0xff] %v269_v0 }

// kernel: _lambda_.30
= control target key start
LH: loop header
LB: loop body
LE: loop exit
PB: predicated region body
PF: predicated region fallthrough
CT: control target
= control target key end

     0   :  { %vm40_vm0 = vcmask 261120   ;;  %s101_s0 = inlined_call_operand.vmem [shape: f32[32,32], index: 0, kind: input, shape index: {}]   ;;  %s102_s1 = inlined_call_operand.vmem [shape: f32[1,32], index: 1, kind: input, shape index: {}]   ;;  %s103_s2 = inlined_call_operand.vmem [shape: f32[1,32], index: 2, kind: input, shape index: {}]   ;;  %s104_s3 = inlined_call_operand.vmem [shape: f32[32,32], index: 3, kind: output, shape index: {}]  }
   0x1   :  { %v14_v0 = vld [vmem:[%s101_s0] sm:$0xff]  ;;  %v15_v4 = vld [vmem:[%s101_s0 + $0x8] sm:$0xff]  ;;  %v16_v5 = vld [vmem:[%s101_s0 + $0x10] sm:$0xff] }
   0x2   :  { %v49_v1 = vld [vmem:[%s102_s1] ss:$0 sm:$0xff]  ;;  %v17_v6 = vld [vmem:[%s101_s0 + $0x18] sm:$0xff] }
   0x3   :  { %v50_v2 = vld [vmem:[%s103_s2] ss:$0 sm:$0xff]  ;;  %v25_v3 = vmul.f32 %v49_v1, %v14_v0  ;;  %v26_v7 = vmul.f32 %v49_v1, %v15_v4  ;;  %v27_v8 = vmul.f32 %v49_v1, %v16_v5  ;;  %v28_v9 = vmul.f32 %v49_v1, %v17_v6 }
   0x5   :  { %v36_v10 = vadd.f32 %v50_v2, %v25_v3  ;;  %v37_v11 = vadd.f32 %v50_v2, %v26_v7  ;;  %v38_v12 = vadd.f32 %v50_v2, %v27_v8  ;;  %v39_v13 = vadd.f32 %v50_v2, %v28_v9 }
   0x7   :  { %41 = vst.msk [vmem:[%s104_s3] sm:$0xff] %vm40_vm0, %v36_v10  ;;  %42 = vst.msk [vmem:[%s104_s3 + $0x8] sm:$0xff] %vm40_vm0, %v37_v11 }
   0x8   :  { %43 = vst.msk [vmem:[%s104_s3 + $0x10] sm:$0xff] %vm40_vm0, %v38_v12  ;;  %44 = vst.msk [vmem:[%s104_s3 + $0x18] sm:$0xff] %vm40_vm0, %v39_v13 }

// kernel: _lambda_.29
= control target key start
LH: loop header
LB: loop body
LE: loop exit
PB: predicated region body
PF: predicated region fallthrough
CT: control target
= control target key end

     0   :  { %vm14_vm0 = vcmask 253952   ;;  %vm22_vm1 = vcmask 261120   ;;  %v68_v0 = vmov 0.0   ;;  %s126_s0 = inlined_call_operand.vmem [shape: f32[32,32], index: 0, kind: input, shape index: {}]   ;;  %s127_s1 = inlined_call_operand.vmem [shape: f32[1,32], index: 1, kind: output, shape index: {0}]   ;;  %s128_s2 = inlined_call_operand.vmem [shape: f32[1,32], index: 2, kind: output, shape index: {1}]  }
   0x1   :  { %15 = vst.msk [vmem:[%s127_s1] sm:$0x1] %vm14_vm0, %v68_v0  ;;  %v17_v1 = vld [vmem:[%s126_s0] sm:$0xff]  ;;  %v18_v2 = vld [vmem:[%s126_s0 + $0x8] sm:$0xff]  ;;  %v19_v3 = vld [vmem:[%s126_s0 + $0x10] sm:$0xff] }
   0x2   :  { %16 = vst.msk [vmem:[%s128_s2] sm:$0x1] %vm14_vm0, %v68_v0  ;;  %v20_v4 = vld [vmem:[%s126_s0 + $0x18] sm:$0xff]  ;;  %v23_v5 = vsel %vm22_vm1, %v17_v1, 0.0  ;;  %v24_v6 = vsel %vm22_vm1, %v18_v2, 0.0  ;;  %v26_v7 = vsel %vm22_vm1, %v19_v3, 0.0  ;;  %v40_v8 = vmul.f32 %v17_v1, %v17_v1 }
   0x3   :  { %v25_v9 = vadd.f32 %v24_v6, %v23_v5  ;;  %v41_v10 = vmul.f32 %v18_v2, %v18_v2  ;;  %v42_v11 = vmul.f32 %v19_v3, %v19_v3  ;;  %v28_v12 = vsel %vm22_vm1, %v20_v4, 0.0 }
   0x4   :  { %v43_v13 = vmul.f32 %v20_v4, %v20_v4  ;;  %v44_v14 = vsel %vm22_vm1, %v40_v8, 0.0 }
   0x5   :  { %v27_v15 = vadd.f32 %v26_v7, %v25_v9  ;;  %v45_v16 = vsel %vm22_vm1, %v41_v10, 0.0  ;;  %v47_v17 = vsel %vm22_vm1, %v42_v11, 0.0 }
   0x6   :  { %v46_v18 = vadd.f32 %v45_v16, %v44_v14  ;;  %v49_v20 = vsel %vm22_vm1, %v43_v13, 0.0 }
   0x7   :  { %v29_v19 = vadd.f32 %v28_v12, %v27_v15 }
   0x8   :  { %v48_v21 = vadd.f32 %v47_v17, %v46_v18  ;;  %v21_v31 = vld [vmem:[%s127_s1] sm:$0x1] }
   0x9   :  { %v30_v22 = vrot.slane %v29_v19, 4  ;;  %v39_v36 = vld [vmem:[%s128_s2] sm:$0x1] }
   0xa   :  { %v50_v23 = vadd.f32 %v49_v20, %v48_v21 }
   0xb   :  { %v31_v24 = vadd.f32 %v30_v22, %v29_v19 }
   0xc   :  { %v51_v25 = vrot.slane %v50_v23, 4 }
   0xd   :  { %v32_v26 = vrot.slane %v31_v24, 2 }
   0xe   :  { %v52_v27 = vadd.f32 %v51_v25, %v50_v23 }
   0xf   :  { %v33_v28 = vadd.f32 %v32_v26, %v31_v24 }
  0x10   :  { %v53_v29 = vrot.slane %v52_v27, 2 }
  0x11   :  { %v34_v30 = vrot.slane %v33_v28, 1 }
  0x12   :  { %v54_v32 = vadd.f32 %v53_v29, %v52_v27 }
  0x13   :  { %v35_v33 = vadd.f32 %v34_v30, %v33_v28 }
  0x14   :  { %v55_v34 = vrot.slane %v54_v32, 1 }
  0x15   :  { %v36_v35 = vadd.f32 %v35_v33, %v21_v31 }
  0x16   :  { %v56_v37 = vadd.f32 %v55_v34, %v54_v32 }
  0x17   :  { %38 = vst.msk [vmem:[%s127_s1] sm:$0x1] %vm14_vm0, %v36_v35 }
  0x18   :  { %v57_v38 = vadd.f32 %v56_v37, %v39_v36 }
  0x1a   :  { %58 = vst.msk [vmem:[%s128_s2] sm:$0x1] %vm14_vm0, %v57_v38 }

// kernel: _lambda_.33
= control target key start
LH: loop header
LB: loop body
LE: loop exit
PB: predicated region body
PF: predicated region fallthrough
CT: control target
= control target key end

     0   :  { %vm31_vm0 = vcmask 523264   ;;  %s71_s0 = inlined_call_operand.vmem [shape: f32[8,64], index: 0, kind: input, shape index: {}]   ;;  %s72_s1 = inlined_call_operand.vmem [shape: f32[1,64], index: 1, kind: input, shape index: {}]   ;;  %s73_s2 = inlined_call_operand.vmem [shape: f32[1,64], index: 2, kind: input, shape index: {}]   ;;  %s74_s3 = inlined_call_operand.vmem [shape: f32[8,64], index: 3, kind: output, shape index: {}]  }
   0x1   :  { %v14_v0 = vld [vmem:[%s71_s0] sm:$0xff] }
   0x2   :  { %v37_v1 = vld [vmem:[%s72_s1] ss:$0 sm:$0xff] }
   0x3   :  { %v38_v2 = vld [vmem:[%s73_s2] ss:$0 sm:$0xff]  ;;  %v22_v3 = vmul.f32 %v37_v1, %v14_v0 }
   0x5   :  { %v30_v4 = vadd.f32 %v38_v2, %v22_v3 }
   0x7   :  { %32 = vst.msk [vmem:[%s74_s3] sm:$0xff] %vm31_vm0, %v30_v4 }

// kernel: _lambda_.32
= control target key start
LH: loop header
LB: loop body
LE: loop exit
PB: predicated region body
PF: predicated region fallthrough
CT: control target
= control target key end

     0   :  { %vm14_vm0 = vcmask 516096   ;;  %vm19_vm1 = vcmask 523264   ;;  %v50_v0 = vmov 0.0   ;;  %s91_s0 = inlined_call_operand.vmem [shape: f32[8,64], index: 0, kind: input, shape index: {}]   ;;  %s92_s1 = inlined_call_operand.vmem [shape: f32[1,64], index: 1, kind: output, shape index: {0}]   ;;  %s93_s2 = inlined_call_operand.vmem [shape: f32[1,64], index: 2, kind: output, shape index: {1}]  }
   0x1   :  { %15 = vst.msk [vmem:[%s92_s1] sm:$0x1] %vm14_vm0, %v50_v0  ;;  %v17_v1 = vld [vmem:[%s91_s0] sm:$0xff]  ;;  %16 = vst.msk [vmem:[%s93_s2] sm:$0x1] %vm14_vm0, %v50_v0 }
   0x2   :  { %v20_v2 = vsel %vm19_vm1, %v17_v1, 0.0  ;;  %v31_v3 = vmul.f32 %v17_v1, %v17_v1 }
   0x3   :  { %v21_v4 = vrot.slane %v20_v2, 4 }
   0x4   :  { %v32_v5 = vsel %vm19_vm1, %v31_v3, 0.0 }
   0x5   :  { %v22_v6 = vadd.f32 %v21_v4, %v20_v2  ;;  %v33_v7 = vrot.slane %v32_v5, 4 }
   0x7   :  { %v23_v8 = vrot.slane %v22_v6, 2  ;;  %v34_v9 = vadd.f32 %v33_v7, %v32_v5 }
   0x8   :  { %v18_v14 = vld [vmem:[%s92_s1] sm:$0x1] }
   0x9   :  { %v24_v10 = vadd.f32 %v23_v8, %v22_v6  ;;  %v35_v11 = vrot.slane %v34_v9, 2  ;;  %v30_v17 = vld [vmem:[%s93_s2] sm:$0x1] }
   0xb   :  { %v25_v12 = vrot.slane %v24_v10, 1  ;;  %v36_v13 = vadd.f32 %v35_v11, %v34_v9 }
   0xd   :  { %v26_v15 = vadd.f32 %v25_v12, %v24_v10  ;;  %v37_v16 = vrot.slane %v36_v13, 1 }
   0xf   :  { %v27_v18 = vadd.f32 %v26_v15, %v18_v14  ;;  %v38_v19 = vadd.f32 %v37_v16, %v36_v13 }
  0x11   :  { %29 = vst.msk [vmem:[%s92_s1] sm:$0x1] %vm14_vm0, %v27_v18  ;;  %v39_v20 = vadd.f32 %v38_v19, %v30_v17 }
  0x13   :  { %40 = vst.msk [vmem:[%s93_s2] sm:$0x1] %vm14_vm0, %v39_v20 }

// kernel: _lambda_.31
= control target key start
LH: loop header
LB: loop body
LE: loop exit
PB: predicated region body
PF: predicated region fallthrough
CT: control target
= control target key end

     0   :  { %s635_s1 = inlined_call_operand.vmem [shape: bf16[512,128], index: 1, kind: input, shape index: {}]   ;;  %s636_s0 = inlined_call_operand.vmem [shape: bf16[8,512], index: 0, kind: input, shape index: {}]   ;;  %s637_s2 = inlined_call_operand.vmem [shape: f32[1,128], index: 2, kind: input, shape index: {}]   ;;  %s638_s3 = inlined_call_operand.vmem [shape: f32[8,128], index: 3, kind: output, shape index: {}]  }
   0x1   :  { %v475_v0 = vld [vmem:[%s635_s1 + $0x40] sm:$0xff]   ;;  %v479_v4 = vld [vmem:[%s635_s1 + $0x48] sm:$0xff]   ;;  %v483_v8 = vld [vmem:[%s635_s1 + $0x50] sm:$0xff]  }
   0x2   :  { %v476_v1 = vld [vmem:[%s635_s1 + $0xc0] sm:$0xff]   ;;  %431 = vmatprep.subr.bf16.mxu0 %v475_v0  ;;  %v480_v5 = vld [vmem:[%s635_s1 + $0xc8] sm:$0xff]   ;;  %v484_v9 = vld [vmem:[%s635_s1 + $0xd0] sm:$0xff]  }
   0x3   :  { %v477_v2 = vld [vmem:[%s635_s1] sm:$0xff]   ;;  %453 = vmatprep.subr.bf16.mxu1 %v476_v1  ;;  %v481_v6 = vld [vmem:[%s635_s1 + $0x8] sm:$0xff]   ;;  %v485_v10 = vld [vmem:[%s635_s1 + $0x10] sm:$0xff]  }
   0x4   :  { %v478_v3 = vld [vmem:[%s635_s1 + $0x80] sm:$0xff]   ;;  %432 = vmatpush3.bf16.msra.mxu0 %v477_v2  ;;  %v482_v7 = vld [vmem:[%s635_s1 + $0x88] sm:$0xff]   ;;  %v486_v11 = vld [vmem:[%s635_s1 + $0x90] sm:$0xff]  }
   0x5   :  { %454 = vmatpush3.bf16.msra.mxu1 %v478_v3  ;;  %433 = vmatprep.subr.bf16.mxu0 %v479_v4  ;;  %v487_v12 = vld [vmem:[%s635_s1 + $0x58] sm:$0xff]   ;;  %v491_v16 = vld [vmem:[%s635_s1 + $0x60] sm:$0xff]   ;;  %v495_v20 = vld [vmem:[%s635_s1 + $0x68] sm:$0xff]  }
   0x6   :  { %455 = vmatprep.subr.bf16.mxu1 %v480_v5  ;;  %v488_v13 = vld [vmem:[%s635_s1 + $0xd8] sm:$0xff]   ;;  %v492_v17 = vld [vmem:[%s635_s1 + $0xe0] sm:$0xff]   ;;  %v496_v21 = vld [vmem:[%s635_s1 + $0xe8] sm:$0xff]  }
   0x7   :  { %v489_v14 = vld [vmem:[%s635_s1 + $0x18] sm:$0xff]   ;;  %v493_v18 = vld [vmem:[%s635_s1 + $0x20] sm:$0xff]   ;;  %v497_v22 = vld [vmem:[%s635_s1 + $0x28] sm:$0xff]  }
   0x8   :  { %434 = vmatpush3.bf16.msra.mxu0 %v481_v6  ;;  %v490_v15 = vld [vmem:[%s635_s1 + $0x98] sm:$0xff]   ;;  %v494_v19 = vld [vmem:[%s635_s1 + $0xa0] sm:$0xff]   ;;  %v498_v23 = vld [vmem:[%s635_s1 + $0xa8] sm:$0xff]  }
   0x9   :  { %456 = vmatpush3.bf16.msra.mxu1 %v482_v7  ;;  %435 = vmatprep.subr.bf16.mxu0 %v483_v8  ;;  %v499_v24 = vld [vmem:[%s635_s1 + $0x70] sm:$0xff]   ;;  %v503_v28 = vld [vmem:[%s635_s1 + $0x78] sm:$0xff]   ;;  %v20_v32 = vld [vmem:[%s636_s0] sm:$0xff] }
   0xa   :  { %457 = vmatprep.subr.bf16.mxu1 %v484_v9  ;;  %v500_v25 = vld [vmem:[%s635_s1 + $0xf0] sm:$0xff]   ;;  %v504_v29 = vld [vmem:[%s635_s1 + $0xf8] sm:$0xff]   ;;  %v21_v33 = vld [vmem:[%s636_s0 + $0x8] sm:$0xff]  ;;  %v22_v34 = vunpack.c.l.bf16 %v20_v32  ;;  %v23_v35 = vunpack.c.h.bf16 %v20_v32 }
   0xb   :  { %v501_v26 = vld [vmem:[%s635_s1 + $0x30] sm:$0xff]   ;;  %v505_v30 = vld [vmem:[%s635_s1 + $0x38] sm:$0xff]   ;;  %v24_v36 = vunpack.c.l.bf16 %v21_v33  ;;  %v25_v37 = vunpack.c.h.bf16 %v21_v33  ;;  %v430_v58 = vld [vmem:[%s637_s2] ss:$0 sm:$0xff] }
   0xc   :  { %436 = vmatpush3.bf16.msra.mxu0 %v485_v10  ;;  %v502_v27 = vld [vmem:[%s635_s1 + $0xb0] sm:$0xff]   ;;  %v506_v31 = vld [vmem:[%s635_s1 + $0xb8] sm:$0xff]   ;;  %vm27_vm0 = vcmp.ge.f32.partialorder %v23_v35, 0.0  ;;  %v31_v38 = vmul.f32 0.2, %v23_v35  ;;  %vm26_vm2 = vcmp.ge.f32.partialorder %v22_v34, 0.0 }
   0xd   :  { %458 = vmatpush3.bf16.msra.mxu1 %v486_v11  ;;  %437 = vmatprep.subr.bf16.mxu0 %v487_v12  ;;  %vm29_vm1 = vcmp.ge.f32.partialorder %v25_v37, 0.0  ;;  %v33_v39 = vmul.f32 0.2, %v25_v37  ;;  %v30_v40 = vmul.f32 0.2, %v22_v34  ;;  %vm28_vm3 = vcmp.ge.f32.partialorder %v24_v36, 0.0 }
   0xe   :  { %459 = vmatprep.subr.bf16.mxu1 %v488_v13  ;;  %v32_v41 = vmul.f32 0.2, %v24_v36  ;;  %v35_v42 = vsel %vm27_vm0, %v23_v35, %v31_v38 }
   0xf   :  { %v37_v43 = vsel %vm29_vm1, %v25_v37, %v33_v39  ;;  %v39_v44 = vpack.c.bf16 %v35_v42, %v35_v42  ;;  %v34_v46 = vsel %vm26_vm2, %v22_v34, %v30_v40 }
  0x10   :  { %438 = vmatpush3.bf16.msra.mxu0 %v489_v14  ;;  %v41_v45 = vpack.c.bf16 %v37_v43, %v37_v43  ;;  %v36_v47 = vsel %vm28_vm3, %v24_v36, %v32_v41  ;;  %v38_v48 = vpack.c.bf16 %v34_v46, %v34_v46 }
  0x11   :  { %460 = vmatpush3.bf16.msra.mxu1 %v490_v15  ;;  %439 = vmatprep.subr.bf16.mxu0 %v491_v16  ;;  %v40_v49 = vpack.c.bf16 %v36_v47, %v36_v47 }
  0x12   :  { %461 = vmatprep.subr.bf16.mxu1 %v492_v17  ;;  %331 = vmatprep.mubr.bf16.mxu0 %v39_v44 }
  0x13   :  { %371 = vmatprep.mubr.bf16.mxu1 %v41_v45 }
  0x14   :  { %440 = vmatpush3.bf16.msra.mxu0 %v493_v18 }
  0x15   :  { %462 = vmatpush3.bf16.msra.mxu1 %v494_v19  ;;  %441 = vmatprep.subr.bf16.mxu0 %v495_v20 }
  0x16   :  { %463 = vmatprep.subr.bf16.mxu1 %v496_v21 }
  0x18   :  { %442 = vmatpush3.bf16.msra.mxu0 %v497_v22 }
  0x19   :  { %464 = vmatpush3.bf16.msra.mxu1 %v498_v23  ;;  %443 = vmatprep.subr.bf16.mxu0 %v499_v24 }
  0x1a   :  { %465 = vmatprep.subr.bf16.mxu1 %v500_v25 }
  0x1c   :  { %444 = vmatpush3.bf16.msra.mxu0 %v501_v26 }
  0x1d   :  { %466 = vmatpush3.bf16.msra.mxu1 %v502_v27  ;;  %445 = vmatprep.subr.bf16.mxu0 %v503_v28 }
  0x1e   :  { %467 = vmatprep.subr.bf16.mxu1 %v504_v29 }
  0x20   :  { %446 = vmatpush3.bf16.msra.mxu0 %v505_v30 }
  0x21   :  { %468 = vmatpush3.bf16.msra.mxu1 %v506_v31 }
  0x23   :  { %332 = vmatmul.mubr.bf16.vlgmr.msra.gmra.mrb[0].mxu0 %v38_v48 }
  0x24   :  { %372 = vmatmul.mubr.bf16.vlgmr.msra.gmra.mrb[0].mxu1 %v40_v49 }
  0xf6   :  { %v447_v50 = vpop.f32.mrb[0].mxu0 }
  0xf7   :  { %v469_v51 = vpop.f32.mrb[0].mxu1  ;;  %v448_v52 = vpop.f32.mrb[1].mxu0 }
  0xf8   :  { %v470_v53 = vpop.f32.mrb[1].mxu1  ;;  %v449_v54 = vadd.f32 %v448_v52, %v447_v50  ;;  %v450_v56 = vpop.f32.mrb[2].mxu0 }
  0xf9   :  { %v471_v55 = vadd.f32 %v470_v53, %v469_v51  ;;  %v472_v57 = vpop.f32.mrb[2].mxu1  ;;  %v451_v59 = vpop.f32.mrb[3].mxu0 }
  0xfa   :  { %v473_v60 = vpop.f32.mrb[3].mxu1 }
  0xfb   :  { %v374_v61 = vadd.f32 %v471_v55, %v449_v54 }
  0xfd   :  { %v392_v62 = vadd.f32 %v430_v58, %v374_v61 }
  0xff   :  { %393 = vst [vmem:[%s638_s3] sm:$0xff] %v392_v62 }

// kernel: _lambda_.34
= control target key start
LH: loop header
LB: loop body
LE: loop exit
PB: predicated region body
PF: predicated region fallthrough
CT: control target
= control target key end

     0   :  { %s1203_s1 = inlined_call_operand.vmem [shape: bf16[1024,128], index: 1, kind: input, shape index: {}]   ;;  %s1204_s0 = inlined_call_operand.vmem [shape: bf16[8,1024], index: 0, kind: input, shape index: {}]   ;;  %s1205_s2 = inlined_call_operand.vmem [shape: f32[1,128], index: 2, kind: input, shape index: {}]   ;;  %s1206_s3 = inlined_call_operand.vmem [shape: f32[8,128], index: 3, kind: output, shape index: {}]  }
   0x1   :  { %v909_v0 = vld [vmem:[%s1203_s1 + $0x40] sm:$0xff]   ;;  %v913_v4 = vld [vmem:[%s1203_s1 + $0x48] sm:$0xff]   ;;  %v917_v8 = vld [vmem:[%s1203_s1 + $0x50] sm:$0xff]  }
   0x2   :  { %v910_v1 = vld [vmem:[%s1203_s1 + $0xc0] sm:$0xff]   ;;  %821 = vmatprep.subr.bf16.mxu0 %v909_v0  ;;  %v914_v5 = vld [vmem:[%s1203_s1 + $0xc8] sm:$0xff]   ;;  %v918_v9 = vld [vmem:[%s1203_s1 + $0xd0] sm:$0xff]  }
   0x3   :  { %v911_v2 = vld [vmem:[%s1203_s1] sm:$0xff]   ;;  %843 = vmatprep.subr.bf16.mxu1 %v910_v1  ;;  %v915_v6 = vld [vmem:[%s1203_s1 + $0x8] sm:$0xff]   ;;  %v919_v10 = vld [vmem:[%s1203_s1 + $0x10] sm:$0xff]  }
   0x4   :  { %v912_v3 = vld [vmem:[%s1203_s1 + $0x80] sm:$0xff]   ;;  %822 = vmatpush3.bf16.msra.mxu0 %v911_v2  ;;  %v916_v7 = vld [vmem:[%s1203_s1 + $0x88] sm:$0xff]   ;;  %v920_v11 = vld [vmem:[%s1203_s1 + $0x90] sm:$0xff]  }
   0x5   :  { %844 = vmatpush3.bf16.msra.mxu1 %v912_v3  ;;  %823 = vmatprep.subr.bf16.mxu0 %v913_v4  ;;  %v921_v12 = vld [vmem:[%s1203_s1 + $0x58] sm:$0xff]   ;;  %v925_v16 = vld [vmem:[%s1203_s1 + $0x60] sm:$0xff]   ;;  %v929_v20 = vld [vmem:[%s1203_s1 + $0x68] sm:$0xff]  }
   0x6   :  { %845 = vmatprep.subr.bf16.mxu1 %v914_v5  ;;  %v922_v13 = vld [vmem:[%s1203_s1 + $0xd8] sm:$0xff]   ;;  %v926_v17 = vld [vmem:[%s1203_s1 + $0xe0] sm:$0xff]   ;;  %v930_v21 = vld [vmem:[%s1203_s1 + $0xe8] sm:$0xff]  }
   0x7   :  { %v923_v14 = vld [vmem:[%s1203_s1 + $0x18] sm:$0xff]   ;;  %v927_v18 = vld [vmem:[%s1203_s1 + $0x20] sm:$0xff]   ;;  %v931_v22 = vld [vmem:[%s1203_s1 + $0x28] sm:$0xff]  }
   0x8   :  { %824 = vmatpush3.bf16.msra.mxu0 %v915_v6  ;;  %v924_v15 = vld [vmem:[%s1203_s1 + $0x98] sm:$0xff]   ;;  %v928_v19 = vld [vmem:[%s1203_s1 + $0xa0] sm:$0xff]   ;;  %v932_v23 = vld [vmem:[%s1203_s1 + $0xa8] sm:$0xff]  }
   0x9   :  { %846 = vmatpush3.bf16.msra.mxu1 %v916_v7  ;;  %825 = vmatprep.subr.bf16.mxu0 %v917_v8  ;;  %v933_v24 = vld [vmem:[%s1203_s1 + $0x70] sm:$0xff]   ;;  %v937_v28 = vld [vmem:[%s1203_s1 + $0x78] sm:$0xff]   ;;  %v20_v32 = vld [vmem:[%s1204_s0] sm:$0xff] }
   0xa   :  { %847 = vmatprep.subr.bf16.mxu1 %v918_v9  ;;  %v934_v25 = vld [vmem:[%s1203_s1 + $0xf0] sm:$0xff]   ;;  %v938_v29 = vld [vmem:[%s1203_s1 + $0xf8] sm:$0xff]   ;;  %v21_v33 = vld [vmem:[%s1204_s0 + $0x8] sm:$0xff]  ;;  %v24_v34 = vunpack.c.l.bf16 %v20_v32  ;;  %v25_v35 = vunpack.c.h.bf16 %v20_v32 }
   0xb   :  { %v935_v26 = vld [vmem:[%s1203_s1 + $0x30] sm:$0xff]   ;;  %v939_v30 = vld [vmem:[%s1203_s1 + $0x38] sm:$0xff]   ;;  %v26_v36 = vunpack.c.l.bf16 %v21_v33  ;;  %v27_v37 = vunpack.c.h.bf16 %v21_v33  ;;  %v941_v38 = vld [vmem:[%s1203_s1 + $0x140] sm:$0xff]  }
   0xc   :  { %826 = vmatpush3.bf16.msra.mxu0 %v919_v10  ;;  %v936_v27 = vld [vmem:[%s1203_s1 + $0xb0] sm:$0xff]   ;;  %v940_v31 = vld [vmem:[%s1203_s1 + $0xb8] sm:$0xff]   ;;  %v942_v39 = vld [vmem:[%s1203_s1 + $0x1c0] sm:$0xff]   ;;  %vm33_vm0 = vcmp.ge.f32.partialorder %v25_v35, 0.0  ;;  %v41_v40 = vmul.f32 0.2, %v25_v35 }
   0xd   :  { %848 = vmatpush3.bf16.msra.mxu1 %v920_v11  ;;  %827 = vmatprep.subr.bf16.mxu0 %v921_v12  ;;  %vm35_vm1 = vcmp.ge.f32.partialorder %v27_v37, 0.0  ;;  %v43_v41 = vmul.f32 0.2, %v27_v37  ;;  %vm32_vm2 = vcmp.ge.f32.partialorder %v24_v34, 0.0  ;;  %v40_v42 = vmul.f32 0.2, %v24_v34 }
   0xe   :  { %849 = vmatprep.subr.bf16.mxu1 %v922_v13  ;;  %vm34_vm3 = vcmp.ge.f32.partialorder %v26_v36, 0.0  ;;  %v42_v43 = vmul.f32 0.2, %v26_v36  ;;  %v49_v44 = vsel %vm33_vm0, %v25_v35, %v41_v40  ;;  %v943_v46 = vld [vmem:[%s1203_s1 + $0x100] sm:$0xff]   ;;  %v945_v54 = vld [vmem:[%s1203_s1 + $0x148] sm:$0xff]   ;;  %v949_v58 = vld [vmem:[%s1203_s1 + $0x150] sm:$0xff]  }
   0xf   :  { %v51_v45 = vsel %vm35_vm1, %v27_v37, %v43_v41  ;;  %v57_v47 = vpack.c.bf16 %v49_v44, %v49_v44  ;;  %v48_v49 = vsel %vm32_vm2, %v24_v34, %v40_v42  ;;  %v944_v51 = vld [vmem:[%s1203_s1 + $0x180] sm:$0xff]   ;;  %v946_v55 = vld [vmem:[%s1203_s1 + $0x1c8] sm:$0xff]   ;;  %v950_v59 = vld [vmem:[%s1203_s1 + $0x1d0] sm:$0xff]  }
  0x10   :  { %828 = vmatpush3.bf16.msra.mxu0 %v923_v14  ;;  %v59_v48 = vpack.c.bf16 %v51_v45, %v51_v45  ;;  %v50_v50 = vsel %vm34_vm3, %v26_v36, %v42_v43  ;;  %v56_v52 = vpack.c.bf16 %v48_v49, %v48_v49  ;;  %v947_v56 = vld [vmem:[%s1203_s1 + $0x108] sm:$0xff]   ;;  %v951_v60 = vld [vmem:[%s1203_s1 + $0x110] sm:$0xff]   ;;  %v953_v62 = vld [vmem:[%s1203_s1 + $0x158] sm:$0xff]  }
  0x11   :  { %850 = vmatpush3.bf16.msra.mxu1 %v924_v15  ;;  %829 = vmatprep.subr.bf16.mxu0 %v925_v16  ;;  %v58_v53 = vpack.c.bf16 %v50_v50, %v50_v50  ;;  %v948_v57 = vld [vmem:[%s1203_s1 + $0x188] sm:$0xff]   ;;  %v952_v61 = vld [vmem:[%s1203_s1 + $0x190] sm:$0xff]   ;;  %v954_v63 = vld [vmem:[%s1203_s1 + $0x1d8] sm:$0xff]  }
  0x12   :  { %851 = vmatprep.subr.bf16.mxu1 %v926_v17  ;;  %609 = vmatprep.mubr.bf16.mxu0 %v57_v47  ;;  %v955_v0 = vld [vmem:[%s1203_s1 + $0x118] sm:$0xff]   ;;  %v957_v2 = vld [vmem:[%s1203_s1 + $0x160] sm:$0xff]   ;;  %v961_v6 = vld [vmem:[%s1203_s1 + $0x168] sm:$0xff]  }
  0x13   :  { %649 = vmatprep.mubr.bf16.mxu1 %v59_v48  ;;  %v956_v1 = vld [vmem:[%s1203_s1 + $0x198] sm:$0xff]   ;;  %v958_v3 = vld [vmem:[%s1203_s1 + $0x1e0] sm:$0xff]   ;;  %v962_v7 = vld [vmem:[%s1203_s1 + $0x1e8] sm:$0xff]  }
  0x14   :  { %830 = vmatpush3.bf16.msra.mxu0 %v927_v18  ;;  %v959_v4 = vld [vmem:[%s1203_s1 + $0x120] sm:$0xff]   ;;  %v963_v8 = vld [vmem:[%s1203_s1 + $0x128] sm:$0xff]   ;;  %v965_v10 = vld [vmem:[%s1203_s1 + $0x170] sm:$0xff]  }
  0x15   :  { %852 = vmatpush3.bf16.msra.mxu1 %v928_v19  ;;  %831 = vmatprep.subr.bf16.mxu0 %v929_v20  ;;  %v960_v5 = vld [vmem:[%s1203_s1 + $0x1a0] sm:$0xff]   ;;  %v964_v9 = vld [vmem:[%s1203_s1 + $0x1a8] sm:$0xff]   ;;  %v966_v11 = vld [vmem:[%s1203_s1 + $0x1f0] sm:$0xff]  }
  0x16   :  { %853 = vmatprep.subr.bf16.mxu1 %v930_v21  ;;  %v967_v12 = vld [vmem:[%s1203_s1 + $0x130] sm:$0xff]   ;;  %v969_v14 = vld [vmem:[%s1203_s1 + $0x178] sm:$0xff]  }
  0x17   :  { %v968_v13 = vld [vmem:[%s1203_s1 + $0x1b0] sm:$0xff]   ;;  %v970_v15 = vld [vmem:[%s1203_s1 + $0x1f8] sm:$0xff]  }
  0x18   :  { %832 = vmatpush3.bf16.msra.mxu0 %v931_v22  ;;  %v971_v16 = vld [vmem:[%s1203_s1 + $0x138] sm:$0xff]   ;;  %v22_v18 = vld [vmem:[%s1204_s0 + $0x10] sm:$0xff] }
  0x19   :  { %854 = vmatpush3.bf16.msra.mxu1 %v932_v23  ;;  %833 = vmatprep.subr.bf16.mxu0 %v933_v24  ;;  %v972_v17 = vld [vmem:[%s1203_s1 + $0x1b8] sm:$0xff]   ;;  %v28_v19 = vunpack.c.l.bf16 %v22_v18  ;;  %v29_v20 = vunpack.c.h.bf16 %v22_v18 }
  0x1a   :  { %855 = vmatprep.subr.bf16.mxu1 %v934_v25  ;;  %v23_v21 = vld [vmem:[%s1204_s0 + $0x18] sm:$0xff] }
  0x1b   :  { %v30_v22 = vunpack.c.l.bf16 %v23_v21  ;;  %v31_v23 = vunpack.c.h.bf16 %v23_v21  ;;  %vm37_vm4 = vcmp.ge.f32.partialorder %v29_v20, 0.0  ;;  %v45_v24 = vmul.f32 0.2, %v29_v20 }
  0x1c   :  { %834 = vmatpush3.bf16.msra.mxu0 %v935_v26  ;;  %vm36_vm5 = vcmp.ge.f32.partialorder %v28_v19, 0.0  ;;  %v44_v25 = vmul.f32 0.2, %v28_v19 }
  0x1d   :  { %856 = vmatpush3.bf16.msra.mxu1 %v936_v27  ;;  %835 = vmatprep.subr.bf16.mxu0 %v937_v28  ;;  %vm39_vm6 = vcmp.ge.f32.partialorder %v31_v23, 0.0  ;;  %v47_v26 = vmul.f32 0.2, %v31_v23  ;;  %vm38_vm7 = vcmp.ge.f32.partialorder %v30_v22, 0.0  ;;  %v46_v27 = vmul.f32 0.2, %v30_v22 }
  0x1e   :  { %857 = vmatprep.subr.bf16.mxu1 %v938_v29  ;;  %v53_v28 = vsel %vm37_vm4, %v29_v20, %v45_v24  ;;  %v52_v29 = vsel %vm36_vm5, %v28_v19, %v44_v25 }
  0x1f   :  { %v60_v32 = vpack.c.bf16 %v52_v29, %v52_v29  ;;  %v54_v33 = vsel %vm38_vm7, %v30_v22, %v46_v27 }
  0x20   :  { %836 = vmatpush3.bf16.msra.mxu0 %v939_v30  ;;  %v61_v30 = vpack.c.bf16 %v53_v28, %v53_v28  ;;  %v62_v35 = vpack.c.bf16 %v54_v33, %v54_v33 }
  0x21   :  { %858 = vmatpush3.bf16.msra.mxu1 %v940_v31  ;;  %865 = vmatprep.subr.bf16.mxu0 %v941_v38  ;;  %v55_v31 = vsel %vm39_vm6, %v31_v23, %v47_v26 }
  0x22   :  { %887 = vmatprep.subr.bf16.mxu1 %v942_v39  ;;  %v63_v34 = vpack.c.bf16 %v55_v31, %v55_v31 }
  0x23   :  { %610 = vmatmul.mubr.bf16.vlgmr.msra.gmra.mrb[0].mxu0 %v56_v52 }
  0x24   :  { %650 = vmatmul.mubr.bf16.vlgmr.msra.gmra.mrb[0].mxu1 %v58_v53  ;;  %866 = vmatpush3.bf16.msra.mxu0 %v943_v46 }
  0x25   :  { %888 = vmatpush3.bf16.msra.mxu1 %v944_v51  ;;  %867 = vmatprep.subr.bf16.mxu0 %v945_v54 }
  0x26   :  { %889 = vmatprep.subr.bf16.mxu1 %v946_v55  ;;  %689 = vmatprep.mubr.bf16.mxu0 %v61_v30 }
  0x27   :  { %729 = vmatprep.mubr.bf16.mxu1 %v63_v34 }
  0x28   :  { %868 = vmatpush3.bf16.msra.mxu0 %v947_v56 }
  0x29   :  { %890 = vmatpush3.bf16.msra.mxu1 %v948_v57  ;;  %869 = vmatprep.subr.bf16.mxu0 %v949_v58  ;;  %v820_v58 = vld [vmem:[%s1205_s2] ss:$0 sm:$0xff] }
  0x2a   :  { %891 = vmatprep.subr.bf16.mxu1 %v950_v59 }
  0x2c   :  { %870 = vmatpush3.bf16.msra.mxu0 %v951_v60 }
  0x2d   :  { %892 = vmatpush3.bf16.msra.mxu1 %v952_v61  ;;  %871 = vmatprep.subr.bf16.mxu0 %v953_v62 }
  0x2e   :  { %893 = vmatprep.subr.bf16.mxu1 %v954_v63 }
  0x30   :  { %872 = vmatpush3.bf16.msra.mxu0 %v955_v0 }
  0x31   :  { %894 = vmatpush3.bf16.msra.mxu1 %v956_v1  ;;  %873 = vmatprep.subr.bf16.mxu0 %v957_v2 }
  0x32   :  { %895 = vmatprep.subr.bf16.mxu1 %v958_v3 }
  0x34   :  { %874 = vmatpush3.bf16.msra.mxu0 %v959_v4 }
  0x35   :  { %896 = vmatpush3.bf16.msra.mxu1 %v960_v5  ;;  %875 = vmatprep.subr.bf16.mxu0 %v961_v6 }
  0x36   :  { %897 = vmatprep.subr.bf16.mxu1 %v962_v7 }
  0x38   :  { %876 = vmatpush3.bf16.msra.mxu0 %v963_v8 }
  0x39   :  { %898 = vmatpush3.bf16.msra.mxu1 %v964_v9  ;;  %877 = vmatprep.subr.bf16.mxu0 %v965_v10 }
  0x3a   :  { %899 = vmatprep.subr.bf16.mxu1 %v966_v11 }
  0x3c   :  { %878 = vmatpush3.bf16.msra.mxu0 %v967_v12 }
  0x3d   :  { %900 = vmatpush3.bf16.msra.mxu1 %v968_v13  ;;  %879 = vmatprep.subr.bf16.mxu0 %v969_v14 }
  0x3e   :  { %901 = vmatprep.subr.bf16.mxu1 %v970_v15 }
  0x40   :  { %880 = vmatpush3.bf16.msra.mxu0 %v971_v16 }
  0x41   :  { %902 = vmatpush3.bf16.msra.mxu1 %v972_v17 }
  0x43   :  { %690 = vmatmul.mubr.bf16.vlgmr.msra.gmra.mrb[4].mxu0 %v60_v32 }
  0x44   :  { %730 = vmatmul.mubr.bf16.vlgmr.msra.gmra.mrb[4].mxu1 %v62_v35 }
  0xf6   :  { %v837_v36 = vpop.f32.mrb[0].mxu0 }
  0xf7   :  { %v859_v37 = vpop.f32.mrb[0].mxu1  ;;  %v838_v38 = vpop.f32.mrb[1].mxu0 }
  0xf8   :  { %v860_v39 = vpop.f32.mrb[1].mxu1  ;;  %v839_v40 = vadd.f32 %v838_v38, %v837_v36  ;;  %v840_v42 = vpop.f32.mrb[2].mxu0 }
  0xf9   :  { %v861_v41 = vadd.f32 %v860_v39, %v859_v37  ;;  %v862_v43 = vpop.f32.mrb[2].mxu1  ;;  %v841_v44 = vpop.f32.mrb[3].mxu0 }
  0xfa   :  { %v863_v45 = vpop.f32.mrb[3].mxu1 }
  0xfb   :  { %v652_v46 = vadd.f32 %v861_v41, %v839_v40 }
 0x116   :  { %v881_v47 = vpop.f32.mrb[4].mxu0 }
 0x117   :  { %v903_v48 = vpop.f32.mrb[4].mxu1  ;;  %v882_v49 = vpop.f32.mrb[5].mxu0 }
 0x118   :  { %v883_v50 = vadd.f32 %v882_v49, %v881_v47  ;;  %v904_v51 = vpop.f32.mrb[5].mxu1  ;;  %v884_v52 = vpop.f32.mrb[6].mxu0 }
 0x119   :  { %v905_v53 = vadd.f32 %v904_v51, %v903_v48  ;;  %v906_v54 = vpop.f32.mrb[6].mxu1  ;;  %v885_v55 = vpop.f32.mrb[7].mxu0 }
 0x11a   :  { %v692_v56 = vadd.f32 %v883_v50, %v652_v46  ;;  %v907_v57 = vpop.f32.mrb[7].mxu1 }
 0x11c   :  { %v732_v59 = vadd.f32 %v905_v53, %v692_v56 }
 0x11e   :  { %v750_v60 = vadd.f32 %v820_v58, %v732_v59 }
 0x120   :  { %751 = vst [vmem:[%s1206_s3] sm:$0xff] %v750_v60 }

// kernel: _lambda_.35
= control target key start
LH: loop header
LB: loop body
LE: loop exit
PB: predicated region body
PF: predicated region fallthrough
CT: control target
= control target key end

     0   :  { %vm473_vm0 = vcmask 523264   ;;  %s1066_s1 = inlined_call_operand.vmem [shape: bf16[576,256], index: 1, kind: input, shape index: {}]   ;;  %s1067_s0 = inlined_call_operand.vmem [shape: bf16[8,576], index: 0, kind: input, shape index: {}]   ;;  %s1068_s2 = inlined_call_operand.vmem [shape: f32[1,256], index: 2, kind: input, shape index: {}]   ;;  %s1069_s3 = inlined_call_operand.vmem [shape: f32[8,256], index: 3, kind: output, shape index: {}]  }
   0x1   :  { %v703_v0 = vld [vmem:[%s1066_s1 + $0x4] ss:$8 sps:$4 sm:$0xff]   ;;  %v707_v2 = vld [vmem:[%s1066_s1] ss:$8 sps:$4 sm:$0xff]   ;;  %v709_v4 = vld [vmem:[%s1066_s1 + $0x14] ss:$8 sps:$4 sm:$0xff]  }
   0x2   :  { %v705_v1 = vld [vmem:[%s1066_s1 + $0x104] ss:$8 sps:$4 sm:$0xff]   ;;  %477 = vmatprep.subr.bf16.mxu0 %v703_v0  ;;  %v708_v3 = vld [vmem:[%s1066_s1 + $0x100] ss:$8 sps:$4 sm:$0xff]   ;;  %v711_v5 = vld [vmem:[%s1066_s1 + $0x114] ss:$8 sps:$4 sm:$0xff]  }
   0x3   :  { %518 = vmatprep.subr.bf16.mxu1 %v705_v1  ;;  %478 = vmatpush1.bf16.msra.mxu0 %v707_v2  ;;  %v713_v6 = vld [vmem:[%s1066_s1 + $0x10] ss:$8 sps:$4 sm:$0xff]   ;;  %v715_v8 = vld [vmem:[%s1066_s1 + $0x24] ss:$8 sps:$4 sm:$0xff]   ;;  %v719_v10 = vld [vmem:[%s1066_s1 + $0x20] ss:$8 sps:$4 sm:$0xff]  }
   0x4   :  { %519 = vmatpush1.bf16.msra.mxu1 %v708_v3  ;;  %479 = vmatprep.subr.bf16.mxu0 %v709_v4  ;;  %v714_v7 = vld [vmem:[%s1066_s1 + $0x110] ss:$8 sps:$4 sm:$0xff]   ;;  %v717_v9 = vld [vmem:[%s1066_s1 + $0x124] ss:$8 sps:$4 sm:$0xff]   ;;  %v720_v11 = vld [vmem:[%s1066_s1 + $0x120] ss:$8 sps:$4 sm:$0xff]  }
   0x5   :  { %520 = vmatprep.subr.bf16.mxu1 %v711_v5  ;;  %v721_v12 = vld [vmem:[%s1066_s1 + $0x34] ss:$8 sps:$4 sm:$0xff]   ;;  %v725_v14 = vld [vmem:[%s1066_s1 + $0x30] ss:$8 sps:$4 sm:$0xff]   ;;  %v727_v16 = vld [vmem:[%s1066_s1 + $0x44] ss:$8 sps:$4 sm:$0xff]  }
   0x6   :  { %v723_v13 = vld [vmem:[%s1066_s1 + $0x134] ss:$8 sps:$4 sm:$0xff]   ;;  %v726_v15 = vld [vmem:[%s1066_s1 + $0x130] ss:$8 sps:$4 sm:$0xff]   ;;  %v729_v17 = vld [vmem:[%s1066_s1 + $0x144] ss:$8 sps:$4 sm:$0xff]  }
   0x7   :  { %480 = vmatpush1.bf16.msra.mxu0 %v713_v6  ;;  %v731_v18 = vld [vmem:[%s1066_s1 + $0x40] ss:$8 sps:$4 sm:$0xff]   ;;  %v733_v20 = vld [vmem:[%s1066_s1 + $0x54] ss:$8 sps:$4 sm:$0xff]   ;;  %v737_v22 = vld [vmem:[%s1066_s1 + $0x50] ss:$8 sps:$4 sm:$0xff]  }
   0x8   :  { %521 = vmatpush1.bf16.msra.mxu1 %v714_v7  ;;  %481 = vmatprep.subr.bf16.mxu0 %v715_v8  ;;  %v732_v19 = vld [vmem:[%s1066_s1 + $0x140] ss:$8 sps:$4 sm:$0xff]   ;;  %v735_v21 = vld [vmem:[%s1066_s1 + $0x154] ss:$8 sps:$4 sm:$0xff]   ;;  %v738_v23 = vld [vmem:[%s1066_s1 + $0x150] ss:$8 sps:$4 sm:$0xff]  }
   0x9   :  { %522 = vmatprep.subr.bf16.mxu1 %v717_v9  ;;  %v739_v24 = vld [vmem:[%s1066_s1 + $0x64] ss:$8 sps:$4 sm:$0xff]   ;;  %v743_v26 = vld [vmem:[%s1066_s1 + $0x60] ss:$8 sps:$4 sm:$0xff]   ;;  %v745_v28 = vld [vmem:[%s1066_s1 + $0x74] ss:$8 sps:$4 sm:$0xff]  }
   0xa   :  { %v741_v25 = vld [vmem:[%s1066_s1 + $0x164] ss:$8 sps:$4 sm:$0xff]   ;;  %v744_v27 = vld [vmem:[%s1066_s1 + $0x160] ss:$8 sps:$4 sm:$0xff]   ;;  %v747_v29 = vld [vmem:[%s1066_s1 + $0x174] ss:$8 sps:$4 sm:$0xff]  }
   0xb   :  { %482 = vmatpush1.bf16.msra.mxu0 %v719_v10  ;;  %v749_v30 = vld [vmem:[%s1066_s1 + $0x70] ss:$8 sps:$4 sm:$0xff]   ;;  %v751_v32 = vld [vmem:[%s1066_s1 + $0x84] ss:$8 sps:$4 sm:$0xff]   ;;  %v755_v34 = vld [vmem:[%s1066_s1 + $0x80] ss:$8 sps:$4 sm:$0xff]  }
   0xc   :  { %523 = vmatpush1.bf16.msra.mxu1 %v720_v11  ;;  %483 = vmatprep.subr.bf16.mxu0 %v721_v12  ;;  %v750_v31 = vld [vmem:[%s1066_s1 + $0x170] ss:$8 sps:$4 sm:$0xff]   ;;  %v753_v33 = vld [vmem:[%s1066_s1 + $0x184] ss:$8 sps:$4 sm:$0xff]   ;;  %v756_v35 = vld [vmem:[%s1066_s1 + $0x180] ss:$8 sps:$4 sm:$0xff]  }
   0xd   :  { %524 = vmatprep.subr.bf16.mxu1 %v723_v13  ;;  %v757_v36 = vld [vmem:[%s1066_s1 + $0x94] ss:$8 sps:$4 sm:$0xff]   ;;  %v761_v38 = vld [vmem:[%s1066_s1 + $0x90] ss:$8 sps:$4 sm:$0xff]   ;;  %v763_v40 = vld [vmem:[%s1066_s1 + $0xa4] ss:$8 sps:$4 sm:$0xff]  }
   0xe   :  { %v759_v37 = vld [vmem:[%s1066_s1 + $0x194] ss:$8 sps:$4 sm:$0xff]   ;;  %v762_v39 = vld [vmem:[%s1066_s1 + $0x190] ss:$8 sps:$4 sm:$0xff]   ;;  %v765_v41 = vld [vmem:[%s1066_s1 + $0x1a4] ss:$8 sps:$4 sm:$0xff]  }
   0xf   :  { %484 = vmatpush1.bf16.msra.mxu0 %v725_v14  ;;  %v767_v42 = vld [vmem:[%s1066_s1 + $0xa0] ss:$8 sps:$4 sm:$0xff]   ;;  %v769_v44 = vld [vmem:[%s1066_s1 + $0xb4] ss:$8 sps:$4 sm:$0xff]   ;;  %v773_v47 = vld [vmem:[%s1066_s1 + $0xb0] ss:$8 sps:$4 sm:$0xff]  }
  0x10   :  { %525 = vmatpush1.bf16.msra.mxu1 %v726_v15  ;;  %485 = vmatprep.subr.bf16.mxu0 %v727_v16  ;;  %v768_v43 = vld [vmem:[%s1066_s1 + $0x1a0] ss:$8 sps:$4 sm:$0xff]   ;;  %v771_v45 = vld [vmem:[%s1066_s1 + $0x1b4] ss:$8 sps:$4 sm:$0xff]   ;;  %v774_v50 = vld [vmem:[%s1066_s1 + $0x1b0] ss:$8 sps:$4 sm:$0xff]  }
  0x11   :  { %526 = vmatprep.subr.bf16.mxu1 %v729_v17  ;;  %v21_v46 = vld [vmem:[%s1067_s0] sm:$0xff]  ;;  %v22_v49 = vld [vmem:[%s1067_s0 + $0x8] sm:$0xff]  ;;  %v781_v60 = vld [vmem:[%s1066_s1 + $0xd4] ss:$8 sps:$4 sm:$0xff]  }
  0x12   :  { %v25_v48 = vunpack.c.h.bf16 %v21_v46  ;;  %v775_v51 = vld [vmem:[%s1066_s1 + $0xc4] ss:$8 sps:$4 sm:$0xff]   ;;  %v27_v52 = vunpack.c.h.bf16 %v22_v49  ;;  %v779_v56 = vld [vmem:[%s1066_s1 + $0xc0] ss:$8 sps:$4 sm:$0xff]   ;;  %v783_v61 = vld [vmem:[%s1066_s1 + $0x1d4] ss:$8 sps:$4 sm:$0xff]   ;;  %v24_v2 = vunpack.c.l.bf16 %v21_v46  ;;  %v26_v3 = vunpack.c.l.bf16 %v22_v49 }
  0x13   :  { %486 = vmatpush1.bf16.msra.mxu0 %v731_v18  ;;  %v777_v53 = vld [vmem:[%s1066_s1 + $0x1c4] ss:$8 sps:$4 sm:$0xff]   ;;  %v780_v58 = vld [vmem:[%s1066_s1 + $0x1c0] ss:$8 sps:$4 sm:$0xff]   ;;  %v785_v62 = vld [vmem:[%s1066_s1 + $0xd0] ss:$8 sps:$4 sm:$0xff]  }
  0x14   :  { %527 = vmatpush1.bf16.msra.mxu1 %v732_v19  ;;  %487 = vmatprep.subr.bf16.mxu0 %v733_v20  ;;  %v30_v54 = vmax.f32 %v25_v48, 0.0  ;;  %v32_v55 = vmax.f32 %v27_v52, 0.0  ;;  %v786_v63 = vld [vmem:[%s1066_s1 + $0x1d0] ss:$8 sps:$4 sm:$0xff]   ;;  %v787_v0 = vld [vmem:[%s1066_s1 + $0xe4] ss:$8 sps:$4 sm:$0xff]  }
  0x15   :  { %528 = vmatprep.subr.bf16.mxu1 %v735_v21  ;;  %v789_v1 = vld [vmem:[%s1066_s1 + $0x1e4] ss:$8 sps:$4 sm:$0xff]   ;;  %v791_v4 = vld [vmem:[%s1066_s1 + $0xe0] ss:$8 sps:$4 sm:$0xff]   ;;  %v793_v6 = vld [vmem:[%s1066_s1 + $0xf4] ss:$8 sps:$4 sm:$0xff]  }
  0x16   :  { %v35_v57 = vpack.c.bf16 %v30_v54, %v30_v54  ;;  %v37_v59 = vpack.c.bf16 %v32_v55, %v32_v55  ;;  %v792_v5 = vld [vmem:[%s1066_s1 + $0x1e0] ss:$8 sps:$4 sm:$0xff]   ;;  %v795_v7 = vld [vmem:[%s1066_s1 + $0x1f4] ss:$8 sps:$4 sm:$0xff]   ;;  %v29_v8 = vmax.f32 %v24_v2, 0.0  ;;  %v31_v9 = vmax.f32 %v26_v3, 0.0 }
  0x17   :  { %488 = vmatpush1.bf16.msra.mxu0 %v737_v22  ;;  %v797_v10 = vld [vmem:[%s1066_s1 + $0xf0] ss:$8 sps:$4 sm:$0xff]   ;;  %v801_v12 = vld [vmem:[%s1066_s1 + $0x204] ss:$8 sps:$4 sm:$0xff]   ;;  %v799_v15 = vld [vmem:[%s1066_s1 + $0x200] ss:$8 sps:$4 sm:$0xff]  }
  0x18   :  { %529 = vmatpush1.bf16.msra.mxu1 %v738_v23  ;;  %489 = vmatprep.subr.bf16.mxu0 %v739_v24  ;;  %v798_v11 = vld [vmem:[%s1066_s1 + $0x1f0] ss:$8 sps:$4 sm:$0xff]   ;;  %v34_v13 = vpack.c.bf16 %v29_v8, %v29_v8  ;;  %v36_v14 = vpack.c.bf16 %v31_v9, %v31_v9  ;;  %v804_v16 = vld [vmem:[%s1066_s1 + $0x214] ss:$8 sps:$4 sm:$0xff]   ;;  %v811_v19 = vmov 0  }
  0x19   :  { %530 = vmatprep.subr.bf16.mxu1 %v741_v25  ;;  %509 = vmatprep.mubr.bf16.mxu0 %v35_v57  ;;  %v23_v17 = vld [vmem:[%s1067_s0 + $0x10] sm:$0xf]  ;;  %v807_v20 = vld [vmem:[%s1066_s1 + $0x224] ss:$8 sps:$4 sm:$0xff]   ;;  %v805_v22 = vld [vmem:[%s1066_s1 + $0x220] ss:$8 sps:$4 sm:$0xff]  }
  0x1a   :  { %550 = vmatprep.mubr.bf16.mxu1 %v37_v59  ;;  %v802_v18 = vld [vmem:[%s1066_s1 + $0x210] ss:$8 sps:$4 sm:$0xff]   ;;  %v28_v21 = vunpack.c.l.bf16 %v23_v17  ;;  %v810_v23 = vld [vmem:[%s1066_s1 + $0x234] ss:$8 sps:$4 sm:$0xff]  }
  0x1b   :  { %490 = vmatpush1.bf16.msra.mxu0 %v743_v26  ;;  %v808_v25 = vld [vmem:[%s1066_s1 + $0x230] ss:$8 sps:$4 sm:$0xff]  }
  0x1c   :  { %531 = vmatpush1.bf16.msra.mxu1 %v744_v27  ;;  %491 = vmatprep.subr.bf16.mxu0 %v745_v28  ;;  %v33_v24 = vmax.f32 %v28_v21, 0.0 }
  0x1d   :  { %532 = vmatprep.subr.bf16.mxu1 %v747_v29 }
  0x1e   :  { %v38_v26 = vpack.c.bf16 %v33_v24, %v33_v24 }
  0x1f   :  { %492 = vmatpush1.bf16.msra.mxu0 %v749_v30 }
  0x20   :  { %533 = vmatpush1.bf16.msra.mxu1 %v750_v31  ;;  %493 = vmatprep.subr.bf16.mxu0 %v751_v32 }
  0x21   :  { %534 = vmatprep.subr.bf16.mxu1 %v753_v33 }
  0x23   :  { %494 = vmatpush1.bf16.msra.mxu0 %v755_v34 }
  0x24   :  { %535 = vmatpush1.bf16.msra.mxu1 %v756_v35  ;;  %495 = vmatprep.subr.bf16.mxu0 %v757_v36 }
  0x25   :  { %536 = vmatprep.subr.bf16.mxu1 %v759_v37  ;;  %v611_v37 = vlaneseq }
  0x27   :  { %496 = vmatpush1.bf16.msra.mxu0 %v761_v38  ;;  %v612_v38 = vshrl.u32 %v611_v37, 7 }
  0x28   :  { %537 = vmatpush1.bf16.msra.mxu1 %v762_v39  ;;  %497 = vmatprep.subr.bf16.mxu0 %v763_v40  ;;  %v609_v40 = vld [vmem:[%s1068_s2] sm:$0x3] }
  0x29   :  { %538 = vmatprep.subr.bf16.mxu1 %v765_v41  ;;  %v613_v39 = vsub.s32 0, %v612_v38  ;;  %v617_v41 = vsub.s32 1, %v612_v38 }
  0x2b   :  { %498 = vmatpush1.bf16.msra.mxu0 %v767_v42  ;;  %v614_v42 = vrot.slane %v609_v40, %v613_v39 }
  0x2c   :  { %539 = vmatpush1.bf16.msra.mxu1 %v768_v43  ;;  %499 = vmatprep.subr.bf16.mxu0 %v769_v44  ;;  %v618_v44 = vrot.slane %v609_v40, %v617_v41 }
  0x2d   :  { %540 = vmatprep.subr.bf16.mxu1 %v771_v45 }
  0x2f   :  { %500 = vmatpush1.bf16.msra.mxu0 %v773_v47 }
  0x30   :  { %541 = vmatpush1.bf16.msra.mxu1 %v774_v50  ;;  %501 = vmatprep.subr.bf16.mxu0 %v775_v51 }
  0x31   :  { %542 = vmatprep.subr.bf16.mxu1 %v777_v53 }
  0x33   :  { %502 = vmatpush1.bf16.msra.mxu0 %v779_v56 }
  0x34   :  { %543 = vmatpush1.bf16.msra.mxu1 %v780_v58  ;;  %503 = vmatprep.subr.bf16.mxu0 %v781_v60 }
  0x35   :  { %544 = vmatprep.subr.bf16.mxu1 %v783_v61 }
  0x37   :  { %504 = vmatpush1.bf16.msra.mxu0 %v785_v62 }
  0x38   :  { %545 = vmatpush1.bf16.msra.mxu1 %v786_v63  ;;  %505 = vmatprep.subr.bf16.mxu0 %v787_v0 }
  0x39   :  { %546 = vmatprep.subr.bf16.mxu1 %v789_v1 }
  0x3b   :  { %506 = vmatpush1.bf16.msra.mxu0 %v791_v4 }
  0x3c   :  { %547 = vmatpush1.bf16.msra.mxu1 %v792_v5  ;;  %507 = vmatprep.subr.bf16.mxu0 %v793_v6 }
  0x3d   :  { %548 = vmatprep.subr.bf16.mxu1 %v795_v7 }
  0x3f   :  { %508 = vmatpush1.bf16.msra.mxu0 %v797_v10 }
  0x40   :  { %549 = vmatpush1.bf16.msra.mxu1 %v798_v11  ;;  %559 = vmatprep.subr.bf16.mxu0 %v801_v12 }
  0x42   :  { %510 = vmatmul.mubr.bf16.vlgmr.msra.gmra.mrb[0].mxu0 %v34_v13 }
  0x43   :  { %551 = vmatmul.mubr.bf16.vlgmr.msra.gmra.mrb[0].mxu1 %v36_v14  ;;  %560 = vmatpush1.bf16.msra.mxu0 %v799_v15 }
  0x44   :  { %591 = vmatprep.mubr.bf16.mxu0 %v811_v19  ;;  %561 = vmatprep.subr.bf16.mxu0 %v804_v16 }
  0x47   :  { %562 = vmatpush1.bf16.msra.mxu0 %v802_v18 }
  0x48   :  { %563 = vmatprep.subr.bf16.mxu0 %v807_v20 }
  0x4b   :  { %564 = vmatpush1.bf16.msra.mxu0 %v805_v22 }
  0x4c   :  { %565 = vmatprep.subr.bf16.mxu0 %v810_v23 }
  0x4f   :  { %566 = vmatpush1.bf16.msra.mxu0 %v808_v25 }
  0x52   :  { %701 = vmatmul.mubr.msk.bf16.vlgmr.msra.gmra.mrb[4].mxu0 %vm473_vm0, %v38_v26 }
 0x115   :  { %v511_v27 = vpop.f32.mrb[0].mxu0 }
 0x116   :  { %v552_v28 = vpop.f32.mrb[0].mxu1  ;;  %v513_v30 = vpop.f32.mrb[1].mxu0 }
 0x117   :  { %v553_v29 = vadd.f32 %v552_v28, %v511_v27  ;;  %v554_v31 = vpop.f32.mrb[1].mxu1  ;;  %v515_v33 = vpop.f32.mrb[2].mxu0 }
 0x118   :  { %v555_v32 = vadd.f32 %v554_v31, %v513_v30  ;;  %v556_v34 = vpop.f32.mrb[2].mxu1  ;;  %v516_v35 = vpop.f32.mrb[3].mxu0 }
 0x119   :  { %v557_v36 = vpop.f32.mrb[3].mxu1 }
 0x125   :  { %v593_v43 = vpop.f32.mrb[4].mxu0 }
 0x126   :  { %v594_v45 = vadd.f32 %v593_v43, %v553_v29  ;;  %v595_v46 = vpop.f32.mrb[5].mxu0 }
 0x127   :  { %v596_v47 = vadd.f32 %v595_v46, %v555_v32  ;;  %v597_v48 = vpop.f32.mrb[6].mxu0 }
 0x128   :  { %v621_v49 = vadd.f32 %v614_v42, %v594_v45  ;;  %v598_v50 = vpop.f32.mrb[7].mxu0 }
 0x129   :  { %v622_v51 = vadd.f32 %v618_v44, %v596_v47 }
 0x12a   :  { %623 = vst [vmem:[%s1069_s3] sm:$0xff] %v621_v49 }
 0x12b   :  { %624 = vst [vmem:[%s1069_s3 + $0x8] sm:$0xff] %v622_v51 }

// kernel: _lambda_.38
= control target key start
LH: loop header
LB: loop body
LE: loop exit
PB: predicated region body
PF: predicated region fallthrough
CT: control target
= control target key end

     0   :  { %vm1113_vm0 = vmmov 0   ;;  %s1371_s1 = inlined_call_operand.vmem [shape: bf16[1152,128], index: 1, kind: input, shape index: {}]   ;;  %s1372_s0 = inlined_call_operand.vmem [shape: bf16[8,1152], index: 0, kind: input, shape index: {}]   ;;  %s1373_s2 = inlined_call_operand.vmem [shape: f32[1,128], index: 2, kind: input, shape index: {}]   ;;  %s1374_s3 = inlined_call_operand.vmem [shape: f32[8,128], index: 3, kind: output, shape index: {}]  }
   0x1   :  { %v1040_v0 = vld [vmem:[%s1371_s1 + $0x40] sm:$0xff]   ;;  %v1044_v4 = vld [vmem:[%s1371_s1 + $0x48] sm:$0xff]   ;;  %v1048_v8 = vld [vmem:[%s1371_s1 + $0x50] sm:$0xff]  }
   0x2   :  { %v1041_v1 = vld [vmem:[%s1371_s1 + $0xc0] sm:$0xff]   ;;  %921 = vmatprep.subr.bf16.mxu0 %v1040_v0  ;;  %v1045_v5 = vld [vmem:[%s1371_s1 + $0xc8] sm:$0xff]   ;;  %v1049_v9 = vld [vmem:[%s1371_s1 + $0xd0] sm:$0xff]  }
   0x3   :  { %v1042_v2 = vld [vmem:[%s1371_s1] sm:$0xff]   ;;  %943 = vmatprep.subr.bf16.mxu1 %v1041_v1  ;;  %v1046_v6 = vld [vmem:[%s1371_s1 + $0x8] sm:$0xff]   ;;  %v1050_v10 = vld [vmem:[%s1371_s1 + $0x10] sm:$0xff]  }
   0x4   :  { %v1043_v3 = vld [vmem:[%s1371_s1 + $0x80] sm:$0xff]   ;;  %922 = vmatpush3.bf16.msra.mxu0 %v1042_v2  ;;  %v1047_v7 = vld [vmem:[%s1371_s1 + $0x88] sm:$0xff]   ;;  %v1051_v11 = vld [vmem:[%s1371_s1 + $0x90] sm:$0xff]  }
   0x5   :  { %944 = vmatpush3.bf16.msra.mxu1 %v1043_v3  ;;  %923 = vmatprep.subr.bf16.mxu0 %v1044_v4  ;;  %v1052_v12 = vld [vmem:[%s1371_s1 + $0x58] sm:$0xff]   ;;  %v1056_v16 = vld [vmem:[%s1371_s1 + $0x60] sm:$0xff]   ;;  %v1060_v20 = vld [vmem:[%s1371_s1 + $0x68] sm:$0xff]  }
   0x6   :  { %945 = vmatprep.subr.bf16.mxu1 %v1045_v5  ;;  %v1053_v13 = vld [vmem:[%s1371_s1 + $0xd8] sm:$0xff]   ;;  %v1057_v17 = vld [vmem:[%s1371_s1 + $0xe0] sm:$0xff]   ;;  %v1061_v21 = vld [vmem:[%s1371_s1 + $0xe8] sm:$0xff]  }
   0x7   :  { %v1054_v14 = vld [vmem:[%s1371_s1 + $0x18] sm:$0xff]   ;;  %v1058_v18 = vld [vmem:[%s1371_s1 + $0x20] sm:$0xff]   ;;  %v1062_v22 = vld [vmem:[%s1371_s1 + $0x28] sm:$0xff]  }
   0x8   :  { %924 = vmatpush3.bf16.msra.mxu0 %v1046_v6  ;;  %v1055_v15 = vld [vmem:[%s1371_s1 + $0x98] sm:$0xff]   ;;  %v1059_v19 = vld [vmem:[%s1371_s1 + $0xa0] sm:$0xff]   ;;  %v1063_v23 = vld [vmem:[%s1371_s1 + $0xa8] sm:$0xff]  }
   0x9   :  { %946 = vmatpush3.bf16.msra.mxu1 %v1047_v7  ;;  %925 = vmatprep.subr.bf16.mxu0 %v1048_v8  ;;  %v1064_v24 = vld [vmem:[%s1371_s1 + $0x70] sm:$0xff]   ;;  %v1068_v28 = vld [vmem:[%s1371_s1 + $0x78] sm:$0xff]   ;;  %v20_v32 = vld [vmem:[%s1372_s0] sm:$0xff] }
   0xa   :  { %947 = vmatprep.subr.bf16.mxu1 %v1049_v9  ;;  %v1065_v25 = vld [vmem:[%s1371_s1 + $0xf0] sm:$0xff]   ;;  %v1069_v29 = vld [vmem:[%s1371_s1 + $0xf8] sm:$0xff]   ;;  %v21_v33 = vld [vmem:[%s1372_s0 + $0x8] sm:$0xff]  ;;  %v25_v34 = vunpack.c.l.bf16 %v20_v32  ;;  %v26_v35 = vunpack.c.h.bf16 %v20_v32 }
   0xb   :  { %v1066_v26 = vld [vmem:[%s1371_s1 + $0x30] sm:$0xff]   ;;  %v1070_v30 = vld [vmem:[%s1371_s1 + $0x38] sm:$0xff]   ;;  %v27_v36 = vunpack.c.l.bf16 %v21_v33  ;;  %v28_v37 = vunpack.c.h.bf16 %v21_v33  ;;  %v1072_v38 = vld [vmem:[%s1371_s1 + $0x140] sm:$0xff]  }
   0xc   :  { %926 = vmatpush3.bf16.msra.mxu0 %v1050_v10  ;;  %v1067_v27 = vld [vmem:[%s1371_s1 + $0xb0] sm:$0xff]   ;;  %v1071_v31 = vld [vmem:[%s1371_s1 + $0xb8] sm:$0xff]   ;;  %v34_v39 = vmax.f32 %v25_v34, 0.0  ;;  %v35_v40 = vmax.f32 %v26_v35, 0.0  ;;  %v1073_v43 = vld [vmem:[%s1371_s1 + $0x100] sm:$0xff]  }
   0xd   :  { %948 = vmatpush3.bf16.msra.mxu1 %v1051_v11  ;;  %927 = vmatprep.subr.bf16.mxu0 %v1052_v12  ;;  %v36_v41 = vmax.f32 %v27_v36, 0.0  ;;  %v37_v42 = vmax.f32 %v28_v37, 0.0  ;;  %v1074_v44 = vld [vmem:[%s1371_s1 + $0x1c0] sm:$0xff]   ;;  %v1076_v50 = vld [vmem:[%s1371_s1 + $0x148] sm:$0xff]   ;;  %v1080_v54 = vld [vmem:[%s1371_s1 + $0x150] sm:$0xff]  }
   0xe   :  { %949 = vmatprep.subr.bf16.mxu1 %v1053_v13  ;;  %v44_v45 = vpack.c.bf16 %v35_v40, %v35_v40  ;;  %v43_v47 = vpack.c.bf16 %v34_v39, %v34_v39  ;;  %v1075_v49 = vld [vmem:[%s1371_s1 + $0x180] sm:$0xff]   ;;  %v1077_v51 = vld [vmem:[%s1371_s1 + $0x108] sm:$0xff]   ;;  %v1081_v55 = vld [vmem:[%s1371_s1 + $0x110] sm:$0xff]  }
   0xf   :  { %v46_v46 = vpack.c.bf16 %v37_v42, %v37_v42  ;;  %v45_v48 = vpack.c.bf16 %v36_v41, %v36_v41  ;;  %v1078_v52 = vld [vmem:[%s1371_s1 + $0x1c8] sm:$0xff]   ;;  %v1082_v56 = vld [vmem:[%s1371_s1 + $0x1d0] sm:$0xff]   ;;  %v1084_v58 = vld [vmem:[%s1371_s1 + $0x158] sm:$0xff]  }
  0x10   :  { %928 = vmatpush3.bf16.msra.mxu0 %v1054_v14  ;;  %661 = vmatprep.mubr.bf16.mxu0 %v44_v45  ;;  %v1079_v53 = vld [vmem:[%s1371_s1 + $0x188] sm:$0xff]   ;;  %v1083_v57 = vld [vmem:[%s1371_s1 + $0x190] sm:$0xff]   ;;  %v1085_v59 = vld [vmem:[%s1371_s1 + $0x118] sm:$0xff]  }
  0x11   :  { %950 = vmatpush3.bf16.msra.mxu1 %v1055_v15  ;;  %929 = vmatprep.subr.bf16.mxu0 %v1056_v16  ;;  %v1086_v60 = vld [vmem:[%s1371_s1 + $0x1d8] sm:$0xff]   ;;  %v1088_v62 = vld [vmem:[%s1371_s1 + $0x160] sm:$0xff]   ;;  %v1092_v2 = vld [vmem:[%s1371_s1 + $0x168] sm:$0xff]  }
  0x12   :  { %951 = vmatprep.subr.bf16.mxu1 %v1057_v17  ;;  %701 = vmatprep.mubr.bf16.mxu1 %v46_v46  ;;  %v1087_v61 = vld [vmem:[%s1371_s1 + $0x198] sm:$0xff]   ;;  %v1089_v63 = vld [vmem:[%s1371_s1 + $0x120] sm:$0xff]   ;;  %v1093_v3 = vld [vmem:[%s1371_s1 + $0x128] sm:$0xff]  }
  0x13   :  { %v1090_v0 = vld [vmem:[%s1371_s1 + $0x1e0] sm:$0xff]   ;;  %v1094_v4 = vld [vmem:[%s1371_s1 + $0x1e8] sm:$0xff]   ;;  %v1096_v6 = vld [vmem:[%s1371_s1 + $0x170] sm:$0xff]  }
  0x14   :  { %930 = vmatpush3.bf16.msra.mxu0 %v1058_v18  ;;  %v1091_v1 = vld [vmem:[%s1371_s1 + $0x1a0] sm:$0xff]   ;;  %v1095_v5 = vld [vmem:[%s1371_s1 + $0x1a8] sm:$0xff]   ;;  %v1097_v7 = vld [vmem:[%s1371_s1 + $0x130] sm:$0xff]  }
  0x15   :  { %952 = vmatpush3.bf16.msra.mxu1 %v1059_v19  ;;  %931 = vmatprep.subr.bf16.mxu0 %v1060_v20  ;;  %v1098_v8 = vld [vmem:[%s1371_s1 + $0x1f0] sm:$0xff]   ;;  %v1100_v10 = vld [vmem:[%s1371_s1 + $0x178] sm:$0xff]   ;;  %v1108_v33 = vld [vmem:[%s1371_s1 + $0x220] sm:$0xff]  }
  0x16   :  { %953 = vmatprep.subr.bf16.mxu1 %v1061_v21  ;;  %v1099_v9 = vld [vmem:[%s1371_s1 + $0x1b0] sm:$0xff]   ;;  %v1101_v11 = vld [vmem:[%s1371_s1 + $0x138] sm:$0xff]   ;;  %v1109_v34 = vld [vmem:[%s1371_s1 + $0x228] sm:$0xff]  }
  0x17   :  { %v1102_v12 = vld [vmem:[%s1371_s1 + $0x1f8] sm:$0xff]   ;;  %v22_v13 = vld [vmem:[%s1372_s0 + $0x10] sm:$0xff]  ;;  %v24_v35 = vld [vmem:[%s1372_s0 + $0x20] sm:$0xf] }
  0x18   :  { %932 = vmatpush3.bf16.msra.mxu0 %v1062_v22  ;;  %v29_v14 = vunpack.c.l.bf16 %v22_v13  ;;  %v30_v15 = vunpack.c.h.bf16 %v22_v13  ;;  %v1103_v16 = vld [vmem:[%s1371_s1 + $0x1b8] sm:$0xff]   ;;  %v33_v36 = vunpack.c.l.bf16 %v24_v35  ;;  %v1110_v37 = vld [vmem:[%s1371_s1 + $0x230] sm:$0xff]  }
  0x19   :  { %954 = vmatpush3.bf16.msra.mxu1 %v1063_v23  ;;  %933 = vmatprep.subr.bf16.mxu0 %v1064_v24  ;;  %v23_v17 = vld [vmem:[%s1372_s0 + $0x18] sm:$0xff]  ;;  %v1104_v24 = vld [vmem:[%s1371_s1 + $0x200] sm:$0xff]  }
  0x1a   :  { %955 = vmatprep.subr.bf16.mxu1 %v1065_v25  ;;  %v31_v18 = vunpack.c.l.bf16 %v23_v17  ;;  %v32_v19 = vunpack.c.h.bf16 %v23_v17  ;;  %v38_v20 = vmax.f32 %v29_v14, 0.0  ;;  %v39_v21 = vmax.f32 %v30_v15, 0.0  ;;  %v1107_v32 = vld [vmem:[%s1371_s1 + $0x218] sm:$0xff]  }
  0x1b   :  { %v1111_v39 = vld [vmem:[%s1371_s1 + $0x238] sm:$0xff]  }
  0x1c   :  { %934 = vmatpush3.bf16.msra.mxu0 %v1066_v26  ;;  %v40_v22 = vmax.f32 %v31_v18, 0.0  ;;  %v41_v23 = vmax.f32 %v32_v19, 0.0  ;;  %v48_v25 = vpack.c.bf16 %v39_v21, %v39_v21  ;;  %v47_v26 = vpack.c.bf16 %v38_v20, %v38_v20 }
  0x1d   :  { %956 = vmatpush3.bf16.msra.mxu1 %v1067_v27  ;;  %935 = vmatprep.subr.bf16.mxu0 %v1068_v28  ;;  %v1112_v27 = vmov 0.0  }
  0x1e   :  { %957 = vmatprep.subr.bf16.mxu1 %v1069_v29  ;;  %v50_v28 = vpack.c.bf16 %v41_v23, %v41_v23  ;;  %v49_v29 = vpack.c.bf16 %v40_v22, %v40_v22 }
  0x20   :  { %936 = vmatpush3.bf16.msra.mxu0 %v1070_v30  ;;  %v1105_v30 = vld [vmem:[%s1371_s1 + $0x208] sm:$0xff]  }
  0x21   :  { %958 = vmatpush3.bf16.msra.mxu1 %v1071_v31  ;;  %965 = vmatprep.subr.bf16.mxu0 %v1072_v38  ;;  %v1106_v31 = vld [vmem:[%s1371_s1 + $0x210] sm:$0xff]   ;;  %v42_v38 = vmax.f32 %v33_v36, 0.0 }
  0x22   :  { %987 = vmatprep.subr.bf16.mxu1 %v1074_v44 }
  0x23   :  { %662 = vmatmul.mubr.bf16.vlgmr.msra.gmra.mrb[0].mxu0 %v43_v47  ;;  %v51_v40 = vpack.c.bf16 %v42_v38, %v42_v38 }
  0x24   :  { %702 = vmatmul.mubr.bf16.vlgmr.msra.gmra.mrb[0].mxu1 %v45_v48  ;;  %966 = vmatpush3.bf16.msra.mxu0 %v1073_v43 }
  0x25   :  { %988 = vmatpush3.bf16.msra.mxu1 %v1075_v49  ;;  %967 = vmatprep.subr.bf16.mxu0 %v1076_v50 }
  0x26   :  { %989 = vmatprep.subr.bf16.mxu1 %v1078_v52  ;;  %741 = vmatprep.mubr.bf16.mxu0 %v48_v25 }
  0x27   :  { %781 = vmatprep.mubr.bf16.mxu1 %v50_v28 }
  0x28   :  { %968 = vmatpush3.bf16.msra.mxu0 %v1077_v51 }
  0x29   :  { %990 = vmatpush3.bf16.msra.mxu1 %v1079_v53  ;;  %969 = vmatprep.subr.bf16.mxu0 %v1080_v54 }
  0x2a   :  { %991 = vmatprep.subr.bf16.mxu1 %v1082_v56 }
  0x2c   :  { %970 = vmatpush3.bf16.msra.mxu0 %v1081_v55 }
  0x2d   :  { %992 = vmatpush3.bf16.msra.mxu1 %v1083_v57  ;;  %971 = vmatprep.subr.bf16.mxu0 %v1084_v58 }
  0x2e   :  { %993 = vmatprep.subr.bf16.mxu1 %v1086_v60 }
  0x30   :  { %972 = vmatpush3.bf16.msra.mxu0 %v1085_v59 }
  0x31   :  { %994 = vmatpush3.bf16.msra.mxu1 %v1087_v61  ;;  %973 = vmatprep.subr.bf16.mxu0 %v1088_v62 }
  0x32   :  { %995 = vmatprep.subr.bf16.mxu1 %v1090_v0 }
  0x34   :  { %974 = vmatpush3.bf16.msra.mxu0 %v1089_v63 }
  0x35   :  { %996 = vmatpush3.bf16.msra.mxu1 %v1091_v1  ;;  %975 = vmatprep.subr.bf16.mxu0 %v1092_v2  ;;  %v920_v1 = vld [vmem:[%s1373_s2] ss:$0 sm:$0xff] }
  0x36   :  { %997 = vmatprep.subr.bf16.mxu1 %v1094_v4 }
  0x38   :  { %976 = vmatpush3.bf16.msra.mxu0 %v1093_v3 }
  0x39   :  { %998 = vmatpush3.bf16.msra.mxu1 %v1095_v5  ;;  %977 = vmatprep.subr.bf16.mxu0 %v1096_v6 }
  0x3a   :  { %999 = vmatprep.subr.bf16.mxu1 %v1098_v8 }
  0x3c   :  { %978 = vmatpush3.bf16.msra.mxu0 %v1097_v7 }
  0x3d   :  { %1000 = vmatpush3.bf16.msra.mxu1 %v1099_v9  ;;  %979 = vmatprep.subr.bf16.mxu0 %v1100_v10 }
  0x3e   :  { %1001 = vmatprep.subr.bf16.mxu1 %v1102_v12 }
  0x40   :  { %980 = vmatpush3.bf16.msra.mxu0 %v1101_v11 }
  0x41   :  { %1002 = vmatpush3.bf16.msra.mxu1 %v1103_v16  ;;  %1018 = vmatprep.subr.bf16.mxu0 %v1112_v27 }
  0x43   :  { %742 = vmatmul.mubr.bf16.vlgmr.msra.gmra.mrb[4].mxu0 %v47_v26 }
  0x44   :  { %1019 = vmatpush3.bf16.msra.mxu0 %v1104_v24  ;;  %782 = vmatmul.mubr.bf16.vlgmr.msra.gmra.mrb[4].mxu1 %v49_v29 }
  0x45   :  { %1020 = vmatprep.subr.bf16.mxu0 %v1112_v27  ;;  %1034 = vmatprep.mubr.msk.bf16.mxu0 %vm1113_vm0, %v1112_v27 }
  0x48   :  { %1021 = vmatpush3.bf16.msra.mxu0 %v1105_v30 }
  0x49   :  { %1022 = vmatprep.subr.bf16.mxu0 %v1112_v27 }
  0x4c   :  { %1023 = vmatpush3.bf16.msra.mxu0 %v1106_v31 }
  0x4d   :  { %1024 = vmatprep.subr.bf16.mxu0 %v1112_v27 }
  0x50   :  { %1025 = vmatpush3.bf16.msra.mxu0 %v1107_v32 }
  0x51   :  { %1026 = vmatprep.subr.bf16.mxu0 %v1112_v27 }
  0x54   :  { %1027 = vmatpush3.bf16.msra.mxu0 %v1108_v33 }
  0x55   :  { %1028 = vmatprep.subr.bf16.mxu0 %v1112_v27 }
  0x58   :  { %1029 = vmatpush3.bf16.msra.mxu0 %v1109_v34 }
  0x59   :  { %1030 = vmatprep.subr.bf16.mxu0 %v1112_v27 }
  0x5c   :  { %1031 = vmatpush3.bf16.msra.mxu0 %v1110_v37 }
  0x5d   :  { %1032 = vmatprep.subr.bf16.mxu0 %v1112_v27 }
  0x60   :  { %1033 = vmatpush3.bf16.msra.mxu0 %v1111_v39 }
  0x63   :  { %1035 = vmatmul.mubr.bf16.vlgmr.msra.gmra.mrb[8].mxu0 %v51_v40 }
  0xf6   :  { %v937_v41 = vpop.f32.mrb[0].mxu0 }
  0xf7   :  { %v959_v42 = vpop.f32.mrb[0].mxu1  ;;  %v938_v43 = vpop.f32.mrb[1].mxu0 }
  0xf8   :  { %v960_v44 = vpop.f32.mrb[1].mxu1  ;;  %v939_v45 = vadd.f32 %v938_v43, %v937_v41  ;;  %v940_v47 = vpop.f32.mrb[2].mxu0 }
  0xf9   :  { %v961_v46 = vadd.f32 %v960_v44, %v959_v42  ;;  %v962_v48 = vpop.f32.mrb[2].mxu1  ;;  %v941_v49 = vpop.f32.mrb[3].mxu0 }
  0xfa   :  { %v963_v50 = vpop.f32.mrb[3].mxu1 }
  0xfb   :  { %v704_v51 = vadd.f32 %v961_v46, %v939_v45 }
 0x116   :  { %v981_v52 = vpop.f32.mrb[4].mxu0 }
 0x117   :  { %v982_v53 = vpop.f32.mrb[5].mxu0  ;;  %v1003_v54 = vpop.f32.mrb[4].mxu1 }
 0x118   :  { %v983_v55 = vadd.f32 %v982_v53, %v981_v52  ;;  %v984_v56 = vpop.f32.mrb[6].mxu0  ;;  %v1004_v57 = vpop.f32.mrb[5].mxu1 }
 0x119   :  { %v985_v58 = vpop.f32.mrb[7].mxu0  ;;  %v1005_v59 = vadd.f32 %v1004_v57, %v1003_v54  ;;  %v1006_v60 = vpop.f32.mrb[6].mxu1 }
 0x11a   :  { %v744_v61 = vadd.f32 %v983_v55, %v704_v51  ;;  %v1007_v62 = vpop.f32.mrb[7].mxu1 }
 0x11c   :  { %v784_v63 = vadd.f32 %v1005_v59, %v744_v61 }
 0x136   :  { %v823_v0 = vpop.f32.mrb[8].mxu0 }
 0x137   :  { %v824_v2 = vadd.f32 %v823_v0, %v784_v63  ;;  %v1036_v3 = vpop.f32.mrb[9].mxu0 }
 0x138   :  { %v826_v4 = vpop.f32.mrb[10].mxu0 }
 0x139   :  { %v842_v5 = vadd.f32 %v920_v1, %v824_v2  ;;  %v1037_v6 = vpop.f32.mrb[11].mxu0 }
 0x13b   :  { %843 = vst [vmem:[%s1374_s3] sm:$0xff] %v842_v5 }

// kernel: _lambda_.41
= control target key start
LH: loop header
LB: loop body
LE: loop exit
PB: predicated region body
PF: predicated region fallthrough
CT: control target
= control target key end

     0   :  { %vm377_vm0 = vcmask 523264   ;;  %s887_s1 = inlined_call_operand.vmem [shape: bf16[576,128], index: 1, kind: input, shape index: {}]   ;;  %s888_s0 = inlined_call_operand.vmem [shape: bf16[32,576], index: 0, kind: input, shape index: {}]   ;;  %s889_s2 = inlined_call_operand.vmem [shape: f32[1,128], index: 2, kind: input, shape index: {}]   ;;  %s890_s3 = inlined_call_operand.vmem [shape: f32[32,128], index: 3, kind: output, shape index: {}]  }
   0x1   :  { %v678_v0 = vld [vmem:[%s887_s1 + $0x40] sm:$0xff]   ;;  %v682_v4 = vld [vmem:[%s887_s1 + $0x48] sm:$0xff]   ;;  %v686_v8 = vld [vmem:[%s887_s1 + $0x50] sm:$0xff]  }
   0x2   :  { %v679_v1 = vld [vmem:[%s887_s1 + $0xc0] sm:$0xff]   ;;  %604 = vmatprep.subr.bf16.mxu0 %v678_v0  ;;  %v683_v5 = vld [vmem:[%s887_s1 + $0xc8] sm:$0xff]   ;;  %v687_v9 = vld [vmem:[%s887_s1 + $0xd0] sm:$0xff]  }
   0x3   :  { %v680_v2 = vld [vmem:[%s887_s1] sm:$0xff]   ;;  %632 = vmatprep.subr.bf16.mxu1 %v679_v1  ;;  %v684_v6 = vld [vmem:[%s887_s1 + $0x8] sm:$0xff]   ;;  %v688_v10 = vld [vmem:[%s887_s1 + $0x10] sm:$0xff]  }
   0x4   :  { %v681_v3 = vld [vmem:[%s887_s1 + $0x80] sm:$0xff]   ;;  %605 = vmatpush3.bf16.msra.mxu0 %v680_v2  ;;  %v685_v7 = vld [vmem:[%s887_s1 + $0x88] sm:$0xff]   ;;  %v689_v11 = vld [vmem:[%s887_s1 + $0x90] sm:$0xff]  }
   0x5   :  { %633 = vmatpush3.bf16.msra.mxu1 %v681_v3  ;;  %606 = vmatprep.subr.bf16.mxu0 %v682_v4  ;;  %v690_v12 = vld [vmem:[%s887_s1 + $0x58] sm:$0xff]   ;;  %v694_v16 = vld [vmem:[%s887_s1 + $0x60] sm:$0xff]   ;;  %v698_v20 = vld [vmem:[%s887_s1 + $0x68] sm:$0xff]  }
   0x6   :  { %634 = vmatprep.subr.bf16.mxu1 %v683_v5  ;;  %v691_v13 = vld [vmem:[%s887_s1 + $0xd8] sm:$0xff]   ;;  %v695_v17 = vld [vmem:[%s887_s1 + $0xe0] sm:$0xff]   ;;  %v699_v21 = vld [vmem:[%s887_s1 + $0xe8] sm:$0xff]  }
   0x7   :  { %v692_v14 = vld [vmem:[%s887_s1 + $0x18] sm:$0xff]   ;;  %v696_v18 = vld [vmem:[%s887_s1 + $0x20] sm:$0xff]   ;;  %v700_v22 = vld [vmem:[%s887_s1 + $0x28] sm:$0xff]  }
   0x8   :  { %607 = vmatpush3.bf16.msra.mxu0 %v684_v6  ;;  %v693_v15 = vld [vmem:[%s887_s1 + $0x98] sm:$0xff]   ;;  %v697_v19 = vld [vmem:[%s887_s1 + $0xa0] sm:$0xff]   ;;  %v701_v23 = vld [vmem:[%s887_s1 + $0xa8] sm:$0xff]  }
   0x9   :  { %635 = vmatpush3.bf16.msra.mxu1 %v685_v7  ;;  %608 = vmatprep.subr.bf16.mxu0 %v686_v8  ;;  %v702_v24 = vld [vmem:[%s887_s1 + $0x70] sm:$0xff]   ;;  %v706_v28 = vld [vmem:[%s887_s1 + $0x78] sm:$0xff]   ;;  %v23_v32 = vld [vmem:[%s888_s0] sm:$0xff] }
   0xa   :  { %636 = vmatprep.subr.bf16.mxu1 %v687_v9  ;;  %v703_v25 = vld [vmem:[%s887_s1 + $0xf0] sm:$0xff]   ;;  %v707_v29 = vld [vmem:[%s887_s1 + $0xf8] sm:$0xff]   ;;  %v24_v34 = vld [vmem:[%s888_s0 + $0x8] sm:$0xff]  ;;  %v35_v35 = vunpack.c.l.bf16 %v23_v32  ;;  %v36_v36 = vunpack.c.h.bf16 %v23_v32 }
   0xb   :  { %v704_v26 = vld [vmem:[%s887_s1 + $0x30] sm:$0xff]   ;;  %v708_v30 = vld [vmem:[%s887_s1 + $0x38] sm:$0xff]   ;;  %v37_v40 = vunpack.c.l.bf16 %v24_v34  ;;  %v38_v41 = vunpack.c.h.bf16 %v24_v34  ;;  %v710_v44 = vld [vmem:[%s887_s1 + $0x100] sm:$0xff]  }
   0xc   :  { %609 = vmatpush3.bf16.msra.mxu0 %v688_v10  ;;  %v705_v27 = vld [vmem:[%s887_s1 + $0xb0] sm:$0xff]   ;;  %v709_v31 = vld [vmem:[%s887_s1 + $0xb8] sm:$0xff]   ;;  %v55_v45 = vmax.f32 %v35_v35, 0.0  ;;  %v56_v46 = vmax.f32 %v36_v36, 0.0  ;;  %v29_v49 = vld [vmem:[%s888_s0 + $0x28] sm:$0xff] }
   0xd   :  { %637 = vmatpush3.bf16.msra.mxu1 %v689_v11  ;;  %610 = vmatprep.subr.bf16.mxu0 %v690_v12  ;;  %v26_v33 = vld [vmem:[%s888_s0 + $0x14] sm:$0xff]  ;;  %v27_v39 = vld [vmem:[%s888_s0 + $0x1c] sm:$0xff]  ;;  %v57_v50 = vmax.f32 %v37_v40, 0.0  ;;  %v58_v51 = vmax.f32 %v38_v41, 0.0  ;;  %v46_v58 = vunpack.c.h.bf16 %v29_v49  ;;  %v33_v60 = vld [vmem:[%s888_s0 + $0x44] sm:$0xff]  ;;  %v45_v4 = vunpack.c.l.bf16 %v29_v49 }
   0xe   :  { %638 = vmatprep.subr.bf16.mxu1 %v691_v13  ;;  %v40_v37 = vunpack.c.l.bf16 %v26_v33  ;;  %v41_v38 = vunpack.c.h.bf16 %v26_v33  ;;  %v42_v42 = vunpack.c.l.bf16 %v27_v39  ;;  %v43_v43 = vunpack.c.h.bf16 %v27_v39  ;;  %v32_v54 = vld [vmem:[%s888_s0 + $0x3c] sm:$0xff]  ;;  %v30_v55 = vld [vmem:[%s888_s0 + $0x30] sm:$0xff]  ;;  %v711_v63 = vld [vmem:[%s887_s1 + $0x108] sm:$0xff]  }
   0xf   :  { %v51_v59 = vunpack.c.h.bf16 %v32_v54  ;;  %v48_v0 = vunpack.c.h.bf16 %v30_v55  ;;  %v53_v1 = vunpack.c.h.bf16 %v33_v60  ;;  %v66_v2 = vmax.f32 %v46_v58, 0.0  ;;  %v25_v6 = vld [vmem:[%s888_s0 + $0x10] ss:$20 sps:$4 sm:$0xff]  }
  0x10   :  { %611 = vmatpush3.bf16.msra.mxu0 %v692_v14  ;;  %v60_v47 = vmax.f32 %v40_v37, 0.0  ;;  %v61_v48 = vmax.f32 %v41_v38, 0.0  ;;  %v62_v52 = vmax.f32 %v42_v42, 0.0  ;;  %v63_v53 = vmax.f32 %v43_v43, 0.0 }
  0x11   :  { %639 = vmatpush3.bf16.msra.mxu1 %v693_v15  ;;  %612 = vmatprep.subr.bf16.mxu0 %v694_v16  ;;  %v71_v3 = vmax.f32 %v51_v59, 0.0  ;;  %v50_v5 = vunpack.c.l.bf16 %v32_v54  ;;  %v68_v7 = vmax.f32 %v48_v0, 0.0  ;;  %v73_v8 = vmax.f32 %v53_v1, 0.0  ;;  %v31_v15 = vld [vmem:[%s888_s0 + $0x38] ss:$20 sps:$4 sm:$0xff]  }
  0x12   :  { %640 = vmatprep.subr.bf16.mxu1 %v695_v17  ;;  %v76_v56 = vpack.c.bf16 %v61_v48, %v56_v46  ;;  %v75_v57 = vpack.c.bf16 %v60_v47, %v55_v45  ;;  %v78_v61 = vpack.c.bf16 %v63_v53, %v58_v51  ;;  %v77_v62 = vpack.c.bf16 %v62_v52, %v57_v50 }
  0x13   :  { %v47_v9 = vunpack.c.l.bf16 %v30_v55  ;;  %v52_v10 = vunpack.c.l.bf16 %v33_v60  ;;  %v81_v11 = vpack.c.bf16 %v71_v3, %v66_v2  ;;  %v65_v12 = vmax.f32 %v45_v4, 0.0 }
  0x14   :  { %613 = vmatpush3.bf16.msra.mxu0 %v696_v18  ;;  %416 = vmatprep.mubr.bf16.mxu0 %v76_v56  ;;  %v70_v13 = vmax.f32 %v50_v5, 0.0  ;;  %v39_v14 = vunpack.c.l.bf16 %v25_v6  ;;  %v83_v16 = vpack.c.bf16 %v73_v8, %v68_v7 }
  0x15   :  { %641 = vmatpush3.bf16.msra.mxu1 %v697_v19  ;;  %614 = vmatprep.subr.bf16.mxu0 %v698_v20  ;;  %v67_v17 = vmax.f32 %v47_v9, 0.0  ;;  %v72_v18 = vmax.f32 %v52_v10, 0.0  ;;  %v712_v19 = vld [vmem:[%s887_s1 + $0x110] sm:$0xff]   ;;  %v44_v20 = vunpack.c.h.bf16 %v25_v6 }
  0x16   :  { %642 = vmatprep.subr.bf16.mxu1 %v699_v21  ;;  %465 = vmatprep.mubr.bf16.mxu1 %v78_v61  ;;  %v59_v21 = vmax.f32 %v39_v14, 0.0  ;;  %v603_v61 = vld [vmem:[%s889_s2] ss:$0 sm:$0xff] }
  0x18   :  { %615 = vmatpush3.bf16.msra.mxu0 %v700_v22  ;;  %v80_v22 = vpack.c.bf16 %v70_v13, %v65_v12 }
  0x19   :  { %643 = vmatpush3.bf16.msra.mxu1 %v701_v23  ;;  %616 = vmatprep.subr.bf16.mxu0 %v702_v24  ;;  %v64_v23 = vmax.f32 %v44_v20, 0.0  ;;  %v49_v24 = vunpack.c.l.bf16 %v31_v15 }
  0x1a   :  { %644 = vmatprep.subr.bf16.mxu1 %v703_v25  ;;  %v54_v25 = vunpack.c.h.bf16 %v31_v15 }
  0x1c   :  { %617 = vmatpush3.bf16.msra.mxu0 %v704_v26  ;;  %v82_v26 = vpack.c.bf16 %v72_v18, %v67_v17 }
  0x1d   :  { %645 = vmatpush3.bf16.msra.mxu1 %v705_v27  ;;  %618 = vmatprep.subr.bf16.mxu0 %v706_v28  ;;  %v713_v27 = vld [vmem:[%s887_s1 + $0x118] sm:$0xff]   ;;  %v79_v28 = vpack.c.bf16 %v64_v23, %v59_v21 }
  0x1e   :  { %646 = vmatprep.subr.bf16.mxu1 %v707_v29  ;;  %v69_v29 = vmax.f32 %v49_v24, 0.0 }
  0x20   :  { %619 = vmatpush3.bf16.msra.mxu0 %v708_v30  ;;  %v74_v30 = vmax.f32 %v54_v25, 0.0 }
  0x21   :  { %647 = vmatpush3.bf16.msra.mxu1 %v709_v31  ;;  %666 = vmatprep.subr.bf16.mxu0 %v710_v44 }
  0x22   :  { %v84_v31 = vpack.c.bf16 %v74_v30, %v69_v29 }
  0x23   :  { %417 = vmatmul.mubr.bf16.vlgmr.msra.gmra.mrb[0].mxu0 %v75_v57 }
  0x24   :  { %466 = vmatmul.mubr.bf16.vlgmr.msra.gmra.mrb[0].mxu1 %v77_v62  ;;  %667 = vmatpush3.bf16.msra.mxu0 %v710_v44 }
  0x25   :  { %668 = vmatprep.subr.bf16.mxu0 %v711_v63  ;;  %424 = vmatprep.mubr.bf16.mxu0 %v81_v11 }
  0x26   :  { %473 = vmatprep.mubr.bf16.mxu1 %v83_v16 }
  0x28   :  { %669 = vmatpush3.bf16.msra.mxu0 %v711_v63 }
  0x29   :  { %670 = vmatprep.subr.bf16.mxu0 %v712_v19 }
  0x2b   :  { %425 = vmatmul.mubr.bf16.gmra.mrb[4].mxu0 %v80_v22 }
  0x2c   :  { %474 = vmatmul.mubr.bf16.gmra.mrb[4].mxu1 %v82_v26  ;;  %671 = vmatpush3.bf16.msra.mxu0 %v712_v19 }
  0x2d   :  { %672 = vmatprep.subr.bf16.mxu0 %v713_v27  ;;  %674 = vmatprep.mubr.msk.bf16.mxu0 %vm377_vm0, %v79_v28 }
  0x30   :  { %673 = vmatpush3.bf16.msra.mxu0 %v713_v27 }
  0x33   :  { %675 = vmatmul.mubr.msk.bf16.vlgmr.msra.gmra.mrb[8].mxu0 %vm377_vm0, %v84_v31 }
  0xf6   :  { %v620_v32 = vpop.f32.mrb[0].mxu0 }
  0xf7   :  { %v648_v33 = vpop.f32.mrb[0].mxu1  ;;  %v621_v34 = vpop.f32.mrb[1].mxu0 }
  0xf8   :  { %v622_v35 = vadd.f32 %v621_v34, %v620_v32  ;;  %v649_v36 = vpop.f32.mrb[1].mxu1  ;;  %v623_v37 = vpop.f32.mrb[2].mxu0 }
  0xf9   :  { %v650_v38 = vadd.f32 %v649_v36, %v648_v33  ;;  %v651_v39 = vpop.f32.mrb[2].mxu1  ;;  %v624_v40 = vpop.f32.mrb[3].mxu0 }
  0xfa   :  { %v625_v41 = vadd.f32 %v624_v40, %v623_v37  ;;  %v652_v42 = vpop.f32.mrb[3].mxu1 }
  0xfb   :  { %v653_v43 = vadd.f32 %v652_v42, %v651_v39  ;;  %v468_v44 = vadd.f32 %v650_v38, %v622_v35 }
  0xfd   :  { %v471_v45 = vadd.f32 %v653_v43, %v625_v41 }
  0xfe   :  { %v626_v46 = vpop.f32.mrb[4].mxu0 }
  0xff   :  { %v654_v47 = vpop.f32.mrb[4].mxu1  ;;  %v627_v48 = vpop.f32.mrb[5].mxu0 }
 0x100   :  { %v628_v49 = vadd.f32 %v627_v48, %v626_v46  ;;  %v655_v50 = vpop.f32.mrb[5].mxu1  ;;  %v629_v51 = vpop.f32.mrb[6].mxu0 }
 0x101   :  { %v656_v52 = vadd.f32 %v655_v50, %v654_v47  ;;  %v657_v53 = vpop.f32.mrb[6].mxu1  ;;  %v630_v54 = vpop.f32.mrb[7].mxu0 }
 0x102   :  { %v631_v55 = vadd.f32 %v630_v54, %v629_v51  ;;  %v658_v56 = vpop.f32.mrb[7].mxu1 }
 0x103   :  { %v659_v57 = vadd.f32 %v658_v56, %v657_v53  ;;  %v476_v58 = vadd.f32 %v656_v52, %v628_v49 }
 0x105   :  { %v479_v59 = vadd.f32 %v659_v57, %v631_v55 }
 0x106   :  { %v676_v60 = vpop.f32.mrb[8].mxu0 }
 0x107   :  { %v525_v62 = vadd.f32 %v676_v60, %v476_v58  ;;  %v516_v63 = vpop.f32.mrb[9].mxu0 }
 0x108   :  { %v517_v0 = vadd.f32 %v516_v63, %v468_v44  ;;  %v677_v1 = vpop.f32.mrb[10].mxu0 }
 0x109   :  { %v555_v2 = vadd.f32 %v603_v61, %v525_v62  ;;  %v528_v3 = vadd.f32 %v677_v1, %v479_v59  ;;  %v519_v4 = vpop.f32.mrb[11].mxu0 }
 0x10a   :  { %v553_v5 = vadd.f32 %v603_v61, %v517_v0  ;;  %v520_v6 = vadd.f32 %v519_v4, %v471_v45 }
 0x10b   :  { %559 = vst [vmem:[%s890_s3 + $0x10] sm:$0xff] %v555_v2  ;;  %v556_v7 = vadd.f32 %v603_v61, %v528_v3 }
 0x10c   :  { %557 = vst [vmem:[%s890_s3] sm:$0xff] %v553_v5  ;;  %v554_v8 = vadd.f32 %v603_v61, %v520_v6 }
 0x10d   :  { %560 = vst [vmem:[%s890_s3 + $0x18] sm:$0xff] %v556_v7 }
 0x10e   :  { %558 = vst [vmem:[%s890_s3 + $0x8] sm:$0xff] %v554_v8 }

// kernel: _lambda_.44
= control target key start
LH: loop header
LB: loop body
LE: loop exit
PB: predicated region body
PF: predicated region fallthrough
CT: control target
= control target key end

     0   :  { %vm347_vm0 = vcmask 261120   ;;  %s1050_s1 = inlined_call_operand.vmem [shape: bf16[288,128], index: 1, kind: input, shape index: {}]   ;;  %s1051_s0 = inlined_call_operand.vmem [shape: bf16[128,288], index: 0, kind: input, shape index: {}]   ;;  %s1052_s2 = inlined_call_operand.vmem [shape: f32[1,128], index: 2, kind: input, shape index: {}]   ;;  %s1053_s3 = inlined_call_operand.vmem [shape: f32[128,128], index: 3, kind: output, shape index: {}]  }
   0x1   :  { %v797_v0 = vld [vmem:[%s1050_s1 + $0x40] sm:$0xff]   ;;  %v799_v2 = vld [vmem:[%s1050_s1 + $0x48] sm:$0xff]   ;;  %v801_v4 = vld [vmem:[%s1050_s1 + $0x50] sm:$0xff]  }
   0x2   :  { %v798_v1 = vld [vmem:[%s1050_s1] sm:$0xff]   ;;  %687 = vmatprep.subr.bf16.mxu0 %v797_v0  ;;  %781 = vmatprep.subr.bf16.mxu1 %v797_v0  ;;  %v800_v3 = vld [vmem:[%s1050_s1 + $0x8] sm:$0xff]   ;;  %v802_v5 = vld [vmem:[%s1050_s1 + $0x10] sm:$0xff]  }
   0x3   :  { %688 = vmatpush3.bf16.msra.mxu0 %v798_v1  ;;  %789 = vmatpush3.bf16.msra.mxu1 %v798_v1  ;;  %v803_v6 = vld [vmem:[%s1050_s1 + $0x58] sm:$0xff]   ;;  %v805_v8 = vld [vmem:[%s1050_s1 + $0x60] sm:$0xff]   ;;  %v807_v10 = vld [vmem:[%s1050_s1 + $0x68] sm:$0xff]  }
   0x4   :  { %689 = vmatprep.subr.bf16.mxu0 %v799_v2  ;;  %782 = vmatprep.subr.bf16.mxu1 %v799_v2  ;;  %v804_v7 = vld [vmem:[%s1050_s1 + $0x18] sm:$0xff]   ;;  %v806_v9 = vld [vmem:[%s1050_s1 + $0x20] sm:$0xff]   ;;  %v37_v12 = vld [vmem:[%s1051_s0 + $0xc] sm:$0xff] }
   0x5   :  { %v35_v11 = vld [vmem:[%s1051_s0] sm:$0xff]  ;;  %v59_v13 = vld [vmem:[%s1051_s0 + $0x90] sm:$0xff]  ;;  %v71_v15 = vunpack.c.h.bf16 %v37_v12  ;;  %v808_v19 = vld [vmem:[%s1050_s1 + $0x28] sm:$0xff]   ;;  %v70_v28 = vunpack.c.l.bf16 %v37_v12 }
   0x6   :  { %v68_v14 = vunpack.c.h.bf16 %v35_v11  ;;  %v61_v16 = vld [vmem:[%s1051_s0 + $0x9c] sm:$0xff]  ;;  %v104_v17 = vunpack.c.h.bf16 %v59_v13  ;;  %v809_v20 = vld [vmem:[%s1050_s1 + $0x70] sm:$0xff]   ;;  %v67_v23 = vunpack.c.l.bf16 %v35_v11  ;;  %v41_v27 = vld [vmem:[%s1051_s0 + $0x24] sm:$0xff]  ;;  %v103_v30 = vunpack.c.l.bf16 %v59_v13 }
   0x7   :  { %690 = vmatpush3.bf16.msra.mxu0 %v800_v3  ;;  %790 = vmatpush3.bf16.msra.mxu1 %v800_v3  ;;  %v107_v18 = vunpack.c.h.bf16 %v61_v16  ;;  %v119_v22 = vmax.f32 %v71_v15, 0.0  ;;  %v39_v26 = vld [vmem:[%s1051_s0 + $0x18] sm:$0xff]  ;;  %v106_v31 = vunpack.c.l.bf16 %v61_v16  ;;  %v63_v32 = vld [vmem:[%s1051_s0 + $0xa8] sm:$0xff]  ;;  %v810_v35 = vld [vmem:[%s1050_s1 + $0x30] sm:$0xff]   ;;  %v77_v37 = vunpack.c.h.bf16 %v41_v27 }
   0x8   :  { %691 = vmatprep.subr.bf16.mxu0 %v801_v4  ;;  %783 = vmatprep.subr.bf16.mxu1 %v801_v4  ;;  %v116_v21 = vmax.f32 %v68_v14, 0.0  ;;  %v152_v24 = vmax.f32 %v104_v17, 0.0  ;;  %v65_v33 = vld [vmem:[%s1051_s0 + $0xb4] sm:$0xff]  ;;  %v74_v36 = vunpack.c.h.bf16 %v39_v26  ;;  %v110_v39 = vunpack.c.h.bf16 %v63_v32  ;;  %v45_v49 = vld [vmem:[%s1051_s0 + $0x3c] sm:$0xff]  ;;  %v814_v2 = vld [vmem:[%s1050_s1 + $0x88] sm:$0xff]  }
   0x9   :  { %v155_v25 = vmax.f32 %v107_v18, 0.0  ;;  %v811_v38 = vld [vmem:[%s1050_s1 + $0x78] sm:$0xff]   ;;  %v113_v40 = vunpack.c.h.bf16 %v65_v33  ;;  %v115_v41 = vmax.f32 %v67_v23, 0.0  ;;  %v118_v42 = vmax.f32 %v70_v28, 0.0  ;;  %v43_v48 = vld [vmem:[%s1051_s0 + $0x30] sm:$0xff]  ;;  %v813_v50 = vld [vmem:[%s1050_s1 + $0x80] sm:$0xff]  }
   0xa   :  { %v164_v29 = vpack.c.bf16 %v119_v22, %v116_v21  ;;  %v151_v43 = vmax.f32 %v103_v30, 0.0  ;;  %v154_v44 = vmax.f32 %v106_v31, 0.0  ;;  %v812_v45 = vld [vmem:[%s1050_s1 + $0x38] sm:$0xff]   ;;  %v122_v46 = vmax.f32 %v74_v36, 0.0  ;;  %v36_v53 = vld [vmem:[%s1051_s0 + $0x8] ss:$12 sps:$4 sm:$0xff]  }
   0xb   :  { %692 = vmatpush3.bf16.msra.mxu0 %v802_v5  ;;  %791 = vmatpush3.bf16.msra.mxu1 %v802_v5  ;;  %v182_v34 = vpack.c.bf16 %v155_v25, %v152_v24  ;;  %v125_v47 = vmax.f32 %v77_v37, 0.0  ;;  %v158_v51 = vmax.f32 %v110_v39, 0.0  ;;  %v161_v52 = vmax.f32 %v113_v40, 0.0  ;;  %v47_v12 = vld [vmem:[%s1051_s0 + $0x48] sm:$0xff]  ;;  %v49_v13 = vld [vmem:[%s1051_s0 + $0x54] sm:$0xff]  ;;  %v51_v36 = vld [vmem:[%s1051_s0 + $0x60] sm:$0xff] }
   0xc   :  { %693 = vmatprep.subr.bf16.mxu0 %v803_v6  ;;  %784 = vmatprep.subr.bf16.mxu1 %v803_v6  ;;  %v163_v54 = vpack.c.bf16 %v118_v42, %v115_v41  ;;  %v181_v55 = vpack.c.bf16 %v154_v44, %v151_v43  ;;  %v73_v56 = vunpack.c.l.bf16 %v39_v26  ;;  %v76_v57 = vunpack.c.l.bf16 %v41_v27  ;;  %v44_v14 = vld [vmem:[%s1051_s0 + $0x38] ss:$12 sps:$4 sm:$0xff]   ;;  %v48_v31 = vld [vmem:[%s1051_s0 + $0x50] ss:$12 sps:$4 sm:$0xff]  }
   0xd   :  { %404 = vmatprep.mubr.bf16.mxu0 %v164_v29  ;;  %452 = vmatprep.mubr.bf16.mxu1 %v182_v34  ;;  %v109_v58 = vunpack.c.l.bf16 %v63_v32  ;;  %v112_v59 = vunpack.c.l.bf16 %v65_v33  ;;  %v80_v60 = vunpack.c.h.bf16 %v43_v48  ;;  %v83_v61 = vunpack.c.h.bf16 %v45_v49  ;;  %v53_v37 = vld [vmem:[%s1051_s0 + $0x6c] sm:$0xff] }
   0xe   :  { %v167_v62 = vpack.c.bf16 %v125_v47, %v122_v46  ;;  %v69_v63 = vunpack.c.l.bf16 %v36_v53  ;;  %v72_v0 = vunpack.c.h.bf16 %v36_v53  ;;  %v185_v1 = vpack.c.bf16 %v161_v52, %v158_v51 }
   0xf   :  { %694 = vmatpush3.bf16.msra.mxu0 %v804_v7  ;;  %792 = vmatpush3.bf16.msra.mxu1 %v804_v7  ;;  %v121_v3 = vmax.f32 %v73_v56, 0.0  ;;  %v124_v4 = vmax.f32 %v76_v57, 0.0  ;;  %v157_v5 = vmax.f32 %v109_v58, 0.0  ;;  %v160_v6 = vmax.f32 %v112_v59, 0.0  ;;  %v56_v57 = vld [vmem:[%s1051_s0 + $0x80] ss:$12 sps:$4 sm:$0xff]  }
  0x10   :  { %695 = vmatprep.subr.bf16.mxu0 %v805_v8  ;;  %785 = vmatprep.subr.bf16.mxu1 %v805_v8  ;;  %v128_v7 = vmax.f32 %v80_v60, 0.0  ;;  %v131_v8 = vmax.f32 %v83_v61, 0.0  ;;  %v120_v11 = vmax.f32 %v72_v0, 0.0  ;;  %v79_v15 = vunpack.c.l.bf16 %v43_v48  ;;  %v55_v60 = vld [vmem:[%s1051_s0 + $0x78] sm:$0xff]  ;;  %v57_v61 = vld [vmem:[%s1051_s0 + $0x84] sm:$0xff] }
  0x11   :  { %v82_v16 = vunpack.c.l.bf16 %v45_v49  ;;  %v86_v22 = vunpack.c.h.bf16 %v47_v12  ;;  %v89_v24 = vunpack.c.h.bf16 %v49_v13  ;;  %v81_v25 = vunpack.c.l.bf16 %v44_v14 }
  0x12   :  { %v170_v21 = vpack.c.bf16 %v131_v8, %v128_v7  ;;  %v84_v26 = vunpack.c.h.bf16 %v44_v14  ;;  %v127_v27 = vmax.f32 %v79_v15, 0.0  ;;  %v85_v41 = vunpack.c.l.bf16 %v47_v12 }
  0x13   :  { %696 = vmatpush3.bf16.msra.mxu0 %v806_v9  ;;  %793 = vmatpush3.bf16.msra.mxu1 %v806_v9  ;;  %v40_v9 = vld [vmem:[%s1051_s0 + $0x20] ss:$12 sps:$4 sm:$0xff]   ;;  %v130_v28 = vmax.f32 %v82_v16, 0.0  ;;  %v134_v32 = vmax.f32 %v86_v22, 0.0  ;;  %v137_v33 = vmax.f32 %v89_v24, 0.0  ;;  %v129_v34 = vmax.f32 %v81_v25, 0.0 }
  0x14   :  { %697 = vmatprep.subr.bf16.mxu0 %v807_v10  ;;  %786 = vmatprep.subr.bf16.mxu1 %v807_v10  ;;  %v117_v10 = vmax.f32 %v69_v63, 0.0  ;;  %v75_v17 = vunpack.c.l.bf16 %v40_v9  ;;  %v78_v18 = vunpack.c.h.bf16 %v40_v9  ;;  %v88_v42 = vunpack.c.l.bf16 %v49_v13 }
  0x15   :  { %v169_v39 = vpack.c.bf16 %v130_v28, %v127_v27  ;;  %v87_v43 = vunpack.c.l.bf16 %v48_v31  ;;  %v90_v44 = vunpack.c.h.bf16 %v48_v31  ;;  %v95_v46 = vunpack.c.h.bf16 %v53_v37 }
  0x16   :  { %v165_v23 = vpack.c.bf16 %v120_v11, %v117_v10  ;;  %v123_v29 = vmax.f32 %v75_v17, 0.0  ;;  %v126_v30 = vmax.f32 %v78_v18, 0.0  ;;  %v173_v47 = vpack.c.bf16 %v137_v33, %v134_v32 }
  0x17   :  { %698 = vmatpush3.bf16.msra.mxu0 %v808_v19  ;;  %794 = vmatpush3.bf16.msra.mxu1 %v808_v19  ;;  %v166_v19 = vpack.c.bf16 %v124_v4, %v121_v3  ;;  %v133_v51 = vmax.f32 %v85_v41, 0.0  ;;  %v136_v52 = vmax.f32 %v88_v42, 0.0  ;;  %v135_v53 = vmax.f32 %v87_v43, 0.0 }
  0x18   :  { %699 = vmatprep.subr.bf16.mxu0 %v809_v20  ;;  %787 = vmatprep.subr.bf16.mxu1 %v809_v20  ;;  %v184_v20 = vpack.c.bf16 %v160_v6, %v157_v5  ;;  %v168_v40 = vpack.c.bf16 %v126_v30, %v123_v29  ;;  %v143_v56 = vmax.f32 %v95_v46, 0.0  ;;  %v91_v63 = vunpack.c.l.bf16 %v51_v36 }
  0x19   :  { %v94_v0 = vunpack.c.l.bf16 %v53_v37  ;;  %v172_v3 = vpack.c.bf16 %v136_v52, %v133_v51  ;;  %v98_v6 = vunpack.c.h.bf16 %v55_v60  ;;  %v101_v8 = vunpack.c.h.bf16 %v57_v61 }
  0x1a   :  { %v139_v11 = vmax.f32 %v91_v63, 0.0  ;;  %v97_v22 = vunpack.c.l.bf16 %v55_v60  ;;  %v980_v60 = vld [vmem:[%s1052_s2] ss:$0 sm:$0xff] }
  0x1b   :  { %700 = vmatpush3.bf16.msra.mxu0 %v810_v35  ;;  %795 = vmatpush3.bf16.msra.mxu1 %v810_v35  ;;  %v132_v35 = vmax.f32 %v84_v26, 0.0  ;;  %v142_v12 = vmax.f32 %v94_v0, 0.0  ;;  %v146_v15 = vmax.f32 %v98_v6, 0.0  ;;  %v149_v16 = vmax.f32 %v101_v8, 0.0 }
  0x1c   :  { %701 = vmatprep.subr.bf16.mxu0 %v811_v38  ;;  %788 = vmatprep.subr.bf16.mxu1 %v811_v38  ;;  %v52_v38 = vld [vmem:[%s1051_s0 + $0x68] ss:$12 sps:$4 sm:$0xff]   ;;  %v145_v28 = vmax.f32 %v97_v22, 0.0 }
  0x1d   :  { %v171_v48 = vpack.c.bf16 %v132_v35, %v129_v34  ;;  %v93_v49 = vunpack.c.l.bf16 %v52_v38  ;;  %v179_v26 = vpack.c.bf16 %v149_v16, %v146_v15 }
  0x1f   :  { %702 = vmatpush3.bf16.msra.mxu0 %v812_v45  ;;  %796 = vmatpush3.bf16.msra.mxu1 %v812_v45  ;;  %v92_v45 = vunpack.c.h.bf16 %v51_v36  ;;  %v141_v58 = vmax.f32 %v93_v49, 0.0 }
  0x20   :  { %761 = vmatprep.subr.bf16.mxu1 %v813_v50 }
  0x22   :  { %405 = vmatmul.mubr.bf16.vlgmr.msra.gmra.mrb[0].mxu0 %v163_v54  ;;  %453 = vmatmul.mubr.bf16.vlgmr.msra.gmra.mrb[0].mxu1 %v181_v55  ;;  %v138_v54 = vmax.f32 %v90_v44, 0.0  ;;  %v140_v55 = vmax.f32 %v92_v45, 0.0 }
  0x23   :  { %762 = vmatpush3.bf16.msra.mxu1 %v813_v50  ;;  %412 = vmatprep.mubr.bf16.mxu0 %v167_v62  ;;  %v96_v50 = vunpack.c.h.bf16 %v52_v38  ;;  %v60_v62 = vld [vmem:[%s1051_s0 + $0x98] ss:$12 sps:$4 sm:$0xff]  }
  0x24   :  { %460 = vmatprep.mubr.bf16.mxu1 %v185_v1  ;;  %763 = vmatprep.subr.bf16.mxu1 %v814_v2  ;;  %v99_v1 = vunpack.c.l.bf16 %v56_v57  ;;  %v174_v4 = vpack.c.bf16 %v138_v54, %v135_v53  ;;  %v176_v5 = vpack.c.bf16 %v143_v56, %v140_v55  ;;  %v105_v9 = vunpack.c.l.bf16 %v60_v62 }
  0x25   :  { %v144_v59 = vmax.f32 %v96_v50, 0.0  ;;  %v108_v10 = vunpack.c.h.bf16 %v60_v62 }
  0x26   :  { %v147_v13 = vmax.f32 %v99_v1, 0.0  ;;  %v153_v17 = vmax.f32 %v105_v9, 0.0 }
  0x27   :  { %764 = vmatpush3.bf16.msra.mxu1 %v814_v2  ;;  %v102_v2 = vunpack.c.h.bf16 %v56_v57  ;;  %v177_v7 = vpack.c.bf16 %v144_v59, %v141_v58  ;;  %v156_v18 = vmax.f32 %v108_v10, 0.0 }
  0x29   :  { %v150_v14 = vmax.f32 %v102_v2, 0.0  ;;  %v183_v27 = vpack.c.bf16 %v156_v18, %v153_v17 }
  0x2a   :  { %413 = vmatmul.mubr.bf16.gmra.mrb[4].mxu0 %v166_v19  ;;  %461 = vmatmul.mubr.bf16.gmra.mrb[4].mxu1 %v184_v20  ;;  %v64_v19 = vld [vmem:[%s1051_s0 + $0xb0] ss:$12 sps:$4 sm:$0xff]   ;;  %v175_v20 = vpack.c.bf16 %v142_v12, %v139_v11 }
  0x2b   :  { %420 = vmatprep.mubr.bf16.mxu0 %v170_v21  ;;  %765 = vmatprep.mubr.msk.bf16.mxu1 %vm347_vm0, %v165_v23  ;;  %v180_v21 = vpack.c.bf16 %v150_v14, %v147_v13  ;;  %v100_v23 = vunpack.c.l.bf16 %v57_v61  ;;  %v111_v24 = vunpack.c.l.bf16 %v64_v19  ;;  %v114_v25 = vunpack.c.h.bf16 %v64_v19 }
  0x2d   :  { %v148_v29 = vmax.f32 %v100_v23, 0.0  ;;  %v159_v30 = vmax.f32 %v111_v24, 0.0  ;;  %v162_v31 = vmax.f32 %v114_v25, 0.0 }
  0x2f   :  { %v178_v32 = vpack.c.bf16 %v148_v29, %v145_v28  ;;  %v186_v33 = vpack.c.bf16 %v162_v31, %v159_v30 }
  0x32   :  { %421 = vmatmul.mubr.bf16.gmra.mrb[8].mxu0 %v169_v39  ;;  %766 = vmatmul.mubr.msk.bf16.vlgmr.msra.gmra.mrb[8].mxu1 %vm347_vm0, %v168_v40 }
  0x33   :  { %428 = vmatprep.mubr.bf16.mxu0 %v173_v47  ;;  %769 = vmatprep.mubr.msk.bf16.mxu1 %vm347_vm0, %v171_v48 }
  0x3a   :  { %429 = vmatmul.mubr.bf16.gmra.mrb[12].mxu0 %v172_v3  ;;  %770 = vmatmul.mubr.msk.bf16.gmra.mrb[12].mxu1 %vm347_vm0, %v174_v4 }
  0x3b   :  { %436 = vmatprep.mubr.bf16.mxu0 %v176_v5  ;;  %773 = vmatprep.mubr.msk.bf16.mxu1 %vm347_vm0, %v177_v7 }
  0x42   :  { %437 = vmatmul.mubr.bf16.gmra.mrb[16].mxu0 %v175_v20  ;;  %774 = vmatmul.mubr.msk.bf16.gmra.mrb[16].mxu1 %vm347_vm0, %v180_v21 }
  0x43   :  { %444 = vmatprep.mubr.bf16.mxu0 %v179_v26  ;;  %777 = vmatprep.mubr.msk.bf16.mxu1 %vm347_vm0, %v183_v27 }
  0x4a   :  { %445 = vmatmul.mubr.bf16.gmra.mrb[20].mxu0 %v178_v32  ;;  %778 = vmatmul.mubr.msk.bf16.gmra.mrb[20].mxu1 %vm347_vm0, %v186_v33 }
  0xf5   :  { %v703_v34 = vpop.f32.mrb[0].mxu0  ;;  %v739_v35 = vpop.f32.mrb[0].mxu1 }
  0xf6   :  { %v704_v36 = vpop.f32.mrb[1].mxu0  ;;  %v740_v37 = vpop.f32.mrb[1].mxu1 }
  0xf7   :  { %v705_v38 = vadd.f32 %v704_v36, %v703_v34  ;;  %v969_v39 = vadd.f32 %v740_v37, %v739_v35  ;;  %v706_v40 = vpop.f32.mrb[2].mxu0  ;;  %v742_v41 = vpop.f32.mrb[2].mxu1 }
  0xf8   :  { %v707_v42 = vpop.f32.mrb[3].mxu0  ;;  %v743_v43 = vpop.f32.mrb[3].mxu1 }
  0xf9   :  { %v708_v44 = vadd.f32 %v707_v42, %v706_v40  ;;  %v971_v45 = vadd.f32 %v743_v43, %v742_v41 }
  0xfd   :  { %v709_v46 = vpop.f32.mrb[4].mxu0  ;;  %v745_v47 = vpop.f32.mrb[4].mxu1 }
  0xfe   :  { %v710_v48 = vpop.f32.mrb[5].mxu0  ;;  %v746_v49 = vpop.f32.mrb[5].mxu1 }
  0xff   :  { %v711_v50 = vadd.f32 %v710_v48, %v709_v46  ;;  %v973_v51 = vadd.f32 %v746_v49, %v745_v47  ;;  %v712_v52 = vpop.f32.mrb[6].mxu0  ;;  %v748_v53 = vpop.f32.mrb[6].mxu1 }
 0x100   :  { %v713_v54 = vpop.f32.mrb[7].mxu0  ;;  %v749_v55 = vpop.f32.mrb[7].mxu1 }
 0x101   :  { %v714_v56 = vadd.f32 %v713_v54, %v712_v52  ;;  %v975_v57 = vadd.f32 %v749_v55, %v748_v53 }
 0x105   :  { %v715_v58 = vpop.f32.mrb[8].mxu0  ;;  %v767_v59 = vpop.f32.mrb[8].mxu1 }
 0x106   :  { %v512_v61 = vadd.f32 %v767_v59, %v711_v50  ;;  %v716_v62 = vpop.f32.mrb[9].mxu0  ;;  %v503_v63 = vpop.f32.mrb[9].mxu1 }
 0x107   :  { %v717_v0 = vadd.f32 %v716_v62, %v715_v58  ;;  %v504_v1 = vadd.f32 %v705_v38, %v503_v63  ;;  %v718_v2 = vpop.f32.mrb[10].mxu0  ;;  %v768_v3 = vpop.f32.mrb[10].mxu1 }
 0x108   :  { %v626_v4 = vadd.f32 %v980_v60, %v512_v61  ;;  %v515_v5 = vadd.f32 %v768_v3, %v714_v56  ;;  %v719_v6 = vpop.f32.mrb[11].mxu0  ;;  %v506_v7 = vpop.f32.mrb[11].mxu1 }
 0x109   :  { %v624_v8 = vadd.f32 %v980_v60, %v504_v1  ;;  %v720_v9 = vadd.f32 %v719_v6, %v718_v2  ;;  %v507_v10 = vadd.f32 %v708_v44, %v506_v7 }
 0x10a   :  { %642 = vst [vmem:[%s1053_s3 + $0x10] sm:$0xff] %v626_v4  ;;  %v627_v11 = vadd.f32 %v980_v60, %v515_v5 }
 0x10b   :  { %640 = vst [vmem:[%s1053_s3] sm:$0xff] %v624_v8  ;;  %v625_v12 = vadd.f32 %v980_v60, %v507_v10 }
 0x10c   :  { %643 = vst [vmem:[%s1053_s3 + $0x18] sm:$0xff] %v627_v11 }
 0x10d   :  { %641 = vst [vmem:[%s1053_s3 + $0x8] sm:$0xff] %v625_v12  ;;  %v721_v13 = vpop.f32.mrb[12].mxu0  ;;  %v771_v14 = vpop.f32.mrb[12].mxu1 }
 0x10e   :  { %v722_v15 = vpop.f32.mrb[13].mxu0  ;;  %v519_v16 = vpop.f32.mrb[13].mxu1 }
 0x10f   :  { %v723_v17 = vadd.f32 %v722_v15, %v721_v13  ;;  %v520_v18 = vadd.f32 %v717_v0, %v519_v16  ;;  %v724_v19 = vpop.f32.mrb[14].mxu0  ;;  %v772_v20 = vpop.f32.mrb[14].mxu1 }
 0x110   :  { %v725_v21 = vpop.f32.mrb[15].mxu0  ;;  %v522_v22 = vpop.f32.mrb[15].mxu1 }
 0x111   :  { %v528_v23 = vadd.f32 %v771_v14, %v723_v17  ;;  %v628_v24 = vadd.f32 %v980_v60, %v520_v18  ;;  %v726_v25 = vadd.f32 %v725_v21, %v724_v19  ;;  %v523_v26 = vadd.f32 %v720_v9, %v522_v22 }
 0x113   :  { %v630_v27 = vadd.f32 %v980_v60, %v528_v23  ;;  %644 = vst [vmem:[%s1053_s3 + $0x20] sm:$0xff] %v628_v24  ;;  %v531_v28 = vadd.f32 %v772_v20, %v726_v25  ;;  %v629_v29 = vadd.f32 %v980_v60, %v523_v26 }
 0x115   :  { %646 = vst [vmem:[%s1053_s3 + $0x30] sm:$0xff] %v630_v27  ;;  %v631_v30 = vadd.f32 %v980_v60, %v531_v28  ;;  %645 = vst [vmem:[%s1053_s3 + $0x28] sm:$0xff] %v629_v29  ;;  %v727_v31 = vpop.f32.mrb[16].mxu0  ;;  %v775_v32 = vpop.f32.mrb[16].mxu1 }
 0x116   :  { %v728_v33 = vpop.f32.mrb[17].mxu0  ;;  %v535_v34 = vpop.f32.mrb[17].mxu1 }
 0x117   :  { %647 = vst [vmem:[%s1053_s3 + $0x38] sm:$0xff] %v631_v30  ;;  %v729_v35 = vadd.f32 %v728_v33, %v727_v31  ;;  %v730_v36 = vpop.f32.mrb[18].mxu0  ;;  %v776_v37 = vpop.f32.mrb[18].mxu1 }
 0x118   :  { %v731_v38 = vpop.f32.mrb[19].mxu0  ;;  %v538_v40 = vpop.f32.mrb[19].mxu1 }
 0x119   :  { %v536_v41 = vadd.f32 %v729_v35, %v535_v34  ;;  %v732_v42 = vadd.f32 %v731_v38, %v730_v36 }
 0x11b   :  { %v632_v43 = vadd.f32 %v980_v60, %v536_v41  ;;  %v539_v44 = vadd.f32 %v732_v42, %v538_v40 }
 0x11d   :  { %648 = vst [vmem:[%s1053_s3 + $0x40] sm:$0xff] %v632_v43  ;;  %v633_v46 = vadd.f32 %v980_v60, %v539_v44  ;;  %v733_v47 = vpop.f32.mrb[20].mxu0  ;;  %v779_v48 = vpop.f32.mrb[20].mxu1 }
 0x11e   :  { %v560_v49 = vadd.f32 %v779_v48, %v973_v51  ;;  %v734_v50 = vpop.f32.mrb[21].mxu0  ;;  %v551_v52 = vpop.f32.mrb[21].mxu1 }
 0x11f   :  { %649 = vst [vmem:[%s1053_s3 + $0x48] sm:$0xff] %v633_v46  ;;  %v735_v53 = vadd.f32 %v734_v50, %v733_v47  ;;  %v552_v54 = vadd.f32 %v969_v39, %v551_v52  ;;  %v736_v55 = vpop.f32.mrb[22].mxu0  ;;  %v780_v56 = vpop.f32.mrb[22].mxu1 }
 0x120   :  { %v638_v58 = vadd.f32 %v980_v60, %v560_v49  ;;  %v563_v59 = vadd.f32 %v780_v56, %v975_v57  ;;  %v737_v61 = vpop.f32.mrb[23].mxu0  ;;  %v554_v62 = vpop.f32.mrb[23].mxu1 }
 0x121   :  { %v544_v63 = vadd.f32 %v775_v32, %v735_v53  ;;  %v636_v51 = vadd.f32 %v980_v60, %v552_v54  ;;  %v738_v0 = vadd.f32 %v737_v61, %v736_v55  ;;  %v555_v1 = vadd.f32 %v971_v45, %v554_v62 }
 0x122   :  { %654 = vst [vmem:[%s1053_s3 + $0x70] sm:$0xff] %v638_v58  ;;  %v639_v39 = vadd.f32 %v980_v60, %v563_v59 }
 0x123   :  { %v634_v2 = vadd.f32 %v980_v60, %v544_v63  ;;  %652 = vst [vmem:[%s1053_s3 + $0x60] sm:$0xff] %v636_v51  ;;  %v547_v57 = vadd.f32 %v776_v37, %v738_v0  ;;  %v637_v3 = vadd.f32 %v980_v60, %v555_v1 }
 0x124   :  { %655 = vst [vmem:[%s1053_s3 + $0x78] sm:$0xff] %v639_v39 }
 0x125   :  { %650 = vst [vmem:[%s1053_s3 + $0x50] sm:$0xff] %v634_v2  ;;  %v635_v45 = vadd.f32 %v980_v60, %v547_v57  ;;  %653 = vst [vmem:[%s1053_s3 + $0x68] sm:$0xff] %v637_v3 }
 0x127   :  { %651 = vst [vmem:[%s1053_s3 + $0x58] sm:$0xff] %v635_v45 }

// kernel: _lambda_.45
= control target key start
LH: loop header
LB: loop body
LE: loop exit
PB: predicated region body
PF: predicated region fallthrough
CT: control target
= control target key end

     0   :  { %vm14_vm0 = vcmask 57344   ;;  %vm82_vm1 = vcmask 64512   ;;  %v428_v0 = vmov 0.0   ;;  %s1318_s0 = inlined_call_operand.vmem [shape: f32[512,8], index: 0, kind: input, shape index: {}]   ;;  %s1319_s1 = inlined_call_operand.vmem [shape: f32[1,8], index: 1, kind: output, shape index: {0}]   ;;  %s1320_s2 = inlined_call_operand.vmem [shape: f32[1,8], index: 2, kind: output, shape index: {1}]  }
   0x1   :  { %15 = vst.msk [vmem:[%s1319_s1] sm:$0x1] %vm14_vm0, %v428_v0  ;;  %16 = vst.msk [vmem:[%s1320_s2] sm:$0x1] %vm14_vm0, %v428_v0  ;;  %v455_v1 = vld [vmem:[%s1318_s0] sm:$0xff]  ;;  %v460_v2 = vld [vmem:[%s1318_s0 + $0x8] sm:$0xff] }
   0x2   :  { %v465_v3 = vld [vmem:[%s1318_s0 + $0x10] sm:$0xff]  ;;  %v83_v4 = vsel %vm82_vm1, %v455_v1, 0.0  ;;  %v84_v5 = vsel %vm82_vm1, %v460_v2, 0.0  ;;  %v476_v7 = vld [vmem:[%s1318_s0 + $0x18] sm:$0xff]  ;;  %v483_v10 = vld [vmem:[%s1318_s0 + $0x20] sm:$0xff] }
   0x3   :  { %v86_v6 = vsel %vm82_vm1, %v465_v3, 0.0  ;;  %v85_v8 = vadd.f32 %v84_v5, %v83_v4  ;;  %v88_v9 = vsel %vm82_vm1, %v476_v7, 0.0  ;;  %v90_v12 = vsel %vm82_vm1, %v483_v10, 0.0  ;;  %v490_v13 = vld [vmem:[%s1318_s0 + $0x28] sm:$0xff]  ;;  %v497_v16 = vld [vmem:[%s1318_s0 + $0x30] sm:$0xff]  ;;  %v502_v18 = vld [vmem:[%s1318_s0 + $0x38] sm:$0xff] }
   0x4   :  { %v92_v15 = vsel %vm82_vm1, %v490_v13, 0.0  ;;  %v507_v19 = vld [vmem:[%s1318_s0 + $0x40] sm:$0xff]  ;;  %v94_v20 = vsel %vm82_vm1, %v497_v16, 0.0  ;;  %v514_v21 = vld [vmem:[%s1318_s0 + $0x48] sm:$0xff]  ;;  %v519_v22 = vld [vmem:[%s1318_s0 + $0x50] sm:$0xff]  ;;  %v96_v25 = vsel %vm82_vm1, %v502_v18, 0.0 }
   0x5   :  { %v87_v11 = vadd.f32 %v86_v6, %v85_v8  ;;  %v524_v23 = vld [vmem:[%s1318_s0 + $0x58] sm:$0xff]  ;;  %v98_v26 = vsel %vm82_vm1, %v507_v19, 0.0  ;;  %v533_v27 = vld [vmem:[%s1318_s0 + $0x108] sm:$0xff]  ;;  %v538_v28 = vld [vmem:[%s1318_s0 + $0x110] sm:$0xff]  ;;  %v100_v30 = vsel %vm82_vm1, %v514_v21, 0.0  ;;  %v102_v31 = vsel %vm82_vm1, %v519_v22, 0.0 }
   0x6   :  { %v543_v29 = vld [vmem:[%s1318_s0 + $0x118] sm:$0xff]  ;;  %v551_v32 = vsel %vm82_vm1, %v524_v23, 0.0  ;;  %v556_v33 = vld [vmem:[%s1318_s0 + $0x120] sm:$0xff]  ;;  %v561_v34 = vld [vmem:[%s1318_s0 + $0x128] sm:$0xff]  ;;  %v570_v37 = vsel %vm82_vm1, %v533_v27, 0.0  ;;  %v574_v38 = vsel %vm82_vm1, %v538_v28, 0.0 }
   0x7   :  { %v89_v14 = vadd.f32 %v88_v9, %v87_v11  ;;  %v566_v35 = vld [vmem:[%s1318_s0 + $0x130] sm:$0xff]  ;;  %1339 = vst [vmem:[#allocation2_spill] sm:$0xff] %v570_v37  ;;  %1340 = vst [vmem:[#allocation3_spill] sm:$0xff] %v574_v38  ;;  %v578_v39 = vsel %vm82_vm1, %v543_v29, 0.0  ;;  %v583_v40 = vld [vmem:[%s1318_s0 + $0x138] sm:$0xff]  ;;  %v597_v43 = vsel %vm82_vm1, %v556_v33, 0.0  ;;  %v222_v37 = vmul.f32 %v465_v3, %v465_v3 }
   0x8   :  { %1341 = vst [vmem:[#allocation4_spill] sm:$0xff] %v578_v39  ;;  %v588_v41 = vld [vmem:[%s1318_s0 + $0x140] sm:$0xff]  ;;  %v593_v42 = vld [vmem:[%s1318_s0 + $0x148] sm:$0xff]  ;;  %1342 = vst [vmem:[#allocation5_spill] sm:$0xff] %v597_v43  ;;  %v601_v44 = vsel %vm82_vm1, %v561_v34, 0.0  ;;  %v605_v45 = vsel %vm82_vm1, %v566_v35, 0.0 }
   0x9   :  { %v91_v17 = vadd.f32 %v90_v12, %v89_v14  ;;  %1343 = vst [vmem:[#allocation6_spill] sm:$0xff] %v601_v44  ;;  %1344 = vst [vmem:[#allocation7_spill] sm:$0xff] %v605_v45  ;;  %v610_v46 = vld [vmem:[%s1318_s0 + $0x150] sm:$0xff]  ;;  %v615_v47 = vld [vmem:[%s1318_s0 + $0x158] sm:$0xff]  ;;  %v624_v50 = vsel %vm82_vm1, %v583_v40, 0.0  ;;  %v628_v51 = vsel %vm82_vm1, %v588_v41, 0.0 }
   0xa   :  { %v620_v48 = vld [vmem:[%s1318_s0 + $0x160] sm:$0xff]  ;;  %1345 = vst [vmem:[#allocation8_spill] sm:$0xff] %v624_v50  ;;  %1346 = vst [vmem:[#allocation9_spill] sm:$0xff] %v628_v51  ;;  %v632_v52 = vsel %vm82_vm1, %v593_v42, 0.0  ;;  %v637_v53 = vld [vmem:[%s1318_s0 + $0x168] sm:$0xff]  ;;  %v651_v56 = vsel %vm82_vm1, %v610_v46, 0.0 }
   0xb   :  { %v93_v24 = vadd.f32 %v92_v15, %v91_v17  ;;  %1347 = vst [vmem:[#allocation10_spill] sm:$0xff] %v632_v52  ;;  %v642_v54 = vld [vmem:[%s1318_s0 + $0x170] sm:$0xff]  ;;  %v647_v55 = vld [vmem:[%s1318_s0 + $0x178] sm:$0xff]  ;;  %1348 = vst [vmem:[#allocation11_spill] sm:$0xff] %v651_v56  ;;  %v655_v57 = vsel %vm82_vm1, %v615_v47, 0.0  ;;  %v659_v58 = vsel %vm82_vm1, %v620_v48, 0.0 }
   0xc   :  { %1349 = vst [vmem:[#allocation12_spill] sm:$0xff] %v655_v57  ;;  %1350 = vst [vmem:[#allocation13_spill] sm:$0xff] %v659_v58  ;;  %v664_v59 = vld [vmem:[%s1318_s0 + $0x180] sm:$0xff]  ;;  %v669_v60 = vld [vmem:[%s1318_s0 + $0x188] sm:$0xff]  ;;  %v678_v63 = vsel %vm82_vm1, %v637_v53, 0.0  ;;  %v682_v0 = vsel %vm82_vm1, %v642_v54, 0.0 }
   0xd   :  { %v95_v36 = vadd.f32 %v94_v20, %v93_v24  ;;  %v674_v61 = vld [vmem:[%s1318_s0 + $0x190] sm:$0xff]  ;;  %1351 = vst [vmem:[#allocation14_spill] sm:$0xff] %v678_v63  ;;  %1352 = vst [vmem:[#allocation15_spill] sm:$0xff] %v682_v0  ;;  %v686_v4 = vsel %vm82_vm1, %v647_v55, 0.0  ;;  %v691_v5 = vld [vmem:[%s1318_s0 + $0x198] sm:$0xff]  ;;  %v705_v9 = vsel %vm82_vm1, %v664_v59, 0.0 }
   0xe   :  { %1353 = vst [vmem:[#allocation16_spill] sm:$0xff] %v686_v4  ;;  %v696_v6 = vld [vmem:[%s1318_s0 + $0x1a0] sm:$0xff]  ;;  %v701_v8 = vld [vmem:[%s1318_s0 + $0x1a8] sm:$0xff]  ;;  %1354 = vst [vmem:[#allocation17_spill] sm:$0xff] %v705_v9  ;;  %v709_v11 = vsel %vm82_vm1, %v669_v60, 0.0  ;;  %v713_v12 = vsel %vm82_vm1, %v674_v61, 0.0 }
   0xf   :  { %v97_v49 = vadd.f32 %v96_v25, %v95_v36  ;;  %1355 = vst [vmem:[#allocation18_spill] sm:$0xff] %v709_v11  ;;  %1356 = vst [vmem:[#allocation19_spill] sm:$0xff] %v713_v12  ;;  %v718_v14 = vld [vmem:[%s1318_s0 + $0x60] sm:$0xff]  ;;  %v723_v15 = vld [vmem:[%s1318_s0 + $0x1b0] sm:$0xff]  ;;  %v737_v25 = vsel %vm82_vm1, %v691_v5, 0.0  ;;  %v745_v36 = vsel %vm82_vm1, %v701_v8, 0.0 }
  0x10   :  { %v728_v17 = vld [vmem:[%s1318_s0 + $0x1b8] sm:$0xff]  ;;  %v733_v20 = vld [vmem:[%s1318_s0 + $0x1c0] sm:$0xff]  ;;  %1357 = vst [vmem:[#allocation20_spill] sm:$0xff] %v737_v25  ;;  %1359 = vst [vmem:[#allocation22_spill] sm:$0xff] %v745_v36 }
  0x11   :  { %v99_v62 = vadd.f32 %v98_v26, %v97_v49  ;;  %v741_v26 = vsel %vm82_vm1, %v696_v6, 0.0  ;;  %v750_v49 = vld [vmem:[%s1318_s0 + $0x1c8] sm:$0xff]  ;;  %v768_v36 = vsel %vm82_vm1, %v728_v17, 0.0  ;;  %v772_v25 = vsel %vm82_vm1, %v733_v20, 0.0  ;;  %v777_v12 = vld [vmem:[%s1318_s0 + $0x1e0] sm:$0xff]  ;;  %v804_v0 = vld [vmem:[%s1318_s0 + $0x1f8] sm:$0xff] }
  0x12   :  { %1358 = vst [vmem:[#allocation21_spill] sm:$0xff] %v741_v26  ;;  %v764_v26 = vsel %vm82_vm1, %v723_v15, 0.0  ;;  %1361 = vst [vmem:[#allocation24_spill] sm:$0xff] %v768_v36  ;;  %v782_v11 = vld [vmem:[%s1318_s0 + $0x1e8] sm:$0xff]  ;;  %v791_v9 = vsel %vm82_vm1, %v750_v49, 0.0  ;;  %v826_v58 = vsel %vm82_vm1, %v804_v0, 0.0 }
  0x13   :  { %v101_v24 = vadd.f32 %v100_v30, %v99_v62  ;;  %v755_v30 = vld [vmem:[%s1318_s0 + $0x1d0] sm:$0xff]  ;;  %v760_v62 = vld [vmem:[%s1318_s0 + $0x1d8] sm:$0xff]  ;;  %1360 = vst [vmem:[#allocation23_spill] sm:$0xff] %v764_v26  ;;  %1362 = vst [vmem:[#allocation25_spill] sm:$0xff] %v772_v25 }
  0x14   :  { %v787_v26 = vld [vmem:[%s1318_s0 + $0x1f0] sm:$0xff]  ;;  %1364 = vst [vmem:[#allocation27_spill] sm:$0xff] %v791_v9  ;;  %v795_v25 = vsel %vm82_vm1, %v755_v30, 0.0  ;;  %v799_v4 = vsel %vm82_vm1, %v760_v62, 0.0  ;;  %1367 = vst [vmem:[#allocation30_spill] sm:$0xff] %v804_v0  ;;  %v814_v9 = vsel %vm82_vm1, %v782_v11, 0.0 }
  0x15   :  { %1363 = vst [vmem:[#allocation26_spill] sm:$0xff] %v787_v26  ;;  %v103_v36 = vadd.f32 %v102_v31, %v101_v24  ;;  %1365 = vst [vmem:[#allocation28_spill] sm:$0xff] %v795_v25  ;;  %v106_v31 = vsel %vm82_vm1, %v718_v14, 0.0  ;;  %v810_v24 = vsel %vm82_vm1, %v777_v12, 0.0  ;;  %v818_v25 = vsel %vm82_vm1, %v787_v26, 0.0  ;;  %v855_v56 = vld [vmem:[%s1318_s0 + $0x90] sm:$0xff] }
  0x16   :  { %1366 = vst [vmem:[#allocation29_spill] sm:$0xff] %v799_v4  ;;  %1368 = vst [vmem:[#allocation31_spill] sm:$0xff] %v810_v24  ;;  %v30_v4 = vld [vmem:[%s1318_s0 + $0x68] sm:$0xff]  ;;  %v860_v52 = vld [vmem:[%s1318_s0 + $0x98] sm:$0xff] }
  0x17   :  { %1369 = vst [vmem:[#allocation32_spill] sm:$0xff] %v814_v9  ;;  %1370 = vst [vmem:[#allocation33_spill] sm:$0xff] %v818_v25  ;;  %v105_v63 = vadd.f32 %v551_v32, %v103_v36  ;;  %v108_v24 = vsel %vm82_vm1, %v30_v4, 0.0  ;;  %v31_v9 = vld [vmem:[%s1318_s0 + $0x70] sm:$0xff]  ;;  %v835_v25 = vld [vmem:[%s1318_s0 + $0x78] sm:$0xff]  ;;  %v120_v39 = vsel %vm82_vm1, %v860_v52, 0.0 }
  0x18   :  { %1371 = vst [vmem:[#allocation34_spill] sm:$0xff] %v826_v58  ;;  %1372 = vst [vmem:[#allocation35_spill] sm:$0xff] %v835_v25  ;;  %v840_v32 = vld [vmem:[%s1318_s0 + $0x80] sm:$0xff]  ;;  %v845_v36 = vld [vmem:[%s1318_s0 + $0x88] sm:$0xff]  ;;  %v110_v58 = vsel %vm82_vm1, %v31_v9, 0.0 }
  0x19   :  { %v107_v57 = vadd.f32 %v106_v31, %v105_v63  ;;  %1373 = vst [vmem:[#allocation36_spill] sm:$0xff] %v840_v32  ;;  %1374 = vst [vmem:[#allocation37_spill] sm:$0xff] %v845_v36  ;;  %v220_v63 = vmul.f32 %v455_v1, %v455_v1  ;;  %v221_v31 = vmul.f32 %v460_v2, %v460_v2  ;;  %v865_v51 = vld [vmem:[%s1318_s0 + $0xa0] sm:$0xff]  ;;  %v112_v1 = vsel %vm82_vm1, %v835_v25, 0.0  ;;  %v876_v44 = vld [vmem:[%s1318_s0 + $0xa8] sm:$0xff] }
  0x1a   :  { %1375 = vst [vmem:[#allocation38_spill] sm:$0xff] %v855_v56  ;;  %1376 = vst [vmem:[#allocation39_spill] sm:$0xff] %v860_v52  ;;  %v114_v2 = vsel %vm82_vm1, %v840_v32, 0.0  ;;  %v116_v45 = vsel %vm82_vm1, %v845_v36, 0.0  ;;  %v881_v43 = vld [vmem:[%s1318_s0 + $0xb0] sm:$0xff]  ;;  %v122_v38 = vsel %vm82_vm1, %v865_v51, 0.0  ;;  %v223_v25 = vmul.f32 %v476_v7, %v476_v7 }
  0x1b   :  { %1377 = vst [vmem:[#allocation40_spill] sm:$0xff] %v865_v51  ;;  %v109_v50 = vadd.f32 %v108_v24, %v107_v57  ;;  %1378 = vst [vmem:[#allocation41_spill] sm:$0xff] %v876_v44  ;;  %v886_v57 = vld [vmem:[%s1318_s0 + $0xb8] sm:$0xff]  ;;  %v118_v24 = vsel %vm82_vm1, %v855_v56, 0.0  ;;  %v899_v36 = vld [vmem:[%s1318_s0 + $0xc0] sm:$0xff]  ;;  %v124_v51 = vsel %vm82_vm1, %v876_v44, 0.0 }
  0x1c   :  { %1379 = vst [vmem:[#allocation42_spill] sm:$0xff] %v881_v43  ;;  %1380 = vst [vmem:[#allocation43_spill] sm:$0xff] %v886_v57  ;;  %v904_v32 = vld [vmem:[%s1318_s0 + $0xc8] sm:$0xff]  ;;  %v909_v52 = vld [vmem:[%s1318_s0 + $0xd0] sm:$0xff]  ;;  %v915_v3 = vsel %vm82_vm1, %v881_v43, 0.0 }
  0x1d   :  { %1381 = vst [vmem:[#allocation44_spill] sm:$0xff] %v899_v36  ;;  %1382 = vst [vmem:[#allocation45_spill] sm:$0xff] %v904_v32  ;;  %v111_v56 = vadd.f32 %v110_v58, %v109_v50  ;;  %v922_v0 = vld [vmem:[%s1318_s0 + $0xd8] sm:$0xff]  ;;  %v927_v26 = vld [vmem:[%s1318_s0 + $0xe0] sm:$0xff]  ;;  %v931_v50 = vsel %vm82_vm1, %v886_v57, 0.0  ;;  %v935_v58 = vsel %vm82_vm1, %v899_v36, 0.0 }
  0x1e   :  { %1383 = vst [vmem:[#allocation46_spill] sm:$0xff] %v909_v52  ;;  %1384 = vst [vmem:[#allocation47_spill] sm:$0xff] %v922_v0  ;;  %v939_v7 = vsel %vm82_vm1, %v904_v32, 0.0  ;;  %v943_v43 = vsel %vm82_vm1, %v909_v52, 0.0  ;;  %v948_v44 = vld [vmem:[%s1318_s0 + $0xe8] sm:$0xff]  ;;  %v953_v57 = vld [vmem:[%s1318_s0 + $0xf0] sm:$0xff]  ;;  %v224_v52 = vmul.f32 %v483_v10, %v483_v10  ;;  %v228_v10 = vmul.f32 %v507_v19, %v507_v19 }
  0x1f   :  { %1385 = vst [vmem:[#allocation48_spill] sm:$0xff] %v927_v26  ;;  %1386 = vst [vmem:[#allocation49_spill] sm:$0xff] %v935_v58  ;;  %v113_v36 = vadd.f32 %v112_v1, %v111_v56  ;;  %v957_v58 = vsel %vm82_vm1, %v922_v0, 0.0  ;;  %v961_v32 = vsel %vm82_vm1, %v927_v26, 0.0  ;;  %v225_v56 = vmul.f32 %v490_v13, %v490_v13 }
  0x20   :  { %1387 = vst [vmem:[#allocation50_spill] sm:$0xff] %v939_v7  ;;  %1388 = vst [vmem:[#allocation51_spill] sm:$0xff] %v943_v43  ;;  %v967_v43 = vsel %vm82_vm1, %v948_v44, 0.0  ;;  %v971_v7 = vsel %vm82_vm1, %v953_v57, 0.0  ;;  %v226_v1 = vmul.f32 %v497_v16, %v497_v16  ;;  %v227_v26 = vmul.f32 %v502_v18, %v502_v18 }
  0x21   :  { %1389 = vst [vmem:[#allocation52_spill] sm:$0xff] %v948_v44  ;;  %1390 = vst [vmem:[#allocation53_spill] sm:$0xff] %v953_v57  ;;  %v115_v0 = vadd.f32 %v114_v2, %v113_v36  ;;  %v229_v44 = vmul.f32 %v514_v21, %v514_v21  ;;  %v230_v57 = vmul.f32 %v519_v22, %v519_v22 }
  0x22   :  { %1391 = vst [vmem:[#allocation54_spill] sm:$0xff] %v971_v7  ;;  %v231_v7 = vmul.f32 %v524_v23, %v524_v23  ;;  %v232_v13 = vmul.f32 %v718_v14, %v718_v14  ;;  %v989_v16 = vmul.f32 %v30_v4, %v30_v4  ;;  %v991_v2 = vmul.f32 %v31_v9, %v31_v9 }
  0x23   :  { %v117_v36 = vadd.f32 %v116_v45, %v115_v0  ;;  %v253_v18 = vmul.f32 %v533_v27, %v533_v27  ;;  %v254_v19 = vmul.f32 %v538_v28, %v538_v28  ;;  %v255_v21 = vmul.f32 %v543_v29, %v543_v29 }
  0x24   :  { %v256_v22 = vmul.f32 %v556_v33, %v556_v33  ;;  %v257_v23 = vmul.f32 %v561_v34, %v561_v34  ;;  %v258_v45 = vmul.f32 %v566_v35, %v566_v35  ;;  %v259_v4 = vmul.f32 %v583_v40, %v583_v40 }
  0x25   :  { %v119_v0 = vadd.f32 %v118_v24, %v117_v36  ;;  %v260_v27 = vmul.f32 %v588_v41, %v588_v41  ;;  %v261_v28 = vmul.f32 %v593_v42, %v593_v42  ;;  %v262_v29 = vmul.f32 %v610_v46, %v610_v46 }
  0x26   :  { %v263_v33 = vmul.f32 %v615_v47, %v615_v47  ;;  %v284_v34 = vsel %vm82_vm1, %v220_v63, 0.0  ;;  %v285_v35 = vsel %vm82_vm1, %v221_v31, 0.0  ;;  %v264_v40 = vmul.f32 %v620_v48, %v620_v48 }
  0x27   :  { %v121_v9 = vadd.f32 %v120_v39, %v119_v0  ;;  %v286_v14 = vadd.f32 %v285_v35, %v284_v34  ;;  %v287_v41 = vsel %vm82_vm1, %v222_v37, 0.0  ;;  %v265_v42 = vmul.f32 %v637_v53, %v637_v53  ;;  %v1392_v0 = vld [vmem:[#allocation26_spill] sm:$0xff] }
  0x28   :  { %v266_v46 = vmul.f32 %v642_v54, %v642_v54  ;;  %v267_v47 = vmul.f32 %v647_v55, %v647_v55  ;;  %v289_v63 = vsel %vm82_vm1, %v223_v25, 0.0  ;;  %v268_v39 = vmul.f32 %v664_v59, %v664_v59  ;;  %v1393_v34 = vld [vmem:[#allocation30_spill] sm:$0xff] }
  0x29   :  { %v123_v24 = vadd.f32 %v122_v38, %v121_v9  ;;  %v269_v48 = vmul.f32 %v669_v60, %v669_v60  ;;  %v288_v31 = vadd.f32 %v287_v41, %v286_v14  ;;  %v270_v37 = vmul.f32 %v674_v61, %v674_v61  ;;  %v1394_v41 = vld [vmem:[#allocation49_spill] sm:$0xff] }
  0x2a   :  { %v271_v53 = vmul.f32 %v691_v5, %v691_v5  ;;  %v272_v54 = vmul.f32 %v696_v6, %v696_v6  ;;  %v291_v55 = vsel %vm82_vm1, %v224_v52, 0.0  ;;  %v273_v38 = vmul.f32 %v701_v8, %v701_v8 }
  0x2b   :  { %v125_v25 = vadd.f32 %v124_v51, %v123_v24  ;;  %v274_v59 = vmul.f32 %v723_v15, %v723_v15  ;;  %v290_v60 = vadd.f32 %v289_v63, %v288_v31  ;;  %v275_v36 = vmul.f32 %v728_v17, %v728_v17 }
  0x2c   :  { %v276_v61 = vmul.f32 %v733_v20, %v733_v20  ;;  %v277_v5 = vmul.f32 %v750_v49, %v750_v49  ;;  %v293_v6 = vsel %vm82_vm1, %v225_v56, 0.0  ;;  %v278_v52 = vmul.f32 %v755_v30, %v755_v30 }
  0x2d   :  { %v127_v51 = vadd.f32 %v915_v3, %v125_v25  ;;  %v279_v8 = vmul.f32 %v760_v62, %v760_v62  ;;  %v292_v15 = vadd.f32 %v291_v55, %v290_v60  ;;  %v280_v17 = vmul.f32 %v777_v12, %v777_v12  ;;  %v1396_v25 = vld [vmem:[#allocation51_spill] sm:$0xff] }
  0x2e   :  { %v281_v20 = vmul.f32 %v782_v11, %v782_v11  ;;  %v282_v49 = vmul.f32 %v1392_v0, %v1392_v0  ;;  %v295_v56 = vsel %vm82_vm1, %v226_v1, 0.0  ;;  %v283_v30 = vmul.f32 %v1393_v34, %v1393_v34  ;;  %v1398_v34 = vld [vmem:[#allocation54_spill] sm:$0xff] }
  0x2f   :  { %v129_v3 = vadd.f32 %v931_v50, %v127_v51  ;;  %v294_v35 = vadd.f32 %v293_v6, %v292_v15  ;;  %v297_v62 = vsel %vm82_vm1, %v227_v26, 0.0  ;;  %v299_v9 = vsel %vm82_vm1, %v228_v10, 0.0 }
  0x30   :  { %v301_v12 = vsel %vm82_vm1, %v229_v44, 0.0  ;;  %v303_v14 = vsel %vm82_vm1, %v230_v57, 0.0  ;;  %v305_v11 = vsel %vm82_vm1, %v231_v7, 0.0  ;;  %v307_v1 = vsel %vm82_vm1, %v232_v13, 0.0  ;;  %v1395_v7 = vld [vmem:[#allocation50_spill] sm:$0xff] }
  0x31   :  { %v131_v63 = vadd.f32 %v1394_v41, %v129_v3  ;;  %v296_v24 = vadd.f32 %v295_v56, %v294_v35  ;;  %v1072_v50 = vsel %vm82_vm1, %v253_v18, 0.0  ;;  %v1075_v31 = vsel %vm82_vm1, %v254_v19, 0.0  ;;  %v1397_v56 = vld [vmem:[#allocation35_spill] sm:$0xff] }
  0x32   :  { %v1078_v26 = vsel %vm82_vm1, %v255_v21, 0.0  ;;  %v1081_v44 = vsel %vm82_vm1, %v256_v22, 0.0  ;;  %v1084_v57 = vsel %vm82_vm1, %v257_v23, 0.0  ;;  %v1088_v13 = vsel %vm82_vm1, %v258_v45, 0.0 }
  0x33   :  { %v133_v10 = vadd.f32 %v1395_v7, %v131_v63  ;;  %v298_v55 = vadd.f32 %v297_v62, %v296_v24  ;;  %v1091_v18 = vsel %vm82_vm1, %v259_v4, 0.0  ;;  %v1094_v19 = vsel %vm82_vm1, %v260_v27, 0.0  ;;  %v1399_v62 = vld [vmem:[#allocation36_spill] sm:$0xff] }
  0x34   :  { %v1097_v21 = vsel %vm82_vm1, %v261_v28, 0.0  ;;  %v1100_v22 = vsel %vm82_vm1, %v262_v29, 0.0  ;;  %v1103_v23 = vsel %vm82_vm1, %v263_v33, 0.0  ;;  %v1107_v45 = vsel %vm82_vm1, %v264_v40, 0.0 }
  0x35   :  { %v135_v60 = vadd.f32 %v1396_v25, %v133_v10  ;;  %v300_v6 = vadd.f32 %v299_v9, %v298_v55  ;;  %v1110_v4 = vsel %vm82_vm1, %v265_v42, 0.0  ;;  %v1113_v27 = vsel %vm82_vm1, %v266_v46, 0.0  ;;  %v1401_v10 = vld [vmem:[#allocation38_spill] sm:$0xff] }
  0x36   :  { %v1116_v28 = vsel %vm82_vm1, %v267_v47, 0.0  ;;  %v1119_v29 = vsel %vm82_vm1, %v268_v39, 0.0  ;;  %v1122_v33 = vsel %vm82_vm1, %v269_v48, 0.0  ;;  %v1126_v40 = vsel %vm82_vm1, %v270_v37, 0.0  ;;  %v1402_v25 = vld [vmem:[#allocation2_spill] sm:$0xff] }
  0x37   :  { %v137_v51 = vadd.f32 %v957_v58, %v135_v60  ;;  %v302_v15 = vadd.f32 %v301_v12, %v300_v6  ;;  %v1129_v42 = vsel %vm82_vm1, %v271_v53, 0.0  ;;  %v1132_v46 = vsel %vm82_vm1, %v272_v54, 0.0 }
  0x38   :  { %v1135_v47 = vsel %vm82_vm1, %v273_v38, 0.0  ;;  %v1138_v39 = vsel %vm82_vm1, %v274_v59, 0.0  ;;  %v1141_v48 = vsel %vm82_vm1, %v275_v36, 0.0  ;;  %v1145_v37 = vsel %vm82_vm1, %v276_v61, 0.0 }
  0x39   :  { %v139_v58 = vadd.f32 %v961_v32, %v137_v51  ;;  %v304_v0 = vadd.f32 %v303_v14, %v302_v15  ;;  %v1148_v53 = vsel %vm82_vm1, %v277_v5, 0.0  ;;  %v1151_v54 = vsel %vm82_vm1, %v278_v52, 0.0  ;;  %v1165_v32 = vld [vmem:[%s1318_s0 + $0xf8] sm:$0xff]  ;;  %v1403_v51 = vld [vmem:[#allocation39_spill] sm:$0xff] }
  0x3a   :  { %v1154_v38 = vsel %vm82_vm1, %v279_v8, 0.0  ;;  %v1157_v59 = vsel %vm82_vm1, %v280_v17, 0.0  ;;  %v1160_v36 = vsel %vm82_vm1, %v281_v20, 0.0  ;;  %v1169_v52 = vsel %vm82_vm1, %v282_v49, 0.0 }
  0x3b   :  { %v141_v61 = vadd.f32 %v967_v43, %v139_v58  ;;  %v306_v5 = vadd.f32 %v305_v11, %v304_v0  ;;  %v1172_v8 = vsel %vm82_vm1, %v283_v30, 0.0  ;;  %v144_v17 = vsel %vm82_vm1, %v1165_v32, 0.0  ;;  %v1183_v43 = vld [vmem:[%s1318_s0 + $0x100] sm:$0xff]  ;;  %v1404_v58 = vld [vmem:[#allocation3_spill] sm:$0xff] }
  0x3c   :  { %v235_v20 = vmul.f32 %v1397_v56, %v1397_v56  ;;  %v309_v3 = vsel %vm82_vm1, %v989_v16, 0.0  ;;  %v146_v30 = vsel %vm82_vm1, %v1183_v43, 0.0  ;;  %v236_v9 = vmul.f32 %v1399_v62, %v1399_v62  ;;  %v1400_v16 = vld [vmem:[#allocation37_spill] sm:$0xff] }
  0x3d   :  { %v143_v49 = vadd.f32 %v1398_v34, %v141_v61  ;;  %v308_v35 = vadd.f32 %v307_v1, %v306_v5  ;;  %v311_v12 = vsel %vm82_vm1, %v991_v2, 0.0  ;;  %v237_v41 = vmul.f32 %v1400_v16, %v1400_v16  ;;  %v1405_v5 = vld [vmem:[#allocation40_spill] sm:$0xff]  ;;  %v1408_v62 = vld [vmem:[#allocation5_spill] sm:$0xff] }
  0x3e   :  { %v313_v63 = vsel %vm82_vm1, %v235_v20, 0.0  ;;  %v238_v1 = vmul.f32 %v1401_v10, %v1401_v10  ;;  %v315_v55 = vsel %vm82_vm1, %v236_v9, 0.0  ;;  %v239_v2 = vmul.f32 %v1403_v51, %v1403_v51  ;;  %v1406_v20 = vld [vmem:[#allocation4_spill] sm:$0xff] }
  0x3f   :  { %v145_v14 = vadd.f32 %v144_v17, %v143_v49  ;;  %v310_v11 = vadd.f32 %v309_v3, %v308_v35  ;;  %v317_v15 = vsel %vm82_vm1, %v237_v41, 0.0  ;;  %v240_v17 = vmul.f32 %v1405_v5, %v1405_v5  ;;  %v1407_v49 = vld [vmem:[#allocation41_spill] sm:$0xff]  ;;  %v1410_v41 = vld [vmem:[#allocation6_spill] sm:$0xff] }
  0x40   :  { %v319_v56 = vsel %vm82_vm1, %v238_v1, 0.0  ;;  %v241_v35 = vmul.f32 %v1407_v49, %v1407_v49 }
  0x41   :  { %v147_v24 = vadd.f32 %v146_v30, %v145_v14  ;;  %v312_v7 = vadd.f32 %v311_v12, %v310_v11  ;;  %v321_v30 = vsel %vm82_vm1, %v239_v2, 0.0  ;;  %v1409_v14 = vld [vmem:[#allocation42_spill] sm:$0xff]  ;;  %v323_v16 = vsel %vm82_vm1, %v240_v17, 0.0 }
  0x42   :  { %v242_v11 = vmul.f32 %v1409_v14, %v1409_v14  ;;  %v325_v1 = vsel %vm82_vm1, %v241_v35, 0.0 }
  0x43   :  { %v149_v60 = vadd.f32 %v1402_v25, %v147_v24  ;;  %v314_v6 = vadd.f32 %v313_v63, %v312_v7  ;;  %v1411_v7 = vld [vmem:[#allocation43_spill] sm:$0xff] }
  0x44   :  { %v243_v10 = vmul.f32 %v1411_v7, %v1411_v7  ;;  %v327_v2 = vsel %vm82_vm1, %v242_v11, 0.0 }
  0x45   :  { %v151_v0 = vadd.f32 %v1404_v58, %v149_v60  ;;  %v316_v61 = vadd.f32 %v315_v55, %v314_v6  ;;  %v1412_v55 = vld [vmem:[#allocation7_spill] sm:$0xff]  ;;  %v1413_v6 = vld [vmem:[#allocation44_spill] sm:$0xff] }
  0x46   :  { %v244_v51 = vmul.f32 %v1413_v6, %v1413_v6  ;;  %v329_v17 = vsel %vm82_vm1, %v243_v10, 0.0 }
  0x47   :  { %v153_v3 = vadd.f32 %v1406_v20, %v151_v0  ;;  %v318_v34 = vadd.f32 %v317_v15, %v316_v61  ;;  %v1414_v15 = vld [vmem:[#allocation8_spill] sm:$0xff]  ;;  %v1415_v61 = vld [vmem:[#allocation45_spill] sm:$0xff] }
  0x48   :  { %v245_v5 = vmul.f32 %v1415_v61, %v1415_v61  ;;  %v331_v35 = vsel %vm82_vm1, %v244_v51, 0.0 }
  0x49   :  { %v155_v9 = vadd.f32 %v1408_v62, %v153_v3  ;;  %v320_v12 = vadd.f32 %v319_v56, %v318_v34  ;;  %v1416_v56 = vld [vmem:[#allocation9_spill] sm:$0xff]  ;;  %v1417_v34 = vld [vmem:[#allocation46_spill] sm:$0xff] }
  0x4a   :  { %v246_v49 = vmul.f32 %v1417_v34, %v1417_v34  ;;  %v333_v11 = vsel %vm82_vm1, %v245_v5, 0.0 }
  0x4b   :  { %v157_v63 = vadd.f32 %v1410_v41, %v155_v9  ;;  %v322_v24 = vadd.f32 %v321_v30, %v320_v12  ;;  %v1418_v30 = vld [vmem:[#allocation10_spill] sm:$0xff]  ;;  %v1419_v12 = vld [vmem:[#allocation47_spill] sm:$0xff] }
  0x4c   :  { %v247_v14 = vmul.f32 %v1419_v12, %v1419_v12  ;;  %v335_v10 = vsel %vm82_vm1, %v246_v49, 0.0  ;;  %v1427_v49 = vld [vmem:[#allocation15_spill] sm:$0xff]  ;;  %v1428_v12 = vld [vmem:[#allocation16_spill] sm:$0xff] }
  0x4d   :  { %v159_v25 = vadd.f32 %v1412_v55, %v157_v63  ;;  %v324_v60 = vadd.f32 %v323_v16, %v322_v24  ;;  %v1420_v16 = vld [vmem:[#allocation11_spill] sm:$0xff]  ;;  %v1421_v24 = vld [vmem:[#allocation48_spill] sm:$0xff] }
  0x4e   :  { %v248_v7 = vmul.f32 %v1421_v24, %v1421_v24  ;;  %v337_v51 = vsel %vm82_vm1, %v247_v14, 0.0 }
  0x4f   :  { %v161_v58 = vadd.f32 %v1414_v15, %v159_v25  ;;  %v326_v0 = vadd.f32 %v325_v1, %v324_v60  ;;  %v1422_v1 = vld [vmem:[#allocation12_spill] sm:$0xff] }
  0x50   :  { %v1423_v60 = vld [vmem:[#allocation52_spill] sm:$0xff]  ;;  %v339_v5 = vsel %vm82_vm1, %v248_v7, 0.0  ;;  %v1430_v7 = vld [vmem:[#allocation18_spill] sm:$0xff] }
  0x51   :  { %v163_v20 = vadd.f32 %v1416_v56, %v161_v58  ;;  %v328_v3 = vadd.f32 %v327_v2, %v326_v0  ;;  %v249_v6 = vmul.f32 %v1423_v60, %v1423_v60  ;;  %v1424_v2 = vld [vmem:[#allocation13_spill] sm:$0xff] }
  0x52   :  { %v1425_v0 = vld [vmem:[#allocation53_spill] sm:$0xff] }
  0x53   :  { %v165_v62 = vadd.f32 %v1418_v30, %v163_v20  ;;  %v330_v9 = vadd.f32 %v329_v17, %v328_v3  ;;  %v250_v61 = vmul.f32 %v1425_v0, %v1425_v0  ;;  %v1426_v17 = vld [vmem:[#allocation14_spill] sm:$0xff]  ;;  %v251_v3 = vmul.f32 %v1165_v32, %v1165_v32 }
  0x54   :  { %v341_v34 = vsel %vm82_vm1, %v249_v6, 0.0  ;;  %v1432_v6 = vld [vmem:[#allocation20_spill] sm:$0xff]  ;;  %v1434_v0 = vld [vmem:[#allocation22_spill] sm:$0xff] }
  0x55   :  { %v167_v41 = vadd.f32 %v1420_v16, %v165_v62  ;;  %v332_v63 = vadd.f32 %v331_v35, %v330_v9  ;;  %v252_v62 = vmul.f32 %v1183_v43, %v1183_v43  ;;  %v343_v9 = vsel %vm82_vm1, %v250_v61, 0.0 }
  0x56   :  { %v345_v16 = vsel %vm82_vm1, %v251_v3, 0.0  ;;  %v1436_v3 = vld [vmem:[#allocation24_spill] sm:$0xff] }
  0x57   :  { %v169_v55 = vadd.f32 %v1422_v1, %v167_v41  ;;  %v334_v25 = vadd.f32 %v333_v11, %v332_v63  ;;  %v1429_v41 = vld [vmem:[#allocation17_spill] sm:$0xff]  ;;  %v347_v32 = vsel %vm82_vm1, %v252_v62, 0.0  ;;  %v1438_v62 = vld [vmem:[#allocation27_spill] sm:$0xff] }
  0x59   :  { %v171_v15 = vadd.f32 %v1424_v2, %v169_v55  ;;  %v336_v58 = vadd.f32 %v335_v10, %v334_v25  ;;  %v1431_v55 = vld [vmem:[#allocation19_spill] sm:$0xff]  ;;  %v1433_v2 = vld [vmem:[#allocation21_spill] sm:$0xff] }
  0x5b   :  { %v173_v56 = vadd.f32 %v1426_v17, %v171_v15  ;;  %v338_v20 = vadd.f32 %v337_v51, %v336_v58  ;;  %v1435_v17 = vld [vmem:[#allocation23_spill] sm:$0xff] }
  0x5d   :  { %v175_v35 = vadd.f32 %v1427_v49, %v173_v56  ;;  %v340_v30 = vadd.f32 %v339_v5, %v338_v20 }
  0x5f   :  { %v177_v14 = vadd.f32 %v1428_v12, %v175_v35  ;;  %v342_v11 = vadd.f32 %v341_v34, %v340_v30  ;;  %v1437_v35 = vld [vmem:[#allocation25_spill] sm:$0xff]  ;;  %v1439_v12 = vld [vmem:[#allocation28_spill] sm:$0xff] }
  0x61   :  { %v179_v63 = vadd.f32 %v1429_v41, %v177_v14  ;;  %v344_v24 = vadd.f32 %v343_v9, %v342_v11  ;;  %v1440_v11 = vld [vmem:[#allocation29_spill] sm:$0xff]  ;;  %v1441_v41 = vld [vmem:[#allocation31_spill] sm:$0xff] }
  0x63   :  { %v181_v10 = vadd.f32 %v1430_v7, %v179_v63  ;;  %v346_v1 = vadd.f32 %v345_v16, %v344_v24  ;;  %v1442_v24 = vld [vmem:[#allocation32_spill] sm:$0xff]  ;;  %v1443_v7 = vld [vmem:[#allocation33_spill] sm:$0xff] }
  0x65   :  { %v183_v25 = vadd.f32 %v1431_v55, %v181_v10  ;;  %v348_v60 = vadd.f32 %v347_v32, %v346_v1  ;;  %v1444_v1 = vld [vmem:[#allocation34_spill] sm:$0xff] }
  0x67   :  { %v185_v43 = vadd.f32 %v1432_v6, %v183_v25  ;;  %v350_v51 = vadd.f32 %v1072_v50, %v348_v60 }
  0x69   :  { %v187_v15 = vadd.f32 %v1433_v2, %v185_v43  ;;  %v352_v58 = vadd.f32 %v1075_v31, %v350_v51 }
  0x6b   :  { %v189_v61 = vadd.f32 %v1434_v0, %v187_v15  ;;  %v354_v5 = vadd.f32 %v1078_v26, %v352_v58 }
  0x6d   :  { %v191_v56 = vadd.f32 %v1435_v17, %v189_v61  ;;  %v356_v20 = vadd.f32 %v1081_v44, %v354_v5 }
  0x6f   :  { %v193_v34 = vadd.f32 %v1436_v3, %v191_v56  ;;  %v358_v49 = vadd.f32 %v1084_v57, %v356_v20 }
  0x71   :  { %v195_v30 = vadd.f32 %v1437_v35, %v193_v34  ;;  %v360_v50 = vadd.f32 %v1088_v13, %v358_v49 }
  0x73   :  { %v197_v9 = vadd.f32 %v1438_v62, %v195_v30  ;;  %v362_v31 = vadd.f32 %v1091_v18, %v360_v50 }
  0x75   :  { %v199_v14 = vadd.f32 %v1439_v12, %v197_v9  ;;  %v364_v26 = vadd.f32 %v1094_v19, %v362_v31 }
  0x77   :  { %v201_v16 = vadd.f32 %v1440_v11, %v199_v14  ;;  %v366_v44 = vadd.f32 %v1097_v21, %v364_v26 }
  0x79   :  { %v203_v63 = vadd.f32 %v1441_v41, %v201_v16  ;;  %v368_v57 = vadd.f32 %v1100_v22, %v366_v44 }
  0x7b   :  { %v205_v32 = vadd.f32 %v1442_v24, %v203_v63  ;;  %v370_v13 = vadd.f32 %v1103_v23, %v368_v57 }
  0x7d   :  { %v207_v10 = vadd.f32 %v1443_v7, %v205_v32  ;;  %v372_v18 = vadd.f32 %v1107_v45, %v370_v13  ;;  %v81_v45 = vld [vmem:[%s1319_s1] sm:$0x1] }
  0x7f   :  { %v209_v55 = vadd.f32 %v1444_v1, %v207_v10  ;;  %v374_v19 = vadd.f32 %v1110_v4, %v372_v18 }
  0x81   :  { %v210_v25 = vrot.slane %v209_v55, 4  ;;  %v376_v60 = vadd.f32 %v1113_v27, %v374_v19 }
  0x83   :  { %v211_v21 = vadd.f32 %v210_v25, %v209_v55  ;;  %v378_v6 = vadd.f32 %v1116_v28, %v376_v60 }
  0x85   :  { %v212_v43 = vrot.slane %v211_v21, 2  ;;  %v380_v22 = vadd.f32 %v1119_v29, %v378_v6 }
  0x87   :  { %v213_v51 = vadd.f32 %v212_v43, %v211_v21  ;;  %v382_v23 = vadd.f32 %v1122_v33, %v380_v22 }
  0x89   :  { %v214_v2 = vrot.slane %v213_v51, 1  ;;  %v384_v15 = vadd.f32 %v1126_v40, %v382_v23 }
  0x8b   :  { %v215_v4 = vadd.f32 %v214_v2, %v213_v51  ;;  %v386_v58 = vadd.f32 %v1129_v42, %v384_v15 }
  0x8d   :  { %v216_v27 = vadd.f32 %v215_v4, %v81_v45  ;;  %v388_v0 = vadd.f32 %v1132_v46, %v386_v58 }
  0x8f   :  { %218 = vst.msk [vmem:[%s1319_s1] sm:$0x1] %vm14_vm0, %v216_v27  ;;  %v390_v28 = vadd.f32 %v1135_v47, %v388_v0 }
  0x91   :  { %v392_v29 = vadd.f32 %v1138_v39, %v390_v28 }
  0x93   :  { %v394_v33 = vadd.f32 %v1141_v48, %v392_v29 }
  0x95   :  { %v396_v40 = vadd.f32 %v1145_v37, %v394_v33  ;;  %v219_v37 = vld [vmem:[%s1320_s2] sm:$0x1] }
  0x97   :  { %v398_v61 = vadd.f32 %v1148_v53, %v396_v40 }
  0x99   :  { %v400_v42 = vadd.f32 %v1151_v54, %v398_v61 }
  0x9b   :  { %v402_v5 = vadd.f32 %v1154_v38, %v400_v42 }
  0x9d   :  { %v404_v46 = vadd.f32 %v1157_v59, %v402_v5 }
  0x9f   :  { %v406_v17 = vadd.f32 %v1160_v36, %v404_v46 }
  0xa1   :  { %v408_v56 = vadd.f32 %v1169_v52, %v406_v17 }
  0xa3   :  { %v410_v47 = vadd.f32 %v1172_v8, %v408_v56 }
  0xa5   :  { %v411_v20 = vrot.slane %v410_v47, 4 }
  0xa7   :  { %v412_v39 = vadd.f32 %v411_v20, %v410_v47 }
  0xa9   :  { %v413_v3 = vrot.slane %v412_v39, 2 }
  0xab   :  { %v414_v48 = vadd.f32 %v413_v3, %v412_v39 }
  0xad   :  { %v415_v34 = vrot.slane %v414_v48, 1 }
  0xaf   :  { %v416_v53 = vadd.f32 %v415_v34, %v414_v48 }
  0xb1   :  { %v417_v54 = vadd.f32 %v416_v53, %v219_v37 }
  0xb3   :  { %418 = vst.msk [vmem:[%s1320_s2] sm:$0x1] %vm14_vm0, %v417_v54 }

// kernel: _lambda_.46
= control target key start
LH: loop header
LB: loop body
LE: loop exit
PB: predicated region body
PF: predicated region fallthrough
CT: control target
= control target key end

     0   :  { %vm220_vm0 = vcmask 64512   ;;  %s897_s0 = inlined_call_operand.vmem [shape: f32[512,8], index: 0, kind: input, shape index: {}]   ;;  %s898_s1 = inlined_call_operand.vmem [shape: f32[1,8], index: 1, kind: input, shape index: {}]   ;;  %s899_s2 = inlined_call_operand.vmem [shape: f32[1,8], index: 2, kind: input, shape index: {}]   ;;  %s900_s3 = inlined_call_operand.vmem [shape: f32[512,8], index: 3, kind: output, shape index: {}]  }
   0x1   :  { %v14_v0 = vld [vmem:[%s897_s0] sm:$0xff]  ;;  %v15_v4 = vld [vmem:[%s897_s0 + $0x8] sm:$0xff]  ;;  %v16_v5 = vld [vmem:[%s897_s0 + $0x10] sm:$0xff] }
   0x2   :  { %v317_v1 = vld [vmem:[%s898_s1] ss:$0 sm:$0xff]  ;;  %v17_v6 = vld [vmem:[%s897_s0 + $0x18] sm:$0xff]  ;;  %v19_v11 = vld [vmem:[%s897_s0 + $0x28] sm:$0xff] }
   0x3   :  { %v322_v2 = vld [vmem:[%s899_s2] ss:$0 sm:$0xff]  ;;  %v85_v3 = vmul.f32 %v317_v1, %v14_v0  ;;  %v86_v7 = vmul.f32 %v317_v1, %v15_v4  ;;  %v87_v8 = vmul.f32 %v317_v1, %v16_v5  ;;  %v88_v9 = vmul.f32 %v317_v1, %v17_v6  ;;  %v20_v12 = vld [vmem:[%s897_s0 + $0x30] sm:$0xff]  ;;  %v21_v17 = vld [vmem:[%s897_s0 + $0x38] sm:$0xff] }
   0x4   :  { %v18_v10 = vld [vmem:[%s897_s0 + $0x20] sm:$0xff]  ;;  %v90_v15 = vmul.f32 %v317_v1, %v19_v11  ;;  %v91_v16 = vmul.f32 %v317_v1, %v20_v12  ;;  %v23_v19 = vld [vmem:[%s897_s0 + $0x48] sm:$0xff]  ;;  %v92_v23 = vmul.f32 %v317_v1, %v21_v17  ;;  %v24_v24 = vld [vmem:[%s897_s0 + $0x50] sm:$0xff] }
   0x5   :  { %v156_v13 = vadd.f32 %v322_v2, %v85_v3  ;;  %v89_v14 = vmul.f32 %v317_v1, %v18_v10  ;;  %v22_v18 = vld [vmem:[%s897_s0 + $0x40] sm:$0xff]  ;;  %v157_v20 = vadd.f32 %v322_v2, %v86_v7  ;;  %v158_v21 = vadd.f32 %v322_v2, %v87_v8  ;;  %v25_v25 = vld [vmem:[%s897_s0 + $0x58] sm:$0xff]  ;;  %v27_v31 = vld [vmem:[%s897_s0 + $0x68] sm:$0xff] }
   0x6   :  { %v159_v22 = vadd.f32 %v322_v2, %v88_v9  ;;  %v26_v26 = vld [vmem:[%s897_s0 + $0x60] sm:$0xff]  ;;  %v161_v28 = vadd.f32 %v322_v2, %v90_v15  ;;  %v162_v29 = vadd.f32 %v322_v2, %v91_v16  ;;  %v93_v30 = vmul.f32 %v317_v1, %v22_v18  ;;  %v28_v32 = vld [vmem:[%s897_s0 + $0x70] sm:$0xff]  ;;  %v29_v33 = vld [vmem:[%s897_s0 + $0x78] sm:$0xff] }
   0x7   :  { %221 = vst.msk [vmem:[%s900_s3] sm:$0xff] %vm220_vm0, %v156_v13  ;;  %v160_v27 = vadd.f32 %v322_v2, %v89_v14  ;;  %222 = vst.msk [vmem:[%s900_s3 + $0x8] sm:$0xff] %vm220_vm0, %v157_v20  ;;  %v163_v34 = vadd.f32 %v322_v2, %v92_v23  ;;  %v94_v35 = vmul.f32 %v317_v1, %v23_v19  ;;  %v30_v38 = vld [vmem:[%s897_s0 + $0x80] sm:$0xff]  ;;  %v31_v43 = vld [vmem:[%s897_s0 + $0x88] sm:$0xff] }
   0x8   :  { %223 = vst.msk [vmem:[%s900_s3 + $0x10] sm:$0xff] %vm220_vm0, %v158_v21  ;;  %224 = vst.msk [vmem:[%s900_s3 + $0x18] sm:$0xff] %vm220_vm0, %v159_v22  ;;  %v95_v36 = vmul.f32 %v317_v1, %v24_v24  ;;  %v96_v37 = vmul.f32 %v317_v1, %v25_v25  ;;  %v164_v39 = vadd.f32 %v322_v2, %v93_v30  ;;  %v32_v44 = vld [vmem:[%s897_s0 + $0x90] sm:$0xff]  ;;  %v33_v45 = vld [vmem:[%s897_s0 + $0x98] sm:$0xff] }
   0x9   :  { %225 = vst.msk [vmem:[%s900_s3 + $0x20] sm:$0xff] %vm220_vm0, %v160_v27  ;;  %226 = vst.msk [vmem:[%s900_s3 + $0x28] sm:$0xff] %vm220_vm0, %v161_v28  ;;  %v97_v40 = vmul.f32 %v317_v1, %v26_v26  ;;  %v98_v41 = vmul.f32 %v317_v1, %v27_v31  ;;  %v99_v42 = vmul.f32 %v317_v1, %v28_v32  ;;  %v34_v50 = vld [vmem:[%s897_s0 + $0xa0] sm:$0xff]  ;;  %v35_v51 = vld [vmem:[%s897_s0 + $0xa8] sm:$0xff] }
   0xa   :  { %227 = vst.msk [vmem:[%s900_s3 + $0x30] sm:$0xff] %vm220_vm0, %v162_v29  ;;  %228 = vst.msk [vmem:[%s900_s3 + $0x38] sm:$0xff] %vm220_vm0, %v163_v34  ;;  %v165_v46 = vadd.f32 %v322_v2, %v94_v35  ;;  %v166_v47 = vadd.f32 %v322_v2, %v95_v36  ;;  %v167_v48 = vadd.f32 %v322_v2, %v96_v37  ;;  %v36_v52 = vld [vmem:[%s897_s0 + $0xb0] sm:$0xff]  ;;  %v37_v57 = vld [vmem:[%s897_s0 + $0xb8] sm:$0xff] }
   0xb   :  { %v100_v49 = vmul.f32 %v317_v1, %v29_v33  ;;  %229 = vst.msk [vmem:[%s900_s3 + $0x40] sm:$0xff] %vm220_vm0, %v164_v39  ;;  %v168_v53 = vadd.f32 %v322_v2, %v97_v40  ;;  %v169_v54 = vadd.f32 %v322_v2, %v98_v41  ;;  %v170_v55 = vadd.f32 %v322_v2, %v99_v42  ;;  %v38_v62 = vld [vmem:[%s897_s0 + $0xc0] sm:$0xff]  ;;  %v39_v5 = vld [vmem:[%s897_s0 + $0xc8] sm:$0xff]  ;;  %v40_v6 = vld [vmem:[%s897_s0 + $0xd0] sm:$0xff] }
   0xc   :  { %v101_v56 = vmul.f32 %v317_v1, %v30_v38  ;;  %230 = vst.msk [vmem:[%s900_s3 + $0x48] sm:$0xff] %vm220_vm0, %v165_v46  ;;  %231 = vst.msk [vmem:[%s900_s3 + $0x50] sm:$0xff] %vm220_vm0, %v166_v47  ;;  %v102_v59 = vmul.f32 %v317_v1, %v31_v43  ;;  %v103_v60 = vmul.f32 %v317_v1, %v32_v44  ;;  %v41_v7 = vld [vmem:[%s897_s0 + $0xd8] sm:$0xff]  ;;  %v42_v12 = vld [vmem:[%s897_s0 + $0xe0] sm:$0xff] }
   0xd   :  { %232 = vst.msk [vmem:[%s900_s3 + $0x58] sm:$0xff] %vm220_vm0, %v167_v48  ;;  %v171_v58 = vadd.f32 %v322_v2, %v100_v49  ;;  %v104_v61 = vmul.f32 %v317_v1, %v33_v45  ;;  %233 = vst.msk [vmem:[%s900_s3 + $0x60] sm:$0xff] %vm220_vm0, %v168_v53  ;;  %v105_v0 = vmul.f32 %v317_v1, %v34_v50  ;;  %v43_v13 = vld [vmem:[%s897_s0 + $0xe8] sm:$0xff]  ;;  %v44_v14 = vld [vmem:[%s897_s0 + $0xf0] sm:$0xff] }
   0xe   :  { %234 = vst.msk [vmem:[%s900_s3 + $0x68] sm:$0xff] %vm220_vm0, %v169_v54  ;;  %235 = vst.msk [vmem:[%s900_s3 + $0x70] sm:$0xff] %vm220_vm0, %v170_v55  ;;  %v172_v63 = vadd.f32 %v322_v2, %v101_v56  ;;  %v106_v3 = vmul.f32 %v317_v1, %v35_v51  ;;  %v107_v4 = vmul.f32 %v317_v1, %v36_v52  ;;  %v45_v19 = vld [vmem:[%s897_s0 + $0xf8] sm:$0xff]  ;;  %v46_v24 = vld [vmem:[%s897_s0 + $0x100] sm:$0xff] }
   0xf   :  { %236 = vst.msk [vmem:[%s900_s3 + $0x78] sm:$0xff] %vm220_vm0, %v171_v58  ;;  %v173_v8 = vadd.f32 %v322_v2, %v102_v59  ;;  %v174_v9 = vadd.f32 %v322_v2, %v103_v60  ;;  %v175_v10 = vadd.f32 %v322_v2, %v104_v61  ;;  %v108_v11 = vmul.f32 %v317_v1, %v37_v57  ;;  %v47_v29 = vld [vmem:[%s897_s0 + $0x108] sm:$0xff]  ;;  %v48_v30 = vld [vmem:[%s897_s0 + $0x110] sm:$0xff]  ;;  %v49_v31 = vld [vmem:[%s897_s0 + $0x118] sm:$0xff] }
  0x10   :  { %237 = vst.msk [vmem:[%s900_s3 + $0x80] sm:$0xff] %vm220_vm0, %v172_v63  ;;  %v176_v15 = vadd.f32 %v322_v2, %v105_v0  ;;  %v177_v16 = vadd.f32 %v322_v2, %v106_v3  ;;  %v178_v17 = vadd.f32 %v322_v2, %v107_v4  ;;  %v109_v18 = vmul.f32 %v317_v1, %v38_v62  ;;  %v50_v36 = vld [vmem:[%s897_s0 + $0x120] sm:$0xff]  ;;  %v51_v37 = vld [vmem:[%s897_s0 + $0x128] sm:$0xff]  ;;  %v52_v38 = vld [vmem:[%s897_s0 + $0x130] sm:$0xff] }
  0x11   :  { %238 = vst.msk [vmem:[%s900_s3 + $0x88] sm:$0xff] %vm220_vm0, %v173_v8  ;;  %239 = vst.msk [vmem:[%s900_s3 + $0x90] sm:$0xff] %vm220_vm0, %v174_v9  ;;  %v179_v20 = vadd.f32 %v322_v2, %v108_v11  ;;  %v110_v21 = vmul.f32 %v317_v1, %v39_v5  ;;  %v111_v22 = vmul.f32 %v317_v1, %v40_v6  ;;  %v53_v43 = vld [vmem:[%s897_s0 + $0x138] sm:$0xff]  ;;  %v54_v48 = vld [vmem:[%s897_s0 + $0x140] sm:$0xff] }
  0x12   :  { %240 = vst.msk [vmem:[%s900_s3 + $0x98] sm:$0xff] %vm220_vm0, %v175_v10  ;;  %v112_v23 = vmul.f32 %v317_v1, %v41_v7  ;;  %241 = vst.msk [vmem:[%s900_s3 + $0xa0] sm:$0xff] %vm220_vm0, %v176_v15  ;;  %v180_v25 = vadd.f32 %v322_v2, %v109_v18  ;;  %v113_v26 = vmul.f32 %v317_v1, %v42_v12  ;;  %v55_v53 = vld [vmem:[%s897_s0 + $0x148] sm:$0xff]  ;;  %v56_v54 = vld [vmem:[%s897_s0 + $0x150] sm:$0xff] }
  0x13   :  { %242 = vst.msk [vmem:[%s900_s3 + $0xa8] sm:$0xff] %vm220_vm0, %v177_v16  ;;  %243 = vst.msk [vmem:[%s900_s3 + $0xb0] sm:$0xff] %vm220_vm0, %v178_v17  ;;  %v114_v27 = vmul.f32 %v317_v1, %v43_v13  ;;  %v115_v28 = vmul.f32 %v317_v1, %v44_v14  ;;  %v181_v32 = vadd.f32 %v322_v2, %v110_v21  ;;  %v57_v55 = vld [vmem:[%s897_s0 + $0x158] sm:$0xff]  ;;  %v58_v60 = vld [vmem:[%s897_s0 + $0x160] sm:$0xff] }
  0x14   :  { %244 = vst.msk [vmem:[%s900_s3 + $0xb8] sm:$0xff] %vm220_vm0, %v179_v20  ;;  %v182_v33 = vadd.f32 %v322_v2, %v111_v22  ;;  %v183_v34 = vadd.f32 %v322_v2, %v112_v23  ;;  %v116_v35 = vmul.f32 %v317_v1, %v45_v19  ;;  %245 = vst.msk [vmem:[%s900_s3 + $0xc0] sm:$0xff] %vm220_vm0, %v180_v25  ;;  %v59_v61 = vld [vmem:[%s897_s0 + $0x168] sm:$0xff]  ;;  %v60_v62 = vld [vmem:[%s897_s0 + $0x170] sm:$0xff] }
  0x15   :  { %v184_v39 = vadd.f32 %v322_v2, %v113_v26  ;;  %v185_v40 = vadd.f32 %v322_v2, %v114_v27  ;;  %v186_v41 = vadd.f32 %v322_v2, %v115_v28  ;;  %v117_v42 = vmul.f32 %v317_v1, %v46_v24  ;;  %246 = vst.msk [vmem:[%s900_s3 + $0xc8] sm:$0xff] %vm220_vm0, %v181_v32  ;;  %v61_v5 = vld [vmem:[%s897_s0 + $0x178] sm:$0xff]  ;;  %v62_v10 = vld [vmem:[%s897_s0 + $0x180] sm:$0xff]  ;;  %v63_v15 = vld [vmem:[%s897_s0 + $0x188] sm:$0xff] }
  0x16   :  { %247 = vst.msk [vmem:[%s900_s3 + $0xd0] sm:$0xff] %vm220_vm0, %v182_v33  ;;  %248 = vst.msk [vmem:[%s900_s3 + $0xd8] sm:$0xff] %vm220_vm0, %v183_v34  ;;  %v187_v44 = vadd.f32 %v322_v2, %v116_v35  ;;  %v118_v45 = vmul.f32 %v317_v1, %v47_v29  ;;  %v119_v46 = vmul.f32 %v317_v1, %v48_v30  ;;  %v64_v16 = vld [vmem:[%s897_s0 + $0x190] sm:$0xff]  ;;  %v65_v17 = vld [vmem:[%s897_s0 + $0x198] sm:$0xff] }
  0x17   :  { %v120_v47 = vmul.f32 %v317_v1, %v49_v31  ;;  %249 = vst.msk [vmem:[%s900_s3 + $0xe0] sm:$0xff] %vm220_vm0, %v184_v39  ;;  %250 = vst.msk [vmem:[%s900_s3 + $0xe8] sm:$0xff] %vm220_vm0, %v185_v40  ;;  %v188_v49 = vadd.f32 %v322_v2, %v117_v42  ;;  %v121_v50 = vmul.f32 %v317_v1, %v50_v36  ;;  %v66_v22 = vld [vmem:[%s897_s0 + $0x1a0] sm:$0xff]  ;;  %v67_v23 = vld [vmem:[%s897_s0 + $0x1a8] sm:$0xff] }
  0x18   :  { %251 = vst.msk [vmem:[%s900_s3 + $0xf0] sm:$0xff] %vm220_vm0, %v186_v41  ;;  %v122_v51 = vmul.f32 %v317_v1, %v51_v37  ;;  %v123_v52 = vmul.f32 %v317_v1, %v52_v38  ;;  %252 = vst.msk [vmem:[%s900_s3 + $0xf8] sm:$0xff] %vm220_vm0, %v187_v44  ;;  %v189_v56 = vadd.f32 %v322_v2, %v118_v45  ;;  %v68_v24 = vld [vmem:[%s897_s0 + $0x1b0] sm:$0xff]  ;;  %v69_v29 = vld [vmem:[%s897_s0 + $0x1b8] sm:$0xff] }
  0x19   :  { %v190_v57 = vadd.f32 %v322_v2, %v119_v46  ;;  %v191_v58 = vadd.f32 %v322_v2, %v120_v47  ;;  %v124_v59 = vmul.f32 %v317_v1, %v53_v43  ;;  %253 = vst.msk [vmem:[%s900_s3 + $0x100] sm:$0xff] %vm220_vm0, %v188_v49  ;;  %v192_v63 = vadd.f32 %v322_v2, %v121_v50  ;;  %v70_v34 = vld [vmem:[%s897_s0 + $0x1c0] sm:$0xff]  ;;  %v71_v39 = vld [vmem:[%s897_s0 + $0x1c8] sm:$0xff]  ;;  %v72_v40 = vld [vmem:[%s897_s0 + $0x1d0] sm:$0xff] }
  0x1a   :  { %v193_v0 = vadd.f32 %v322_v2, %v122_v51  ;;  %v194_v3 = vadd.f32 %v322_v2, %v123_v52  ;;  %v125_v4 = vmul.f32 %v317_v1, %v54_v48  ;;  %254 = vst.msk [vmem:[%s900_s3 + $0x108] sm:$0xff] %vm220_vm0, %v189_v56  ;;  %v126_v7 = vmul.f32 %v317_v1, %v55_v53  ;;  %v73_v41 = vld [vmem:[%s897_s0 + $0x1d8] sm:$0xff]  ;;  %v74_v46 = vld [vmem:[%s897_s0 + $0x1e0] sm:$0xff]  ;;  %v75_v47 = vld [vmem:[%s897_s0 + $0x1e8] sm:$0xff] }
  0x1b   :  { %255 = vst.msk [vmem:[%s900_s3 + $0x110] sm:$0xff] %vm220_vm0, %v190_v57  ;;  %256 = vst.msk [vmem:[%s900_s3 + $0x118] sm:$0xff] %vm220_vm0, %v191_v58  ;;  %v195_v6 = vadd.f32 %v322_v2, %v124_v59  ;;  %v127_v8 = vmul.f32 %v317_v1, %v56_v54  ;;  %v128_v9 = vmul.f32 %v317_v1, %v57_v55  ;;  %v76_v48 = vld [vmem:[%s897_s0 + $0x1f0] sm:$0xff]  ;;  %v77_v53 = vld [vmem:[%s897_s0 + $0x1f8] sm:$0xff] }
  0x1c   :  { %257 = vst.msk [vmem:[%s900_s3 + $0x120] sm:$0xff] %vm220_vm0, %v192_v63  ;;  %258 = vst.msk [vmem:[%s900_s3 + $0x128] sm:$0xff] %vm220_vm0, %v193_v0  ;;  %v196_v11 = vadd.f32 %v322_v2, %v125_v4  ;;  %v129_v12 = vmul.f32 %v317_v1, %v58_v60  ;;  %v130_v13 = vmul.f32 %v317_v1, %v59_v61 }
  0x1d   :  { %259 = vst.msk [vmem:[%s900_s3 + $0x130] sm:$0xff] %vm220_vm0, %v194_v3  ;;  %v131_v14 = vmul.f32 %v317_v1, %v60_v62  ;;  %260 = vst.msk [vmem:[%s900_s3 + $0x138] sm:$0xff] %vm220_vm0, %v195_v6  ;;  %v197_v18 = vadd.f32 %v322_v2, %v126_v7  ;;  %v198_v19 = vadd.f32 %v322_v2, %v127_v8 }
  0x1e   :  { %v199_v20 = vadd.f32 %v322_v2, %v128_v9  ;;  %v132_v21 = vmul.f32 %v317_v1, %v61_v5  ;;  %261 = vst.msk [vmem:[%s900_s3 + $0x140] sm:$0xff] %vm220_vm0, %v196_v11  ;;  %v200_v25 = vadd.f32 %v322_v2, %v129_v12  ;;  %v201_v26 = vadd.f32 %v322_v2, %v130_v13 }
  0x1f   :  { %v202_v27 = vadd.f32 %v322_v2, %v131_v14  ;;  %v133_v28 = vmul.f32 %v317_v1, %v62_v10  ;;  %262 = vst.msk [vmem:[%s900_s3 + $0x148] sm:$0xff] %vm220_vm0, %v197_v18  ;;  %263 = vst.msk [vmem:[%s900_s3 + $0x150] sm:$0xff] %vm220_vm0, %v198_v19  ;;  %v134_v31 = vmul.f32 %v317_v1, %v63_v15 }
  0x20   :  { %264 = vst.msk [vmem:[%s900_s3 + $0x158] sm:$0xff] %vm220_vm0, %v199_v20  ;;  %v203_v30 = vadd.f32 %v322_v2, %v132_v21  ;;  %v135_v32 = vmul.f32 %v317_v1, %v64_v16  ;;  %v136_v33 = vmul.f32 %v317_v1, %v65_v17  ;;  %265 = vst.msk [vmem:[%s900_s3 + $0x160] sm:$0xff] %vm220_vm0, %v200_v25 }
  0x21   :  { %266 = vst.msk [vmem:[%s900_s3 + $0x168] sm:$0xff] %vm220_vm0, %v201_v26  ;;  %267 = vst.msk [vmem:[%s900_s3 + $0x170] sm:$0xff] %vm220_vm0, %v202_v27  ;;  %v204_v35 = vadd.f32 %v322_v2, %v133_v28  ;;  %v137_v36 = vmul.f32 %v317_v1, %v66_v22  ;;  %v138_v37 = vmul.f32 %v317_v1, %v67_v23 }
  0x22   :  { %v139_v38 = vmul.f32 %v317_v1, %v68_v24  ;;  %268 = vst.msk [vmem:[%s900_s3 + $0x178] sm:$0xff] %vm220_vm0, %v203_v30  ;;  %v205_v42 = vadd.f32 %v322_v2, %v134_v31  ;;  %v206_v43 = vadd.f32 %v322_v2, %v135_v32  ;;  %v207_v44 = vadd.f32 %v322_v2, %v136_v33 }
  0x23   :  { %v140_v45 = vmul.f32 %v317_v1, %v69_v29  ;;  %269 = vst.msk [vmem:[%s900_s3 + $0x180] sm:$0xff] %vm220_vm0, %v204_v35  ;;  %v208_v49 = vadd.f32 %v322_v2, %v137_v36  ;;  %v209_v50 = vadd.f32 %v322_v2, %v138_v37  ;;  %v141_v52 = vmul.f32 %v317_v1, %v70_v34 }
  0x24   :  { %v210_v51 = vadd.f32 %v322_v2, %v139_v38  ;;  %270 = vst.msk [vmem:[%s900_s3 + $0x188] sm:$0xff] %vm220_vm0, %v205_v42  ;;  %271 = vst.msk [vmem:[%s900_s3 + $0x190] sm:$0xff] %vm220_vm0, %v206_v43  ;;  %v142_v55 = vmul.f32 %v317_v1, %v71_v39  ;;  %v143_v56 = vmul.f32 %v317_v1, %v72_v40 }
  0x25   :  { %272 = vst.msk [vmem:[%s900_s3 + $0x198] sm:$0xff] %vm220_vm0, %v207_v44  ;;  %v211_v54 = vadd.f32 %v322_v2, %v140_v45  ;;  %v144_v57 = vmul.f32 %v317_v1, %v73_v41  ;;  %273 = vst.msk [vmem:[%s900_s3 + $0x1a0] sm:$0xff] %vm220_vm0, %v208_v49  ;;  %v212_v58 = vadd.f32 %v322_v2, %v141_v52 }
  0x26   :  { %274 = vst.msk [vmem:[%s900_s3 + $0x1a8] sm:$0xff] %vm220_vm0, %v209_v50  ;;  %275 = vst.msk [vmem:[%s900_s3 + $0x1b0] sm:$0xff] %vm220_vm0, %v210_v51  ;;  %v145_v59 = vmul.f32 %v317_v1, %v74_v46  ;;  %v146_v60 = vmul.f32 %v317_v1, %v75_v47  ;;  %v147_v61 = vmul.f32 %v317_v1, %v76_v48 }
  0x27   :  { %276 = vst.msk [vmem:[%s900_s3 + $0x1b8] sm:$0xff] %vm220_vm0, %v211_v54  ;;  %v213_v62 = vadd.f32 %v322_v2, %v142_v55  ;;  %v214_v63 = vadd.f32 %v322_v2, %v143_v56  ;;  %v215_v0 = vadd.f32 %v322_v2, %v144_v57  ;;  %v148_v3 = vmul.f32 %v317_v1, %v77_v53 }
  0x28   :  { %277 = vst.msk [vmem:[%s900_s3 + $0x1c0] sm:$0xff] %vm220_vm0, %v212_v58  ;;  %v216_v4 = vadd.f32 %v322_v2, %v145_v59  ;;  %v217_v5 = vadd.f32 %v322_v2, %v146_v60  ;;  %v218_v6 = vadd.f32 %v322_v2, %v147_v61 }
  0x29   :  { %278 = vst.msk [vmem:[%s900_s3 + $0x1c8] sm:$0xff] %vm220_vm0, %v213_v62  ;;  %279 = vst.msk [vmem:[%s900_s3 + $0x1d0] sm:$0xff] %vm220_vm0, %v214_v63  ;;  %v219_v1 = vadd.f32 %v322_v2, %v148_v3 }
  0x2a   :  { %280 = vst.msk [vmem:[%s900_s3 + $0x1d8] sm:$0xff] %vm220_vm0, %v215_v0  ;;  %281 = vst.msk [vmem:[%s900_s3 + $0x1e0] sm:$0xff] %vm220_vm0, %v216_v4 }
  0x2b   :  { %282 = vst.msk [vmem:[%s900_s3 + $0x1e8] sm:$0xff] %vm220_vm0, %v217_v5  ;;  %283 = vst.msk [vmem:[%s900_s3 + $0x1f0] sm:$0xff] %vm220_vm0, %v218_v6 }
  0x2c   :  { %284 = vst.msk [vmem:[%s900_s3 + $0x1f8] sm:$0xff] %vm220_vm0, %v219_v1 }

// kernel: tile.6
= control target key start
LH: loop header
LB: loop body
LE: loop exit
PB: predicated region body
PF: predicated region fallthrough
CT: control target
= control target key end

     0   :  { %s22_s0 = inlined_call_operand.vmem [shape: f32[2], index: 0, kind: input, shape index: {}]   ;;  %s23_s1 = inlined_call_operand.vmem [shape: f32[4,2], index: 1, kind: output, shape index: {}]  }
   0x1   :  { %v4_v0 = vld [vmem:[%s22_s0] ss:$0 sm:$0xff] }
   0x2   :  { %5 = vst [vmem:[%s23_s1] sm:$0xf] %v4_v0 }

// kernel: tile.7
= control target key start
LH: loop header
LB: loop body
LE: loop exit
PB: predicated region body
PF: predicated region fallthrough
CT: control target
= control target key end

     0   :  { %vm7_vm0 = vcmask 15360   ;;  %s37_s8 = smov 2   ;;  %s38_s9 = smov 4   ;;  %vm13_vm1 = vcmask 64560   ;;  %vm19_vm2 = vcmask 48160   ;;  %vm25_vm3 = vcmask 31760   ;;  %s55_s0 = inlined_call_operand.vmem [shape: f32[4,2], index: 0, kind: input, shape index: {}]   ;;  %s56_s1 = inlined_call_operand.vmem [shape: f32[8], index: 1, kind: output, shape index: {}]  }
   0x1   :  { %v4_v0 = vld [vmem:[%s55_s0] sm:$0xf]  ;;  %s36_s0 = smov 6  }
   0x2   :  { %5 = vst [vmem:[#allocation1] sm:$0xf] %v4_v0 }
   0x9   :  { %v10_v1 = vld [vmem:[#allocation1 + $0x3] sm:$0x1]   ;;  %v22_v2 = vld [vmem:[#allocation1 + $0x1] sm:$0x1]   ;;  %v6_v3 = vld [vmem:[#allocation1] sm:$0x1]  }
   0xa   :  { %11 = vrot.lane.b32.xlu0 %v10_v1, %s36_s0  ;;  %23 = vrot.lane.b32.xlu1 %v22_v2, %s37_s8  ;;  %v16_v4 = vld [vmem:[#allocation1 + $0x2] sm:$0x1]   ;;  %8 = vst.msk [vmem:[#allocation0] sm:$0x1] %vm7_vm0, %v6_v3  }
   0xe   :  { %17 = vrot.lane.b32.xlu0 %v16_v4, %s38_s9 }
  0x7c   :  { %v12_v5 = vpop.permute.xlu0 %11   ;;  %v24_v6 = vpop.permute.xlu1 %23  }
  0x7d   :  { %14 = vst.msk [vmem:[#allocation0] sm:$0x1] %vm13_vm1, %v12_v5  }
  0x80   :  { %v18_v7 = vpop.permute.xlu0 %17  }
  0x81   :  { %20 = vst.msk [vmem:[#allocation0] sm:$0x1] %vm19_vm2, %v18_v7  }
  0x82   :  { %26 = vst.msk [vmem:[#allocation0] sm:$0x1] %vm25_vm3, %v24_v6  }
  0x89   :  { %v30_v8 = vld [vmem:[#allocation0] sm:$0x1] }
  0x8a   :  { %32 = vst [vmem:[%s56_s1] sm:$0x1] %v30_v8 }

// kernel: _lambda_.47
= control target key start
LH: loop header
LB: loop body
LE: loop exit
PB: predicated region body
PF: predicated region fallthrough
CT: control target
= control target key end

     0   :  { %s1328_s12 = smov 0   ;;  %s1330_s13 = smov 0   ;;  %s1534_s0 = inlined_call_operand.vmem [shape: bf16[512,144], index: 0, kind: input, shape index: {}]   ;;  %s1535_s1 = inlined_call_operand.vmem [shape: bf16[144,128], index: 1, kind: input, shape index: {}]   ;;  %s1536_s2 = inlined_call_operand.vmem [shape: f32[1,128], index: 2, kind: input, shape index: {}]   ;;  %s1537_s3 = inlined_call_operand.vmem [shape: f32[512,128], index: 3, kind: output, shape index: {}]  }
   0x1   :  { %s1332_s14 = smov 0  }
   0x2 LB: > { %s32_s15 = sadd.s32 1, %s1301_s13  ;;  %p1132_p0 = scmp.ge.s32.totalorder %s1305_s14, 1  ;;  %s1305_s14 = sphi %s1332_s14, %s13_s14   ;;  %s1301_s13 = sphi %s1330_s13, %s1539_s13   ;;  %s1297_s12 = sphi %s1328_s12, %s1538_s12  }
   0x3   : > { %p34_p1 = scmp.ge.s32.totalorder %s32_s15, 2  ;;  %p191_p2 = scmp.lt.s32.totalorder %s1305_s14, 3 }
   0x5   : > { %s1541_s15 = smov (%p34_p1, %s32_s15), 0  ;;  %p192_p3 = pnand %p1132_p0, %p191_p2 }
   0x6   : > { %v1210_v0 = vld [vmem:[%s1535_s1] sm:$0xff] (!%p192_p3)   ;;  %v1307_v1 = vmov (!%p192_p3), 0   ;;  %s1133_s18 = sshll.u32 (!%p192_p3), %s1297_s12, 5  ;;  %v1211_v2 = vld [vmem:[%s1535_s1 + $0x8] sm:$0xff] (!%p192_p3)   ;;  %v1212_v3 = vld [vmem:[%s1535_s1 + $0x10] sm:$0xff] (!%p192_p3)   ;;  %vm600_vm0 = vcmask (!%p192_p3), 130048  }
   0x7   : > { %195 = sbr.rel (%p192_p3) target bundleno = 328 (0x148), region = 32  ;;  %649 = vmatprep.subr.bf16.mxu0 (!%p192_p3), %v1307_v1  ;;  %1167 = vmatprep.subr.bf16.mxu1 (!%p192_p3), %v1307_v1  ;;  %p236_p4 = scmp.lt.s32.totalorder (!%p192_p3), %s1133_s18, 63  ;;  %v1213_v7 = vld [vmem:[%s1535_s1 + $0x18] sm:$0xff] (!%p192_p3)   ;;  %v1214_v17 = vld [vmem:[%s1535_s1 + $0x20] sm:$0xff] (!%p192_p3)   ;;  %v1215_v20 = vld [vmem:[%s1535_s1 + $0x28] sm:$0xff] (!%p192_p3)  }
   0x8   : > { %650 = vmatpush1.bf16.msra.mxu0 (!%p192_p3), %v1210_v0  ;;  %1176 = vmatpush1.bf16.msra.mxu1 (!%p192_p3), %v1210_v0  ;;  %v1216_v21 = vld [vmem:[%s1535_s1 + $0x30] sm:$0xff] (!%p192_p3)   ;;  %v1217_v30 = vld [vmem:[%s1535_s1 + $0x38] sm:$0xff] (!%p192_p3)   ;;  %v1218_v39 = vld [vmem:[%s1535_s1 + $0x40] sm:$0xff] (!%p192_p3)  }
   0x9   : > { %651 = vmatprep.subr.bf16.mxu0 (!%p192_p3), %v1307_v1  ;;  %1168 = vmatprep.subr.bf16.mxu1 (!%p192_p3), %v1307_v1 }
   0xc   : > { %652 = vmatpush1.bf16.msra.mxu0 (!%p192_p3), %v1211_v2  ;;  %1177 = vmatpush1.bf16.msra.mxu1 (!%p192_p3), %v1211_v2 }
   0xd   : > { %653 = vmatprep.subr.bf16.mxu0 (!%p192_p3), %v1307_v1  ;;  %1169 = vmatprep.subr.bf16.mxu1 (!%p192_p3), %v1307_v1 }
   0xe   : > { %s1543_s18 = smov (!%p236_p4, %s1133_s18), 63 }
   0xf   : > { %s1166_s23 = sshll.u32 %s1543_s18, 3 }
  0x10   : > { %s1369_s26 = scalar_lea.vmem %s1534_s0, %s1166_s23  ;;  %654 = vmatpush1.bf16.msra.mxu0 %v1212_v3  ;;  %1178 = vmatpush1.bf16.msra.mxu1 %v1212_v3  ;;  %s1465_s20 = scalar_lea.vmem %s1537_s3, %s1166_s23 }
  0x11   : > { %v304_v4 = vld [vmem:[%s1369_s26] sm:$0xff]  ;;  %v305_v5 = vld [vmem:[%s1369_s26 + $0x8] sm:$0xff]  ;;  %655 = vmatprep.subr.bf16.mxu0 %v1307_v1  ;;  %1170 = vmatprep.subr.bf16.mxu1 %v1307_v1  ;;  %v306_v22 = vld [vmem:[%s1369_s26 + $0x10] sm:$0xff] }
  0x12   : > { %v320_v6 = vld [vmem:[%s1369_s26 + $0x80] sm:$0xff]  ;;  %v337_v8 = vunpack.c.h.bf16 %v304_v4  ;;  %v339_v9 = vunpack.c.h.bf16 %v305_v5  ;;  %v321_v10 = vld [vmem:[%s1369_s26 + $0x88] sm:$0xff]  ;;  %v307_v23 = vld [vmem:[%s1369_s26 + $0x18] sm:$0xff]  ;;  %v336_v26 = vunpack.c.l.bf16 %v304_v4  ;;  %v338_v27 = vunpack.c.l.bf16 %v305_v5 }
  0x13   : > { %v369_v11 = vunpack.c.h.bf16 %v320_v6  ;;  %v371_v12 = vunpack.c.h.bf16 %v321_v10  ;;  %v322_v24 = vld [vmem:[%s1369_s26 + $0x90] sm:$0xff]  ;;  %v323_v25 = vld [vmem:[%s1369_s26 + $0x98] sm:$0xff]  ;;  %v368_v28 = vunpack.c.l.bf16 %v320_v6  ;;  %v370_v29 = vunpack.c.l.bf16 %v321_v10  ;;  %v308_v44 = vld [vmem:[%s1369_s26 + $0x20] sm:$0xff] }
  0x14   : > { %v401_v13 = vmax.f32 %v337_v8, 0.0  ;;  %v403_v14 = vmax.f32 %v339_v9, 0.0  ;;  %656 = vmatpush1.bf16.msra.mxu0 %v1213_v7  ;;  %1179 = vmatpush1.bf16.msra.mxu1 %v1213_v7  ;;  %v341_v31 = vunpack.c.h.bf16 %v306_v22  ;;  %v343_v32 = vunpack.c.h.bf16 %v307_v23  ;;  %v309_v45 = vld [vmem:[%s1369_s26 + $0x28] sm:$0xff]  ;;  %v324_v46 = vld [vmem:[%s1369_s26 + $0xa0] sm:$0xff]  ;;  %v310_v4 = vld [vmem:[%s1369_s26 + $0x30] sm:$0xff] }
  0x15   : > { %v433_v15 = vmax.f32 %v369_v11, 0.0  ;;  %v435_v16 = vmax.f32 %v371_v12, 0.0  ;;  %657 = vmatprep.subr.bf16.mxu0 %v1307_v1  ;;  %1171 = vmatprep.subr.bf16.mxu1 %v1307_v1  ;;  %v373_v33 = vunpack.c.h.bf16 %v322_v24  ;;  %v375_v34 = vunpack.c.h.bf16 %v323_v25  ;;  %v325_v47 = vld [vmem:[%s1369_s26 + $0xa8] sm:$0xff]  ;;  %v311_v5 = vld [vmem:[%s1369_s26 + $0x38] sm:$0xff]  ;;  %v326_v6 = vld [vmem:[%s1369_s26 + $0xb0] sm:$0xff] }
  0x16   : > { %v465_v18 = vpack.c.bf16 %v403_v14, %v401_v13  ;;  %v400_v35 = vmax.f32 %v336_v26, 0.0  ;;  %v402_v36 = vmax.f32 %v338_v27, 0.0  ;;  %v432_v37 = vmax.f32 %v368_v28, 0.0  ;;  %v327_v7 = vld [vmem:[%s1369_s26 + $0xb8] sm:$0xff]  ;;  %v312_v28 = vld [vmem:[%s1369_s26 + $0x40] sm:$0xff] }
  0x17   : > { %v481_v19 = vpack.c.bf16 %v435_v16, %v433_v15  ;;  %v434_v38 = vmax.f32 %v370_v29, 0.0  ;;  %v405_v40 = vmax.f32 %v341_v31, 0.0  ;;  %v407_v41 = vmax.f32 %v343_v32, 0.0  ;;  %v313_v29 = vld [vmem:[%s1369_s26 + $0x48] sm:$0xff] }
  0x18   : > { %1147 = vmatprep.mubr.msk.bf16.mxu0 %vm600_vm0, %v465_v18  ;;  %658 = vmatpush1.bf16.msra.mxu0 %v1214_v17  ;;  %v437_v42 = vmax.f32 %v373_v33, 0.0  ;;  %v439_v43 = vmax.f32 %v375_v34, 0.0  ;;  %v464_v48 = vpack.c.bf16 %v402_v36, %v400_v35  ;;  %v340_v50 = vunpack.c.l.bf16 %v306_v22  ;;  %v329_v31 = vld [vmem:[%s1369_s26 + $0xc8] sm:$0xff] }
  0x19   : > { %1155 = vmatprep.mubr.msk.bf16.mxu1 %vm600_vm0, %v481_v19  ;;  %1180 = vmatpush1.bf16.msra.mxu1 %v1214_v17  ;;  %v480_v49 = vpack.c.bf16 %v434_v38, %v432_v37  ;;  %v342_v51 = vunpack.c.l.bf16 %v307_v23  ;;  %v372_v52 = vunpack.c.l.bf16 %v322_v24  ;;  %v374_v53 = vunpack.c.l.bf16 %v323_v25 }
  0x1a   : > { %659 = vmatprep.subr.bf16.mxu0 %v1307_v1  ;;  %1172 = vmatprep.subr.bf16.mxu1 %v1307_v1  ;;  %v345_v54 = vunpack.c.h.bf16 %v308_v44  ;;  %v347_v55 = vunpack.c.h.bf16 %v309_v45  ;;  %v467_v56 = vpack.c.bf16 %v407_v41, %v405_v40  ;;  %v483_v57 = vpack.c.bf16 %v439_v43, %v437_v42 }
  0x1b   : > { %v377_v58 = vunpack.c.h.bf16 %v324_v46  ;;  %v379_v59 = vunpack.c.h.bf16 %v325_v47  ;;  %v404_v60 = vmax.f32 %v340_v50, 0.0  ;;  %v406_v61 = vmax.f32 %v342_v51, 0.0 }
  0x1c   : > { %660 = vmatpush1.bf16.msra.mxu0 %v1215_v20  ;;  %v436_v62 = vmax.f32 %v372_v52, 0.0  ;;  %v438_v63 = vmax.f32 %v374_v53, 0.0  ;;  %v409_v0 = vmax.f32 %v345_v54, 0.0  ;;  %v344_v8 = vunpack.c.l.bf16 %v308_v44  ;;  %v314_v52 = vld [vmem:[%s1369_s26 + $0x50] sm:$0xff]  ;;  %v315_v53 = vld [vmem:[%s1369_s26 + $0x58] sm:$0xff] }
  0x1d   : > { %1181 = vmatpush1.bf16.msra.mxu1 %v1215_v20  ;;  %661 = vmatprep.subr.bf16.mxu0 %v1307_v1  ;;  %v441_v2 = vmax.f32 %v377_v58, 0.0  ;;  %v443_v3 = vmax.f32 %v379_v59, 0.0  ;;  %v346_v9 = vunpack.c.l.bf16 %v309_v45  ;;  %v376_v10 = vunpack.c.l.bf16 %v324_v46  ;;  %v330_v54 = vld [vmem:[%s1369_s26 + $0xd0] sm:$0xff] }
  0x1e   : > { %1173 = vmatprep.subr.bf16.mxu1 %v1307_v1  ;;  %v378_v11 = vunpack.c.l.bf16 %v325_v47  ;;  %v466_v12 = vpack.c.bf16 %v406_v61, %v404_v60  ;;  %v482_v13 = vpack.c.bf16 %v438_v63, %v436_v62  ;;  %v349_v15 = vunpack.c.h.bf16 %v310_v4 }
  0x1f   : > { %v485_v16 = vpack.c.bf16 %v443_v3, %v441_v2  ;;  %v351_v17 = vunpack.c.h.bf16 %v311_v5  ;;  %v381_v18 = vunpack.c.h.bf16 %v326_v6  ;;  %v383_v19 = vunpack.c.h.bf16 %v327_v7 }
  0x20   : > { %662 = vmatpush1.bf16.msra.mxu0 %v1216_v21  ;;  %v408_v20 = vmax.f32 %v344_v8, 0.0  ;;  %v440_v22 = vmax.f32 %v376_v10, 0.0  ;;  %v442_v23 = vmax.f32 %v378_v11, 0.0  ;;  %v413_v24 = vmax.f32 %v349_v15, 0.0  ;;  %v333_v15 = vld [vmem:[%s1369_s26 + $0xe8] sm:$0xff] }
  0x21   : > { %1182 = vmatpush1.bf16.msra.mxu1 %v1216_v21  ;;  %663 = vmatprep.subr.bf16.mxu0 %v1307_v1  ;;  %v410_v21 = vmax.f32 %v346_v9, 0.0  ;;  %v415_v25 = vmax.f32 %v351_v17, 0.0  ;;  %v445_v26 = vmax.f32 %v381_v18, 0.0  ;;  %v447_v27 = vmax.f32 %v383_v19, 0.0 }
  0x22   : > { %1174 = vmatprep.subr.bf16.mxu1 %v1307_v1  ;;  %v484_v33 = vpack.c.bf16 %v442_v23, %v440_v22  ;;  %v348_v34 = vunpack.c.l.bf16 %v310_v4  ;;  %v350_v35 = vunpack.c.l.bf16 %v311_v5  ;;  %v380_v36 = vunpack.c.l.bf16 %v326_v6 }
  0x23   : > { %v468_v32 = vpack.c.bf16 %v410_v21, %v408_v20  ;;  %v382_v37 = vunpack.c.l.bf16 %v327_v7  ;;  %v353_v38 = vunpack.c.h.bf16 %v312_v28  ;;  %v471_v40 = vpack.c.bf16 %v415_v25, %v413_v24 }
  0x24   : > { %664 = vmatpush1.bf16.msra.mxu0 %v1217_v30  ;;  %v487_v41 = vpack.c.bf16 %v447_v27, %v445_v26  ;;  %v387_v43 = vunpack.c.h.bf16 %v329_v31  ;;  %v412_v44 = vmax.f32 %v348_v34, 0.0  ;;  %v414_v45 = vmax.f32 %v350_v35, 0.0 }
  0x25   : > { %1183 = vmatpush1.bf16.msra.mxu1 %v1217_v30  ;;  %665 = vmatprep.subr.bf16.mxu0 %v1307_v1  ;;  %v328_v30 = vld [vmem:[%s1369_s26 + $0xc0] sm:$0xff]  ;;  %v444_v46 = vmax.f32 %v380_v36, 0.0  ;;  %v446_v47 = vmax.f32 %v382_v37, 0.0  ;;  %v386_v59 = vunpack.c.l.bf16 %v329_v31  ;;  %v357_v63 = vunpack.c.h.bf16 %v314_v52  ;;  %v318_v36 = vld [vmem:[%s1369_s26 + $0x70] sm:$0xff]  ;;  %v319_v37 = vld [vmem:[%s1369_s26 + $0x78] sm:$0xff] }
  0x26   : > { %1175 = vmatprep.subr.bf16.mxu1 %v1307_v1  ;;  %v411_v1 = vmax.f32 %v347_v55, 0.0  ;;  %v385_v42 = vunpack.c.h.bf16 %v328_v30  ;;  %v451_v51 = vmax.f32 %v387_v43, 0.0  ;;  %v331_v55 = vld [vmem:[%s1369_s26 + $0xd8] sm:$0xff]  ;;  %v384_v58 = vunpack.c.l.bf16 %v328_v30 }
  0x27   : > { %v470_v60 = vpack.c.bf16 %v414_v45, %v412_v44  ;;  %v486_v61 = vpack.c.bf16 %v446_v47, %v444_v46  ;;  %v389_v2 = vunpack.c.h.bf16 %v330_v54  ;;  %v391_v3 = vunpack.c.h.bf16 %v331_v55 }
  0x28   : > { %666 = vmatpush1.bf16.msra.mxu0 %v1218_v39  ;;  %v469_v14 = vpack.c.bf16 %v411_v1, %v409_v0  ;;  %v449_v50 = vmax.f32 %v385_v42, 0.0  ;;  %v359_v1 = vunpack.c.h.bf16 %v315_v53  ;;  %v448_v6 = vmax.f32 %v384_v58, 0.0 }
  0x29   : > { %1184 = vmatpush1.bf16.msra.mxu1 %v1218_v39  ;;  %v355_v39 = vunpack.c.h.bf16 %v313_v29  ;;  %v450_v7 = vmax.f32 %v386_v59, 0.0  ;;  %v421_v8 = vmax.f32 %v357_v63, 0.0  ;;  %v453_v10 = vmax.f32 %v389_v2, 0.0 }
  0x2a   : > { %v489_v0 = vpack.c.bf16 %v451_v51, %v449_v50  ;;  %v423_v9 = vmax.f32 %v359_v1, 0.0  ;;  %v455_v11 = vmax.f32 %v391_v3, 0.0  ;;  %v356_v18 = vunpack.c.l.bf16 %v314_v52 }
  0x2b   : > { %682 = vmatmul.mubr.bf16.vlgmr.msra.gmra.mrb[0].mxu0 %v464_v48  ;;  %v417_v48 = vmax.f32 %v353_v38, 0.0  ;;  %v488_v17 = vpack.c.bf16 %v450_v7, %v448_v6  ;;  %v358_v19 = vunpack.c.l.bf16 %v315_v53  ;;  %v388_v20 = vunpack.c.l.bf16 %v330_v54  ;;  %v334_v38 = vld [vmem:[%s1369_s26 + $0xf0] sm:$0xff] }
  0x2c   : > { %746 = vmatmul.mubr.bf16.vlgmr.msra.gmra.mrb[0].mxu1 %v480_v49  ;;  %1148 = vmatprep.mubr.msk.bf16.mxu0 %vm600_vm0, %v467_v56  ;;  %v419_v49 = vmax.f32 %v355_v39, 0.0  ;;  %v352_v56 = vunpack.c.l.bf16 %v312_v28  ;;  %v390_v21 = vunpack.c.l.bf16 %v331_v55  ;;  %v475_v24 = vpack.c.bf16 %v423_v9, %v421_v8  ;;  %v335_v39 = vld [vmem:[%s1369_s26 + $0xf8] sm:$0xff] }
  0x2d   : > { %1156 = vmatprep.mubr.msk.bf16.mxu1 %vm600_vm0, %v483_v57  ;;  %v354_v57 = vunpack.c.l.bf16 %v313_v29  ;;  %v491_v25 = vpack.c.bf16 %v455_v11, %v453_v10  ;;  %v395_v27 = vunpack.c.h.bf16 %v333_v15  ;;  %v420_v28 = vmax.f32 %v356_v18, 0.0  ;;  %v1452_v10 = vld [vmem:[%s1536_s2] ss:$0 sm:$0xff] }
  0x2e   : > { %v473_v62 = vpack.c.bf16 %v419_v49, %v417_v48  ;;  %v416_v4 = vmax.f32 %v352_v56, 0.0  ;;  %v422_v29 = vmax.f32 %v358_v19, 0.0  ;;  %v452_v30 = vmax.f32 %v388_v20, 0.0 }
  0x2f   : > { %v418_v5 = vmax.f32 %v354_v57, 0.0  ;;  %v454_v31 = vmax.f32 %v390_v21, 0.0  ;;  %v459_v35 = vmax.f32 %v395_v27, 0.0  ;;  %v394_v43 = vunpack.c.l.bf16 %v333_v15 }
  0x30   : > { %v474_v44 = vpack.c.bf16 %v422_v29, %v420_v28  ;;  %v365_v47 = vunpack.c.h.bf16 %v318_v36  ;;  %v367_v49 = vunpack.c.h.bf16 %v319_v37  ;;  %v397_v50 = vunpack.c.h.bf16 %v334_v38 }
  0x31   : > { %v490_v45 = vpack.c.bf16 %v454_v31, %v452_v30  ;;  %v399_v51 = vunpack.c.h.bf16 %v335_v39  ;;  %v458_v55 = vmax.f32 %v394_v43, 0.0  ;;  %v366_v63 = vunpack.c.l.bf16 %v319_v37 }
  0x32   : > { %v429_v56 = vmax.f32 %v365_v47, 0.0  ;;  %v431_v57 = vmax.f32 %v367_v49, 0.0  ;;  %v461_v58 = vmax.f32 %v397_v50, 0.0  ;;  %v398_v1 = vunpack.c.l.bf16 %v335_v39 }
  0x33   : > { %690 = vmatmul.mubr.bf16.gmra.mrb[4].mxu0 %v466_v12  ;;  %v316_v12 = vld [vmem:[%s1369_s26 + $0x60] sm:$0xff]  ;;  %v463_v59 = vmax.f32 %v399_v51, 0.0 }
  0x34   : > { %754 = vmatmul.mubr.bf16.gmra.mrb[4].mxu1 %v482_v13  ;;  %1149 = vmatprep.mubr.msk.bf16.mxu0 %vm600_vm0, %v469_v14  ;;  %v317_v13 = vld [vmem:[%s1369_s26 + $0x68] sm:$0xff]  ;;  %v332_v14 = vld [vmem:[%s1369_s26 + $0xe0] sm:$0xff]  ;;  %v361_v22 = vunpack.c.h.bf16 %v316_v12  ;;  %v479_v2 = vpack.c.bf16 %v431_v57, %v429_v56  ;;  %v462_v7 = vmax.f32 %v398_v1, 0.0 }
  0x35   : > { %1157 = vmatprep.mubr.msk.bf16.mxu1 %vm600_vm0, %v485_v16  ;;  %v472_v16 = vpack.c.bf16 %v418_v5, %v416_v4  ;;  %v363_v23 = vunpack.c.h.bf16 %v317_v13  ;;  %v393_v26 = vunpack.c.h.bf16 %v332_v14  ;;  %v392_v42 = vunpack.c.l.bf16 %v332_v14 }
  0x36   : > { %v495_v3 = vpack.c.bf16 %v463_v59, %v461_v58  ;;  %v430_v5 = vmax.f32 %v366_v63, 0.0 }
  0x37   : > { %v457_v34 = vmax.f32 %v393_v26, 0.0  ;;  %v456_v54 = vmax.f32 %v392_v42, 0.0 }
  0x39   : > { %v493_v48 = vpack.c.bf16 %v459_v35, %v457_v34 }
  0x3b   : > { %698 = vmatmul.mubr.bf16.gmra.mrb[8].mxu0 %v468_v32  ;;  %v425_v32 = vmax.f32 %v361_v22, 0.0 }
  0x3c   : > { %762 = vmatmul.mubr.bf16.gmra.mrb[8].mxu1 %v484_v33  ;;  %1150 = vmatprep.mubr.msk.bf16.mxu0 %vm600_vm0, %v471_v40  ;;  %v427_v33 = vmax.f32 %v363_v23, 0.0  ;;  %v360_v40 = vunpack.c.l.bf16 %v316_v12 }
  0x3d   : > { %1158 = vmatprep.mubr.msk.bf16.mxu1 %vm600_vm0, %v487_v41  ;;  %v362_v41 = vunpack.c.l.bf16 %v317_v13 }
  0x3e   : > { %v477_v46 = vpack.c.bf16 %v427_v33, %v425_v32  ;;  %v424_v52 = vmax.f32 %v360_v40, 0.0 }
  0x3f   : > { %v426_v53 = vmax.f32 %v362_v41, 0.0 }
  0x43   : > { %706 = vmatmul.mubr.bf16.gmra.mrb[12].mxu0 %v470_v60  ;;  %v476_v60 = vpack.c.bf16 %v426_v53, %v424_v52 }
  0x44   : > { %770 = vmatmul.mubr.bf16.gmra.mrb[12].mxu1 %v486_v61  ;;  %1151 = vmatprep.mubr.msk.bf16.mxu0 %vm600_vm0, %v473_v62  ;;  %v492_v61 = vpack.c.bf16 %v458_v55, %v456_v54  ;;  %v364_v62 = vunpack.c.l.bf16 %v318_v36 }
  0x45   : > { %1159 = vmatprep.mubr.msk.bf16.mxu1 %vm600_vm0, %v489_v0  ;;  %v396_v0 = vunpack.c.l.bf16 %v334_v38 }
  0x46   : > { %v428_v4 = vmax.f32 %v364_v62, 0.0 }
  0x47   : > { %v460_v6 = vmax.f32 %v396_v0, 0.0 }
  0x48   : > { %v478_v8 = vpack.c.bf16 %v430_v5, %v428_v4 }
  0x49   : > { %v494_v9 = vpack.c.bf16 %v462_v7, %v460_v6 }
  0x4b   : > { %714 = vmatmul.mubr.bf16.gmra.mrb[16].mxu0 %v472_v16 }
  0x4c   : > { %778 = vmatmul.mubr.bf16.gmra.mrb[16].mxu1 %v488_v17  ;;  %1152 = vmatprep.mubr.msk.bf16.mxu0 %vm600_vm0, %v475_v24 }
  0x4d   : > { %1160 = vmatprep.mubr.msk.bf16.mxu1 %vm600_vm0, %v491_v25 }
  0x53   : > { %722 = vmatmul.mubr.bf16.gmra.mrb[20].mxu0 %v474_v44 }
  0x54   : > { %786 = vmatmul.mubr.bf16.gmra.mrb[20].mxu1 %v490_v45  ;;  %1153 = vmatprep.mubr.msk.bf16.mxu0 %vm600_vm0, %v477_v46 }
  0x55   : > { %1161 = vmatprep.mubr.msk.bf16.mxu1 %vm600_vm0, %v493_v48 }
  0x5b   : > { %730 = vmatmul.mubr.bf16.gmra.mrb[24].mxu0 %v476_v60 }
  0x5c   : > { %794 = vmatmul.mubr.bf16.gmra.mrb[24].mxu1 %v492_v61  ;;  %1154 = vmatprep.mubr.msk.bf16.mxu0 %vm600_vm0, %v479_v2 }
  0x5d   : > { %1162 = vmatprep.mubr.msk.bf16.mxu1 %vm600_vm0, %v495_v3 }
  0x63   : > { %738 = vmatmul.mubr.bf16.gmra.mrb[28].mxu0 %v478_v8 }
  0x64   : > { %802 = vmatmul.mubr.bf16.gmra.mrb[28].mxu1 %v494_v9 }
  0xfe   : > { %v683_v11 = vpop.f32.mrb[0].mxu0 }
  0xff   : > { %v747_v12 = vpop.f32.mrb[0].mxu1  ;;  %v916_v13 = vadd.f32 %v1452_v10, %v683_v11  ;;  %v685_v15 = vpop.f32.mrb[1].mxu0 }
 0x100   : > { %v932_v14 = vadd.f32 %v1452_v10, %v747_v12  ;;  %v749_v16 = vpop.f32.mrb[1].mxu1  ;;  %v686_v17 = vpop.f32.mrb[2].mxu0 }
 0x101   : > { %v750_v18 = vpop.f32.mrb[2].mxu1  ;;  %1219 = vtanh.f32 %v916_v13  ;;  %v917_v19 = vadd.f32 %v1452_v10, %v686_v17  ;;  %v688_v21 = vpop.f32.mrb[3].mxu0 }
 0x102   : > { %v933_v20 = vadd.f32 %v1452_v10, %v750_v18  ;;  %v752_v22 = vpop.f32.mrb[3].mxu1  ;;  %1221 = vtanh.f32 %v932_v14 }
 0x103   : > { %1223 = vtanh.f32 %v917_v19 }
 0x104   : > { %1225 = vtanh.f32 %v933_v20 }
 0x106   : > { %v691_v23 = vpop.f32.mrb[4].mxu0 }
 0x107   : > { %v755_v24 = vpop.f32.mrb[4].mxu1  ;;  %v918_v25 = vadd.f32 %v1452_v10, %v691_v23  ;;  %v693_v27 = vpop.f32.mrb[5].mxu0 }
 0x108   : > { %v934_v26 = vadd.f32 %v1452_v10, %v755_v24  ;;  %v757_v28 = vpop.f32.mrb[5].mxu1  ;;  %v694_v29 = vpop.f32.mrb[6].mxu0 }
 0x109   : > { %v758_v30 = vpop.f32.mrb[6].mxu1  ;;  %1227 = vtanh.f32 %v918_v25  ;;  %v919_v31 = vadd.f32 %v1452_v10, %v694_v29  ;;  %v696_v33 = vpop.f32.mrb[7].mxu0 }
 0x10a   : > { %v935_v32 = vadd.f32 %v1452_v10, %v758_v30  ;;  %v760_v34 = vpop.f32.mrb[7].mxu1  ;;  %1229 = vtanh.f32 %v934_v26 }
 0x10b   : > { %v1220_v35 = vpop.eup %1219  ;;  %1231 = vtanh.f32 %v919_v31 }
 0x10c   : > { %v1222_v36 = vpop.eup %1221  ;;  %980 = vst [vmem:[%s1465_s20] sm:$0xff] %v1220_v35  ;;  %1233 = vtanh.f32 %v935_v32 }
 0x10d   : > { %v1224_v37 = vpop.eup %1223  ;;  %996 = vst [vmem:[%s1465_s20 + $0x80] sm:$0xff] %v1222_v36 }
 0x10e   : > { %v1226_v38 = vpop.eup %1225  ;;  %981 = vst [vmem:[%s1465_s20 + $0x8] sm:$0xff] %v1224_v37  ;;  %v699_v39 = vpop.f32.mrb[8].mxu0 }
 0x10f   : > { %v763_v40 = vpop.f32.mrb[8].mxu1  ;;  %997 = vst [vmem:[%s1465_s20 + $0x88] sm:$0xff] %v1226_v38  ;;  %v920_v41 = vadd.f32 %v1452_v10, %v699_v39  ;;  %v701_v43 = vpop.f32.mrb[9].mxu0 }
 0x110   : > { %v936_v42 = vadd.f32 %v1452_v10, %v763_v40  ;;  %v765_v44 = vpop.f32.mrb[9].mxu1  ;;  %v702_v45 = vpop.f32.mrb[10].mxu0 }
 0x111   : > { %v766_v46 = vpop.f32.mrb[10].mxu1  ;;  %1235 = vtanh.f32 %v920_v41  ;;  %v921_v47 = vadd.f32 %v1452_v10, %v702_v45  ;;  %v704_v49 = vpop.f32.mrb[11].mxu0 }
 0x112   : > { %v937_v48 = vadd.f32 %v1452_v10, %v766_v46  ;;  %v768_v50 = vpop.f32.mrb[11].mxu1  ;;  %1237 = vtanh.f32 %v936_v42 }
 0x113   : > { %v1228_v51 = vpop.eup %1227  ;;  %1239 = vtanh.f32 %v921_v47 }
 0x114   : > { %v1230_v52 = vpop.eup %1229  ;;  %982 = vst [vmem:[%s1465_s20 + $0x10] sm:$0xff] %v1228_v51  ;;  %1241 = vtanh.f32 %v937_v48 }
 0x115   : > { %v1232_v53 = vpop.eup %1231  ;;  %998 = vst [vmem:[%s1465_s20 + $0x90] sm:$0xff] %v1230_v52 }
 0x116   : > { %v1234_v54 = vpop.eup %1233  ;;  %983 = vst [vmem:[%s1465_s20 + $0x18] sm:$0xff] %v1232_v53  ;;  %v707_v55 = vpop.f32.mrb[12].mxu0 }
 0x117   : > { %v771_v56 = vpop.f32.mrb[12].mxu1  ;;  %999 = vst [vmem:[%s1465_s20 + $0x98] sm:$0xff] %v1234_v54  ;;  %v922_v57 = vadd.f32 %v1452_v10, %v707_v55  ;;  %v709_v59 = vpop.f32.mrb[13].mxu0 }
 0x118   : > { %v938_v58 = vadd.f32 %v1452_v10, %v771_v56  ;;  %v773_v60 = vpop.f32.mrb[13].mxu1  ;;  %v710_v61 = vpop.f32.mrb[14].mxu0 }
 0x119   : > { %v774_v62 = vpop.f32.mrb[14].mxu1  ;;  %1243 = vtanh.f32 %v922_v57  ;;  %v923_v63 = vadd.f32 %v1452_v10, %v710_v61  ;;  %v712_v1 = vpop.f32.mrb[15].mxu0 }
 0x11a   : > { %v939_v0 = vadd.f32 %v1452_v10, %v774_v62  ;;  %v776_v2 = vpop.f32.mrb[15].mxu1  ;;  %1245 = vtanh.f32 %v938_v58 }
 0x11b   : > { %v1236_v3 = vpop.eup %1235  ;;  %1247 = vtanh.f32 %v923_v63 }
 0x11c   : > { %v1238_v4 = vpop.eup %1237  ;;  %984 = vst [vmem:[%s1465_s20 + $0x20] sm:$0xff] %v1236_v3  ;;  %1249 = vtanh.f32 %v939_v0 }
 0x11d   : > { %v1240_v5 = vpop.eup %1239  ;;  %1000 = vst [vmem:[%s1465_s20 + $0xa0] sm:$0xff] %v1238_v4 }
 0x11e   : > { %v1242_v6 = vpop.eup %1241  ;;  %985 = vst [vmem:[%s1465_s20 + $0x28] sm:$0xff] %v1240_v5  ;;  %v715_v7 = vpop.f32.mrb[16].mxu0 }
 0x11f   : > { %v779_v8 = vpop.f32.mrb[16].mxu1  ;;  %1001 = vst [vmem:[%s1465_s20 + $0xa8] sm:$0xff] %v1242_v6  ;;  %v924_v9 = vadd.f32 %v1452_v10, %v715_v7  ;;  %v717_v12 = vpop.f32.mrb[17].mxu0 }
 0x120   : > { %v940_v11 = vadd.f32 %v1452_v10, %v779_v8  ;;  %v781_v13 = vpop.f32.mrb[17].mxu1  ;;  %v718_v14 = vpop.f32.mrb[18].mxu0 }
 0x121   : > { %v782_v15 = vpop.f32.mrb[18].mxu1  ;;  %1251 = vtanh.f32 %v924_v9  ;;  %v925_v16 = vadd.f32 %v1452_v10, %v718_v14  ;;  %v720_v18 = vpop.f32.mrb[19].mxu0 }
 0x122   : > { %v941_v17 = vadd.f32 %v1452_v10, %v782_v15  ;;  %v784_v19 = vpop.f32.mrb[19].mxu1  ;;  %1253 = vtanh.f32 %v940_v11 }
 0x123   : > { %v1244_v20 = vpop.eup %1243  ;;  %1255 = vtanh.f32 %v925_v16 }
 0x124   : > { %v1246_v21 = vpop.eup %1245  ;;  %986 = vst [vmem:[%s1465_s20 + $0x30] sm:$0xff] %v1244_v20  ;;  %1257 = vtanh.f32 %v941_v17 }
 0x125   : > { %v1248_v22 = vpop.eup %1247  ;;  %1002 = vst [vmem:[%s1465_s20 + $0xb0] sm:$0xff] %v1246_v21 }
 0x126   : > { %v1250_v23 = vpop.eup %1249  ;;  %987 = vst [vmem:[%s1465_s20 + $0x38] sm:$0xff] %v1248_v22  ;;  %v723_v24 = vpop.f32.mrb[20].mxu0 }
 0x127   : > { %v787_v25 = vpop.f32.mrb[20].mxu1  ;;  %1003 = vst [vmem:[%s1465_s20 + $0xb8] sm:$0xff] %v1250_v23  ;;  %v926_v26 = vadd.f32 %v1452_v10, %v723_v24  ;;  %v725_v28 = vpop.f32.mrb[21].mxu0 }
 0x128   : > { %v942_v27 = vadd.f32 %v1452_v10, %v787_v25  ;;  %v789_v29 = vpop.f32.mrb[21].mxu1  ;;  %v726_v30 = vpop.f32.mrb[22].mxu0 }
 0x129   : > { %v790_v31 = vpop.f32.mrb[22].mxu1  ;;  %1259 = vtanh.f32 %v926_v26  ;;  %v927_v32 = vadd.f32 %v1452_v10, %v726_v30  ;;  %v728_v34 = vpop.f32.mrb[23].mxu0 }
 0x12a   : > { %v943_v33 = vadd.f32 %v1452_v10, %v790_v31  ;;  %v792_v35 = vpop.f32.mrb[23].mxu1  ;;  %1261 = vtanh.f32 %v942_v27 }
 0x12b   : > { %v1252_v36 = vpop.eup %1251  ;;  %1263 = vtanh.f32 %v927_v32 }
 0x12c   : > { %v1254_v37 = vpop.eup %1253  ;;  %988 = vst [vmem:[%s1465_s20 + $0x40] sm:$0xff] %v1252_v36  ;;  %1265 = vtanh.f32 %v943_v33 }
 0x12d   : > { %v1256_v38 = vpop.eup %1255  ;;  %1004 = vst [vmem:[%s1465_s20 + $0xc0] sm:$0xff] %v1254_v37 }
 0x12e   : > { %v1258_v39 = vpop.eup %1257  ;;  %989 = vst [vmem:[%s1465_s20 + $0x48] sm:$0xff] %v1256_v38  ;;  %v731_v40 = vpop.f32.mrb[24].mxu0 }
 0x12f   : > { %v795_v41 = vpop.f32.mrb[24].mxu1  ;;  %1005 = vst [vmem:[%s1465_s20 + $0xc8] sm:$0xff] %v1258_v39  ;;  %v928_v42 = vadd.f32 %v1452_v10, %v731_v40  ;;  %v733_v44 = vpop.f32.mrb[25].mxu0 }
 0x130   : > { %v944_v43 = vadd.f32 %v1452_v10, %v795_v41  ;;  %v797_v45 = vpop.f32.mrb[25].mxu1  ;;  %v734_v46 = vpop.f32.mrb[26].mxu0 }
 0x131   : > { %v798_v47 = vpop.f32.mrb[26].mxu1  ;;  %1267 = vtanh.f32 %v928_v42  ;;  %v929_v48 = vadd.f32 %v1452_v10, %v734_v46  ;;  %v736_v50 = vpop.f32.mrb[27].mxu0 }
 0x132   : > { %v945_v49 = vadd.f32 %v1452_v10, %v798_v47  ;;  %v800_v51 = vpop.f32.mrb[27].mxu1  ;;  %1269 = vtanh.f32 %v944_v43 }
 0x133   : > { %v1260_v52 = vpop.eup %1259  ;;  %1271 = vtanh.f32 %v929_v48 }
 0x134   : > { %v1262_v53 = vpop.eup %1261  ;;  %990 = vst [vmem:[%s1465_s20 + $0x50] sm:$0xff] %v1260_v52  ;;  %1273 = vtanh.f32 %v945_v49 }
 0x135   : > { %v1264_v54 = vpop.eup %1263  ;;  %1006 = vst [vmem:[%s1465_s20 + $0xd0] sm:$0xff] %v1262_v53 }
 0x136   : > { %v1266_v55 = vpop.eup %1265  ;;  %991 = vst [vmem:[%s1465_s20 + $0x58] sm:$0xff] %v1264_v54  ;;  %v739_v56 = vpop.f32.mrb[28].mxu0 }
 0x137   : > { %v803_v57 = vpop.f32.mrb[28].mxu1  ;;  %1007 = vst [vmem:[%s1465_s20 + $0xd8] sm:$0xff] %v1266_v55  ;;  %v930_v58 = vadd.f32 %v1452_v10, %v739_v56  ;;  %v741_v60 = vpop.f32.mrb[29].mxu0 }
 0x138   : > { %v946_v59 = vadd.f32 %v1452_v10, %v803_v57  ;;  %v805_v61 = vpop.f32.mrb[29].mxu1  ;;  %v742_v62 = vpop.f32.mrb[30].mxu0 }
 0x139   : > { %v806_v63 = vpop.f32.mrb[30].mxu1  ;;  %1275 = vtanh.f32 %v930_v58  ;;  %v931_v0 = vadd.f32 %v1452_v10, %v742_v62  ;;  %v744_v2 = vpop.f32.mrb[31].mxu0 }
 0x13a   : > { %v947_v1 = vadd.f32 %v1452_v10, %v806_v63  ;;  %v808_v3 = vpop.f32.mrb[31].mxu1  ;;  %1277 = vtanh.f32 %v946_v59 }
 0x13b   : > { %v1268_v4 = vpop.eup %1267  ;;  %1279 = vtanh.f32 %v931_v0 }
 0x13c   : > { %v1270_v5 = vpop.eup %1269  ;;  %992 = vst [vmem:[%s1465_s20 + $0x60] sm:$0xff] %v1268_v4  ;;  %1281 = vtanh.f32 %v947_v1 }
 0x13d   : > { %v1272_v6 = vpop.eup %1271  ;;  %1008 = vst [vmem:[%s1465_s20 + $0xe0] sm:$0xff] %v1270_v5 }
 0x13e   : > { %v1274_v7 = vpop.eup %1273  ;;  %993 = vst [vmem:[%s1465_s20 + $0x68] sm:$0xff] %v1272_v6 }
 0x13f   : > { %1009 = vst [vmem:[%s1465_s20 + $0xe8] sm:$0xff] %v1274_v7 }
 0x143   : > { %v1276_v8 = vpop.eup %1275 }
 0x144   : > { %v1278_v9 = vpop.eup %1277  ;;  %994 = vst [vmem:[%s1465_s20 + $0x70] sm:$0xff] %v1276_v8 }
 0x145   : > { %v1280_v10 = vpop.eup %1279  ;;  %1010 = vst [vmem:[%s1465_s20 + $0xf0] sm:$0xff] %v1278_v9 }
 0x146   : > { %v1282_v11 = vpop.eup %1281  ;;  %995 = vst [vmem:[%s1465_s20 + $0x78] sm:$0xff] %v1280_v10 }
 0x147   : > { %1011 = vst [vmem:[%s1465_s20 + $0xf8] sm:$0xff] %v1282_v11 }
 0x148 PF: > { %s13_s14 = sadd.s32 1, %s1305_s14   ;;  %s1538_s12 = smov %s1301_s13 }
 0x149   : > { %p10_p5 = scmp.ge.s32.totalorder %s13_s14, 4   ;;  %s1539_s13 = smov %s1541_s15 }
 0x14b   :  { %12 = sbr.rel (!%p10_p5) target bundleno = 2 (0x2), region = 76 }

</bundles_post_ra>
